<compile_context>
chip_gen: v7x
topology: tpu7x:2x2x1
jax: 0.10.0
libtpu: 0.0.40
codegen_flags: <defaults>
</compile_context>

<pallas_src>
import functools

import jax
import jax.numpy as jnp
import numpy as np
from jax.experimental import pallas as pl
from jax.experimental.pallas import tpu as pltpu

EPS = 1e-5  # nn.InstanceNorm2d default eps


def _pick_row_tile(H, W, C):
    """Rows per conv tile: matmul M = tr*W >= ~512 (MXU-friendly) while the
    f32 accumulator tile (tr*W, C) stays under ~4 MiB; tr must divide H."""
    target_rows = -(-512 // W)                        # ceil(512 / W)
    budget_rows = max(1, (4 << 20) // (W * C * 4))
    tr = 1
    for d in range(1, H + 1):
        if H % d == 0 and d <= budget_rows:
            tr = d
            if d >= target_rows:
                break
    return tr


def _resblock_kernel(tr, x_ref, w1_ref, w2_ref, o_ref, pad_ref, conv_ref):
    """One batch sample per grid step.

    x_ref   : (H, W, C) f32        (batch dim squeezed by BlockSpec)
    w*_ref  : (9, C, C) conv_dtype  tap-major [dh*3+dw, c_in, c_out]
    o_ref   : (H, W, C) f32
    pad_ref : VMEM (H+2, W+2, C) conv_dtype  — zero halo + conv-input interior
    conv_ref: VMEM (H, W, C) f32            — persistent conv output for IN
    """
    H, W, C = x_ref.shape
    HW = H * W
    cdt = pad_ref.dtype
    num_tiles = H // tr

    # Zero only the 1-pixel halo (interior fully overwritten before each conv).
    # Re-done every grid step so it is correct however the parallel grid axis
    # is split across TensorCores.
    pad_ref[0:1, :, :] = jnp.zeros((1, W + 2, C), cdt)
    pad_ref[H + 1:H + 2, :, :] = jnp.zeros((1, W + 2, C), cdt)
    pad_ref[:, 0:1, :] = jnp.zeros((H + 2, 1, C), cdt)
    pad_ref[:, W + 1:W + 2, :] = jnp.zeros((H + 2, 1, C), cdt)

    def conv3x3(w_ref):
        # Row-tiled conv: per tile, 9 shifted (tr*W, C) x (C, C) MXU dots
        # accumulated in f32 (MRB accumulates in place on v7x).  Never builds
        # an (HW, 9C) im2col slab, never concatenates taps.
        @pl.loop(0, num_tiles)
        def _(t):
            r0 = pl.multiple_of(t * tr, tr)
            acc = jnp.zeros((tr * W, C), jnp.float32)
            for tap in range(9):
                dh, dw = tap // 3, tap % 3
                patch = pad_ref[pl.ds(r0 + dh, tr), dw:dw + W, :]
                acc = acc + jnp.dot(patch.reshape(tr * W, C), w_ref[tap],
                                    preferred_element_type=jnp.float32)
            conv_ref[pl.ds(r0, tr), :, :] = acc.reshape(tr, W, C)
        # NOTE: conv bias intentionally omitted — cancelled exactly by the
        # InstanceNorm mean subtraction that follows.

    def instance_norm(y):
        # Two-pass (mean, then centred second moment): numerically safe even
        # when the conv-output mean is not small relative to its std.
        inv_hw = 1.0 / HW
        mean = jnp.sum(y, axis=(0, 1), keepdims=True) * inv_hw      # (1,1,C)
        d = y - mean
        var = jnp.sum(d * d, axis=(0, 1), keepdims=True) * inv_hw   # (1,1,C)
        return d * jax.lax.rsqrt(var + EPS)

    # --- conv1 -> IN -> ReLU ---
    pad_ref[1:H + 1, 1:W + 1, :] = x_ref[...].astype(cdt)
    conv3x3(w1_ref)
    h = jnp.maximum(instance_norm(conv_ref[...]), 0.0)

    # --- conv2 -> IN ---  (conv2's input written straight into pad interior)
    pad_ref[1:H + 1, 1:W + 1, :] = h.astype(cdt)
    conv3x3(w2_ref)
    h = instance_norm(conv_ref[...])

    # --- residual + ReLU ---
    o_ref[...] = jnp.maximum(h + x_ref[...], 0.0)


def instance_residual_block(x_nchw, params, conv_dtype=jnp.float32):
    """Wrapper: NCHW in/out (PyTorch convention), NHWC inside the kernel.

    params = (w1, b1, w2, b2) with w* in OIHW.  Biases are accepted for API
    parity but NOT passed to the kernel: a per-channel bias before
    InstanceNorm has zero effect on the output.
    conv_dtype=jnp.bfloat16 is recommended for realistic channel counts
    (C=128/256), especially on v5e.
    """
    w1, _b1, w2, _b2 = params
    N, C, H, W = x_nchw.shape
    tr = _pick_row_tile(H, W, C)

    x_nhwc = jnp.transpose(x_nchw, (0, 2, 3, 1)).astype(jnp.float32)

    # OIHW -> (3,3,I,O) -> (9, I, O): tap index = dh*3 + dw.
    def to_mat(w):
        return jnp.transpose(w, (2, 3, 1, 0)).reshape(9, C, C).astype(conv_dtype)

    w1_mat, w2_mat = to_mat(w1), to_mat(w2)

    cd_bytes = jnp.dtype(conv_dtype).itemsize
    # Working-set estimate for vmem_limit_bytes: double-buffered x/out blocks,
    # pad & conv-output scratch, both weight operands, per-tile live values.
    xo_bytes = 4 * (H * W * C * 4)                 # x + out, double-buffered
    pad_bytes = (H + 2) * (W + 2) * C * cd_bytes
    conv_bytes = H * W * C * 4
    w_bytes = 2 * (9 * C * C * cd_bytes)           # w1 + w2 (one buffer each)
    tile_bytes = tr * W * C * (4 + 2 * cd_bytes)   # acc + patch values
    working = xo_bytes + pad_bytes + conv_bytes + 2 * w_bytes + tile_bytes
    vmem_limit = max(min(int(1.5 * working) + (8 << 20), 64 << 20), 16 << 20)

    flops = 2 * 2 * N * H * W * (9 * C) * C        # two 3x3 convs as matmuls
    bytes_accessed = 4 * (2 * N * H * W * C) + 2 * (9 * C * C) * cd_bytes
    cost = pl.CostEstimate(flops=flops,
                           transcendentals=2 * N * C,   # rsqrt per (n,c), twice
                           bytes_accessed=bytes_accessed)

    kernel = functools.partial(_resblock_kernel, tr)

    def build(single_buffer_weights):
        w_kwargs = {"pipeline_mode": pl.Buffered(1)} if single_buffer_weights else {}
        w_spec = pl.BlockSpec((9, C, C), lambda n: (0, 0, 0), **w_kwargs)
        return pl.pallas_call(
            kernel,
            out_shape=jax.ShapeDtypeStruct((N, H, W, C), jnp.float32),
            grid_spec=pltpu.PrefetchScalarGridSpec(
                num_scalar_prefetch=0,
                grid=(N,),
                in_specs=[
                    pl.BlockSpec((None, H, W, C), lambda n: (n, 0, 0, 0)),
                    w_spec,
                    w_spec,
                ],
                out_specs=pl.BlockSpec((None, H, W, C), lambda n: (n, 0, 0, 0)),
                scratch_shapes=[
                    pltpu.VMEM((H + 2, W + 2, C), conv_dtype),  # pad scratch
                    pltpu.VMEM((H, W, C), jnp.float32),          # conv output
                ],
            ),
            compiler_params=pltpu.CompilerParams(
                dimension_semantics=("parallel",),   # v7x: use N >= 2 samples
                vmem_limit_bytes=vmem_limit),
            cost_estimate=cost,
        )

    # Grid-invariant weights are requested single-buffered (pl.Buffered(1));
    # fall back to default double-buffering if this build rejects it.
    try:
        out_nhwc = jax.block_until_ready(build(True)(x_nhwc, w1_mat, w2_mat))
    except Exception:
        out_nhwc = build(False)(x_nhwc, w1_mat, w2_mat)

    return jnp.transpose(out_nhwc, (0, 3, 1, 2))


def reference_forward(x_nchw, params):
    """Pure-JAX reference mirroring the PyTorch module (keeps conv biases)."""
    w1, b1, w2, b2 = params

    def conv(x, w, b):
        y = jax.lax.conv_general_dilated(
            x, w, window_strides=(1, 1), padding=((1, 1), (1, 1)),
            dimension_numbers=("NCHW", "OIHW", "NCHW"),
            precision=jax.lax.Precision.HIGHEST)
        return y + b[None, :, None, None]

    def inorm(x):
        mean = jnp.mean(x, axis=(2, 3), keepdims=True)
        var = jnp.mean((x - mean) ** 2, axis=(2, 3), keepdims=True)
        return (x - mean) * jax.lax.rsqrt(var + EPS)

    h = jax.nn.relu(inorm(conv(x_nchw, w1, b1)))
    h = inorm(conv(h, w2, b2))
    return jax.nn.relu(h + x_nchw)


if __name__ == "__main__":
    # Small shapes consistent with the module (in_channels == out_channels).
    N, C, H, W = 2, 4, 16, 16
    keys = jax.random.split(jax.random.PRNGKey(0), 5)
    x = jax.random.normal(keys[0], (N, C, H, W), jnp.float32)

    w1 = 0.1 * jax.random.normal(keys[1], (C, C, 3, 3), jnp.float32)
    b1 = 0.1 * jax.random.normal(keys[2], (C,), jnp.float32)
    w2 = 0.1 * jax.random.normal(keys[3], (C, C, 3, 3), jnp.float32)
    b2 = 0.1 * jax.random.normal(keys[4], (C,), jnp.float32)
    params = (w1, b1, w2, b2)

    ref = jax.block_until_ready(reference_forward(x, params))

    # Primary correctness gate: f32 matmul path.
    out = jax.block_until_ready(instance_residual_block(x, params))
    assert out.shape == x.shape and out.dtype == jnp.float32
    np.testing.assert_allclose(np.asarray(out), np.asarray(ref),
                               rtol=2e-2, atol=2e-2)

    # Secondary (non-fatal) check: exercise the bf16 matmul / bf16 pad path
    # that would be used at realistic CycleGAN channel counts.
    try:
        out_bf16 = jax.block_until_ready(
            instance_residual_block(x, params, conv_dtype=jnp.bfloat16))
        np.testing.assert_allclose(np.asarray(out_bf16), np.asarray(ref),
                                   rtol=6e-2, atol=6e-2)
    except Exception as e:
        print("bf16 path check skipped:", type(e).__name__)

    print("KERNEL_OK")
</pallas_src>

<mosaic_0001>
module attributes {stable_mosaic.version = 11 : i64} {
  func.func @_resblock_kernel(%arg0: i32, %arg1: memref<1x16x16x4xf32, #tpu.memory_space<vmem>>, %arg2: memref<9x4x4xf32, #tpu.memory_space<vmem>>, %arg3: memref<9x4x4xf32, #tpu.memory_space<vmem>>, %arg4: memref<1x16x16x4xf32, #tpu.memory_space<vmem>>, %arg5: memref<18x18x4xf32, #tpu.memory_space<vmem>>, %arg6: memref<16x16x4xf32, #tpu.memory_space<vmem>>) attributes {dimension_semantics = [#tpu.dimension_semantics<parallel>], iteration_bounds = array<i64: 2>, scalar_prefetch = 0 : i64, scratch_operands = 2 : i64, tpu.core_type = #tpu.core_type<tc>, window_params = [{transform_indices = @transform_0, window_bounds = array<i64: 1, 16, 16, 4>}, {pipeline_mode = #tpu.pipeline_mode<synchronous>, transform_indices = @transform_1, window_bounds = array<i64: 9, 4, 4>}, {pipeline_mode = #tpu.pipeline_mode<synchronous>, transform_indices = @transform_2, window_bounds = array<i64: 9, 4, 4>}, {transform_indices = @transform_3, window_bounds = array<i64: 1, 16, 16, 4>}]} {
    %cst = arith.constant 0.000000e+00 : f32
    %0 = vector.broadcast %cst : f32 to vector<1x18x4xf32>
    %c0 = arith.constant 0 : index
    %c0_0 = arith.constant 0 : index
    %c0_1 = arith.constant 0 : index
    %1 = vector.load %arg5[%c0, %c0_0, %c0_1] : memref<18x18x4xf32, #tpu.memory_space<vmem>>, vector<1x18x4xf32>
    tpu.vector_store %arg5[%c0, %c0_0, %c0_1], %0 {strides = array<i32>} : memref<18x18x4xf32, #tpu.memory_space<vmem>>, vector<1x18x4xf32>,
    %cst_2 = arith.constant 0.000000e+00 : f32
    %2 = vector.broadcast %cst_2 : f32 to vector<1x18x4xf32>
    %c17 = arith.constant 17 : index
    %c0_3 = arith.constant 0 : index
    %c0_4 = arith.constant 0 : index
    %3 = vector.load %arg5[%c17, %c0_3, %c0_4] : memref<18x18x4xf32, #tpu.memory_space<vmem>>, vector<1x18x4xf32>
    tpu.vector_store %arg5[%c17, %c0_3, %c0_4], %2 {strides = array<i32>} : memref<18x18x4xf32, #tpu.memory_space<vmem>>, vector<1x18x4xf32>,
    %cst_5 = arith.constant 0.000000e+00 : f32
    %4 = vector.broadcast %cst_5 : f32 to vector<18x1x4xf32>
    %c0_6 = arith.constant 0 : index
    %c0_7 = arith.constant 0 : index
    %c0_8 = arith.constant 0 : index
    %5 = vector.load %arg5[%c0_6, %c0_7, %c0_8] : memref<18x18x4xf32, #tpu.memory_space<vmem>>, vector<18x1x4xf32>
    tpu.vector_store %arg5[%c0_6, %c0_7, %c0_8], %4 {strides = array<i32>} : memref<18x18x4xf32, #tpu.memory_space<vmem>>, vector<18x1x4xf32>,
    %cst_9 = arith.constant 0.000000e+00 : f32
    %6 = vector.broadcast %cst_9 : f32 to vector<18x1x4xf32>
    %c0_10 = arith.constant 0 : index
    %c17_11 = arith.constant 17 : index
    %c0_12 = arith.constant 0 : index
    %7 = vector.load %arg5[%c0_10, %c17_11, %c0_12] : memref<18x18x4xf32, #tpu.memory_space<vmem>>, vector<18x1x4xf32>
    tpu.vector_store %arg5[%c0_10, %c17_11, %c0_12], %6 {strides = array<i32>} : memref<18x18x4xf32, #tpu.memory_space<vmem>>, vector<18x1x4xf32>,
    %c0_13 = arith.constant 0 : index
    %c0_14 = arith.constant 0 : index
    %c0_15 = arith.constant 0 : index
    %c0_16 = arith.constant 0 : index
    %8 = vector.load %arg1[%c0_13, %c0_14, %c0_15, %c0_16] : memref<1x16x16x4xf32, #tpu.memory_space<vmem>>, vector<1x16x16x4xf32>
    %9 = vector.shape_cast %8 : vector<1x16x16x4xf32> to vector<16x16x4xf32>
    %c1 = arith.constant 1 : index
    %c1_17 = arith.constant 1 : index
    %c0_18 = arith.constant 0 : index
    %10 = vector.load %arg5[%c1, %c1_17, %c0_18] : memref<18x18x4xf32, #tpu.memory_space<vmem>>, vector<16x16x4xf32>
    tpu.vector_store %arg5[%c1, %c1_17, %c0_18], %9 {strides = array<i32>} : memref<18x18x4xf32, #tpu.memory_space<vmem>>, vector<16x16x4xf32>,
    %c0_i32 = arith.constant 0 : i32
    %c1_i32 = arith.constant 1 : i32
    %11 = arith.muli %c0_i32, %c1_i32 : i32
    %c0_i32_19 = arith.constant 0 : i32
    %12 = arith.addi %c0_i32_19, %11 : i32
    %c16_i32 = arith.constant 16 : i32
    %13 = arith.muli %12, %c16_i32 : i32
    %14 = tpu.assume_multiple %13, 16 : i32
    %cst_20 = arith.constant 0.000000e+00 : f32
    %15 = vector.broadcast %cst_20 : f32 to vector<256x4xf32>
    %c0_i32_21 = arith.constant 0 : i32
    %16 = arith.addi %14, %c0_i32_21 : i32
    %17 = arith.index_cast %16 : i32 to index
    %c0_22 = arith.constant 0 : index
    %c0_23 = arith.constant 0 : index
    %18 = vector.load %arg5[%17, %c0_22, %c0_23] : memref<18x18x4xf32, #tpu.memory_space<vmem>>, vector<16x16x4xf32>
    %19 = vector.shape_cast %18 : vector<16x16x4xf32> to vector<256x4xf32>
    %c0_24 = arith.constant 0 : index
    %c0_25 = arith.constant 0 : index
    %c0_26 = arith.constant 0 : index
    %20 = vector.load %arg2[%c0_24, %c0_25, %c0_26] : memref<9x4x4xf32, #tpu.memory_space<vmem>>, vector<1x4x4xf32>
    %21 = vector.shape_cast %20 : vector<1x4x4xf32> to vector<4x4xf32>
    %cst_27 = arith.constant dense<0.000000e+00> : vector<256x4xf32>
    %22 = tpu.matmul %19, %21, %cst_27 {dimension_numbers = #tpu.dot_dimension_numbers<[1], [0], [0], [1], [0, 0, 1, 1], [], []>} : vector<256x4xf32>, vector<4x4xf32>, vector<256x4xf32> -> vector<256x4xf32>
    %23 = arith.addf %15, %22 : vector<256x4xf32>
    %c0_i32_28 = arith.constant 0 : i32
    %24 = arith.addi %14, %c0_i32_28 : i32
    %25 = arith.index_cast %24 : i32 to index
    %c1_29 = arith.constant 1 : index
    %c0_30 = arith.constant 0 : index
    %26 = vector.load %arg5[%25, %c1_29, %c0_30] : memref<18x18x4xf32, #tpu.memory_space<vmem>>, vector<16x16x4xf32>
    %27 = vector.shape_cast %26 : vector<16x16x4xf32> to vector<256x4xf32>
    %c1_31 = arith.constant 1 : index
    %c0_32 = arith.constant 0 : index
    %c0_33 = arith.constant 0 : index
    %28 = vector.load %arg2[%c1_31, %c0_32, %c0_33] : memref<9x4x4xf32, #tpu.memory_space<vmem>>, vector<1x4x4xf32>
    %29 = vector.shape_cast %28 : vector<1x4x4xf32> to vector<4x4xf32>
    %cst_34 = arith.constant dense<0.000000e+00> : vector<256x4xf32>
    %30 = tpu.matmul %27, %29, %cst_34 {dimension_numbers = #tpu.dot_dimension_numbers<[1], [0], [0], [1], [0, 0, 1, 1], [], []>} : vector<256x4xf32>, vector<4x4xf32>, vector<256x4xf32> -> vector<256x4xf32>
    %31 = arith.addf %23, %30 : vector<256x4xf32>
    %c0_i32_35 = arith.constant 0 : i32
    %32 = arith.addi %14, %c0_i32_35 : i32
    %33 = arith.index_cast %32 : i32 to index
    %c2 = arith.constant 2 : index
    %c0_36 = arith.constant 0 : index
    %34 = vector.load %arg5[%33, %c2, %c0_36] : memref<18x18x4xf32, #tpu.memory_space<vmem>>, vector<16x16x4xf32>
    %35 = vector.shape_cast %34 : vector<16x16x4xf32> to vector<256x4xf32>
    %c2_37 = arith.constant 2 : index
    %c0_38 = arith.constant 0 : index
    %c0_39 = arith.constant 0 : index
    %36 = vector.load %arg2[%c2_37, %c0_38, %c0_39] : memref<9x4x4xf32, #tpu.memory_space<vmem>>, vector<1x4x4xf32>
    %37 = vector.shape_cast %36 : vector<1x4x4xf32> to vector<4x4xf32>
    %cst_40 = arith.constant dense<0.000000e+00> : vector<256x4xf32>
    %38 = tpu.matmul %35, %37, %cst_40 {dimension_numbers = #tpu.dot_dimension_numbers<[1], [0], [0], [1], [0, 0, 1, 1], [], []>} : vector<256x4xf32>, vector<4x4xf32>, vector<256x4xf32> -> vector<256x4xf32>
    %39 = arith.addf %31, %38 : vector<256x4xf32>
    %c1_i32_41 = arith.constant 1 : i32
    %40 = arith.addi %14, %c1_i32_41 : i32
    %41 = arith.index_cast %40 : i32 to index
    %c0_42 = arith.constant 0 : index
    %c0_43 = arith.constant 0 : index
    %42 = vector.load %arg5[%41, %c0_42, %c0_43] : memref<18x18x4xf32, #tpu.memory_space<vmem>>, vector<16x16x4xf32>
    %43 = vector.shape_cast %42 : vector<16x16x4xf32> to vector<256x4xf32>
    %c3 = arith.constant 3 : index
    %c0_44 = arith.constant 0 : index
    %c0_45 = arith.constant 0 : index
    %44 = vector.load %arg2[%c3, %c0_44, %c0_45] : memref<9x4x4xf32, #tpu.memory_space<vmem>>, vector<1x4x4xf32>
    %45 = vector.shape_cast %44 : vector<1x4x4xf32> to vector<4x4xf32>
    %cst_46 = arith.constant dense<0.000000e+00> : vector<256x4xf32>
    %46 = tpu.matmul %43, %45, %cst_46 {dimension_numbers = #tpu.dot_dimension_numbers<[1], [0], [0], [1], [0, 0, 1, 1], [], []>} : vector<256x4xf32>, vector<4x4xf32>, vector<256x4xf32> -> vector<256x4xf32>
    %47 = arith.addf %39, %46 : vector<256x4xf32>
    %c1_i32_47 = arith.constant 1 : i32
    %48 = arith.addi %14, %c1_i32_47 : i32
    %49 = arith.index_cast %48 : i32 to index
    %c1_48 = arith.constant 1 : index
    %c0_49 = arith.constant 0 : index
    %50 = vector.load %arg5[%49, %c1_48, %c0_49] : memref<18x18x4xf32, #tpu.memory_space<vmem>>, vector<16x16x4xf32>
    %51 = vector.shape_cast %50 : vector<16x16x4xf32> to vector<256x4xf32>
    %c4 = arith.constant 4 : index
    %c0_50 = arith.constant 0 : index
    %c0_51 = arith.constant 0 : index
    %52 = vector.load %arg2[%c4, %c0_50, %c0_51] : memref<9x4x4xf32, #tpu.memory_space<vmem>>, vector<1x4x4xf32>
    %53 = vector.shape_cast %52 : vector<1x4x4xf32> to vector<4x4xf32>
    %cst_52 = arith.constant dense<0.000000e+00> : vector<256x4xf32>
    %54 = tpu.matmul %51, %53, %cst_52 {dimension_numbers = #tpu.dot_dimension_numbers<[1], [0], [0], [1], [0, 0, 1, 1], [], []>} : vector<256x4xf32>, vector<4x4xf32>, vector<256x4xf32> -> vector<256x4xf32>
    %55 = arith.addf %47, %54 : vector<256x4xf32>
    %c1_i32_53 = arith.constant 1 : i32
    %56 = arith.addi %14, %c1_i32_53 : i32
    %57 = arith.index_cast %56 : i32 to index
    %c2_54 = arith.constant 2 : index
    %c0_55 = arith.constant 0 : index
    %58 = vector.load %arg5[%57, %c2_54, %c0_55] : memref<18x18x4xf32, #tpu.memory_space<vmem>>, vector<16x16x4xf32>
    %59 = vector.shape_cast %58 : vector<16x16x4xf32> to vector<256x4xf32>
    %c5 = arith.constant 5 : index
    %c0_56 = arith.constant 0 : index
    %c0_57 = arith.constant 0 : index
    %60 = vector.load %arg2[%c5, %c0_56, %c0_57] : memref<9x4x4xf32, #tpu.memory_space<vmem>>, vector<1x4x4xf32>
    %61 = vector.shape_cast %60 : vector<1x4x4xf32> to vector<4x4xf32>
    %cst_58 = arith.constant dense<0.000000e+00> : vector<256x4xf32>
    %62 = tpu.matmul %59, %61, %cst_58 {dimension_numbers = #tpu.dot_dimension_numbers<[1], [0], [0], [1], [0, 0, 1, 1], [], []>} : vector<256x4xf32>, vector<4x4xf32>, vector<256x4xf32> -> vector<256x4xf32>
    %63 = arith.addf %55, %62 : vector<256x4xf32>
    %c2_i32 = arith.constant 2 : i32
    %64 = arith.addi %14, %c2_i32 : i32
    %65 = arith.index_cast %64 : i32 to index
    %c0_59 = arith.constant 0 : index
    %c0_60 = arith.constant 0 : index
    %66 = vector.load %arg5[%65, %c0_59, %c0_60] : memref<18x18x4xf32, #tpu.memory_space<vmem>>, vector<16x16x4xf32>
    %67 = vector.shape_cast %66 : vector<16x16x4xf32> to vector<256x4xf32>
    %c6 = arith.constant 6 : index
    %c0_61 = arith.constant 0 : index
    %c0_62 = arith.constant 0 : index
    %68 = vector.load %arg2[%c6, %c0_61, %c0_62] : memref<9x4x4xf32, #tpu.memory_space<vmem>>, vector<1x4x4xf32>
    %69 = vector.shape_cast %68 : vector<1x4x4xf32> to vector<4x4xf32>
    %cst_63 = arith.constant dense<0.000000e+00> : vector<256x4xf32>
    %70 = tpu.matmul %67, %69, %cst_63 {dimension_numbers = #tpu.dot_dimension_numbers<[1], [0], [0], [1], [0, 0, 1, 1], [], []>} : vector<256x4xf32>, vector<4x4xf32>, vector<256x4xf32> -> vector<256x4xf32>
    %71 = arith.addf %63, %70 : vector<256x4xf32>
    %c2_i32_64 = arith.constant 2 : i32
    %72 = arith.addi %14, %c2_i32_64 : i32
    %73 = arith.index_cast %72 : i32 to index
    %c1_65 = arith.constant 1 : index
    %c0_66 = arith.constant 0 : index
    %74 = vector.load %arg5[%73, %c1_65, %c0_66] : memref<18x18x4xf32, #tpu.memory_space<vmem>>, vector<16x16x4xf32>
    %75 = vector.shape_cast %74 : vector<16x16x4xf32> to vector<256x4xf32>
    %c7 = arith.constant 7 : index
    %c0_67 = arith.constant 0 : index
    %c0_68 = arith.constant 0 : index
    %76 = vector.load %arg2[%c7, %c0_67, %c0_68] : memref<9x4x4xf32, #tpu.memory_space<vmem>>, vector<1x4x4xf32>
    %77 = vector.shape_cast %76 : vector<1x4x4xf32> to vector<4x4xf32>
    %cst_69 = arith.constant dense<0.000000e+00> : vector<256x4xf32>
    %78 = tpu.matmul %75, %77, %cst_69 {dimension_numbers = #tpu.dot_dimension_numbers<[1], [0], [0], [1], [0, 0, 1, 1], [], []>} : vector<256x4xf32>, vector<4x4xf32>, vector<256x4xf32> -> vector<256x4xf32>
    %79 = arith.addf %71, %78 : vector<256x4xf32>
    %c2_i32_70 = arith.constant 2 : i32
    %80 = arith.addi %14, %c2_i32_70 : i32
    %81 = arith.index_cast %80 : i32 to index
    %c2_71 = arith.constant 2 : index
    %c0_72 = arith.constant 0 : index
    %82 = vector.load %arg5[%81, %c2_71, %c0_72] : memref<18x18x4xf32, #tpu.memory_space<vmem>>, vector<16x16x4xf32>
    %83 = vector.shape_cast %82 : vector<16x16x4xf32> to vector<256x4xf32>
    %c8 = arith.constant 8 : index
    %c0_73 = arith.constant 0 : index
    %c0_74 = arith.constant 0 : index
    %84 = vector.load %arg2[%c8, %c0_73, %c0_74] : memref<9x4x4xf32, #tpu.memory_space<vmem>>, vector<1x4x4xf32>
    %85 = vector.shape_cast %84 : vector<1x4x4xf32> to vector<4x4xf32>
    %cst_75 = arith.constant dense<0.000000e+00> : vector<256x4xf32>
    %86 = tpu.matmul %83, %85, %cst_75 {dimension_numbers = #tpu.dot_dimension_numbers<[1], [0], [0], [1], [0, 0, 1, 1], [], []>} : vector<256x4xf32>, vector<4x4xf32>, vector<256x4xf32> -> vector<256x4xf32>
    %87 = arith.addf %79, %86 : vector<256x4xf32>
    %88 = vector.shape_cast %87 : vector<256x4xf32> to vector<16x16x4xf32>
    %89 = arith.index_cast %14 : i32 to index
    %c0_76 = arith.constant 0 : index
    %c0_77 = arith.constant 0 : index
    %90 = vector.load %arg6[%89, %c0_76, %c0_77] : memref<16x16x4xf32, #tpu.memory_space<vmem>>, vector<16x16x4xf32>
    tpu.vector_store %arg6[%89, %c0_76, %c0_77], %88 {strides = array<i32>} : memref<16x16x4xf32, #tpu.memory_space<vmem>>, vector<16x16x4xf32>,
    %c1_i32_78 = arith.constant 1 : i32
    %c0_79 = arith.constant 0 : index
    %c0_80 = arith.constant 0 : index
    %c0_81 = arith.constant 0 : index
    %91 = vector.load %arg6[%c0_79, %c0_80, %c0_81] : memref<16x16x4xf32, #tpu.memory_space<vmem>>, vector<16x16x4xf32>
    %cst_82 = arith.constant dense<0.000000e+00> : vector<4xf32>
    %92 = vector.multi_reduction <add>, %91, %cst_82 [0, 1] : vector<16x16x4xf32> to vector<4xf32>
    %93 = vector.shape_cast %92 : vector<4xf32> to vector<1x1x4xf32>
    %cst_83 = arith.constant 3.906250e-03 : f32
    %94 = vector.broadcast %cst_83 : f32 to vector<1x1x4xf32>
    %95 = arith.mulf %93, %94 : vector<1x1x4xf32>
    %96 = vector.broadcast %95 : vector<1x1x4xf32> to vector<16x16x4xf32>
    %97 = arith.subf %91, %96 : vector<16x16x4xf32>
    %98 = arith.mulf %97, %97 : vector<16x16x4xf32>
    %cst_84 = arith.constant dense<0.000000e+00> : vector<4xf32>
    %99 = vector.multi_reduction <add>, %98, %cst_84 [0, 1] : vector<16x16x4xf32> to vector<4xf32>
    %100 = vector.shape_cast %99 : vector<4xf32> to vector<1x1x4xf32>
    %cst_85 = arith.constant 3.906250e-03 : f32
    %101 = vector.broadcast %cst_85 : f32 to vector<1x1x4xf32>
    %102 = arith.mulf %100, %101 : vector<1x1x4xf32>
    %cst_86 = arith.constant 9.99999974E-6 : f32
    %103 = vector.broadcast %cst_86 : f32 to vector<1x1x4xf32>
    %104 = arith.addf %102, %103 : vector<1x1x4xf32>
    %105 = math.rsqrt %104 : vector<1x1x4xf32>
    %106 = vector.broadcast %105 : vector<1x1x4xf32> to vector<16x16x4xf32>
    %107 = arith.mulf %97, %106 : vector<16x16x4xf32>
    %cst_87 = arith.constant 0.000000e+00 : f32
    %108 = vector.broadcast %cst_87 : f32 to vector<16x16x4xf32>
    %109 = arith.maximumf %107, %108 : vector<16x16x4xf32>
    %c1_88 = arith.constant 1 : index
    %c1_89 = arith.constant 1 : index
    %c0_90 = arith.constant 0 : index
    %110 = vector.load %arg5[%c1_88, %c1_89, %c0_90] : memref<18x18x4xf32, #tpu.memory_space<vmem>>, vector<16x16x4xf32>
    tpu.vector_store %arg5[%c1_88, %c1_89, %c0_90], %109 {strides = array<i32>} : memref<18x18x4xf32, #tpu.memory_space<vmem>>, vector<16x16x4xf32>,
    %c0_i32_91 = arith.constant 0 : i32
    %c1_i32_92 = arith.constant 1 : i32
    %111 = arith.muli %c0_i32_91, %c1_i32_92 : i32
    %c0_i32_93 = arith.constant 0 : i32
    %112 = arith.addi %c0_i32_93, %111 : i32
    %c16_i32_94 = arith.constant 16 : i32
    %113 = arith.muli %112, %c16_i32_94 : i32
    %114 = tpu.assume_multiple %113, 16 : i32
    %cst_95 = arith.constant 0.000000e+00 : f32
    %115 = vector.broadcast %cst_95 : f32 to vector<256x4xf32>
    %c0_i32_96 = arith.constant 0 : i32
    %116 = arith.addi %114, %c0_i32_96 : i32
    %117 = arith.index_cast %116 : i32 to index
    %c0_97 = arith.constant 0 : index
    %c0_98 = arith.constant 0 : index
    %118 = vector.load %arg5[%117, %c0_97, %c0_98] : memref<18x18x4xf32, #tpu.memory_space<vmem>>, vector<16x16x4xf32>
    %119 = vector.shape_cast %118 : vector<16x16x4xf32> to vector<256x4xf32>
    %c0_99 = arith.constant 0 : index
    %c0_100 = arith.constant 0 : index
    %c0_101 = arith.constant 0 : index
    %120 = vector.load %arg3[%c0_99, %c0_100, %c0_101] : memref<9x4x4xf32, #tpu.memory_space<vmem>>, vector<1x4x4xf32>
    %121 = vector.shape_cast %120 : vector<1x4x4xf32> to vector<4x4xf32>
    %cst_102 = arith.constant dense<0.000000e+00> : vector<256x4xf32>
    %122 = tpu.matmul %119, %121, %cst_102 {dimension_numbers = #tpu.dot_dimension_numbers<[1], [0], [0], [1], [0, 0, 1, 1], [], []>} : vector<256x4xf32>, vector<4x4xf32>, vector<256x4xf32> -> vector<256x4xf32>
    %123 = arith.addf %115, %122 : vector<256x4xf32>
    %c0_i32_103 = arith.constant 0 : i32
    %124 = arith.addi %114, %c0_i32_103 : i32
    %125 = arith.index_cast %124 : i32 to index
    %c1_104 = arith.constant 1 : index
    %c0_105 = arith.constant 0 : index
    %126 = vector.load %arg5[%125, %c1_104, %c0_105] : memref<18x18x4xf32, #tpu.memory_space<vmem>>, vector<16x16x4xf32>
    %127 = vector.shape_cast %126 : vector<16x16x4xf32> to vector<256x4xf32>
    %c1_106 = arith.constant 1 : index
    %c0_107 = arith.constant 0 : index
    %c0_108 = arith.constant 0 : index
    %128 = vector.load %arg3[%c1_106, %c0_107, %c0_108] : memref<9x4x4xf32, #tpu.memory_space<vmem>>, vector<1x4x4xf32>
    %129 = vector.shape_cast %128 : vector<1x4x4xf32> to vector<4x4xf32>
    %cst_109 = arith.constant dense<0.000000e+00> : vector<256x4xf32>
    %130 = tpu.matmul %127, %129, %cst_109 {dimension_numbers = #tpu.dot_dimension_numbers<[1], [0], [0], [1], [0, 0, 1, 1], [], []>} : vector<256x4xf32>, vector<4x4xf32>, vector<256x4xf32> -> vector<256x4xf32>
    %131 = arith.addf %123, %130 : vector<256x4xf32>
    %c0_i32_110 = arith.constant 0 : i32
    %132 = arith.addi %114, %c0_i32_110 : i32
    %133 = arith.index_cast %132 : i32 to index
    %c2_111 = arith.constant 2 : index
    %c0_112 = arith.constant 0 : index
    %134 = vector.load %arg5[%133, %c2_111, %c0_112] : memref<18x18x4xf32, #tpu.memory_space<vmem>>, vector<16x16x4xf32>
    %135 = vector.shape_cast %134 : vector<16x16x4xf32> to vector<256x4xf32>
    %c2_113 = arith.constant 2 : index
    %c0_114 = arith.constant 0 : index
    %c0_115 = arith.constant 0 : index
    %136 = vector.load %arg3[%c2_113, %c0_114, %c0_115] : memref<9x4x4xf32, #tpu.memory_space<vmem>>, vector<1x4x4xf32>
    %137 = vector.shape_cast %136 : vector<1x4x4xf32> to vector<4x4xf32>
    %cst_116 = arith.constant dense<0.000000e+00> : vector<256x4xf32>
    %138 = tpu.matmul %135, %137, %cst_116 {dimension_numbers = #tpu.dot_dimension_numbers<[1], [0], [0], [1], [0, 0, 1, 1], [], []>} : vector<256x4xf32>, vector<4x4xf32>, vector<256x4xf32> -> vector<256x4xf32>
    %139 = arith.addf %131, %138 : vector<256x4xf32>
    %c1_i32_117 = arith.constant 1 : i32
    %140 = arith.addi %114, %c1_i32_117 : i32
    %141 = arith.index_cast %140 : i32 to index
    %c0_118 = arith.constant 0 : index
    %c0_119 = arith.constant 0 : index
    %142 = vector.load %arg5[%141, %c0_118, %c0_119] : memref<18x18x4xf32, #tpu.memory_space<vmem>>, vector<16x16x4xf32>
    %143 = vector.shape_cast %142 : vector<16x16x4xf32> to vector<256x4xf32>
    %c3_120 = arith.constant 3 : index
    %c0_121 = arith.constant 0 : index
    %c0_122 = arith.constant 0 : index
    %144 = vector.load %arg3[%c3_120, %c0_121, %c0_122] : memref<9x4x4xf32, #tpu.memory_space<vmem>>, vector<1x4x4xf32>
    %145 = vector.shape_cast %144 : vector<1x4x4xf32> to vector<4x4xf32>
    %cst_123 = arith.constant dense<0.000000e+00> : vector<256x4xf32>
    %146 = tpu.matmul %143, %145, %cst_123 {dimension_numbers = #tpu.dot_dimension_numbers<[1], [0], [0], [1], [0, 0, 1, 1], [], []>} : vector<256x4xf32>, vector<4x4xf32>, vector<256x4xf32> -> vector<256x4xf32>
    %147 = arith.addf %139, %146 : vector<256x4xf32>
    %c1_i32_124 = arith.constant 1 : i32
    %148 = arith.addi %114, %c1_i32_124 : i32
    %149 = arith.index_cast %148 : i32 to index
    %c1_125 = arith.constant 1 : index
    %c0_126 = arith.constant 0 : index
    %150 = vector.load %arg5[%149, %c1_125, %c0_126] : memref<18x18x4xf32, #tpu.memory_space<vmem>>, vector<16x16x4xf32>
    %151 = vector.shape_cast %150 : vector<16x16x4xf32> to vector<256x4xf32>
    %c4_127 = arith.constant 4 : index
    %c0_128 = arith.constant 0 : index
    %c0_129 = arith.constant 0 : index
    %152 = vector.load %arg3[%c4_127, %c0_128, %c0_129] : memref<9x4x4xf32, #tpu.memory_space<vmem>>, vector<1x4x4xf32>
    %153 = vector.shape_cast %152 : vector<1x4x4xf32> to vector<4x4xf32>
    %cst_130 = arith.constant dense<0.000000e+00> : vector<256x4xf32>
    %154 = tpu.matmul %151, %153, %cst_130 {dimension_numbers = #tpu.dot_dimension_numbers<[1], [0], [0], [1], [0, 0, 1, 1], [], []>} : vector<256x4xf32>, vector<4x4xf32>, vector<256x4xf32> -> vector<256x4xf32>
    %155 = arith.addf %147, %154 : vector<256x4xf32>
    %c1_i32_131 = arith.constant 1 : i32
    %156 = arith.addi %114, %c1_i32_131 : i32
    %157 = arith.index_cast %156 : i32 to index
    %c2_132 = arith.constant 2 : index
    %c0_133 = arith.constant 0 : index
    %158 = vector.load %arg5[%157, %c2_132, %c0_133] : memref<18x18x4xf32, #tpu.memory_space<vmem>>, vector<16x16x4xf32>
    %159 = vector.shape_cast %158 : vector<16x16x4xf32> to vector<256x4xf32>
    %c5_134 = arith.constant 5 : index
    %c0_135 = arith.constant 0 : index
    %c0_136 = arith.constant 0 : index
    %160 = vector.load %arg3[%c5_134, %c0_135, %c0_136] : memref<9x4x4xf32, #tpu.memory_space<vmem>>, vector<1x4x4xf32>
    %161 = vector.shape_cast %160 : vector<1x4x4xf32> to vector<4x4xf32>
    %cst_137 = arith.constant dense<0.000000e+00> : vector<256x4xf32>
    %162 = tpu.matmul %159, %161, %cst_137 {dimension_numbers = #tpu.dot_dimension_numbers<[1], [0], [0], [1], [0, 0, 1, 1], [], []>} : vector<256x4xf32>, vector<4x4xf32>, vector<256x4xf32> -> vector<256x4xf32>
    %163 = arith.addf %155, %162 : vector<256x4xf32>
    %c2_i32_138 = arith.constant 2 : i32
    %164 = arith.addi %114, %c2_i32_138 : i32
    %165 = arith.index_cast %164 : i32 to index
    %c0_139 = arith.constant 0 : index
    %c0_140 = arith.constant 0 : index
    %166 = vector.load %arg5[%165, %c0_139, %c0_140] : memref<18x18x4xf32, #tpu.memory_space<vmem>>, vector<16x16x4xf32>
    %167 = vector.shape_cast %166 : vector<16x16x4xf32> to vector<256x4xf32>
    %c6_141 = arith.constant 6 : index
    %c0_142 = arith.constant 0 : index
    %c0_143 = arith.constant 0 : index
    %168 = vector.load %arg3[%c6_141, %c0_142, %c0_143] : memref<9x4x4xf32, #tpu.memory_space<vmem>>, vector<1x4x4xf32>
    %169 = vector.shape_cast %168 : vector<1x4x4xf32> to vector<4x4xf32>
    %cst_144 = arith.constant dense<0.000000e+00> : vector<256x4xf32>
    %170 = tpu.matmul %167, %169, %cst_144 {dimension_numbers = #tpu.dot_dimension_numbers<[1], [0], [0], [1], [0, 0, 1, 1], [], []>} : vector<256x4xf32>, vector<4x4xf32>, vector<256x4xf32> -> vector<256x4xf32>
    %171 = arith.addf %163, %170 : vector<256x4xf32>
    %c2_i32_145 = arith.constant 2 : i32
    %172 = arith.addi %114, %c2_i32_145 : i32
    %173 = arith.index_cast %172 : i32 to index
    %c1_146 = arith.constant 1 : index
    %c0_147 = arith.constant 0 : index
    %174 = vector.load %arg5[%173, %c1_146, %c0_147] : memref<18x18x4xf32, #tpu.memory_space<vmem>>, vector<16x16x4xf32>
    %175 = vector.shape_cast %174 : vector<16x16x4xf32> to vector<256x4xf32>
    %c7_148 = arith.constant 7 : index
    %c0_149 = arith.constant 0 : index
    %c0_150 = arith.constant 0 : index
    %176 = vector.load %arg3[%c7_148, %c0_149, %c0_150] : memref<9x4x4xf32, #tpu.memory_space<vmem>>, vector<1x4x4xf32>
    %177 = vector.shape_cast %176 : vector<1x4x4xf32> to vector<4x4xf32>
    %cst_151 = arith.constant dense<0.000000e+00> : vector<256x4xf32>
    %178 = tpu.matmul %175, %177, %cst_151 {dimension_numbers = #tpu.dot_dimension_numbers<[1], [0], [0], [1], [0, 0, 1, 1], [], []>} : vector<256x4xf32>, vector<4x4xf32>, vector<256x4xf32> -> vector<256x4xf32>
    %179 = arith.addf %171, %178 : vector<256x4xf32>
    %c2_i32_152 = arith.constant 2 : i32
    %180 = arith.addi %114, %c2_i32_152 : i32
    %181 = arith.index_cast %180 : i32 to index
    %c2_153 = arith.constant 2 : index
    %c0_154 = arith.constant 0 : index
    %182 = vector.load %arg5[%181, %c2_153, %c0_154] : memref<18x18x4xf32, #tpu.memory_space<vmem>>, vector<16x16x4xf32>
    %183 = vector.shape_cast %182 : vector<16x16x4xf32> to vector<256x4xf32>
    %c8_155 = arith.constant 8 : index
    %c0_156 = arith.constant 0 : index
    %c0_157 = arith.constant 0 : index
    %184 = vector.load %arg3[%c8_155, %c0_156, %c0_157] : memref<9x4x4xf32, #tpu.memory_space<vmem>>, vector<1x4x4xf32>
    %185 = vector.shape_cast %184 : vector<1x4x4xf32> to vector<4x4xf32>
    %cst_158 = arith.constant dense<0.000000e+00> : vector<256x4xf32>
    %186 = tpu.matmul %183, %185, %cst_158 {dimension_numbers = #tpu.dot_dimension_numbers<[1], [0], [0], [1], [0, 0, 1, 1], [], []>} : vector<256x4xf32>, vector<4x4xf32>, vector<256x4xf32> -> vector<256x4xf32>
    %187 = arith.addf %179, %186 : vector<256x4xf32>
    %188 = vector.shape_cast %187 : vector<256x4xf32> to vector<16x16x4xf32>
    %189 = arith.index_cast %114 : i32 to index
    %c0_159 = arith.constant 0 : index
    %c0_160 = arith.constant 0 : index
    %190 = vector.load %arg6[%189, %c0_159, %c0_160] : memref<16x16x4xf32, #tpu.memory_space<vmem>>, vector<16x16x4xf32>
    tpu.vector_store %arg6[%189, %c0_159, %c0_160], %188 {strides = array<i32>} : memref<16x16x4xf32, #tpu.memory_space<vmem>>, vector<16x16x4xf32>,
    %c1_i32_161 = arith.constant 1 : i32
    %c0_162 = arith.constant 0 : index
    %c0_163 = arith.constant 0 : index
    %c0_164 = arith.constant 0 : index
    %191 = vector.load %arg6[%c0_162, %c0_163, %c0_164] : memref<16x16x4xf32, #tpu.memory_space<vmem>>, vector<16x16x4xf32>
    %cst_165 = arith.constant dense<0.000000e+00> : vector<4xf32>
    %192 = vector.multi_reduction <add>, %191, %cst_165 [0, 1] : vector<16x16x4xf32> to vector<4xf32>
    %193 = vector.shape_cast %192 : vector<4xf32> to vector<1x1x4xf32>
    %cst_166 = arith.constant 3.906250e-03 : f32
    %194 = vector.broadcast %cst_166 : f32 to vector<1x1x4xf32>
    %195 = arith.mulf %193, %194 : vector<1x1x4xf32>
    %196 = vector.broadcast %195 : vector<1x1x4xf32> to vector<16x16x4xf32>
    %197 = arith.subf %191, %196 : vector<16x16x4xf32>
    %198 = arith.mulf %197, %197 : vector<16x16x4xf32>
    %cst_167 = arith.constant dense<0.000000e+00> : vector<4xf32>
    %199 = vector.multi_reduction <add>, %198, %cst_167 [0, 1] : vector<16x16x4xf32> to vector<4xf32>
    %200 = vector.shape_cast %199 : vector<4xf32> to vector<1x1x4xf32>
    %cst_168 = arith.constant 3.906250e-03 : f32
    %201 = vector.broadcast %cst_168 : f32 to vector<1x1x4xf32>
    %202 = arith.mulf %200, %201 : vector<1x1x4xf32>
    %cst_169 = arith.constant 9.99999974E-6 : f32
    %203 = vector.broadcast %cst_169 : f32 to vector<1x1x4xf32>
    %204 = arith.addf %202, %203 : vector<1x1x4xf32>
    %205 = math.rsqrt %204 : vector<1x1x4xf32>
    %206 = vector.broadcast %205 : vector<1x1x4xf32> to vector<16x16x4xf32>
    %207 = arith.mulf %197, %206 : vector<16x16x4xf32>
    %c0_170 = arith.constant 0 : index
    %c0_171 = arith.constant 0 : index
    %c0_172 = arith.constant 0 : index
    %c0_173 = arith.constant 0 : index
    %208 = vector.load %arg1[%c0_170, %c0_171, %c0_172, %c0_173] : memref<1x16x16x4xf32, #tpu.memory_space<vmem>>, vector<1x16x16x4xf32>
    %209 = vector.shape_cast %208 : vector<1x16x16x4xf32> to vector<16x16x4xf32>
    %210 = arith.addf %207, %209 : vector<16x16x4xf32>
    %cst_174 = arith.constant 0.000000e+00 : f32
    %211 = vector.broadcast %cst_174 : f32 to vector<16x16x4xf32>
    %212 = arith.maximumf %210, %211 : vector<16x16x4xf32>
    %c0_175 = arith.constant 0 : index
    %c0_176 = arith.constant 0 : index
    %c0_177 = arith.constant 0 : index
    %c0_178 = arith.constant 0 : index
    %213 = vector.load %arg4[%c0_175, %c0_176, %c0_177, %c0_178] : memref<1x16x16x4xf32, #tpu.memory_space<vmem>>, vector<1x16x16x4xf32>
    %214 = vector.shape_cast %213 : vector<1x16x16x4xf32> to vector<16x16x4xf32>
    %215 = vector.shape_cast %212 : vector<16x16x4xf32> to vector<1x16x16x4xf32>
    tpu.vector_store %arg4[%c0_175, %c0_176, %c0_177, %c0_178], %215 {strides = array<i32>} : memref<1x16x16x4xf32, #tpu.memory_space<vmem>>, vector<1x16x16x4xf32>,
    return
  }
  func.func @transform_0(%arg0: i32) -> (i32, i32, i32, i32) {
    %c0_i32 = arith.constant 0 : i32
    %c0_i32_0 = arith.constant 0 : i32
    %c0_i32_1 = arith.constant 0 : i32
    %c0_i32_2 = arith.constant 0 : i32
    return %arg0, %c0_i32, %c0_i32_0, %c0_i32_1 : i32, i32, i32, i32
  }
  func.func @transform_1(%arg0: i32) -> (i32, i32, i32) {
    %c0_i32 = arith.constant 0 : i32
    %c0_i32_0 = arith.constant 0 : i32
    %c0_i32_1 = arith.constant 0 : i32
    %c0_i32_2 = arith.constant 0 : i32
    return %c0_i32, %c0_i32_0, %c0_i32_1 : i32, i32, i32
  }
  func.func @transform_2(%arg0: i32) -> (i32, i32, i32) {
    %c0_i32 = arith.constant 0 : i32
    %c0_i32_0 = arith.constant 0 : i32
    %c0_i32_1 = arith.constant 0 : i32
    %c0_i32_2 = arith.constant 0 : i32
    return %c0_i32, %c0_i32_0, %c0_i32_1 : i32, i32, i32
  }
  func.func @transform_3(%arg0: i32) -> (i32, i32, i32, i32) {
    %c0_i32 = arith.constant 0 : i32
    %c0_i32_0 = arith.constant 0 : i32
    %c0_i32_1 = arith.constant 0 : i32
    %c0_i32_2 = arith.constant 0 : i32
    return %arg0, %c0_i32, %c0_i32_0, %c0_i32_1 : i32, i32, i32, i32
  }
}

module attributes {stable_mosaic.version = 11 : i64} {
  func.func @_resblock_kernel(%arg0: i32, %arg1: memref<1x16x16x4xf32, #tpu.memory_space<vmem>>, %arg2: memref<9x4x4xf32, #tpu.memory_space<vmem>>, %arg3: memref<9x4x4xf32, #tpu.memory_space<vmem>>, %arg4: memref<1x16x16x4xf32, #tpu.memory_space<vmem>>, %arg5: memref<18x18x4xf32, #tpu.memory_space<vmem>>, %arg6: memref<16x16x4xf32, #tpu.memory_space<vmem>>) attributes {dimension_semantics = [#tpu.dimension_semantics<parallel>], iteration_bounds = array<i64: 2>, scalar_prefetch = 0 : i64, scratch_operands = 2 : i64, tpu.core_type = #tpu.core_type<tc>, window_params = [{transform_indices = @transform_0, window_bounds = array<i64: 1, 16, 16, 4>}, {pipeline_mode = #tpu.pipeline_mode<synchronous>, transform_indices = @transform_1, window_bounds = array<i64: 9, 4, 4>}, {pipeline_mode = #tpu.pipeline_mode<synchronous>, transform_indices = @transform_2, window_bounds = array<i64: 9, 4, 4>}, {transform_indices = @transform_3, window_bounds = array<i64: 1, 16, 16, 4>}]} {
    %cst = arith.constant 0.000000e+00 : f32
    %0 = vector.broadcast %cst : f32 to vector<1x18x4xf32>
    %c0 = arith.constant 0 : index
    %c0_0 = arith.constant 0 : index
    %c0_1 = arith.constant 0 : index
    %1 = vector.load %arg5[%c0, %c0_0, %c0_1] : memref<18x18x4xf32, #tpu.memory_space<vmem>>, vector<1x18x4xf32>
    tpu.vector_store %arg5[%c0, %c0_0, %c0_1], %0 {strides = array<i32>} : memref<18x18x4xf32, #tpu.memory_space<vmem>>, vector<1x18x4xf32>,
    %cst_2 = arith.constant 0.000000e+00 : f32
    %2 = vector.broadcast %cst_2 : f32 to vector<1x18x4xf32>
    %c17 = arith.constant 17 : index
    %c0_3 = arith.constant 0 : index
    %c0_4 = arith.constant 0 : index
    %3 = vector.load %arg5[%c17, %c0_3, %c0_4] : memref<18x18x4xf32, #tpu.memory_space<vmem>>, vector<1x18x4xf32>
    tpu.vector_store %arg5[%c17, %c0_3, %c0_4], %2 {strides = array<i32>} : memref<18x18x4xf32, #tpu.memory_space<vmem>>, vector<1x18x4xf32>,
    %cst_5 = arith.constant 0.000000e+00 : f32
    %4 = vector.broadcast %cst_5 : f32 to vector<18x1x4xf32>
    %c0_6 = arith.constant 0 : index
    %c0_7 = arith.constant 0 : index
    %c0_8 = arith.constant 0 : index
    %5 = vector.load %arg5[%c0_6, %c0_7, %c0_8] : memref<18x18x4xf32, #tpu.memory_space<vmem>>, vector<18x1x4xf32>
    tpu.vector_store %arg5[%c0_6, %c0_7, %c0_8], %4 {strides = array<i32>} : memref<18x18x4xf32, #tpu.memory_space<vmem>>, vector<18x1x4xf32>,
    %cst_9 = arith.constant 0.000000e+00 : f32
    %6 = vector.broadcast %cst_9 : f32 to vector<18x1x4xf32>
    %c0_10 = arith.constant 0 : index
    %c17_11 = arith.constant 17 : index
    %c0_12 = arith.constant 0 : index
    %7 = vector.load %arg5[%c0_10, %c17_11, %c0_12] : memref<18x18x4xf32, #tpu.memory_space<vmem>>, vector<18x1x4xf32>
    tpu.vector_store %arg5[%c0_10, %c17_11, %c0_12], %6 {strides = array<i32>} : memref<18x18x4xf32, #tpu.memory_space<vmem>>, vector<18x1x4xf32>,
    %c0_13 = arith.constant 0 : index
    %c0_14 = arith.constant 0 : index
    %c0_15 = arith.constant 0 : index
    %c0_16 = arith.constant 0 : index
    %8 = vector.load %arg1[%c0_13, %c0_14, %c0_15, %c0_16] : memref<1x16x16x4xf32, #tpu.memory_space<vmem>>, vector<1x16x16x4xf32>
    %9 = vector.shape_cast %8 : vector<1x16x16x4xf32> to vector<16x16x4xf32>
    %c1 = arith.constant 1 : index
    %c1_17 = arith.constant 1 : index
    %c0_18 = arith.constant 0 : index
    %10 = vector.load %arg5[%c1, %c1_17, %c0_18] : memref<18x18x4xf32, #tpu.memory_space<vmem>>, vector<16x16x4xf32>
    tpu.vector_store %arg5[%c1, %c1_17, %c0_18], %9 {strides = array<i32>} : memref<18x18x4xf32, #tpu.memory_space<vmem>>, vector<16x16x4xf32>,
    %c0_i32 = arith.constant 0 : i32
    %c1_i32 = arith.constant 1 : i32
    %11 = arith.muli %c0_i32, %c1_i32 : i32
    %c0_i32_19 = arith.constant 0 : i32
    %12 = arith.addi %c0_i32_19, %11 : i32
    %c16_i32 = arith.constant 16 : i32
    %13 = arith.muli %12, %c16_i32 : i32
    %14 = tpu.assume_multiple %13, 16 : i32
    %cst_20 = arith.constant 0.000000e+00 : f32
    %15 = vector.broadcast %cst_20 : f32 to vector<256x4xf32>
    %c0_i32_21 = arith.constant 0 : i32
    %16 = arith.addi %14, %c0_i32_21 : i32
    %17 = arith.index_cast %16 : i32 to index
    %c0_22 = arith.constant 0 : index
    %c0_23 = arith.constant 0 : index
    %18 = vector.load %arg5[%17, %c0_22, %c0_23] : memref<18x18x4xf32, #tpu.memory_space<vmem>>, vector<16x16x4xf32>
    %19 = vector.shape_cast %18 : vector<16x16x4xf32> to vector<256x4xf32>
    %c0_24 = arith.constant 0 : index
    %c0_25 = arith.constant 0 : index
    %c0_26 = arith.constant 0 : index
    %20 = vector.load %arg2[%c0_24, %c0_25, %c0_26] : memref<9x4x4xf32, #tpu.memory_space<vmem>>, vector<1x4x4xf32>
    %21 = vector.shape_cast %20 : vector<1x4x4xf32> to vector<4x4xf32>
    %cst_27 = arith.constant dense<0.000000e+00> : vector<256x4xf32>
    %22 = tpu.matmul %19, %21, %cst_27 {dimension_numbers = #tpu.dot_dimension_numbers<[1], [0], [0], [1], [0, 0, 1, 1], [], []>} : vector<256x4xf32>, vector<4x4xf32>, vector<256x4xf32> -> vector<256x4xf32>
    %23 = arith.addf %15, %22 : vector<256x4xf32>
    %c0_i32_28 = arith.constant 0 : i32
    %24 = arith.addi %14, %c0_i32_28 : i32
    %25 = arith.index_cast %24 : i32 to index
    %c1_29 = arith.constant 1 : index
    %c0_30 = arith.constant 0 : index
    %26 = vector.load %arg5[%25, %c1_29, %c0_30] : memref<18x18x4xf32, #tpu.memory_space<vmem>>, vector<16x16x4xf32>
    %27 = vector.shape_cast %26 : vector<16x16x4xf32> to vector<256x4xf32>
    %c1_31 = arith.constant 1 : index
    %c0_32 = arith.constant 0 : index
    %c0_33 = arith.constant 0 : index
    %28 = vector.load %arg2[%c1_31, %c0_32, %c0_33] : memref<9x4x4xf32, #tpu.memory_space<vmem>>, vector<1x4x4xf32>
    %29 = vector.shape_cast %28 : vector<1x4x4xf32> to vector<4x4xf32>
    %cst_34 = arith.constant dense<0.000000e+00> : vector<256x4xf32>
    %30 = tpu.matmul %27, %29, %cst_34 {dimension_numbers = #tpu.dot_dimension_numbers<[1], [0], [0], [1], [0, 0, 1, 1], [], []>} : vector<256x4xf32>, vector<4x4xf32>, vector<256x4xf32> -> vector<256x4xf32>
    %31 = arith.addf %23, %30 : vector<256x4xf32>
    %c0_i32_35 = arith.constant 0 : i32
    %32 = arith.addi %14, %c0_i32_35 : i32
    %33 = arith.index_cast %32 : i32 to index
    %c2 = arith.constant 2 : index
    %c0_36 = arith.constant 0 : index
    %34 = vector.load %arg5[%33, %c2, %c0_36] : memref<18x18x4xf32, #tpu.memory_space<vmem>>, vector<16x16x4xf32>
    %35 = vector.shape_cast %34 : vector<16x16x4xf32> to vector<256x4xf32>
    %c2_37 = arith.constant 2 : index
    %c0_38 = arith.constant 0 : index
    %c0_39 = arith.constant 0 : index
    %36 = vector.load %arg2[%c2_37, %c0_38, %c0_39] : memref<9x4x4xf32, #tpu.memory_space<vmem>>, vector<1x4x4xf32>
    %37 = vector.shape_cast %36 : vector<1x4x4xf32> to vector<4x4xf32>
    %cst_40 = arith.constant dense<0.000000e+00> : vector<256x4xf32>
    %38 = tpu.matmul %35, %37, %cst_40 {dimension_numbers = #tpu.dot_dimension_numbers<[1], [0], [0], [1], [0, 0, 1, 1], [], []>} : vector<256x4xf32>, vector<4x4xf32>, vector<256x4xf32> -> vector<256x4xf32>
    %39 = arith.addf %31, %38 : vector<256x4xf32>
    %c1_i32_41 = arith.constant 1 : i32
    %40 = arith.addi %14, %c1_i32_41 : i32
    %41 = arith.index_cast %40 : i32 to index
    %c0_42 = arith.constant 0 : index
    %c0_43 = arith.constant 0 : index
    %42 = vector.load %arg5[%41, %c0_42, %c0_43] : memref<18x18x4xf32, #tpu.memory_space<vmem>>, vector<16x16x4xf32>
    %43 = vector.shape_cast %42 : vector<16x16x4xf32> to vector<256x4xf32>
    %c3 = arith.constant 3 : index
    %c0_44 = arith.constant 0 : index
    %c0_45 = arith.constant 0 : index
    %44 = vector.load %arg2[%c3, %c0_44, %c0_45] : memref<9x4x4xf32, #tpu.memory_space<vmem>>, vector<1x4x4xf32>
    %45 = vector.shape_cast %44 : vector<1x4x4xf32> to vector<4x4xf32>
    %cst_46 = arith.constant dense<0.000000e+00> : vector<256x4xf32>
    %46 = tpu.matmul %43, %45, %cst_46 {dimension_numbers = #tpu.dot_dimension_numbers<[1], [0], [0], [1], [0, 0, 1, 1], [], []>} : vector<256x4xf32>, vector<4x4xf32>, vector<256x4xf32> -> vector<256x4xf32>
    %47 = arith.addf %39, %46 : vector<256x4xf32>
    %c1_i32_47 = arith.constant 1 : i32
    %48 = arith.addi %14, %c1_i32_47 : i32
    %49 = arith.index_cast %48 : i32 to index
    %c1_48 = arith.constant 1 : index
    %c0_49 = arith.constant 0 : index
    %50 = vector.load %arg5[%49, %c1_48, %c0_49] : memref<18x18x4xf32, #tpu.memory_space<vmem>>, vector<16x16x4xf32>
    %51 = vector.shape_cast %50 : vector<16x16x4xf32> to vector<256x4xf32>
    %c4 = arith.constant 4 : index
    %c0_50 = arith.constant 0 : index
    %c0_51 = arith.constant 0 : index
    %52 = vector.load %arg2[%c4, %c0_50, %c0_51] : memref<9x4x4xf32, #tpu.memory_space<vmem>>, vector<1x4x4xf32>
    %53 = vector.shape_cast %52 : vector<1x4x4xf32> to vector<4x4xf32>
    %cst_52 = arith.constant dense<0.000000e+00> : vector<256x4xf32>
    %54 = tpu.matmul %51, %53, %cst_52 {dimension_numbers = #tpu.dot_dimension_numbers<[1], [0], [0], [1], [0, 0, 1, 1], [], []>} : vector<256x4xf32>, vector<4x4xf32>, vector<256x4xf32> -> vector<256x4xf32>
    %55 = arith.addf %47, %54 : vector<256x4xf32>
    %c1_i32_53 = arith.constant 1 : i32
    %56 = arith.addi %14, %c1_i32_53 : i32
    %57 = arith.index_cast %56 : i32 to index
    %c2_54 = arith.constant 2 : index
    %c0_55 = arith.constant 0 : index
    %58 = vector.load %arg5[%57, %c2_54, %c0_55] : memref<18x18x4xf32, #tpu.memory_space<vmem>>, vector<16x16x4xf32>
    %59 = vector.shape_cast %58 : vector<16x16x4xf32> to vector<256x4xf32>
    %c5 = arith.constant 5 : index
    %c0_56 = arith.constant 0 : index
    %c0_57 = arith.constant 0 : index
    %60 = vector.load %arg2[%c5, %c0_56, %c0_57] : memref<9x4x4xf32, #tpu.memory_space<vmem>>, vector<1x4x4xf32>
    %61 = vector.shape_cast %60 : vector<1x4x4xf32> to vector<4x4xf32>
    %cst_58 = arith.constant dense<0.000000e+00> : vector<256x4xf32>
    %62 = tpu.matmul %59, %61, %cst_58 {dimension_numbers = #tpu.dot_dimension_numbers<[1], [0], [0], [1], [0, 0, 1, 1], [], []>} : vector<256x4xf32>, vector<4x4xf32>, vector<256x4xf32> -> vector<256x4xf32>
    %63 = arith.addf %55, %62 : vector<256x4xf32>
    %c2_i32 = arith.constant 2 : i32
    %64 = arith.addi %14, %c2_i32 : i32
    %65 = arith.index_cast %64 : i32 to index
    %c0_59 = arith.constant 0 : index
    %c0_60 = arith.constant 0 : index
    %66 = vector.load %arg5[%65, %c0_59, %c0_60] : memref<18x18x4xf32, #tpu.memory_space<vmem>>, vector<16x16x4xf32>
    %67 = vector.shape_cast %66 : vector<16x16x4xf32> to vector<256x4xf32>
    %c6 = arith.constant 6 : index
    %c0_61 = arith.constant 0 : index
    %c0_62 = arith.constant 0 : index
    %68 = vector.load %arg2[%c6, %c0_61, %c0_62] : memref<9x4x4xf32, #tpu.memory_space<vmem>>, vector<1x4x4xf32>
    %69 = vector.shape_cast %68 : vector<1x4x4xf32> to vector<4x4xf32>
    %cst_63 = arith.constant dense<0.000000e+00> : vector<256x4xf32>
    %70 = tpu.matmul %67, %69, %cst_63 {dimension_numbers = #tpu.dot_dimension_numbers<[1], [0], [0], [1], [0, 0, 1, 1], [], []>} : vector<256x4xf32>, vector<4x4xf32>, vector<256x4xf32> -> vector<256x4xf32>
    %71 = arith.addf %63, %70 : vector<256x4xf32>
    %c2_i32_64 = arith.constant 2 : i32
    %72 = arith.addi %14, %c2_i32_64 : i32
    %73 = arith.index_cast %72 : i32 to index
    %c1_65 = arith.constant 1 : index
    %c0_66 = arith.constant 0 : index
    %74 = vector.load %arg5[%73, %c1_65, %c0_66] : memref<18x18x4xf32, #tpu.memory_space<vmem>>, vector<16x16x4xf32>
    %75 = vector.shape_cast %74 : vector<16x16x4xf32> to vector<256x4xf32>
    %c7 = arith.constant 7 : index
    %c0_67 = arith.constant 0 : index
    %c0_68 = arith.constant 0 : index
    %76 = vector.load %arg2[%c7, %c0_67, %c0_68] : memref<9x4x4xf32, #tpu.memory_space<vmem>>, vector<1x4x4xf32>
    %77 = vector.shape_cast %76 : vector<1x4x4xf32> to vector<4x4xf32>
    %cst_69 = arith.constant dense<0.000000e+00> : vector<256x4xf32>
    %78 = tpu.matmul %75, %77, %cst_69 {dimension_numbers = #tpu.dot_dimension_numbers<[1], [0], [0], [1], [0, 0, 1, 1], [], []>} : vector<256x4xf32>, vector<4x4xf32>, vector<256x4xf32> -> vector<256x4xf32>
    %79 = arith.addf %71, %78 : vector<256x4xf32>
    %c2_i32_70 = arith.constant 2 : i32
    %80 = arith.addi %14, %c2_i32_70 : i32
    %81 = arith.index_cast %80 : i32 to index
    %c2_71 = arith.constant 2 : index
    %c0_72 = arith.constant 0 : index
    %82 = vector.load %arg5[%81, %c2_71, %c0_72] : memref<18x18x4xf32, #tpu.memory_space<vmem>>, vector<16x16x4xf32>
    %83 = vector.shape_cast %82 : vector<16x16x4xf32> to vector<256x4xf32>
    %c8 = arith.constant 8 : index
    %c0_73 = arith.constant 0 : index
    %c0_74 = arith.constant 0 : index
    %84 = vector.load %arg2[%c8, %c0_73, %c0_74] : memref<9x4x4xf32, #tpu.memory_space<vmem>>, vector<1x4x4xf32>
    %85 = vector.shape_cast %84 : vector<1x4x4xf32> to vector<4x4xf32>
    %cst_75 = arith.constant dense<0.000000e+00> : vector<256x4xf32>
    %86 = tpu.matmul %83, %85, %cst_75 {dimension_numbers = #tpu.dot_dimension_numbers<[1], [0], [0], [1], [0, 0, 1, 1], [], []>} : vector<256x4xf32>, vector<4x4xf32>, vector<256x4xf32> -> vector<256x4xf32>
    %87 = arith.addf %79, %86 : vector<256x4xf32>
    %88 = vector.shape_cast %87 : vector<256x4xf32> to vector<16x16x4xf32>
    %89 = arith.index_cast %14 : i32 to index
    %c0_76 = arith.constant 0 : index
    %c0_77 = arith.constant 0 : index
    %90 = vector.load %arg6[%89, %c0_76, %c0_77] : memref<16x16x4xf32, #tpu.memory_space<vmem>>, vector<16x16x4xf32>
    tpu.vector_store %arg6[%89, %c0_76, %c0_77], %88 {strides = array<i32>} : memref<16x16x4xf32, #tpu.memory_space<vmem>>, vector<16x16x4xf32>,
    %c1_i32_78 = arith.constant 1 : i32
    %c0_79 = arith.constant 0 : index
    %c0_80 = arith.constant 0 : index
    %c0_81 = arith.constant 0 : index
    %91 = vector.load %arg6[%c0_79, %c0_80, %c0_81] : memref<16x16x4xf32, #tpu.memory_space<vmem>>, vector<16x16x4xf32>
    %cst_82 = arith.constant dense<0.000000e+00> : vector<4xf32>
    %92 = vector.multi_reduction <add>, %91, %cst_82 [0, 1] : vector<16x16x4xf32> to vector<4xf32>
    %93 = vector.shape_cast %92 : vector<4xf32> to vector<1x1x4xf32>
    %cst_83 = arith.constant 3.906250e-03 : f32
    %94 = vector.broadcast %cst_83 : f32 to vector<1x1x4xf32>
    %95 = arith.mulf %93, %94 : vector<1x1x4xf32>
    %96 = vector.broadcast %95 : vector<1x1x4xf32> to vector<16x16x4xf32>
    %97 = arith.subf %91, %96 : vector<16x16x4xf32>
    %98 = arith.mulf %97, %97 : vector<16x16x4xf32>
    %cst_84 = arith.constant dense<0.000000e+00> : vector<4xf32>
    %99 = vector.multi_reduction <add>, %98, %cst_84 [0, 1] : vector<16x16x4xf32> to vector<4xf32>
    %100 = vector.shape_cast %99 : vector<4xf32> to vector<1x1x4xf32>
    %cst_85 = arith.constant 3.906250e-03 : f32
    %101 = vector.broadcast %cst_85 : f32 to vector<1x1x4xf32>
    %102 = arith.mulf %100, %101 : vector<1x1x4xf32>
    %cst_86 = arith.constant 9.99999974E-6 : f32
    %103 = vector.broadcast %cst_86 : f32 to vector<1x1x4xf32>
    %104 = arith.addf %102, %103 : vector<1x1x4xf32>
    %105 = math.rsqrt %104 : vector<1x1x4xf32>
    %106 = vector.broadcast %105 : vector<1x1x4xf32> to vector<16x16x4xf32>
    %107 = arith.mulf %97, %106 : vector<16x16x4xf32>
    %cst_87 = arith.constant 0.000000e+00 : f32
    %108 = vector.broadcast %cst_87 : f32 to vector<16x16x4xf32>
    %109 = arith.maximumf %107, %108 : vector<16x16x4xf32>
    %c1_88 = arith.constant 1 : index
    %c1_89 = arith.constant 1 : index
    %c0_90 = arith.constant 0 : index
    %110 = vector.load %arg5[%c1_88, %c1_89, %c0_90] : memref<18x18x4xf32, #tpu.memory_space<vmem>>, vector<16x16x4xf32>
    tpu.vector_store %arg5[%c1_88, %c1_89, %c0_90], %109 {strides = array<i32>} : memref<18x18x4xf32, #tpu.memory_space<vmem>>, vector<16x16x4xf32>,
    %c0_i32_91 = arith.constant 0 : i32
    %c1_i32_92 = arith.constant 1 : i32
    %111 = arith.muli %c0_i32_91, %c1_i32_92 : i32
    %c0_i32_93 = arith.constant 0 : i32
    %112 = arith.addi %c0_i32_93, %111 : i32
    %c16_i32_94 = arith.constant 16 : i32
    %113 = arith.muli %112, %c16_i32_94 : i32
    %114 = tpu.assume_multiple %113, 16 : i32
    %cst_95 = arith.constant 0.000000e+00 : f32
    %115 = vector.broadcast %cst_95 : f32 to vector<256x4xf32>
    %c0_i32_96 = arith.constant 0 : i32
    %116 = arith.addi %114, %c0_i32_96 : i32
    %117 = arith.index_cast %116 : i32 to index
    %c0_97 = arith.constant 0 : index
    %c0_98 = arith.constant 0 : index
    %118 = vector.load %arg5[%117, %c0_97, %c0_98] : memref<18x18x4xf32, #tpu.memory_space<vmem>>, vector<16x16x4xf32>
    %119 = vector.shape_cast %118 : vector<16x16x4xf32> to vector<256x4xf32>
    %c0_99 = arith.constant 0 : index
    %c0_100 = arith.constant 0 : index
    %c0_101 = arith.constant 0 : index
    %120 = vector.load %arg3[%c0_99, %c0_100, %c0_101] : memref<9x4x4xf32, #tpu.memory_space<vmem>>, vector<1x4x4xf32>
    %121 = vector.shape_cast %120 : vector<1x4x4xf32> to vector<4x4xf32>
    %cst_102 = arith.constant dense<0.000000e+00> : vector<256x4xf32>
    %122 = tpu.matmul %119, %121, %cst_102 {dimension_numbers = #tpu.dot_dimension_numbers<[1], [0], [0], [1], [0, 0, 1, 1], [], []>} : vector<256x4xf32>, vector<4x4xf32>, vector<256x4xf32> -> vector<256x4xf32>
    %123 = arith.addf %115, %122 : vector<256x4xf32>
    %c0_i32_103 = arith.constant 0 : i32
    %124 = arith.addi %114, %c0_i32_103 : i32
    %125 = arith.index_cast %124 : i32 to index
    %c1_104 = arith.constant 1 : index
    %c0_105 = arith.constant 0 : index
    %126 = vector.load %arg5[%125, %c1_104, %c0_105] : memref<18x18x4xf32, #tpu.memory_space<vmem>>, vector<16x16x4xf32>
    %127 = vector.shape_cast %126 : vector<16x16x4xf32> to vector<256x4xf32>
    %c1_106 = arith.constant 1 : index
    %c0_107 = arith.constant 0 : index
    %c0_108 = arith.constant 0 : index
    %128 = vector.load %arg3[%c1_106, %c0_107, %c0_108] : memref<9x4x4xf32, #tpu.memory_space<vmem>>, vector<1x4x4xf32>
    %129 = vector.shape_cast %128 : vector<1x4x4xf32> to vector<4x4xf32>
    %cst_109 = arith.constant dense<0.000000e+00> : vector<256x4xf32>
    %130 = tpu.matmul %127, %129, %cst_109 {dimension_numbers = #tpu.dot_dimension_numbers<[1], [0], [0], [1], [0, 0, 1, 1], [], []>} : vector<256x4xf32>, vector<4x4xf32>, vector<256x4xf32> -> vector<256x4xf32>
    %131 = arith.addf %123, %130 : vector<256x4xf32>
    %c0_i32_110 = arith.constant 0 : i32
    %132 = arith.addi %114, %c0_i32_110 : i32
    %133 = arith.index_cast %132 : i32 to index
    %c2_111 = arith.constant 2 : index
    %c0_112 = arith.constant 0 : index
    %134 = vector.load %arg5[%133, %c2_111, %c0_112] : memref<18x18x4xf32, #tpu.memory_space<vmem>>, vector<16x16x4xf32>
    %135 = vector.shape_cast %134 : vector<16x16x4xf32> to vector<256x4xf32>
    %c2_113 = arith.constant 2 : index
    %c0_114 = arith.constant 0 : index
    %c0_115 = arith.constant 0 : index
    %136 = vector.load %arg3[%c2_113, %c0_114, %c0_115] : memref<9x4x4xf32, #tpu.memory_space<vmem>>, vector<1x4x4xf32>
    %137 = vector.shape_cast %136 : vector<1x4x4xf32> to vector<4x4xf32>
    %cst_116 = arith.constant dense<0.000000e+00> : vector<256x4xf32>
    %138 = tpu.matmul %135, %137, %cst_116 {dimension_numbers = #tpu.dot_dimension_numbers<[1], [0], [0], [1], [0, 0, 1, 1], [], []>} : vector<256x4xf32>, vector<4x4xf32>, vector<256x4xf32> -> vector<256x4xf32>
    %139 = arith.addf %131, %138 : vector<256x4xf32>
    %c1_i32_117 = arith.constant 1 : i32
    %140 = arith.addi %114, %c1_i32_117 : i32
    %141 = arith.index_cast %140 : i32 to index
    %c0_118 = arith.constant 0 : index
    %c0_119 = arith.constant 0 : index
    %142 = vector.load %arg5[%141, %c0_118, %c0_119] : memref<18x18x4xf32, #tpu.memory_space<vmem>>, vector<16x16x4xf32>
    %143 = vector.shape_cast %142 : vector<16x16x4xf32> to vector<256x4xf32>
    %c3_120 = arith.constant 3 : index
    %c0_121 = arith.constant 0 : index
    %c0_122 = arith.constant 0 : index
    %144 = vector.load %arg3[%c3_120, %c0_121, %c0_122] : memref<9x4x4xf32, #tpu.memory_space<vmem>>, vector<1x4x4xf32>
    %145 = vector.shape_cast %144 : vector<1x4x4xf32> to vector<4x4xf32>
    %cst_123 = arith.constant dense<0.000000e+00> : vector<256x4xf32>
    %146 = tpu.matmul %143, %145, %cst_123 {dimension_numbers = #tpu.dot_dimension_numbers<[1], [0], [0], [1], [0, 0, 1, 1], [], []>} : vector<256x4xf32>, vector<4x4xf32>, vector<256x4xf32> -> vector<256x4xf32>
    %147 = arith.addf %139, %146 : vector<256x4xf32>
    %c1_i32_124 = arith.constant 1 : i32
    %148 = arith.addi %114, %c1_i32_124 : i32
    %149 = arith.index_cast %148 : i32 to index
    %c1_125 = arith.constant 1 : index
    %c0_126 = arith.constant 0 : index
    %150 = vector.load %arg5[%149, %c1_125, %c0_126] : memref<18x18x4xf32, #tpu.memory_space<vmem>>, vector<16x16x4xf32>
    %151 = vector.shape_cast %150 : vector<16x16x4xf32> to vector<256x4xf32>
    %c4_127 = arith.constant 4 : index
    %c0_128 = arith.constant 0 : index
    %c0_129 = arith.constant 0 : index
    %152 = vector.load %arg3[%c4_127, %c0_128, %c0_129] : memref<9x4x4xf32, #tpu.memory_space<vmem>>, vector<1x4x4xf32>
    %153 = vector.shape_cast %152 : vector<1x4x4xf32> to vector<4x4xf32>
    %cst_130 = arith.constant dense<0.000000e+00> : vector<256x4xf32>
    %154 = tpu.matmul %151, %153, %cst_130 {dimension_numbers = #tpu.dot_dimension_numbers<[1], [0], [0], [1], [0, 0, 1, 1], [], []>} : vector<256x4xf32>, vector<4x4xf32>, vector<256x4xf32> -> vector<256x4xf32>
    %155 = arith.addf %147, %154 : vector<256x4xf32>
    %c1_i32_131 = arith.constant 1 : i32
    %156 = arith.addi %114, %c1_i32_131 : i32
    %157 = arith.index_cast %156 : i32 to index
    %c2_132 = arith.constant 2 : index
    %c0_133 = arith.constant 0 : index
    %158 = vector.load %arg5[%157, %c2_132, %c0_133] : memref<18x18x4xf32, #tpu.memory_space<vmem>>, vector<16x16x4xf32>
    %159 = vector.shape_cast %158 : vector<16x16x4xf32> to vector<256x4xf32>
    %c5_134 = arith.constant 5 : index
    %c0_135 = arith.constant 0 : index
    %c0_136 = arith.constant 0 : index
    %160 = vector.load %arg3[%c5_134, %c0_135, %c0_136] : memref<9x4x4xf32, #tpu.memory_space<vmem>>, vector<1x4x4xf32>
    %161 = vector.shape_cast %160 : vector<1x4x4xf32> to vector<4x4xf32>
    %cst_137 = arith.constant dense<0.000000e+00> : vector<256x4xf32>
    %162 = tpu.matmul %159, %161, %cst_137 {dimension_numbers = #tpu.dot_dimension_numbers<[1], [0], [0], [1], [0, 0, 1, 1], [], []>} : vector<256x4xf32>, vector<4x4xf32>, vector<256x4xf32> -> vector<256x4xf32>
    %163 = arith.addf %155, %162 : vector<256x4xf32>
    %c2_i32_138 = arith.constant 2 : i32
    %164 = arith.addi %114, %c2_i32_138 : i32
    %165 = arith.index_cast %164 : i32 to index
    %c0_139 = arith.constant 0 : index
    %c0_140 = arith.constant 0 : index
    %166 = vector.load %arg5[%165, %c0_139, %c0_140] : memref<18x18x4xf32, #tpu.memory_space<vmem>>, vector<16x16x4xf32>
    %167 = vector.shape_cast %166 : vector<16x16x4xf32> to vector<256x4xf32>
    %c6_141 = arith.constant 6 : index
    %c0_142 = arith.constant 0 : index
    %c0_143 = arith.constant 0 : index
    %168 = vector.load %arg3[%c6_141, %c0_142, %c0_143] : memref<9x4x4xf32, #tpu.memory_space<vmem>>, vector<1x4x4xf32>
    %169 = vector.shape_cast %168 : vector<1x4x4xf32> to vector<4x4xf32>
    %cst_144 = arith.constant dense<0.000000e+00> : vector<256x4xf32>
    %170 = tpu.matmul %167, %169, %cst_144 {dimension_numbers = #tpu.dot_dimension_numbers<[1], [0], [0], [1], [0, 0, 1, 1], [], []>} : vector<256x4xf32>, vector<4x4xf32>, vector<256x4xf32> -> vector<256x4xf32>
    %171 = arith.addf %163, %170 : vector<256x4xf32>
    %c2_i32_145 = arith.constant 2 : i32
    %172 = arith.addi %114, %c2_i32_145 : i32
    %173 = arith.index_cast %172 : i32 to index
    %c1_146 = arith.constant 1 : index
    %c0_147 = arith.constant 0 : index
    %174 = vector.load %arg5[%173, %c1_146, %c0_147] : memref<18x18x4xf32, #tpu.memory_space<vmem>>, vector<16x16x4xf32>
    %175 = vector.shape_cast %174 : vector<16x16x4xf32> to vector<256x4xf32>
    %c7_148 = arith.constant 7 : index
    %c0_149 = arith.constant 0 : index
    %c0_150 = arith.constant 0 : index
    %176 = vector.load %arg3[%c7_148, %c0_149, %c0_150] : memref<9x4x4xf32, #tpu.memory_space<vmem>>, vector<1x4x4xf32>
    %177 = vector.shape_cast %176 : vector<1x4x4xf32> to vector<4x4xf32>
    %cst_151 = arith.constant dense<0.000000e+00> : vector<256x4xf32>
    %178 = tpu.matmul %175, %177, %cst_151 {dimension_numbers = #tpu.dot_dimension_numbers<[1], [0], [0], [1], [0, 0, 1, 1], [], []>} : vector<256x4xf32>, vector<4x4xf32>, vector<256x4xf32> -> vector<256x4xf32>
    %179 = arith.addf %171, %178 : vector<256x4xf32>
    %c2_i32_152 = arith.constant 2 : i32
    %180 = arith.addi %114, %c2_i32_152 : i32
    %181 = arith.index_cast %180 : i32 to index
    %c2_153 = arith.constant 2 : index
    %c0_154 = arith.constant 0 : index
    %182 = vector.load %arg5[%181, %c2_153, %c0_154] : memref<18x18x4xf32, #tpu.memory_space<vmem>>, vector<16x16x4xf32>
    %183 = vector.shape_cast %182 : vector<16x16x4xf32> to vector<256x4xf32>
    %c8_155 = arith.constant 8 : index
    %c0_156 = arith.constant 0 : index
    %c0_157 = arith.constant 0 : index
    %184 = vector.load %arg3[%c8_155, %c0_156, %c0_157] : memref<9x4x4xf32, #tpu.memory_space<vmem>>, vector<1x4x4xf32>
    %185 = vector.shape_cast %184 : vector<1x4x4xf32> to vector<4x4xf32>
    %cst_158 = arith.constant dense<0.000000e+00> : vector<256x4xf32>
    %186 = tpu.matmul %183, %185, %cst_158 {dimension_numbers = #tpu.dot_dimension_numbers<[1], [0], [0], [1], [0, 0, 1, 1], [], []>} : vector<256x4xf32>, vector<4x4xf32>, vector<256x4xf32> -> vector<256x4xf32>
    %187 = arith.addf %179, %186 : vector<256x4xf32>
    %188 = vector.shape_cast %187 : vector<256x4xf32> to vector<16x16x4xf32>
    %189 = arith.index_cast %114 : i32 to index
    %c0_159 = arith.constant 0 : index
    %c0_160 = arith.constant 0 : index
    %190 = vector.load %arg6[%189, %c0_159, %c0_160] : memref<16x16x4xf32, #tpu.memory_space<vmem>>, vector<16x16x4xf32>
    tpu.vector_store %arg6[%189, %c0_159, %c0_160], %188 {strides = array<i32>} : memref<16x16x4xf32, #tpu.memory_space<vmem>>, vector<16x16x4xf32>,
    %c1_i32_161 = arith.constant 1 : i32
    %c0_162 = arith.constant 0 : index
    %c0_163 = arith.constant 0 : index
    %c0_164 = arith.constant 0 : index
    %191 = vector.load %arg6[%c0_162, %c0_163, %c0_164] : memref<16x16x4xf32, #tpu.memory_space<vmem>>, vector<16x16x4xf32>
    %cst_165 = arith.constant dense<0.000000e+00> : vector<4xf32>
    %192 = vector.multi_reduction <add>, %191, %cst_165 [0, 1] : vector<16x16x4xf32> to vector<4xf32>
    %193 = vector.shape_cast %192 : vector<4xf32> to vector<1x1x4xf32>
    %cst_166 = arith.constant 3.906250e-03 : f32
    %194 = vector.broadcast %cst_166 : f32 to vector<1x1x4xf32>
    %195 = arith.mulf %193, %194 : vector<1x1x4xf32>
    %196 = vector.broadcast %195 : vector<1x1x4xf32> to vector<16x16x4xf32>
    %197 = arith.subf %191, %196 : vector<16x16x4xf32>
    %198 = arith.mulf %197, %197 : vector<16x16x4xf32>
    %cst_167 = arith.constant dense<0.000000e+00> : vector<4xf32>
    %199 = vector.multi_reduction <add>, %198, %cst_167 [0, 1] : vector<16x16x4xf32> to vector<4xf32>
    %200 = vector.shape_cast %199 : vector<4xf32> to vector<1x1x4xf32>
    %cst_168 = arith.constant 3.906250e-03 : f32
    %201 = vector.broadcast %cst_168 : f32 to vector<1x1x4xf32>
    %202 = arith.mulf %200, %201 : vector<1x1x4xf32>
    %cst_169 = arith.constant 9.99999974E-6 : f32
    %203 = vector.broadcast %cst_169 : f32 to vector<1x1x4xf32>
    %204 = arith.addf %202, %203 : vector<1x1x4xf32>
    %205 = math.rsqrt %204 : vector<1x1x4xf32>
    %206 = vector.broadcast %205 : vector<1x1x4xf32> to vector<16x16x4xf32>
    %207 = arith.mulf %197, %206 : vector<16x16x4xf32>
    %c0_170 = arith.constant 0 : index
    %c0_171 = arith.constant 0 : index
    %c0_172 = arith.constant 0 : index
    %c0_173 = arith.constant 0 : index
    %208 = vector.load %arg1[%c0_170, %c0_171, %c0_172, %c0_173] : memref<1x16x16x4xf32, #tpu.memory_space<vmem>>, vector<1x16x16x4xf32>
    %209 = vector.shape_cast %208 : vector<1x16x16x4xf32> to vector<16x16x4xf32>
    %210 = arith.addf %207, %209 : vector<16x16x4xf32>
    %cst_174 = arith.constant 0.000000e+00 : f32
    %211 = vector.broadcast %cst_174 : f32 to vector<16x16x4xf32>
    %212 = arith.maximumf %210, %211 : vector<16x16x4xf32>
    %c0_175 = arith.constant 0 : index
    %c0_176 = arith.constant 0 : index
    %c0_177 = arith.constant 0 : index
    %c0_178 = arith.constant 0 : index
    %213 = vector.load %arg4[%c0_175, %c0_176, %c0_177, %c0_178] : memref<1x16x16x4xf32, #tpu.memory_space<vmem>>, vector<1x16x16x4xf32>
    %214 = vector.shape_cast %213 : vector<1x16x16x4xf32> to vector<16x16x4xf32>
    %215 = vector.shape_cast %212 : vector<16x16x4xf32> to vector<1x16x16x4xf32>
    tpu.vector_store %arg4[%c0_175, %c0_176, %c0_177, %c0_178], %215 {strides = array<i32>} : memref<1x16x16x4xf32, #tpu.memory_space<vmem>>, vector<1x16x16x4xf32>,
    return
  }
  func.func @transform_0(%arg0: i32) -> (i32, i32, i32, i32) {
    %c0_i32 = arith.constant 0 : i32
    %c0_i32_0 = arith.constant 0 : i32
    %c0_i32_1 = arith.constant 0 : i32
    %c0_i32_2 = arith.constant 0 : i32
    return %arg0, %c0_i32, %c0_i32_0, %c0_i32_1 : i32, i32, i32, i32
  }
  func.func @transform_1(%arg0: i32) -> (i32, i32, i32) {
    %c0_i32 = arith.constant 0 : i32
    %c0_i32_0 = arith.constant 0 : i32
    %c0_i32_1 = arith.constant 0 : i32
    %c0_i32_2 = arith.constant 0 : i32
    return %c0_i32, %c0_i32_0, %c0_i32_1 : i32, i32, i32
  }
  func.func @transform_2(%arg0: i32) -> (i32, i32, i32) {
    %c0_i32 = arith.constant 0 : i32
    %c0_i32_0 = arith.constant 0 : i32
    %c0_i32_1 = arith.constant 0 : i32
    %c0_i32_2 = arith.constant 0 : i32
    return %c0_i32, %c0_i32_0, %c0_i32_1 : i32, i32, i32
  }
  func.func @transform_3(%arg0: i32) -> (i32, i32, i32, i32) {
    %c0_i32 = arith.constant 0 : i32
    %c0_i32_0 = arith.constant 0 : i32
    %c0_i32_1 = arith.constant 0 : i32
    %c0_i32_2 = arith.constant 0 : i32
    return %arg0, %c0_i32, %c0_i32_0, %c0_i32_1 : i32, i32, i32, i32
  }
}

</mosaic_0001>

<bundles_post_ra>
// kernel: tpu_custom_call.1
= control target key start
LH: loop header
LB: loop body
LE: loop exit
PB: predicated region body
PF: predicated region fallthrough
CT: control target
= control target key end

     0   :  { %s10707_s12 = smov 0   ;;  %s13483_s0 = inlined_call_operand.vmem [shape: f32[2,16,16,4], index: 0, kind: input, shape index: {}]   ;;  %s13484_s1 = inlined_call_operand.vmem [shape: f32[9,4,4], index: 1, kind: input, shape index: {}]   ;;  %s13485_s2 = inlined_call_operand.vmem [shape: f32[9,4,4], index: 2, kind: input, shape index: {}]   ;;  %s13486_s3 = inlined_call_operand.vmem [shape: f32[2,16,16,4], index: 3, kind: output, shape index: {}]  }
   0x1 LB: > { %s8036_s13 = sadd.s32 4294967295, %s10684_s12   ;;  %p8040_p0 = scmp.ge.s32.totalorder %s10684_s12, 1  ;;  %s10684_s12 = sphi %s10707_s12, %s13_s12  }
   0x2   : > { %p137_p1 = scmp.lt.s32.totalorder %s10684_s12, 3 }
   0x4   : > { %p138_p2 = pnand %p8040_p0, %p137_p1 }
   0x6   : > { %141 = sbr.rel (%p138_p2) target bundleno = 1901 (0x76d), region = 32 }
   0xd   : > { %v8045_v0 = vld [vmem:[%s13484_s1 + $0x4] sm:$0xf]  ;;  %vm447_vm0 = vcmask 1043456   ;;  %vm171_vm1 = vcmask 31744   ;;  %vm174_vm2 = vcmask 25600   ;;  %v10686_v1 = vmov 0.0  }
   0xe   : > { %9253 = vmatprep.subr.msk.mxu0 %vm447_vm0, %v8045_v0  ;;  %172 = vst.msk [vmem:[#allocation2] sm:$0xff] %vm171_vm1, %v10686_v1  ;;  %173 = vst.msk [vmem:[#allocation2 + $0x8] sm:$0xff] %vm171_vm1, %v10686_v1  ;;  %v10726_v2 = vld [vmem:[%s13484_s1] sm:$0xf]  ;;  %p10730_p3 = scmp.lt.s32.totalorder %s8036_s13, 1  ;;  %vm180_vm3 = vcmask 24576  }
   0xf   : > { %177 = vst.msk [vmem:[#allocation2 + $0x198] sm:$0xff] %vm171_vm1, %v10686_v1  ;;  %178 = vst.msk [vmem:[#allocation2 + $0x1a0] sm:$0xff] %vm171_vm1, %v10686_v1  ;;  %9254 = vmatpush3.msk.msra.mxu0 %vm447_vm0, %v8045_v0  ;;  %v10793_v6 = vld [vmem:[%s13484_s1 + $0x8] sm:$0xf] }
  0x10   : > { %175 = vst.msk [vmem:[#allocation2 + $0x10] sm:$0x3] %vm174_vm2, %v10686_v1  ;;  %179 = vst.msk [vmem:[#allocation2 + $0x1a8] sm:$0x3] %vm174_vm2, %v10686_v1  ;;  %9303 = vmatprep.subr.msk.mxu0 %vm447_vm0, %v10726_v2  ;;  %s13761_s13 = smov (!%p10730_p3, %s8036_s13), 1 }
  0x11   : > { %181 = vst.msk [vmem:[#allocation2] sm:$0x1] %vm180_vm3, %v10686_v1  ;;  %182 = vst.msk [vmem:[#allocation2 + $0x18] sm:$0x1] %vm180_vm3, %v10686_v1  ;;  %s8657_s19 = sshll.u32 %s13761_s13, 8 }
  0x12   : > { %183 = vst.msk [vmem:[#allocation2 + $0x30] sm:$0x1] %vm180_vm3, %v10686_v1  ;;  %184 = vst.msk [vmem:[#allocation2 + $0x48] sm:$0x1] %vm180_vm3, %v10686_v1  ;;  %s10785_s22 = scalar_lea.vmem %s13483_s0, %s8657_s19  ;;  %s13394_s6 = scalar_lea.vmem %s13486_s3, %s8657_s19 }
  0x13   : > { %185 = vst.msk [vmem:[#allocation2 + $0x60] sm:$0x1] %vm180_vm3, %v10686_v1  ;;  %186 = vst.msk [vmem:[#allocation2 + $0x78] sm:$0x1] %vm180_vm3, %v10686_v1  ;;  %v217_v3 = vld [vmem:[%s10785_s22] sm:$0xff]  ;;  %v218_v4 = vld [vmem:[%s10785_s22 + $0x8] sm:$0xff] }
  0x14   : > { %187 = vst.msk [vmem:[#allocation2 + $0x90] sm:$0x1] %vm180_vm3, %v10686_v1  ;;  %188 = vst.msk [vmem:[#allocation2 + $0xa8] sm:$0x1] %vm180_vm3, %v10686_v1  ;;  %v219_v5 = vld [vmem:[%s10785_s22 + $0x10] sm:$0xff]  ;;  %v220_v9 = vld [vmem:[%s10785_s22 + $0x18] sm:$0xff] }
  0x15   : > { %189 = vst.msk [vmem:[#allocation2 + $0xc0] sm:$0x1] %vm180_vm3, %v10686_v1  ;;  %190 = vst.msk [vmem:[#allocation2 + $0xd8] sm:$0x1] %vm180_vm3, %v10686_v1  ;;  %v317_v7 = vld [vmem:[#allocation2 + $0x1] sm:$0xff]  ;;  %v223_v12 = vld [vmem:[%s10785_s22 + $0x30] sm:$0xff] }
  0x16   : > { %191 = vst.msk [vmem:[#allocation2 + $0xf0] sm:$0x1] %vm180_vm3, %v10686_v1  ;;  %192 = vst.msk [vmem:[#allocation2 + $0x108] sm:$0x1] %vm180_vm3, %v10686_v1  ;;  %9255 = vmatprep.mubr.msk.f32.mxu0 %vm171_vm1, %v317_v7  ;;  %v221_v10 = vld [vmem:[%s10785_s22 + $0x20] sm:$0xff]  ;;  %v222_v11 = vld [vmem:[%s10785_s22 + $0x28] sm:$0xff] }
  0x17   : > { %193 = vst.msk [vmem:[#allocation2 + $0x120] sm:$0x1] %vm180_vm3, %v10686_v1  ;;  %194 = vst.msk [vmem:[#allocation2 + $0x138] sm:$0x1] %vm180_vm3, %v10686_v1  ;;  %v318_v8 = vld [vmem:[#allocation2 + $0x9] sm:$0xff]  ;;  %v224_v13 = vld [vmem:[%s10785_s22 + $0x38] sm:$0xff] }
  0x18   : > { %195 = vst.msk [vmem:[#allocation2 + $0x150] sm:$0x1] %vm180_vm3, %v10686_v1  ;;  %196 = vst.msk [vmem:[#allocation2 + $0x168] sm:$0x1] %vm180_vm3, %v10686_v1  ;;  %9256 = vmatmul.mubr.msk.f32.vlgmr.msra.gmra.mrb[0].mxu0 %vm171_vm1, %v318_v8  ;;  %v225_v14 = vld [vmem:[%s10785_s22 + $0x40] sm:$0xff]  ;;  %v226_v15 = vld [vmem:[%s10785_s22 + $0x48] sm:$0xff] }
  0x19   : > { %197 = vst.msk [vmem:[#allocation2 + $0x180] sm:$0x1] %vm180_vm3, %v10686_v1  ;;  %198 = vst.msk [vmem:[#allocation2 + $0x198] sm:$0x1] %vm180_vm3, %v10686_v1  ;;  %9304 = vmatpush3.msk.msra.mxu0 %vm447_vm0, %v10726_v2  ;;  %v227_v16 = vld [vmem:[%s10785_s22 + $0x50] sm:$0xff]  ;;  %v228_v17 = vld [vmem:[%s10785_s22 + $0x58] sm:$0xff] }
  0x1a   : > { %199 = vst.msk [vmem:[#allocation2 + $0x11] sm:$0x1] %vm180_vm3, %v10686_v1  ;;  %200 = vst.msk [vmem:[#allocation2 + $0x29] sm:$0x1] %vm180_vm3, %v10686_v1  ;;  %v229_v18 = vld [vmem:[%s10785_s22 + $0x60] sm:$0xff]  ;;  %v230_v19 = vld [vmem:[%s10785_s22 + $0x68] sm:$0xff]  ;;  %9353 = vmatprep.subr.msk.mxu0 %vm447_vm0, %v10793_v6 }
  0x1b   : > { %201 = vst.msk [vmem:[#allocation2 + $0x41] sm:$0x1] %vm180_vm3, %v10686_v1  ;;  %202 = vst.msk [vmem:[#allocation2 + $0x59] sm:$0x1] %vm180_vm3, %v10686_v1  ;;  %v231_v20 = vld [vmem:[%s10785_s22 + $0x70] sm:$0xff]  ;;  %v232_v21 = vld [vmem:[%s10785_s22 + $0x78] sm:$0xff] }
  0x1c   : > { %203 = vst.msk [vmem:[#allocation2 + $0x71] sm:$0x1] %vm180_vm3, %v10686_v1  ;;  %204 = vst.msk [vmem:[#allocation2 + $0x89] sm:$0x1] %vm180_vm3, %v10686_v1  ;;  %v233_v22 = vld [vmem:[%s10785_s22 + $0x80] sm:$0xff]  ;;  %v234_v23 = vld [vmem:[%s10785_s22 + $0x88] sm:$0xff] }
  0x1d   : > { %205 = vst.msk [vmem:[#allocation2 + $0xa1] sm:$0x1] %vm180_vm3, %v10686_v1  ;;  %206 = vst.msk [vmem:[#allocation2 + $0xb9] sm:$0x1] %vm180_vm3, %v10686_v1  ;;  %v235_v24 = vld [vmem:[%s10785_s22 + $0x90] sm:$0xff]  ;;  %v236_v25 = vld [vmem:[%s10785_s22 + $0x98] sm:$0xff] }
  0x1e   : > { %207 = vst.msk [vmem:[#allocation2 + $0xd1] sm:$0x1] %vm180_vm3, %v10686_v1  ;;  %208 = vst.msk [vmem:[#allocation2 + $0xe9] sm:$0x1] %vm180_vm3, %v10686_v1  ;;  %v237_v26 = vld [vmem:[%s10785_s22 + $0xa0] sm:$0xff]  ;;  %v238_v27 = vld [vmem:[%s10785_s22 + $0xa8] sm:$0xff] }
  0x1f   : > { %209 = vst.msk [vmem:[#allocation2 + $0x101] sm:$0x1] %vm180_vm3, %v10686_v1  ;;  %210 = vst.msk [vmem:[#allocation2 + $0x119] sm:$0x1] %vm180_vm3, %v10686_v1  ;;  %v239_v31 = vld [vmem:[%s10785_s22 + $0xb0] sm:$0xff]  ;;  %v240_v32 = vld [vmem:[%s10785_s22 + $0xb8] sm:$0xff] }
  0x20   : > { %211 = vst.msk [vmem:[#allocation2 + $0x131] sm:$0x1] %vm180_vm3, %v10686_v1  ;;  %212 = vst.msk [vmem:[#allocation2 + $0x149] sm:$0x1] %vm180_vm3, %v10686_v1  ;;  %v241_v37 = vld [vmem:[%s10785_s22 + $0xc0] sm:$0xff]  ;;  %v242_v38 = vld [vmem:[%s10785_s22 + $0xc8] sm:$0xff] }
  0x21   : > { %213 = vst.msk [vmem:[#allocation2 + $0x161] sm:$0x1] %vm180_vm3, %v10686_v1  ;;  %214 = vst.msk [vmem:[#allocation2 + $0x179] sm:$0x1] %vm180_vm3, %v10686_v1  ;;  %v243_v39 = vld [vmem:[%s10785_s22 + $0xd0] sm:$0xff]  ;;  %v244_v40 = vld [vmem:[%s10785_s22 + $0xd8] sm:$0xff] }
  0x22   : > { %215 = vst.msk [vmem:[#allocation2 + $0x191] sm:$0x1] %vm180_vm3, %v10686_v1  ;;  %216 = vst.msk [vmem:[#allocation2 + $0x1a9] sm:$0x1] %vm180_vm3, %v10686_v1  ;;  %v245_v41 = vld [vmem:[%s10785_s22 + $0xe0] sm:$0xff]  ;;  %v246_v42 = vld [vmem:[%s10785_s22 + $0xe8] sm:$0xff] }
  0x23   : > { %250 = vst.msk [vmem:[#allocation2 + $0x19] sm:$0xff] %vm171_vm1, %v217_v3  ;;  %251 = vst.msk [vmem:[#allocation2 + $0x21] sm:$0xff] %vm171_vm1, %v218_v4  ;;  %v284_v2 = vld [vmem:[#allocation2] sm:$0xff]  ;;  %v285_v3 = vld [vmem:[#allocation2 + $0x8] sm:$0xff] }
  0x24   : > { %252 = vst.msk [vmem:[#allocation2 + $0x31] sm:$0xff] %vm171_vm1, %v219_v5  ;;  %253 = vst.msk [vmem:[#allocation2 + $0x39] sm:$0xff] %vm171_vm1, %v220_v9  ;;  %v10984_v5 = vld [vmem:[%s13484_s1 + $0xc] sm:$0xf] }
  0x25   : > { %254 = vst.msk [vmem:[#allocation2 + $0x49] sm:$0xff] %vm171_vm1, %v221_v10  ;;  %255 = vst.msk [vmem:[#allocation2 + $0x51] sm:$0xff] %vm171_vm1, %v222_v11 }
  0x26   : > { %256 = vst.msk [vmem:[#allocation2 + $0x61] sm:$0xff] %vm171_vm1, %v223_v12  ;;  %257 = vst.msk [vmem:[#allocation2 + $0x69] sm:$0xff] %vm171_vm1, %v224_v13 }
  0x27   : > { %258 = vst.msk [vmem:[#allocation2 + $0x79] sm:$0xff] %vm171_vm1, %v225_v14  ;;  %259 = vst.msk [vmem:[#allocation2 + $0x81] sm:$0xff] %vm171_vm1, %v226_v15 }
  0x28   : > { %260 = vst.msk [vmem:[#allocation2 + $0x91] sm:$0xff] %vm171_vm1, %v227_v16  ;;  %261 = vst.msk [vmem:[#allocation2 + $0x99] sm:$0xff] %vm171_vm1, %v228_v17 }
  0x29   : > { %262 = vst.msk [vmem:[#allocation2 + $0xa9] sm:$0xff] %vm171_vm1, %v229_v18  ;;  %263 = vst.msk [vmem:[#allocation2 + $0xb1] sm:$0xff] %vm171_vm1, %v230_v19 }
  0x2a   : > { %264 = vst.msk [vmem:[#allocation2 + $0xc1] sm:$0xff] %vm171_vm1, %v231_v20  ;;  %265 = vst.msk [vmem:[#allocation2 + $0xc9] sm:$0xff] %vm171_vm1, %v232_v21  ;;  %v10839_v28 = vld [vmem:[#allocation2 + $0x19] sm:$0xff]  ;;  %v10841_v29 = vld [vmem:[#allocation2 + $0x21] sm:$0xff] }
  0x2b   : > { %266 = vst.msk [vmem:[#allocation2 + $0xd9] sm:$0xff] %vm171_vm1, %v233_v22  ;;  %267 = vst.msk [vmem:[#allocation2 + $0xe1] sm:$0xff] %vm171_vm1, %v234_v23  ;;  %v10843_v30 = vld [vmem:[#allocation2 + $0x31] sm:$0xff]  ;;  %9258 = vmatprep.mubr.msk.f32.mxu0 %vm171_vm1, %v10839_v28  ;;  %v10858_v33 = vld [vmem:[#allocation2 + $0x39] sm:$0xff] }
  0x2c   : > { %268 = vst.msk [vmem:[#allocation2 + $0xf1] sm:$0xff] %vm171_vm1, %v235_v24  ;;  %269 = vst.msk [vmem:[#allocation2 + $0xf9] sm:$0xff] %vm171_vm1, %v236_v25  ;;  %9259 = vmatmul.mubr.msk.f32.gmra.mrb[2].mxu0 %vm171_vm1, %v10841_v29  ;;  %v10860_v34 = vld [vmem:[#allocation2 + $0x49] sm:$0xff]  ;;  %v10866_v35 = vld [vmem:[#allocation2 + $0x51] sm:$0xff] }
  0x2d   : > { %270 = vst.msk [vmem:[#allocation2 + $0x109] sm:$0xff] %vm171_vm1, %v237_v26  ;;  %271 = vst.msk [vmem:[#allocation2 + $0x111] sm:$0xff] %vm171_vm1, %v238_v27  ;;  %9261 = vmatprep.mubr.msk.f32.mxu0 %vm171_vm1, %v10843_v30  ;;  %v10868_v36 = vld [vmem:[#allocation2 + $0x61] sm:$0xff]  ;;  %v10884_v43 = vld [vmem:[#allocation2 + $0x69] sm:$0xff] }
  0x2e   : > { %272 = vst.msk [vmem:[#allocation2 + $0x121] sm:$0xff] %vm171_vm1, %v239_v31  ;;  %273 = vst.msk [vmem:[#allocation2 + $0x129] sm:$0xff] %vm171_vm1, %v240_v32  ;;  %v10888_v44 = vld [vmem:[#allocation2 + $0x79] sm:$0xff]  ;;  %v10894_v45 = vld [vmem:[#allocation2 + $0x81] sm:$0xff] }
  0x2f   : > { %274 = vst.msk [vmem:[#allocation2 + $0x139] sm:$0xff] %vm171_vm1, %v241_v37  ;;  %275 = vst.msk [vmem:[#allocation2 + $0x141] sm:$0xff] %vm171_vm1, %v242_v38  ;;  %v10896_v46 = vld [vmem:[#allocation2 + $0x91] sm:$0xff]  ;;  %v10902_v47 = vld [vmem:[#allocation2 + $0x99] sm:$0xff] }
  0x30   : > { %9262 = vmatmul.mubr.msk.f32.gmra.mrb[4].mxu0 %vm171_vm1, %v10858_v33  ;;  %276 = vst.msk [vmem:[#allocation2 + $0x151] sm:$0xff] %vm171_vm1, %v243_v39  ;;  %277 = vst.msk [vmem:[#allocation2 + $0x159] sm:$0xff] %vm171_vm1, %v244_v40  ;;  %v10904_v48 = vld [vmem:[#allocation2 + $0xa9] sm:$0xff]  ;;  %v10910_v49 = vld [vmem:[#allocation2 + $0xb1] sm:$0xff] }
  0x31   : > { %9264 = vmatprep.mubr.msk.f32.mxu0 %vm171_vm1, %v10860_v34  ;;  %278 = vst.msk [vmem:[#allocation2 + $0x169] sm:$0xff] %vm171_vm1, %v245_v41  ;;  %279 = vst.msk [vmem:[#allocation2 + $0x171] sm:$0xff] %vm171_vm1, %v246_v42  ;;  %v10912_v50 = vld [vmem:[#allocation2 + $0xc1] sm:$0xff]  ;;  %v10918_v51 = vld [vmem:[#allocation2 + $0xc9] sm:$0xff] }
  0x32   : > { %v10920_v52 = vld [vmem:[#allocation2 + $0xd9] sm:$0xff]  ;;  %v10926_v53 = vld [vmem:[#allocation2 + $0xe1] sm:$0xff]  ;;  %v10993_v8 = vld [vmem:[#allocation2 + $0x30] sm:$0xff] }
  0x33   : > { %v10928_v54 = vld [vmem:[#allocation2 + $0xf1] sm:$0xff]  ;;  %v10934_v55 = vld [vmem:[#allocation2 + $0xf9] sm:$0xff]  ;;  %v11003_v10 = vld [vmem:[#allocation2 + $0x48] sm:$0xff] }
  0x34   : > { %9265 = vmatmul.mubr.msk.f32.gmra.mrb[6].mxu0 %vm171_vm1, %v10866_v35  ;;  %v10936_v56 = vld [vmem:[#allocation2 + $0x109] sm:$0xff]  ;;  %v10942_v57 = vld [vmem:[#allocation2 + $0x111] sm:$0xff]  ;;  %v10991_v7 = vld [vmem:[#allocation2 + $0x20] sm:$0xff] }
  0x35   : > { %9267 = vmatprep.mubr.msk.f32.mxu0 %vm171_vm1, %v10868_v36  ;;  %v10944_v58 = vld [vmem:[#allocation2 + $0x121] sm:$0xff]  ;;  %v10950_v59 = vld [vmem:[#allocation2 + $0x129] sm:$0xff]  ;;  %v10979_v4 = vld [vmem:[#allocation2 + $0x18] sm:$0xff] }
  0x36   : > { %v10952_v60 = vld [vmem:[#allocation2 + $0x139] sm:$0xff]  ;;  %v10958_v61 = vld [vmem:[#allocation2 + $0x141] sm:$0xff]  ;;  %v11027_v15 = vld [vmem:[#allocation2 + $0x90] sm:$0xff] }
  0x37   : > { %v10960_v62 = vld [vmem:[#allocation2 + $0x151] sm:$0xff]  ;;  %v10966_v63 = vld [vmem:[#allocation2 + $0x159] sm:$0xff]  ;;  %v11017_v12 = vld [vmem:[#allocation2 + $0x68] sm:$0xff] }
  0x38   : > { %9268 = vmatmul.mubr.msk.f32.gmra.mrb[8].mxu0 %vm171_vm1, %v10884_v43  ;;  %13605 = vst [vmem:[#allocation4_spill] sm:$0xff] %v10966_v63  ;;  %v10968_v0 = vld [vmem:[#allocation2 + $0x169] sm:$0xff]  ;;  %v10974_v1 = vld [vmem:[#allocation2 + $0x171] sm:$0xff]  ;;  %v11011_v11 = vld [vmem:[#allocation2 + $0x60] sm:$0xff] }
  0x39   : > { %9270 = vmatprep.mubr.msk.f32.mxu0 %vm171_vm1, %v10888_v44  ;;  %13606 = vst [vmem:[#allocation5_spill] sm:$0xff] %v10968_v0  ;;  %13607 = vst [vmem:[#allocation6_spill] sm:$0xff] %v10974_v1  ;;  %v11001_v9 = vld [vmem:[#allocation2 + $0x38] sm:$0xff]  ;;  %v11025_v14 = vld [vmem:[#allocation2 + $0x80] sm:$0xff] }
  0x3a   : > { %v11019_v13 = vld [vmem:[#allocation2 + $0x78] sm:$0xff]  ;;  %v11035_v17 = vld [vmem:[#allocation2 + $0xa8] sm:$0xff]  ;;  %v11041_v18 = vld [vmem:[#allocation2 + $0xb0] sm:$0xff] }
  0x3b   : > { %v11033_v16 = vld [vmem:[#allocation2 + $0x98] sm:$0xff]  ;;  %v11043_v19 = vld [vmem:[#allocation2 + $0xc0] sm:$0xff]  ;;  %v11049_v20 = vld [vmem:[#allocation2 + $0xc8] sm:$0xff] }
  0x3c   : > { %9271 = vmatmul.mubr.msk.f32.gmra.mrb[10].mxu0 %vm171_vm1, %v10894_v45  ;;  %v11051_v21 = vld [vmem:[#allocation2 + $0xd8] sm:$0xff]  ;;  %v11057_v22 = vld [vmem:[#allocation2 + $0xe0] sm:$0xff]  ;;  %v11059_v23 = vld [vmem:[#allocation2 + $0xf0] sm:$0xff] }
  0x3d   : > { %9273 = vmatprep.mubr.msk.f32.mxu0 %vm171_vm1, %v10896_v46  ;;  %v11065_v24 = vld [vmem:[#allocation2 + $0xf8] sm:$0xff]  ;;  %v11067_v25 = vld [vmem:[#allocation2 + $0x108] sm:$0xff]  ;;  %v11073_v26 = vld [vmem:[#allocation2 + $0x110] sm:$0xff] }
  0x3e   : > { %v11075_v27 = vld [vmem:[#allocation2 + $0x120] sm:$0xff]  ;;  %v11081_v31 = vld [vmem:[#allocation2 + $0x128] sm:$0xff]  ;;  %v11083_v32 = vld [vmem:[#allocation2 + $0x138] sm:$0xff] }
  0x3f   : > { %v11089_v37 = vld [vmem:[#allocation2 + $0x140] sm:$0xff]  ;;  %v11091_v38 = vld [vmem:[#allocation2 + $0x150] sm:$0xff]  ;;  %v248_v40 = vld [vmem:[%s10785_s22 + $0xf8] sm:$0xff] }
  0x40   : > { %9274 = vmatmul.mubr.msk.f32.gmra.mrb[12].mxu0 %vm171_vm1, %v10902_v47  ;;  %v247_v39 = vld [vmem:[%s10785_s22 + $0xf0] sm:$0xff]  ;;  %281 = vst.msk [vmem:[#allocation2 + $0x189] sm:$0xff] %vm171_vm1, %v248_v40  ;;  %v11101_v41 = vld [vmem:[#allocation2 + $0x158] sm:$0xff]  ;;  %v11103_v42 = vld [vmem:[#allocation2 + $0x168] sm:$0xff] }
  0x41   : > { %9276 = vmatprep.mubr.msk.f32.mxu0 %vm171_vm1, %v10904_v48  ;;  %280 = vst.msk [vmem:[#allocation2 + $0x181] sm:$0xff] %vm171_vm1, %v247_v39  ;;  %v1001_v39 = vld [vmem:[#allocation2 + $0xa] sm:$0xff]  ;;  %v11114_v40 = vld [vmem:[#allocation2 + $0x1a] sm:$0xff] }
  0x42   : > { %13608 = vst [vmem:[#allocation7_spill] sm:$0xff] %v11114_v40 }
  0x44   : > { %9277 = vmatmul.mubr.msk.f32.gmra.mrb[14].mxu0 %vm171_vm1, %v10910_v49 }
  0x45   : > { %9279 = vmatprep.mubr.msk.f32.mxu0 %vm171_vm1, %v10912_v50 }
  0x48   : > { %9280 = vmatmul.mubr.msk.f32.gmra.mrb[16].mxu0 %vm171_vm1, %v10918_v51 }
  0x49   : > { %9282 = vmatprep.mubr.msk.f32.mxu0 %vm171_vm1, %v10920_v52 }
  0x4c   : > { %9283 = vmatmul.mubr.msk.f32.gmra.mrb[18].mxu0 %vm171_vm1, %v10926_v53 }
  0x4d   : > { %9285 = vmatprep.mubr.msk.f32.mxu0 %vm171_vm1, %v10928_v54 }
  0x50   : > { %9286 = vmatmul.mubr.msk.f32.gmra.mrb[20].mxu0 %vm171_vm1, %v10934_v55 }
  0x51   : > { %9288 = vmatprep.mubr.msk.f32.mxu0 %vm171_vm1, %v10936_v56 }
  0x54   : > { %9289 = vmatmul.mubr.msk.f32.gmra.mrb[22].mxu0 %vm171_vm1, %v10942_v57 }
  0x55   : > { %9291 = vmatprep.mubr.msk.f32.mxu0 %vm171_vm1, %v10944_v58 }
  0x58   : > { %9292 = vmatmul.mubr.msk.f32.gmra.mrb[24].mxu0 %vm171_vm1, %v10950_v59 }
  0x59   : > { %9294 = vmatprep.mubr.msk.f32.mxu0 %vm171_vm1, %v10952_v60 }
  0x5c   : > { %9295 = vmatmul.mubr.msk.f32.gmra.mrb[26].mxu0 %vm171_vm1, %v10958_v61 }
  0x5d   : > { %9297 = vmatprep.mubr.msk.f32.mxu0 %vm171_vm1, %v10960_v62 }
  0x60   : > { %9298 = vmatmul.mubr.msk.f32.gmra.mrb[28].mxu0 %vm171_vm1, %v10966_v63  ;;  %v11128_v63 = vld [vmem:[#allocation2 + $0x32] sm:$0xff] }
  0x61   : > { %9300 = vmatprep.mubr.msk.f32.mxu0 %vm171_vm1, %v10968_v0  ;;  %v11126_v0 = vld [vmem:[#allocation2 + $0x22] sm:$0xff]  ;;  %13610 = vst [vmem:[#allocation9_spill] sm:$0xff] %v11128_v63 }
  0x62   : > { %13609 = vst [vmem:[#allocation8_spill] sm:$0xff] %v11126_v0 }
  0x64   : > { %9301 = vmatmul.mubr.msk.f32.gmra.mrb[30].mxu0 %vm171_vm1, %v10974_v1  ;;  %v11119_v1 = vld [vmem:[%s13484_s1 + $0x10] sm:$0xf] }
  0x65   : > { %9305 = vmatprep.mubr.msk.f32.mxu0 %vm171_vm1, %v284_v2  ;;  %v11109_v2 = vld [vmem:[#allocation2 + $0x170] sm:$0xff] }
  0x68   : > { %9306 = vmatmul.mubr.msk.f32.vlgmr.msra.gmra.mrb[0].mxu0 %vm171_vm1, %v285_v3  ;;  %v1000_v3 = vld [vmem:[#allocation2 + $0x2] sm:$0xff] }
  0x69   : > { %9354 = vmatpush3.msk.msra.mxu0 %vm447_vm0, %v10793_v6  ;;  %9308 = vmatprep.mubr.msk.f32.mxu0 %vm171_vm1, %v10979_v4  ;;  %v11009_v6 = vld [vmem:[#allocation2 + $0x50] sm:$0xff] }
  0x6a   : > { %9403 = vmatprep.subr.msk.mxu0 %vm447_vm0, %v10984_v5 }
  0x6c   : > { %9309 = vmatmul.mubr.msk.f32.gmra.mrb[2].mxu0 %vm171_vm1, %v10991_v7 }
  0x6d   : > { %9311 = vmatprep.mubr.msk.f32.mxu0 %vm171_vm1, %v10993_v8 }
  0x70   : > { %9312 = vmatmul.mubr.msk.f32.gmra.mrb[4].mxu0 %vm171_vm1, %v11001_v9 }
  0x71   : > { %9314 = vmatprep.mubr.msk.f32.mxu0 %vm171_vm1, %v11003_v10 }
  0x74   : > { %9315 = vmatmul.mubr.msk.f32.gmra.mrb[6].mxu0 %vm171_vm1, %v11009_v6 }
  0x75   : > { %9317 = vmatprep.mubr.msk.f32.mxu0 %vm171_vm1, %v11011_v11 }
  0x78   : > { %9318 = vmatmul.mubr.msk.f32.gmra.mrb[8].mxu0 %vm171_vm1, %v11017_v12 }
  0x79   : > { %9320 = vmatprep.mubr.msk.f32.mxu0 %vm171_vm1, %v11019_v13 }
  0x7c   : > { %9321 = vmatmul.mubr.msk.f32.gmra.mrb[10].mxu0 %vm171_vm1, %v11025_v14 }
  0x7d   : > { %9323 = vmatprep.mubr.msk.f32.mxu0 %vm171_vm1, %v11027_v15 }
  0x80   : > { %9324 = vmatmul.mubr.msk.f32.gmra.mrb[12].mxu0 %vm171_vm1, %v11033_v16 }
  0x81   : > { %9326 = vmatprep.mubr.msk.f32.mxu0 %vm171_vm1, %v11035_v17 }
  0x84   : > { %9327 = vmatmul.mubr.msk.f32.gmra.mrb[14].mxu0 %vm171_vm1, %v11041_v18 }
  0x85   : > { %9329 = vmatprep.mubr.msk.f32.mxu0 %vm171_vm1, %v11043_v19 }
  0x88   : > { %9330 = vmatmul.mubr.msk.f32.gmra.mrb[16].mxu0 %vm171_vm1, %v11049_v20 }
  0x89   : > { %9332 = vmatprep.mubr.msk.f32.mxu0 %vm171_vm1, %v11051_v21 }
  0x8c   : > { %9333 = vmatmul.mubr.msk.f32.gmra.mrb[18].mxu0 %vm171_vm1, %v11057_v22 }
  0x8d   : > { %9335 = vmatprep.mubr.msk.f32.mxu0 %vm171_vm1, %v11059_v23 }
  0x90   : > { %9336 = vmatmul.mubr.msk.f32.gmra.mrb[20].mxu0 %vm171_vm1, %v11065_v24 }
  0x91   : > { %9338 = vmatprep.mubr.msk.f32.mxu0 %vm171_vm1, %v11067_v25 }
  0x94   : > { %9339 = vmatmul.mubr.msk.f32.gmra.mrb[22].mxu0 %vm171_vm1, %v11073_v26 }
  0x95   : > { %9341 = vmatprep.mubr.msk.f32.mxu0 %vm171_vm1, %v11075_v27 }
  0x98   : > { %9342 = vmatmul.mubr.msk.f32.gmra.mrb[24].mxu0 %vm171_vm1, %v11081_v31 }
  0x99   : > { %9344 = vmatprep.mubr.msk.f32.mxu0 %vm171_vm1, %v11083_v32 }
  0x9c   : > { %9345 = vmatmul.mubr.msk.f32.gmra.mrb[26].mxu0 %vm171_vm1, %v11089_v37 }
  0x9d   : > { %9347 = vmatprep.mubr.msk.f32.mxu0 %vm171_vm1, %v11091_v38 }
  0xa0   : > { %9348 = vmatmul.mubr.msk.f32.gmra.mrb[28].mxu0 %vm171_vm1, %v11101_v41 }
  0xa1   : > { %9350 = vmatprep.mubr.msk.f32.mxu0 %vm171_vm1, %v11103_v42 }
  0xa4   : > { %9351 = vmatmul.mubr.msk.f32.gmra.mrb[30].mxu0 %vm171_vm1, %v11109_v2 }
  0xa5   : > { %9355 = vmatprep.mubr.msk.f32.mxu0 %vm171_vm1, %v1000_v3  ;;  %v11136_v3 = vld [vmem:[#allocation2 + $0x3a] sm:$0xff] }
  0xa6   : > { %13611 = vst [vmem:[#allocation10_spill] sm:$0xff] %v11136_v3 }
  0xa8   : > { %9356 = vmatmul.mubr.msk.f32.vlgmr.msra.gmra.mrb[0].mxu0 %vm171_vm1, %v1001_v39  ;;  %v11138_v39 = vld [vmem:[#allocation2 + $0x4a] sm:$0xff] }
  0xa9   : > { %9404 = vmatpush3.msk.msra.mxu0 %vm447_vm0, %v10984_v5  ;;  %9358 = vmatprep.mubr.msk.f32.mxu0 %vm171_vm1, %v11114_v40  ;;  %13612 = vst [vmem:[#allocation11_spill] sm:$0xff] %v11138_v39  ;;  %v11144_v5 = vld [vmem:[#allocation2 + $0x52] sm:$0xff]  ;;  %v11146_v40 = vld [vmem:[#allocation2 + $0x62] sm:$0xff] }
  0xaa   : > { %9453 = vmatprep.subr.msk.mxu0 %vm447_vm0, %v11119_v1  ;;  %13613 = vst [vmem:[#allocation12_spill] sm:$0xff] %v11144_v5  ;;  %13614 = vst [vmem:[#allocation13_spill] sm:$0xff] %v11146_v40 }
  0xac   : > { %9359 = vmatmul.mubr.msk.f32.gmra.mrb[2].mxu0 %vm171_vm1, %v11126_v0  ;;  %v11154_v0 = vld [vmem:[#allocation2 + $0x7a] sm:$0xff] }
  0xad   : > { %9361 = vmatprep.mubr.msk.f32.mxu0 %vm171_vm1, %v11128_v63  ;;  %v11152_v63 = vld [vmem:[#allocation2 + $0x6a] sm:$0xff]  ;;  %13616 = vst [vmem:[#allocation15_spill] sm:$0xff] %v11154_v0 }
  0xae   : > { %13615 = vst [vmem:[#allocation14_spill] sm:$0xff] %v11152_v63 }
  0xb0   : > { %9362 = vmatmul.mubr.msk.f32.gmra.mrb[4].mxu0 %vm171_vm1, %v11136_v3  ;;  %v11162_v3 = vld [vmem:[#allocation2 + $0x92] sm:$0xff] }
  0xb1   : > { %9364 = vmatprep.mubr.msk.f32.mxu0 %vm171_vm1, %v11138_v39  ;;  %v11160_v39 = vld [vmem:[#allocation2 + $0x82] sm:$0xff]  ;;  %13618 = vst [vmem:[#allocation17_spill] sm:$0xff] %v11162_v3 }
  0xb2   : > { %13617 = vst [vmem:[#allocation16_spill] sm:$0xff] %v11160_v39 }
  0xb4   : > { %9365 = vmatmul.mubr.msk.f32.gmra.mrb[6].mxu0 %vm171_vm1, %v11144_v5  ;;  %v11170_v5 = vld [vmem:[#allocation2 + $0xaa] sm:$0xff] }
  0xb5   : > { %9367 = vmatprep.mubr.msk.f32.mxu0 %vm171_vm1, %v11146_v40  ;;  %v11168_v40 = vld [vmem:[#allocation2 + $0x9a] sm:$0xff]  ;;  %13620 = vst [vmem:[#allocation19_spill] sm:$0xff] %v11170_v5 }
  0xb6   : > { %13619 = vst [vmem:[#allocation18_spill] sm:$0xff] %v11168_v40 }
  0xb8   : > { %9368 = vmatmul.mubr.msk.f32.gmra.mrb[8].mxu0 %vm171_vm1, %v11152_v63  ;;  %v11178_v63 = vld [vmem:[#allocation2 + $0xc2] sm:$0xff] }
  0xb9   : > { %9370 = vmatprep.mubr.msk.f32.mxu0 %vm171_vm1, %v11154_v0  ;;  %v11176_v0 = vld [vmem:[#allocation2 + $0xb2] sm:$0xff]  ;;  %13622 = vst [vmem:[#allocation21_spill] sm:$0xff] %v11178_v63 }
  0xba   : > { %13621 = vst [vmem:[#allocation20_spill] sm:$0xff] %v11176_v0 }
  0xbc   : > { %9371 = vmatmul.mubr.msk.f32.gmra.mrb[10].mxu0 %vm171_vm1, %v11160_v39  ;;  %v11186_v39 = vld [vmem:[#allocation2 + $0xda] sm:$0xff] }
  0xbd   : > { %9373 = vmatprep.mubr.msk.f32.mxu0 %vm171_vm1, %v11162_v3  ;;  %v11184_v3 = vld [vmem:[#allocation2 + $0xca] sm:$0xff]  ;;  %13624 = vst [vmem:[#allocation23_spill] sm:$0xff] %v11186_v39 }
  0xbe   : > { %13623 = vst [vmem:[#allocation22_spill] sm:$0xff] %v11184_v3 }
  0xc0   : > { %9374 = vmatmul.mubr.msk.f32.gmra.mrb[12].mxu0 %vm171_vm1, %v11168_v40  ;;  %v11194_v40 = vld [vmem:[#allocation2 + $0xf2] sm:$0xff] }
  0xc1   : > { %9376 = vmatprep.mubr.msk.f32.mxu0 %vm171_vm1, %v11170_v5  ;;  %v11192_v5 = vld [vmem:[#allocation2 + $0xe2] sm:$0xff]  ;;  %13626 = vst [vmem:[#allocation25_spill] sm:$0xff] %v11194_v40 }
  0xc2   : > { %13625 = vst [vmem:[#allocation24_spill] sm:$0xff] %v11192_v5 }
  0xc4   : > { %9377 = vmatmul.mubr.msk.f32.gmra.mrb[14].mxu0 %vm171_vm1, %v11176_v0  ;;  %v11202_v0 = vld [vmem:[#allocation2 + $0x10a] sm:$0xff] }
  0xc5   : > { %9379 = vmatprep.mubr.msk.f32.mxu0 %vm171_vm1, %v11178_v63  ;;  %v11200_v63 = vld [vmem:[#allocation2 + $0xfa] sm:$0xff]  ;;  %13628 = vst [vmem:[#allocation27_spill] sm:$0xff] %v11202_v0 }
  0xc6   : > { %13627 = vst [vmem:[#allocation26_spill] sm:$0xff] %v11200_v63 }
  0xc8   : > { %9380 = vmatmul.mubr.msk.f32.gmra.mrb[16].mxu0 %vm171_vm1, %v11184_v3  ;;  %v11210_v3 = vld [vmem:[#allocation2 + $0x122] sm:$0xff] }
  0xc9   : > { %9382 = vmatprep.mubr.msk.f32.mxu0 %vm171_vm1, %v11186_v39  ;;  %v11208_v39 = vld [vmem:[#allocation2 + $0x112] sm:$0xff]  ;;  %13630 = vst [vmem:[#allocation29_spill] sm:$0xff] %v11210_v3 }
  0xca   : > { %13629 = vst [vmem:[#allocation28_spill] sm:$0xff] %v11208_v39 }
  0xcc   : > { %9383 = vmatmul.mubr.msk.f32.gmra.mrb[18].mxu0 %vm171_vm1, %v11192_v5  ;;  %v11218_v5 = vld [vmem:[#allocation2 + $0x13a] sm:$0xff] }
  0xcd   : > { %9385 = vmatprep.mubr.msk.f32.mxu0 %vm171_vm1, %v11194_v40  ;;  %v11216_v40 = vld [vmem:[#allocation2 + $0x12a] sm:$0xff]  ;;  %13631 = vst [vmem:[#allocation30_spill] sm:$0xff] %v11218_v5 }
  0xd0   : > { %9386 = vmatmul.mubr.msk.f32.gmra.mrb[20].mxu0 %vm171_vm1, %v11200_v63  ;;  %v11226_v63 = vld [vmem:[#allocation2 + $0x152] sm:$0xff] }
  0xd1   : > { %9388 = vmatprep.mubr.msk.f32.mxu0 %vm171_vm1, %v11202_v0  ;;  %v11224_v0 = vld [vmem:[#allocation2 + $0x142] sm:$0xff]  ;;  %13632 = vst [vmem:[#allocation31_spill] sm:$0xff] %v11226_v63 }
  0xd4   : > { %9389 = vmatmul.mubr.msk.f32.gmra.mrb[22].mxu0 %vm171_vm1, %v11208_v39  ;;  %v11234_v39 = vld [vmem:[#allocation2 + $0x16a] sm:$0xff] }
  0xd5   : > { %9391 = vmatprep.mubr.msk.f32.mxu0 %vm171_vm1, %v11210_v3  ;;  %v11232_v3 = vld [vmem:[#allocation2 + $0x15a] sm:$0xff]  ;;  %13633 = vst [vmem:[#allocation32_spill] sm:$0xff] %v11234_v39 }
  0xd8   : > { %9392 = vmatmul.mubr.msk.f32.gmra.mrb[24].mxu0 %vm171_vm1, %v11216_v40 }
  0xd9   : > { %9394 = vmatprep.mubr.msk.f32.mxu0 %vm171_vm1, %v11218_v5  ;;  %v11240_v5 = vld [vmem:[#allocation2 + $0x172] sm:$0xff] }
  0xdc   : > { %9395 = vmatmul.mubr.msk.f32.gmra.mrb[26].mxu0 %vm171_vm1, %v11224_v0 }
  0xdd   : > { %9397 = vmatprep.mubr.msk.f32.mxu0 %vm171_vm1, %v11226_v63  ;;  %v8214_v63 = vld [vmem:[%s13484_s1 + $0x14] sm:$0xf] }
  0xe0   : > { %9398 = vmatmul.mubr.msk.f32.gmra.mrb[28].mxu0 %vm171_vm1, %v11232_v3 }
  0xe1   : > { %9400 = vmatprep.mubr.msk.f32.mxu0 %vm171_vm1, %v11234_v39 }
  0xe4   : > { %9401 = vmatmul.mubr.msk.f32.gmra.mrb[30].mxu0 %vm171_vm1, %v11240_v5 }
  0xe5   : > { %9405 = vmatprep.mubr.msk.f32.mxu0 %vm171_vm1, %v10979_v4  ;;  %v11314_v4 = vld [vmem:[#allocation2 + $0x188] sm:$0xff] }
  0xe8   : > { %9406 = vmatmul.mubr.msk.f32.vlgmr.msra.gmra.mrb[0].mxu0 %vm171_vm1, %v10991_v7  ;;  %v8248_v7 = vld [vmem:[%s13484_s1 + $0x18] sm:$0xf] }
  0xe9   : > { %9454 = vmatpush3.msk.msra.mxu0 %vm447_vm0, %v11119_v1  ;;  %9408 = vmatprep.mubr.msk.f32.mxu0 %vm171_vm1, %v10993_v8  ;;  %v11308_v1 = vld [vmem:[#allocation2 + $0x180] sm:$0xff] }
  0xea   : > { %9503 = vmatprep.subr.msk.mxu0 %vm447_vm0, %v8214_v63 }
  0xec   : > { %9409 = vmatmul.mubr.msk.f32.gmra.mrb[2].mxu0 %vm171_vm1, %v11001_v9 }
  0xed   : > { %9411 = vmatprep.mubr.msk.f32.mxu0 %vm171_vm1, %v11003_v10 }
  0xf0   : > { %9412 = vmatmul.mubr.msk.f32.gmra.mrb[4].mxu0 %vm171_vm1, %v11009_v6 }
  0xf1   : > { %9414 = vmatprep.mubr.msk.f32.mxu0 %vm171_vm1, %v11011_v11 }
  0xf4   : > { %9415 = vmatmul.mubr.msk.f32.gmra.mrb[6].mxu0 %vm171_vm1, %v11017_v12 }
  0xf5   : > { %9417 = vmatprep.mubr.msk.f32.mxu0 %vm171_vm1, %v11019_v13 }
  0xf8   : > { %9418 = vmatmul.mubr.msk.f32.gmra.mrb[8].mxu0 %vm171_vm1, %v11025_v14 }
  0xf9   : > { %9420 = vmatprep.mubr.msk.f32.mxu0 %vm171_vm1, %v11027_v15 }
  0xfc   : > { %9421 = vmatmul.mubr.msk.f32.gmra.mrb[10].mxu0 %vm171_vm1, %v11033_v16 }
  0xfd   : > { %9423 = vmatprep.mubr.msk.f32.mxu0 %vm171_vm1, %v11035_v17 }
 0x100   : > { %9424 = vmatmul.mubr.msk.f32.gmra.mrb[12].mxu0 %vm171_vm1, %v11041_v18 }
 0x101   : > { %9426 = vmatprep.mubr.msk.f32.mxu0 %vm171_vm1, %v11043_v19 }
 0x104   : > { %9427 = vmatmul.mubr.msk.f32.gmra.mrb[14].mxu0 %vm171_vm1, %v11049_v20 }
 0x105   : > { %9429 = vmatprep.mubr.msk.f32.mxu0 %vm171_vm1, %v11051_v21 }
 0x108   : > { %9430 = vmatmul.mubr.msk.f32.gmra.mrb[16].mxu0 %vm171_vm1, %v11057_v22 }
 0x109   : > { %9432 = vmatprep.mubr.msk.f32.mxu0 %vm171_vm1, %v11059_v23 }
 0x10c   : > { %9433 = vmatmul.mubr.msk.f32.gmra.mrb[18].mxu0 %vm171_vm1, %v11065_v24 }
 0x10d   : > { %9435 = vmatprep.mubr.msk.f32.mxu0 %vm171_vm1, %v11067_v25 }
 0x110   : > { %9436 = vmatmul.mubr.msk.f32.gmra.mrb[20].mxu0 %vm171_vm1, %v11073_v26 }
 0x111   : > { %9438 = vmatprep.mubr.msk.f32.mxu0 %vm171_vm1, %v11075_v27 }
 0x114   : > { %9439 = vmatmul.mubr.msk.f32.gmra.mrb[22].mxu0 %vm171_vm1, %v11081_v31 }
 0x115   : > { %9441 = vmatprep.mubr.msk.f32.mxu0 %vm171_vm1, %v11083_v32 }
 0x118   : > { %9442 = vmatmul.mubr.msk.f32.gmra.mrb[24].mxu0 %vm171_vm1, %v11089_v37 }
 0x119   : > { %9444 = vmatprep.mubr.msk.f32.mxu0 %vm171_vm1, %v11091_v38 }
 0x11c   : > { %9445 = vmatmul.mubr.msk.f32.gmra.mrb[26].mxu0 %vm171_vm1, %v11101_v41 }
 0x11d   : > { %9447 = vmatprep.mubr.msk.f32.mxu0 %vm171_vm1, %v11103_v42 }
 0x120   : > { %9448 = vmatmul.mubr.msk.f32.gmra.mrb[28].mxu0 %vm171_vm1, %v11109_v2 }
 0x121   : > { %9450 = vmatprep.mubr.msk.f32.mxu0 %vm171_vm1, %v11308_v1 }
 0x124   : > { %9451 = vmatmul.mubr.msk.f32.gmra.mrb[30].mxu0 %vm171_vm1, %v11314_v4 }
 0x125   : > { %9455 = vmatprep.mubr.msk.f32.mxu0 %vm171_vm1, %v10839_v28  ;;  %v13634_v28 = vld [vmem:[#allocation4_spill] sm:$0xff] }
 0x128   : > { %9456 = vmatmul.mubr.msk.f32.vlgmr.msra.gmra.mrb[0].mxu0 %vm171_vm1, %v10841_v29  ;;  %v13635_v29 = vld [vmem:[#allocation5_spill] sm:$0xff] }
 0x129   : > { %9504 = vmatpush3.msk.msra.mxu0 %vm447_vm0, %v8214_v63  ;;  %9458 = vmatprep.mubr.msk.f32.mxu0 %vm171_vm1, %v10843_v30  ;;  %v11381_v30 = vld [vmem:[#allocation2 + $0x181] sm:$0xff]  ;;  %v13655_v63 = vld [vmem:[#allocation25_spill] sm:$0xff] }
 0x12a   : > { %9553 = vmatprep.subr.msk.mxu0 %vm447_vm0, %v8248_v7 }
 0x12c   : > { %9459 = vmatmul.mubr.msk.f32.gmra.mrb[2].mxu0 %vm171_vm1, %v10858_v33  ;;  %v13636_v33 = vld [vmem:[#allocation6_spill] sm:$0xff] }
 0x12d   : > { %9461 = vmatprep.mubr.msk.f32.mxu0 %vm171_vm1, %v10860_v34  ;;  %v11387_v34 = vld [vmem:[#allocation2 + $0x189] sm:$0xff] }
 0x130   : > { %9462 = vmatmul.mubr.msk.f32.gmra.mrb[4].mxu0 %vm171_vm1, %v10866_v35  ;;  %v13637_v35 = vld [vmem:[#allocation7_spill] sm:$0xff] }
 0x131   : > { %9464 = vmatprep.mubr.msk.f32.mxu0 %vm171_vm1, %v10868_v36  ;;  %v8282_v36 = vld [vmem:[%s13484_s1 + $0x1c] sm:$0xf] }
 0x134   : > { %9465 = vmatmul.mubr.msk.f32.gmra.mrb[6].mxu0 %vm171_vm1, %v10884_v43  ;;  %v13638_v43 = vld [vmem:[#allocation8_spill] sm:$0xff] }
 0x135   : > { %9467 = vmatprep.mubr.msk.f32.mxu0 %vm171_vm1, %v10888_v44  ;;  %v13639_v44 = vld [vmem:[#allocation9_spill] sm:$0xff] }
 0x138   : > { %9468 = vmatmul.mubr.msk.f32.gmra.mrb[8].mxu0 %vm171_vm1, %v10894_v45  ;;  %v13640_v45 = vld [vmem:[#allocation10_spill] sm:$0xff] }
 0x139   : > { %9470 = vmatprep.mubr.msk.f32.mxu0 %vm171_vm1, %v10896_v46  ;;  %v13641_v46 = vld [vmem:[#allocation11_spill] sm:$0xff] }
 0x13c   : > { %9471 = vmatmul.mubr.msk.f32.gmra.mrb[10].mxu0 %vm171_vm1, %v10902_v47  ;;  %v13642_v47 = vld [vmem:[#allocation12_spill] sm:$0xff] }
 0x13d   : > { %9473 = vmatprep.mubr.msk.f32.mxu0 %vm171_vm1, %v10904_v48  ;;  %v13643_v48 = vld [vmem:[#allocation13_spill] sm:$0xff] }
 0x140   : > { %9474 = vmatmul.mubr.msk.f32.gmra.mrb[12].mxu0 %vm171_vm1, %v10910_v49  ;;  %v13644_v49 = vld [vmem:[#allocation14_spill] sm:$0xff] }
 0x141   : > { %9476 = vmatprep.mubr.msk.f32.mxu0 %vm171_vm1, %v10912_v50  ;;  %v13645_v50 = vld [vmem:[#allocation15_spill] sm:$0xff] }
 0x144   : > { %9477 = vmatmul.mubr.msk.f32.gmra.mrb[14].mxu0 %vm171_vm1, %v10918_v51  ;;  %v13646_v51 = vld [vmem:[#allocation16_spill] sm:$0xff] }
 0x145   : > { %9479 = vmatprep.mubr.msk.f32.mxu0 %vm171_vm1, %v10920_v52  ;;  %v13647_v52 = vld [vmem:[#allocation17_spill] sm:$0xff] }
 0x148   : > { %9480 = vmatmul.mubr.msk.f32.gmra.mrb[16].mxu0 %vm171_vm1, %v10926_v53  ;;  %v13648_v53 = vld [vmem:[#allocation18_spill] sm:$0xff] }
 0x149   : > { %9482 = vmatprep.mubr.msk.f32.mxu0 %vm171_vm1, %v10928_v54  ;;  %v13649_v54 = vld [vmem:[#allocation19_spill] sm:$0xff] }
 0x14c   : > { %9483 = vmatmul.mubr.msk.f32.gmra.mrb[18].mxu0 %vm171_vm1, %v10934_v55  ;;  %v13650_v55 = vld [vmem:[#allocation20_spill] sm:$0xff] }
 0x14d   : > { %9485 = vmatprep.mubr.msk.f32.mxu0 %vm171_vm1, %v10936_v56  ;;  %v13651_v56 = vld [vmem:[#allocation21_spill] sm:$0xff] }
 0x150   : > { %9486 = vmatmul.mubr.msk.f32.gmra.mrb[20].mxu0 %vm171_vm1, %v10942_v57  ;;  %v13652_v57 = vld [vmem:[#allocation22_spill] sm:$0xff] }
 0x151   : > { %9488 = vmatprep.mubr.msk.f32.mxu0 %vm171_vm1, %v10944_v58  ;;  %v13653_v58 = vld [vmem:[#allocation23_spill] sm:$0xff] }
 0x154   : > { %9489 = vmatmul.mubr.msk.f32.gmra.mrb[22].mxu0 %vm171_vm1, %v10950_v59  ;;  %v13654_v59 = vld [vmem:[#allocation24_spill] sm:$0xff] }
 0x155   : > { %9491 = vmatprep.mubr.msk.f32.mxu0 %vm171_vm1, %v10952_v60 }
 0x158   : > { %9492 = vmatmul.mubr.msk.f32.gmra.mrb[24].mxu0 %vm171_vm1, %v10958_v61 }
 0x159   : > { %9494 = vmatprep.mubr.msk.f32.mxu0 %vm171_vm1, %v10960_v62 }
 0x15c   : > { %9495 = vmatmul.mubr.msk.f32.gmra.mrb[26].mxu0 %vm171_vm1, %v13634_v28 }
 0x15d   : > { %9497 = vmatprep.mubr.msk.f32.mxu0 %vm171_vm1, %v13635_v29 }
 0x160   : > { %9498 = vmatmul.mubr.msk.f32.gmra.mrb[28].mxu0 %vm171_vm1, %v13636_v33 }
 0x161   : > { %9500 = vmatprep.mubr.msk.f32.mxu0 %vm171_vm1, %v11381_v30 }
 0x164   : > { %9501 = vmatmul.mubr.msk.f32.gmra.mrb[30].mxu0 %vm171_vm1, %v11387_v34 }
 0x165   : > { %9505 = vmatprep.mubr.msk.f32.mxu0 %vm171_vm1, %v13637_v35  ;;  %v13657_v35 = vld [vmem:[#allocation27_spill] sm:$0xff] }
 0x168   : > { %9506 = vmatmul.mubr.msk.f32.vlgmr.msra.gmra.mrb[0].mxu0 %vm171_vm1, %v13638_v43  ;;  %v13658_v43 = vld [vmem:[#allocation28_spill] sm:$0xff] }
 0x169   : > { %9554 = vmatpush3.msk.msra.mxu0 %vm447_vm0, %v8248_v7  ;;  %9508 = vmatprep.mubr.msk.f32.mxu0 %vm171_vm1, %v13639_v44  ;;  %v13656_v7 = vld [vmem:[#allocation26_spill] sm:$0xff] }
 0x16a   : > { %9603 = vmatprep.subr.msk.mxu0 %vm447_vm0, %v8282_v36 }
 0x16c   : > { %9509 = vmatmul.mubr.msk.f32.gmra.mrb[2].mxu0 %vm171_vm1, %v13640_v45 }
 0x16d   : > { %9511 = vmatprep.mubr.msk.f32.mxu0 %vm171_vm1, %v13641_v46 }
 0x170   : > { %9512 = vmatmul.mubr.msk.f32.gmra.mrb[4].mxu0 %vm171_vm1, %v13642_v47 }
 0x171   : > { %9514 = vmatprep.mubr.msk.f32.mxu0 %vm171_vm1, %v13643_v48 }
 0x174   : > { %9515 = vmatmul.mubr.msk.f32.gmra.mrb[6].mxu0 %vm171_vm1, %v13644_v49 }
 0x175   : > { %9517 = vmatprep.mubr.msk.f32.mxu0 %vm171_vm1, %v13645_v50 }
 0x178   : > { %9518 = vmatmul.mubr.msk.f32.gmra.mrb[8].mxu0 %vm171_vm1, %v13646_v51 }
 0x179   : > { %9520 = vmatprep.mubr.msk.f32.mxu0 %vm171_vm1, %v13647_v52 }
 0x17c   : > { %9521 = vmatmul.mubr.msk.f32.gmra.mrb[10].mxu0 %vm171_vm1, %v13648_v53 }
 0x17d   : > { %9523 = vmatprep.mubr.msk.f32.mxu0 %vm171_vm1, %v13649_v54 }
 0x180   : > { %9524 = vmatmul.mubr.msk.f32.gmra.mrb[12].mxu0 %vm171_vm1, %v13650_v55 }
 0x181   : > { %9526 = vmatprep.mubr.msk.f32.mxu0 %vm171_vm1, %v13651_v56  ;;  %v13659_v56 = vld [vmem:[#allocation29_spill] sm:$0xff] }
 0x184   : > { %9527 = vmatmul.mubr.msk.f32.gmra.mrb[14].mxu0 %vm171_vm1, %v13652_v57 }
 0x185   : > { %9529 = vmatprep.mubr.msk.f32.mxu0 %vm171_vm1, %v13653_v58  ;;  %v13660_v58 = vld [vmem:[#allocation30_spill] sm:$0xff] }
 0x188   : > { %9530 = vmatmul.mubr.msk.f32.gmra.mrb[16].mxu0 %vm171_vm1, %v13654_v59 }
 0x189   : > { %9532 = vmatprep.mubr.msk.f32.mxu0 %vm171_vm1, %v13655_v63  ;;  %v13661_v63 = vld [vmem:[#allocation31_spill] sm:$0xff] }
 0x18c   : > { %9533 = vmatmul.mubr.msk.f32.gmra.mrb[18].mxu0 %vm171_vm1, %v13656_v7 }
 0x18d   : > { %9535 = vmatprep.mubr.msk.f32.mxu0 %vm171_vm1, %v13657_v35 }
 0x190   : > { %9536 = vmatmul.mubr.msk.f32.gmra.mrb[20].mxu0 %vm171_vm1, %v13658_v43  ;;  %v11454_v43 = vld [vmem:[#allocation2 + $0x182] sm:$0xff] }
 0x191   : > { %9538 = vmatprep.mubr.msk.f32.mxu0 %vm171_vm1, %v13659_v56 }
 0x194   : > { %9539 = vmatmul.mubr.msk.f32.gmra.mrb[22].mxu0 %vm171_vm1, %v11216_v40 }
 0x195   : > { %9541 = vmatprep.mubr.msk.f32.mxu0 %vm171_vm1, %v13660_v58  ;;  %v11460_v58 = vld [vmem:[#allocation2 + $0x18a] sm:$0xff] }
 0x198   : > { %9542 = vmatmul.mubr.msk.f32.gmra.mrb[24].mxu0 %vm171_vm1, %v11224_v0 }
 0x199   : > { %9544 = vmatprep.mubr.msk.f32.mxu0 %vm171_vm1, %v13661_v63 }
 0x19c   : > { %9545 = vmatmul.mubr.msk.f32.gmra.mrb[26].mxu0 %vm171_vm1, %v11232_v3 }
 0x19d   : > { %9547 = vmatprep.mubr.msk.f32.mxu0 %vm171_vm1, %v11234_v39  ;;  %v8316_v39 = vld [vmem:[%s13484_s1 + $0x20] sm:$0xf] }
 0x1a0   : > { %9548 = vmatmul.mubr.msk.f32.gmra.mrb[28].mxu0 %vm171_vm1, %v11240_v5 }
 0x1a1   : > { %9550 = vmatprep.mubr.msk.f32.mxu0 %vm171_vm1, %v11454_v43 }
 0x1a4   : > { %9551 = vmatmul.mubr.msk.f32.gmra.mrb[30].mxu0 %vm171_vm1, %v11460_v58 }
 0x1a5   : > { %9555 = vmatprep.mubr.msk.f32.mxu0 %vm171_vm1, %v10993_v8  ;;  %v2596_v8 = vld [vmem:[#allocation2 + $0x198] sm:$0xff] }
 0x1a8   : > { %9556 = vmatmul.mubr.msk.f32.vlgmr.msra.gmra.mrb[0].mxu0 %vm171_vm1, %v11001_v9  ;;  %v2597_v9 = vld [vmem:[#allocation2 + $0x1a0] sm:$0xff] }
 0x1a9   : > { %9604 = vmatpush3.msk.msra.mxu0 %vm447_vm0, %v8282_v36  ;;  %9558 = vmatprep.mubr.msk.f32.mxu0 %vm171_vm1, %v11003_v10  ;;  %v2956_v10 = vld [vmem:[#allocation2 + $0x31] sm:$0xff] }
 0x1aa   : > { %9653 = vmatprep.subr.msk.mxu0 %vm447_vm0, %v8316_v39 }
 0x1ac   : > { %9559 = vmatmul.mubr.msk.f32.gmra.mrb[2].mxu0 %vm171_vm1, %v11009_v6  ;;  %v2957_v6 = vld [vmem:[#allocation2 + $0x39] sm:$0xff] }
 0x1ad   : > { %9561 = vmatprep.mubr.msk.f32.mxu0 %vm171_vm1, %v11011_v11  ;;  %v2958_v11 = vld [vmem:[#allocation2 + $0x49] sm:$0xff] }
 0x1b0   : > { %9562 = vmatmul.mubr.msk.f32.gmra.mrb[4].mxu0 %vm171_vm1, %v11017_v12  ;;  %v2959_v12 = vld [vmem:[#allocation2 + $0x51] sm:$0xff] }
 0x1b1   : > { %9564 = vmatprep.mubr.msk.f32.mxu0 %vm171_vm1, %v11019_v13  ;;  %v2960_v13 = vld [vmem:[#allocation2 + $0x61] sm:$0xff] }
 0x1b4   : > { %9565 = vmatmul.mubr.msk.f32.gmra.mrb[6].mxu0 %vm171_vm1, %v11025_v14  ;;  %v2961_v14 = vld [vmem:[#allocation2 + $0x69] sm:$0xff] }
 0x1b5   : > { %9567 = vmatprep.mubr.msk.f32.mxu0 %vm171_vm1, %v11027_v15  ;;  %v2962_v15 = vld [vmem:[#allocation2 + $0x79] sm:$0xff] }
 0x1b8   : > { %9568 = vmatmul.mubr.msk.f32.gmra.mrb[8].mxu0 %vm171_vm1, %v11033_v16  ;;  %v2963_v16 = vld [vmem:[#allocation2 + $0x81] sm:$0xff] }
 0x1b9   : > { %9570 = vmatprep.mubr.msk.f32.mxu0 %vm171_vm1, %v11035_v17  ;;  %v2964_v17 = vld [vmem:[#allocation2 + $0x91] sm:$0xff] }
 0x1bc   : > { %9571 = vmatmul.mubr.msk.f32.gmra.mrb[10].mxu0 %vm171_vm1, %v11041_v18  ;;  %v2965_v18 = vld [vmem:[#allocation2 + $0x99] sm:$0xff] }
 0x1bd   : > { %9573 = vmatprep.mubr.msk.f32.mxu0 %vm171_vm1, %v11043_v19  ;;  %v2966_v19 = vld [vmem:[#allocation2 + $0xa9] sm:$0xff] }
 0x1c0   : > { %9574 = vmatmul.mubr.msk.f32.gmra.mrb[12].mxu0 %vm171_vm1, %v11049_v20  ;;  %v2967_v20 = vld [vmem:[#allocation2 + $0xb1] sm:$0xff] }
 0x1c1   : > { %9576 = vmatprep.mubr.msk.f32.mxu0 %vm171_vm1, %v11051_v21  ;;  %v2968_v21 = vld [vmem:[#allocation2 + $0xc1] sm:$0xff] }
 0x1c4   : > { %9577 = vmatmul.mubr.msk.f32.gmra.mrb[14].mxu0 %vm171_vm1, %v11057_v22  ;;  %v2969_v22 = vld [vmem:[#allocation2 + $0xc9] sm:$0xff] }
 0x1c5   : > { %9579 = vmatprep.mubr.msk.f32.mxu0 %vm171_vm1, %v11059_v23  ;;  %v2970_v23 = vld [vmem:[#allocation2 + $0xd9] sm:$0xff] }
 0x1c8   : > { %9580 = vmatmul.mubr.msk.f32.gmra.mrb[16].mxu0 %vm171_vm1, %v11065_v24  ;;  %v2971_v24 = vld [vmem:[#allocation2 + $0xe1] sm:$0xff] }
 0x1c9   : > { %9582 = vmatprep.mubr.msk.f32.mxu0 %vm171_vm1, %v11067_v25  ;;  %v2972_v25 = vld [vmem:[#allocation2 + $0xf1] sm:$0xff] }
 0x1cc   : > { %9583 = vmatmul.mubr.msk.f32.gmra.mrb[18].mxu0 %vm171_vm1, %v11073_v26  ;;  %v2973_v26 = vld [vmem:[#allocation2 + $0xf9] sm:$0xff] }
 0x1cd   : > { %9585 = vmatprep.mubr.msk.f32.mxu0 %vm171_vm1, %v11075_v27  ;;  %v2974_v27 = vld [vmem:[#allocation2 + $0x109] sm:$0xff] }
 0x1d0   : > { %9586 = vmatmul.mubr.msk.f32.gmra.mrb[20].mxu0 %vm171_vm1, %v11081_v31  ;;  %v2975_v31 = vld [vmem:[#allocation2 + $0x111] sm:$0xff] }
 0x1d1   : > { %9588 = vmatprep.mubr.msk.f32.mxu0 %vm171_vm1, %v11083_v32  ;;  %v2976_v32 = vld [vmem:[#allocation2 + $0x121] sm:$0xff] }
 0x1d4   : > { %9589 = vmatmul.mubr.msk.f32.gmra.mrb[22].mxu0 %vm171_vm1, %v11089_v37  ;;  %v2977_v37 = vld [vmem:[#allocation2 + $0x129] sm:$0xff] }
 0x1d5   : > { %9591 = vmatprep.mubr.msk.f32.mxu0 %vm171_vm1, %v11091_v38  ;;  %v2986_v38 = vld [vmem:[#allocation2 + $0x199] sm:$0xff] }
 0x1d8   : > { %9592 = vmatmul.mubr.msk.f32.gmra.mrb[24].mxu0 %vm171_vm1, %v11101_v41  ;;  %v13664_v41 = vld [vmem:[#allocation25_spill] sm:$0xff] }
 0x1d9   : > { %9594 = vmatprep.mubr.msk.f32.mxu0 %vm171_vm1, %v11103_v42  ;;  %v13665_v42 = vld [vmem:[#allocation28_spill] sm:$0xff] }
 0x1dc   : > { %9595 = vmatmul.mubr.msk.f32.gmra.mrb[26].mxu0 %vm171_vm1, %v11109_v2  ;;  %v13666_v2 = vld [vmem:[#allocation30_spill] sm:$0xff] }
 0x1dd   : > { %9597 = vmatprep.mubr.msk.f32.mxu0 %vm171_vm1, %v11308_v1 }
 0x1e0   : > { %9598 = vmatmul.mubr.msk.f32.gmra.mrb[28].mxu0 %vm171_vm1, %v11314_v4 }
 0x1e1   : > { %9600 = vmatprep.mubr.msk.f32.mxu0 %vm171_vm1, %v2596_v8 }
 0x1e4   : > { %9601 = vmatmul.mubr.msk.f32.gmra.mrb[30].mxu0 %vm171_vm1, %v2597_v9 }
 0x1e5   : > { %9605 = vmatprep.mubr.msk.f32.mxu0 %vm171_vm1, %v2956_v10 }
 0x1e8   : > { %9606 = vmatmul.mubr.msk.f32.vlgmr.msra.gmra.mrb[0].mxu0 %vm171_vm1, %v2957_v6 }
 0x1e9   : > { %9654 = vmatpush3.msk.msra.mxu0 %vm447_vm0, %v8316_v39  ;;  %9608 = vmatprep.mubr.msk.f32.mxu0 %vm171_vm1, %v2958_v11  ;;  %v13667_v39 = vld [vmem:[#allocation32_spill] sm:$0xff] }
 0x1ec   : > { %9609 = vmatmul.mubr.msk.f32.gmra.mrb[2].mxu0 %vm171_vm1, %v2959_v12 }
 0x1ed   : > { %9611 = vmatprep.mubr.msk.f32.mxu0 %vm171_vm1, %v2960_v13 }
 0x1f0   : > { %9612 = vmatmul.mubr.msk.f32.gmra.mrb[4].mxu0 %vm171_vm1, %v2961_v14 }
 0x1f1   : > { %9614 = vmatprep.mubr.msk.f32.mxu0 %vm171_vm1, %v2962_v15 }
 0x1f4   : > { %9615 = vmatmul.mubr.msk.f32.gmra.mrb[6].mxu0 %vm171_vm1, %v2963_v16 }
 0x1f5   : > { %9617 = vmatprep.mubr.msk.f32.mxu0 %vm171_vm1, %v2964_v17 }
 0x1f8   : > { %9618 = vmatmul.mubr.msk.f32.gmra.mrb[8].mxu0 %vm171_vm1, %v2965_v18 }
 0x1f9   : > { %9620 = vmatprep.mubr.msk.f32.mxu0 %vm171_vm1, %v2966_v19 }
 0x1fc   : > { %9621 = vmatmul.mubr.msk.f32.gmra.mrb[10].mxu0 %vm171_vm1, %v2967_v20 }
 0x1fd   : > { %9623 = vmatprep.mubr.msk.f32.mxu0 %vm171_vm1, %v2968_v21 }
 0x200   : > { %9624 = vmatmul.mubr.msk.f32.gmra.mrb[12].mxu0 %vm171_vm1, %v2969_v22 }
 0x201   : > { %9626 = vmatprep.mubr.msk.f32.mxu0 %vm171_vm1, %v2970_v23 }
 0x204   : > { %9627 = vmatmul.mubr.msk.f32.gmra.mrb[14].mxu0 %vm171_vm1, %v2971_v24 }
 0x205   : > { %9629 = vmatprep.mubr.msk.f32.mxu0 %vm171_vm1, %v2972_v25 }
 0x208   : > { %9630 = vmatmul.mubr.msk.f32.gmra.mrb[16].mxu0 %vm171_vm1, %v2973_v26 }
 0x209   : > { %9632 = vmatprep.mubr.msk.f32.mxu0 %vm171_vm1, %v2974_v27 }
 0x20c   : > { %9633 = vmatmul.mubr.msk.f32.gmra.mrb[18].mxu0 %vm171_vm1, %v2975_v31 }
 0x20d   : > { %9635 = vmatprep.mubr.msk.f32.mxu0 %vm171_vm1, %v2976_v32 }
 0x210   : > { %9636 = vmatmul.mubr.msk.f32.gmra.mrb[20].mxu0 %vm171_vm1, %v2977_v37 }
 0x211   : > { %9638 = vmatprep.mubr.msk.f32.mxu0 %vm171_vm1, %v10952_v60  ;;  %v2987_v60 = vld [vmem:[#allocation2 + $0x1a1] sm:$0xff] }
 0x214   : > { %9639 = vmatmul.mubr.msk.f32.gmra.mrb[22].mxu0 %vm171_vm1, %v10958_v61  ;;  %v13662_v61 = vld [vmem:[#allocation21_spill] sm:$0xff] }
 0x215   : > { %9641 = vmatprep.mubr.msk.f32.mxu0 %vm171_vm1, %v10960_v62  ;;  %v13663_v62 = vld [vmem:[#allocation23_spill] sm:$0xff] }
 0x218   : > { %9642 = vmatmul.mubr.msk.f32.gmra.mrb[24].mxu0 %vm171_vm1, %v13634_v28 }
 0x219   : > { %9644 = vmatprep.mubr.msk.f32.mxu0 %vm171_vm1, %v13635_v29 }
 0x21c   : > { %9645 = vmatmul.mubr.msk.f32.gmra.mrb[26].mxu0 %vm171_vm1, %v13636_v33 }
 0x21d   : > { %9647 = vmatprep.mubr.msk.f32.mxu0 %vm171_vm1, %v11381_v30 }
 0x220   : > { %9648 = vmatmul.mubr.msk.f32.gmra.mrb[28].mxu0 %vm171_vm1, %v11387_v34 }
 0x221   : > { %9650 = vmatprep.mubr.msk.f32.mxu0 %vm171_vm1, %v2986_v38 }
 0x224   : > { %9651 = vmatmul.mubr.msk.f32.gmra.mrb[30].mxu0 %vm171_vm1, %v2987_v60 }
 0x225   : > { %9655 = vmatprep.mubr.msk.f32.mxu0 %vm171_vm1, %v13639_v44 }
 0x228   : > { %9656 = vmatmul.mubr.msk.f32.vlgmr.msra.gmra.mrb[0].mxu0 %vm171_vm1, %v13640_v45 }
 0x229   : > { %9658 = vmatprep.mubr.msk.f32.mxu0 %vm171_vm1, %v13641_v46 }
 0x22c   : > { %9659 = vmatmul.mubr.msk.f32.gmra.mrb[2].mxu0 %vm171_vm1, %v13642_v47 }
 0x22d   : > { %9661 = vmatprep.mubr.msk.f32.mxu0 %vm171_vm1, %v13643_v48 }
 0x230   : > { %9662 = vmatmul.mubr.msk.f32.gmra.mrb[4].mxu0 %vm171_vm1, %v13644_v49 }
 0x231   : > { %9664 = vmatprep.mubr.msk.f32.mxu0 %vm171_vm1, %v13645_v50 }
 0x234   : > { %9665 = vmatmul.mubr.msk.f32.gmra.mrb[6].mxu0 %vm171_vm1, %v13646_v51 }
 0x235   : > { %9667 = vmatprep.mubr.msk.f32.mxu0 %vm171_vm1, %v13647_v52 }
 0x238   : > { %9668 = vmatmul.mubr.msk.f32.gmra.mrb[8].mxu0 %vm171_vm1, %v13648_v53 }
 0x239   : > { %9670 = vmatprep.mubr.msk.f32.mxu0 %vm171_vm1, %v13649_v54 }
 0x23c   : > { %9671 = vmatmul.mubr.msk.f32.gmra.mrb[10].mxu0 %vm171_vm1, %v13650_v55 }
 0x23d   : > { %9673 = vmatprep.mubr.msk.f32.mxu0 %vm171_vm1, %v13662_v61 }
 0x240   : > { %9674 = vmatmul.mubr.msk.f32.gmra.mrb[12].mxu0 %vm171_vm1, %v13652_v57 }
 0x241   : > { %9676 = vmatprep.mubr.msk.f32.mxu0 %vm171_vm1, %v13663_v62 }
 0x244   : > { %9677 = vmatmul.mubr.msk.f32.gmra.mrb[14].mxu0 %vm171_vm1, %v13654_v59 }
 0x245   : > { %9679 = vmatprep.mubr.msk.f32.mxu0 %vm171_vm1, %v13664_v41 }
 0x248   : > { %9680 = vmatmul.mubr.msk.f32.gmra.mrb[16].mxu0 %vm171_vm1, %v13656_v7 }
 0x249   : > { %9682 = vmatprep.mubr.msk.f32.mxu0 %vm171_vm1, %v13657_v35 }
 0x24c   : > { %9683 = vmatmul.mubr.msk.f32.gmra.mrb[18].mxu0 %vm171_vm1, %v13665_v42 }
 0x24d   : > { %9685 = vmatprep.mubr.msk.f32.mxu0 %vm171_vm1, %v13659_v56 }
 0x250   : > { %9686 = vmatmul.mubr.msk.f32.gmra.mrb[20].mxu0 %vm171_vm1, %v11216_v40  ;;  %v3376_v40 = vld [vmem:[#allocation2 + $0x19a] sm:$0xff] }
 0x251   : > { %9688 = vmatprep.mubr.msk.f32.mxu0 %vm171_vm1, %v13666_v2 }
 0x254   : > { %9689 = vmatmul.mubr.msk.f32.gmra.mrb[22].mxu0 %vm171_vm1, %v11224_v0  ;;  %v3377_v0 = vld [vmem:[#allocation2 + $0x1a2] sm:$0xff] }
 0x255   : > { %9691 = vmatprep.mubr.msk.f32.mxu0 %vm171_vm1, %v13661_v63 }
 0x258   : > { %9692 = vmatmul.mubr.msk.f32.gmra.mrb[24].mxu0 %vm171_vm1, %v11232_v3 }
 0x259   : > { %9694 = vmatprep.mubr.msk.f32.mxu0 %vm171_vm1, %v13667_v39 }
 0x25c   : > { %9695 = vmatmul.mubr.msk.f32.gmra.mrb[26].mxu0 %vm171_vm1, %v11240_v5 }
 0x25d   : > { %9697 = vmatprep.mubr.msk.f32.mxu0 %vm171_vm1, %v11454_v43 }
 0x260   : > { %9698 = vmatmul.mubr.msk.f32.gmra.mrb[28].mxu0 %vm171_vm1, %v11460_v58 }
 0x261   : > { %9700 = vmatprep.mubr.msk.f32.mxu0 %vm171_vm1, %v3376_v40 }
 0x264   : > { %9701 = vmatmul.mubr.msk.f32.gmra.mrb[30].mxu0 %vm171_vm1, %v3377_v0 }
 0x2fb   : > { %v9657_v1 = vpop.f32.mrb[0].mxu0 }
 0x2fc   : > { %3739 = vst.msk [vmem:[#allocation3 + $0x8] sm:$0xff] %vm171_vm1, %v9657_v1  ;;  %v3545_v3 = vpop.f32.mrb[1].mxu0 }
 0x2fd   : > { %3738 = vst.msk [vmem:[#allocation3] sm:$0xff] %vm171_vm1, %v3545_v3 }
 0x2ff   : > { %v9660_v4 = vpop.f32.mrb[2].mxu0 }
 0x300   : > { %3741 = vst.msk [vmem:[#allocation3 + $0x18] sm:$0xff] %vm171_vm1, %v9660_v4  ;;  %v3555_v5 = vpop.f32.mrb[3].mxu0 }
 0x301   : > { %3740 = vst.msk [vmem:[#allocation3 + $0x10] sm:$0xff] %vm171_vm1, %v3555_v5 }
 0x303   : > { %v11638_v28 = vld [vmem:[#allocation3 + $0x8] sm:$0xff]  ;;  %v9663_v29 = vpop.f32.mrb[4].mxu0 }
 0x304   : > { %v11640_v30 = vld [vmem:[#allocation3] sm:$0xff]  ;;  %3743 = vst.msk [vmem:[#allocation3 + $0x28] sm:$0xff] %vm171_vm1, %v9663_v29  ;;  %v3565_v33 = vpop.f32.mrb[5].mxu0  ;;  %v3803_v34 = vsel %vm171_vm1, %v11638_v28, 0.0 }
 0x305   : > { %v3802_v36 = vsel %vm171_vm1, %v11640_v30, 0.0  ;;  %3742 = vst.msk [vmem:[#allocation3 + $0x20] sm:$0xff] %vm171_vm1, %v3565_v33 }
 0x306   : > { %v3804_v45 = vadd.f32 %v3803_v34, %v3802_v36 }
 0x307   : > { %v9666_v44 = vpop.f32.mrb[6].mxu0  ;;  %v11648_v46 = vld [vmem:[#allocation3 + $0x18] sm:$0xff] }
 0x308   : > { %v11650_v47 = vld [vmem:[#allocation3 + $0x10] sm:$0xff]  ;;  %3745 = vst.msk [vmem:[#allocation3 + $0x38] sm:$0xff] %vm171_vm1, %v9666_v44  ;;  %v3575_v48 = vpop.f32.mrb[7].mxu0  ;;  %v3807_v51 = vsel %vm171_vm1, %v11648_v46, 0.0 }
 0x309   : > { %v3805_v49 = vsel %vm171_vm1, %v11650_v47, 0.0  ;;  %3744 = vst.msk [vmem:[#allocation3 + $0x30] sm:$0xff] %vm171_vm1, %v3575_v48 }
 0x30a   : > { %v3806_v50 = vadd.f32 %v3805_v49, %v3804_v45 }
 0x30b   : > { %v9669_v52 = vpop.f32.mrb[8].mxu0  ;;  %v11658_v53 = vld [vmem:[#allocation3 + $0x28] sm:$0xff] }
 0x30c   : > { %v11660_v54 = vld [vmem:[#allocation3 + $0x20] sm:$0xff]  ;;  %v3808_v55 = vadd.f32 %v3807_v51, %v3806_v50  ;;  %3747 = vst.msk [vmem:[#allocation3 + $0x48] sm:$0xff] %vm171_vm1, %v9669_v52  ;;  %v3585_v56 = vpop.f32.mrb[9].mxu0  ;;  %v3811_v59 = vsel %vm171_vm1, %v11658_v53, 0.0 }
 0x30d   : > { %v3809_v57 = vsel %vm171_vm1, %v11660_v54, 0.0  ;;  %3746 = vst.msk [vmem:[#allocation3 + $0x40] sm:$0xff] %vm171_vm1, %v3585_v56 }
 0x30e   : > { %v3810_v58 = vadd.f32 %v3809_v57, %v3808_v55 }
 0x30f   : > { %v9672_v63 = vpop.f32.mrb[10].mxu0  ;;  %v11668_v7 = vld [vmem:[#allocation3 + $0x38] sm:$0xff] }
 0x310   : > { %v11670_v35 = vld [vmem:[#allocation3 + $0x30] sm:$0xff]  ;;  %v3812_v43 = vadd.f32 %v3811_v59, %v3810_v58  ;;  %3749 = vst.msk [vmem:[#allocation3 + $0x58] sm:$0xff] %vm171_vm1, %v9672_v63  ;;  %v3595_v8 = vpop.f32.mrb[11].mxu0  ;;  %v3815_v6 = vsel %vm171_vm1, %v11668_v7, 0.0 }
 0x311   : > { %v3813_v9 = vsel %vm171_vm1, %v11670_v35, 0.0  ;;  %3748 = vst.msk [vmem:[#allocation3 + $0x50] sm:$0xff] %vm171_vm1, %v3595_v8 }
 0x312   : > { %v3814_v10 = vadd.f32 %v3813_v9, %v3812_v43 }
 0x313   : > { %v9675_v11 = vpop.f32.mrb[12].mxu0  ;;  %v11678_v12 = vld [vmem:[#allocation3 + $0x48] sm:$0xff] }
 0x314   : > { %v11680_v13 = vld [vmem:[#allocation3 + $0x40] sm:$0xff]  ;;  %v3816_v14 = vadd.f32 %v3815_v6, %v3814_v10  ;;  %3751 = vst.msk [vmem:[#allocation3 + $0x68] sm:$0xff] %vm171_vm1, %v9675_v11  ;;  %v3605_v15 = vpop.f32.mrb[13].mxu0  ;;  %v3819_v18 = vsel %vm171_vm1, %v11678_v12, 0.0 }
 0x315   : > { %v3817_v16 = vsel %vm171_vm1, %v11680_v13, 0.0  ;;  %3750 = vst.msk [vmem:[#allocation3 + $0x60] sm:$0xff] %vm171_vm1, %v3605_v15 }
 0x316   : > { %v3818_v17 = vadd.f32 %v3817_v16, %v3816_v14 }
 0x317   : > { %v9678_v19 = vpop.f32.mrb[14].mxu0  ;;  %v11688_v20 = vld [vmem:[#allocation3 + $0x58] sm:$0xff] }
 0x318   : > { %v11690_v21 = vld [vmem:[#allocation3 + $0x50] sm:$0xff]  ;;  %v3820_v22 = vadd.f32 %v3819_v18, %v3818_v17  ;;  %3753 = vst.msk [vmem:[#allocation3 + $0x78] sm:$0xff] %vm171_vm1, %v9678_v19  ;;  %v3615_v23 = vpop.f32.mrb[15].mxu0  ;;  %v3823_v26 = vsel %vm171_vm1, %v11688_v20, 0.0 }
 0x319   : > { %v3821_v24 = vsel %vm171_vm1, %v11690_v21, 0.0  ;;  %3752 = vst.msk [vmem:[#allocation3 + $0x70] sm:$0xff] %vm171_vm1, %v3615_v23 }
 0x31a   : > { %v3822_v25 = vadd.f32 %v3821_v24, %v3820_v22 }
 0x31b   : > { %v9681_v27 = vpop.f32.mrb[16].mxu0  ;;  %v11698_v31 = vld [vmem:[#allocation3 + $0x68] sm:$0xff] }
 0x31c   : > { %v11700_v32 = vld [vmem:[#allocation3 + $0x60] sm:$0xff]  ;;  %v3824_v37 = vadd.f32 %v3823_v26, %v3822_v25  ;;  %3755 = vst.msk [vmem:[#allocation3 + $0x88] sm:$0xff] %vm171_vm1, %v9681_v27  ;;  %v3625_v38 = vpop.f32.mrb[17].mxu0  ;;  %v3827_v62 = vsel %vm171_vm1, %v11698_v31, 0.0 }
 0x31d   : > { %v3825_v60 = vsel %vm171_vm1, %v11700_v32, 0.0  ;;  %3754 = vst.msk [vmem:[#allocation3 + $0x80] sm:$0xff] %vm171_vm1, %v3625_v38 }
 0x31e   : > { %v3826_v61 = vadd.f32 %v3825_v60, %v3824_v37 }
 0x31f   : > { %v9684_v41 = vpop.f32.mrb[18].mxu0  ;;  %v11708_v42 = vld [vmem:[#allocation3 + $0x78] sm:$0xff] }
 0x320   : > { %v11710_v2 = vld [vmem:[#allocation3 + $0x70] sm:$0xff]  ;;  %v3828_v39 = vadd.f32 %v3827_v62, %v3826_v61  ;;  %3757 = vst.msk [vmem:[#allocation3 + $0x98] sm:$0xff] %vm171_vm1, %v9684_v41  ;;  %v3635_v40 = vpop.f32.mrb[19].mxu0  ;;  %v3831_v3 = vsel %vm171_vm1, %v11708_v42, 0.0 }
 0x321   : > { %v3829_v0 = vsel %vm171_vm1, %v11710_v2, 0.0  ;;  %3756 = vst.msk [vmem:[#allocation3 + $0x90] sm:$0xff] %vm171_vm1, %v3635_v40 }
 0x322   : > { %v3830_v1 = vadd.f32 %v3829_v0, %v3828_v39 }
 0x323   : > { %v9687_v4 = vpop.f32.mrb[20].mxu0  ;;  %v11718_v5 = vld [vmem:[#allocation3 + $0x88] sm:$0xff] }
 0x324   : > { %v11720_v29 = vld [vmem:[#allocation3 + $0x80] sm:$0xff]  ;;  %v3832_v33 = vadd.f32 %v3831_v3, %v3830_v1  ;;  %3759 = vst.msk [vmem:[#allocation3 + $0xa8] sm:$0xff] %vm171_vm1, %v9687_v4  ;;  %v3645_v34 = vpop.f32.mrb[21].mxu0  ;;  %v3835_v45 = vsel %vm171_vm1, %v11718_v5, 0.0 }
 0x325   : > { %v3833_v36 = vsel %vm171_vm1, %v11720_v29, 0.0  ;;  %3758 = vst.msk [vmem:[#allocation3 + $0xa0] sm:$0xff] %vm171_vm1, %v3645_v34 }
 0x326   : > { %v3834_v44 = vadd.f32 %v3833_v36, %v3832_v33 }
 0x327   : > { %v9690_v48 = vpop.f32.mrb[22].mxu0  ;;  %v11728_v49 = vld [vmem:[#allocation3 + $0x98] sm:$0xff] }
 0x328   : > { %v11730_v50 = vld [vmem:[#allocation3 + $0x90] sm:$0xff]  ;;  %v3836_v51 = vadd.f32 %v3835_v45, %v3834_v44  ;;  %3761 = vst.msk [vmem:[#allocation3 + $0xb8] sm:$0xff] %vm171_vm1, %v9690_v48  ;;  %v3655_v52 = vpop.f32.mrb[23].mxu0  ;;  %v3839_v57 = vsel %vm171_vm1, %v11728_v49, 0.0 }
 0x329   : > { %v3837_v55 = vsel %vm171_vm1, %v11730_v50, 0.0  ;;  %3760 = vst.msk [vmem:[#allocation3 + $0xb0] sm:$0xff] %vm171_vm1, %v3655_v52 }
 0x32a   : > { %v3838_v56 = vadd.f32 %v3837_v55, %v3836_v51 }
 0x32b   : > { %v9693_v58 = vpop.f32.mrb[24].mxu0  ;;  %v11738_v59 = vld [vmem:[#allocation3 + $0xa8] sm:$0xff] }
 0x32c   : > { %v11740_v63 = vld [vmem:[#allocation3 + $0xa0] sm:$0xff]  ;;  %v3840_v43 = vadd.f32 %v3839_v57, %v3838_v56  ;;  %3763 = vst.msk [vmem:[#allocation3 + $0xc8] sm:$0xff] %vm171_vm1, %v9693_v58  ;;  %v3665_v8 = vpop.f32.mrb[25].mxu0  ;;  %v3843_v6 = vsel %vm171_vm1, %v11738_v59, 0.0 }
 0x32d   : > { %v3841_v9 = vsel %vm171_vm1, %v11740_v63, 0.0  ;;  %3762 = vst.msk [vmem:[#allocation3 + $0xc0] sm:$0xff] %vm171_vm1, %v3665_v8 }
 0x32e   : > { %v3842_v10 = vadd.f32 %v3841_v9, %v3840_v43 }
 0x32f   : > { %v9696_v11 = vpop.f32.mrb[26].mxu0  ;;  %v11748_v14 = vld [vmem:[#allocation3 + $0xb8] sm:$0xff] }
 0x330   : > { %v11750_v15 = vld [vmem:[#allocation3 + $0xb0] sm:$0xff]  ;;  %v3844_v16 = vadd.f32 %v3843_v6, %v3842_v10  ;;  %3765 = vst.msk [vmem:[#allocation3 + $0xd8] sm:$0xff] %vm171_vm1, %v9696_v11  ;;  %v3675_v17 = vpop.f32.mrb[27].mxu0  ;;  %v3847_v22 = vsel %vm171_vm1, %v11748_v14, 0.0 }
 0x331   : > { %v3845_v18 = vsel %vm171_vm1, %v11750_v15, 0.0  ;;  %3764 = vst.msk [vmem:[#allocation3 + $0xd0] sm:$0xff] %vm171_vm1, %v3675_v17  ;;  %v8350_v6 = vld [vmem:[%s13485_s2 + $0x4] sm:$0xf]  ;;  %v4138_v17 = vld [vmem:[#allocation2 + $0x9] sm:$0xff] }
 0x332   : > { %v3846_v19 = vadd.f32 %v3845_v18, %v3844_v16  ;;  %9703 = vmatprep.subr.msk.mxu1 %vm447_vm0, %v8350_v6  ;;  %v4137_v11 = vld [vmem:[#allocation2 + $0x1] sm:$0xff] }
 0x333   : > { %v9699_v23 = vpop.f32.mrb[28].mxu0  ;;  %v11758_v24 = vld [vmem:[#allocation3 + $0xc8] sm:$0xff]  ;;  %9704 = vmatpush3.msk.msra.mxu1 %vm447_vm0, %v8350_v6  ;;  %v4136_v16 = vld [vmem:[%s13485_s2] sm:$0xf]  ;;  %9705 = vmatprep.mubr.msk.f32.mxu1 %vm171_vm1, %v4137_v11 }
 0x334   : > { %v11760_v25 = vld [vmem:[#allocation3 + $0xc0] sm:$0xff]  ;;  %v3848_v26 = vadd.f32 %v3847_v22, %v3846_v19  ;;  %3767 = vst.msk [vmem:[#allocation3 + $0xe8] sm:$0xff] %vm171_vm1, %v9699_v23  ;;  %v3685_v27 = vpop.f32.mrb[29].mxu0  ;;  %v3851_v60 = vsel %vm171_vm1, %v11758_v24, 0.0  ;;  %9753 = vmatprep.subr.msk.mxu1 %vm447_vm0, %v4136_v16  ;;  %9706 = vmatmul.mubr.msk.f32.vlgmr.msra.gmra.mrb[0].mxu1 %vm171_vm1, %v4138_v17 }
 0x335   : > { %v3849_v37 = vsel %vm171_vm1, %v11760_v25, 0.0  ;;  %3766 = vst.msk [vmem:[#allocation3 + $0xe0] sm:$0xff] %vm171_vm1, %v3685_v27  ;;  %9754 = vmatpush3.msk.msra.mxu1 %vm447_vm0, %v4136_v16 }
 0x336   : > { %v3850_v38 = vadd.f32 %v3849_v37, %v3848_v26 }
 0x337   : > { %v9702_v61 = vpop.f32.mrb[30].mxu0  ;;  %v11768_v62 = vld [vmem:[#allocation3 + $0xd8] sm:$0xff] }
 0x338   : > { %v11770_v41 = vld [vmem:[#allocation3 + $0xd0] sm:$0xff]  ;;  %v3852_v39 = vadd.f32 %v3851_v60, %v3850_v38  ;;  %3769 = vst.msk [vmem:[#allocation3 + $0xf8] sm:$0xff] %vm171_vm1, %v9702_v61  ;;  %v3695_v40 = vpop.f32.mrb[31].mxu0  ;;  %v3855_v3 = vsel %vm171_vm1, %v11768_v62, 0.0 }
 0x339   : > { %v3853_v0 = vsel %vm171_vm1, %v11770_v41, 0.0  ;;  %3768 = vst.msk [vmem:[#allocation3 + $0xf0] sm:$0xff] %vm171_vm1, %v3695_v40 }
 0x33a   : > { %v3854_v1 = vadd.f32 %v3853_v0, %v3852_v39 }
 0x33b   : > { %v11778_v4 = vld [vmem:[#allocation3 + $0xe8] sm:$0xff] }
 0x33c   : > { %v11780_v33 = vld [vmem:[#allocation3 + $0xe0] sm:$0xff]  ;;  %v3856_v34 = vadd.f32 %v3855_v3, %v3854_v1  ;;  %v3859_v45 = vsel %vm171_vm1, %v11778_v4, 0.0 }
 0x33d   : > { %v3857_v36 = vsel %vm171_vm1, %v11780_v33, 0.0 }
 0x33e   : > { %v3858_v44 = vadd.f32 %v3857_v36, %v3856_v34 }
 0x33f   : > { %v11786_v48 = vld [vmem:[#allocation3 + $0xf8] sm:$0xff] }
 0x340   : > { %v11788_v51 = vld [vmem:[#allocation3 + $0xf0] sm:$0xff]  ;;  %v3860_v52 = vadd.f32 %v3859_v45, %v3858_v44  ;;  %v3863_v57 = vsel %vm171_vm1, %v11786_v48, 0.0 }
 0x341   : > { %v3861_v55 = vsel %vm171_vm1, %v11788_v51, 0.0 }
 0x342   : > { %v3862_v56 = vadd.f32 %v3861_v55, %v3860_v52 }
 0x344   : > { %v3864_v58 = vadd.f32 %v3863_v57, %v3862_v56 }
 0x346   : > { %v3865_v43 = vrot.slane %v3864_v58, 4 }
 0x348   : > { %v3866_v8 = vadd.f32 %v3865_v43, %v3864_v58 }
 0x34a   : > { %v3867_v9 = vrot.slane %v3866_v8, 2 }
 0x34c   : > { %v3868_v10 = vadd.f32 %v3867_v9, %v3866_v8 }
 0x34e   : > { %v3869_v18 = vrot.slane %v3868_v10, 1 }
 0x350   : > { %v3870_v19 = vadd.f32 %v3869_v18, %v3868_v10 }
 0x352   : > { %v11806_v22 = vmul.f32 0.00390625, %v3870_v19 }
 0x354   : > { %v11810_v23 = vsub.f32 %v11640_v30, %v11806_v22  ;;  %v11814_v26 = vsub.f32 %v11638_v28, %v11806_v22  ;;  %v11818_v27 = vsub.f32 %v11650_v47, %v11806_v22  ;;  %v11822_v37 = vsub.f32 %v11648_v46, %v11806_v22 }
 0x355   : > { %v11830_v30 = vsub.f32 %v11660_v54, %v11806_v22  ;;  %v11836_v47 = vsub.f32 %v11658_v53, %v11806_v22  ;;  %v11844_v0 = vsub.f32 %v11670_v35, %v11806_v22  ;;  %v11851_v53 = vsub.f32 %v11668_v7, %v11806_v22 }
 0x356   : > { %v3904_v38 = vmul.f32 %v11810_v23, %v11810_v23  ;;  %v3905_v60 = vmul.f32 %v11814_v26, %v11814_v26  ;;  %v3906_v28 = vmul.f32 %v11818_v27, %v11818_v27  ;;  %v3907_v46 = vmul.f32 %v11822_v37, %v11822_v37 }
 0x357   : > { %v3908_v54 = vmul.f32 %v11830_v30, %v11830_v30  ;;  %v3909_v34 = vmul.f32 %v11836_v47, %v11836_v47  ;;  %v11858_v35 = vsub.f32 %v11680_v13, %v11806_v22  ;;  %v3910_v45 = vmul.f32 %v11844_v0, %v11844_v0 }
 0x358   : > { %v3936_v61 = vsel %vm171_vm1, %v3904_v38, 0.0  ;;  %v3937_v39 = vsel %vm171_vm1, %v3905_v60, 0.0  ;;  %v3939_v1 = vsel %vm171_vm1, %v3906_v28, 0.0  ;;  %v3941_v36 = vsel %vm171_vm1, %v3907_v46, 0.0 }
 0x359   : > { %v3938_v40 = vadd.f32 %v3937_v39, %v3936_v61  ;;  %v3943_v52 = vsel %vm171_vm1, %v3908_v54, 0.0  ;;  %v11865_v7 = vsub.f32 %v11678_v12, %v11806_v22  ;;  %v3911_v56 = vmul.f32 %v11851_v53, %v11851_v53 }
 0x35a   : > { %v3945_v57 = vsel %vm171_vm1, %v3909_v34, 0.0  ;;  %v11872_v13 = vsub.f32 %v11690_v21, %v11806_v22  ;;  %v3912_v43 = vmul.f32 %v11858_v35, %v11858_v35  ;;  %v3947_v8 = vsel %vm171_vm1, %v3910_v45, 0.0 }
 0x35b   : > { %v3940_v3 = vadd.f32 %v3939_v1, %v3938_v40  ;;  %v11879_v12 = vsub.f32 %v11688_v20, %v11806_v22  ;;  %v3913_v10 = vmul.f32 %v11865_v7, %v11865_v7  ;;  %v3949_v6 = vsel %vm171_vm1, %v3911_v56, 0.0 }
 0x35c   : > { %v11886_v21 = vsub.f32 %v11700_v32, %v11806_v22  ;;  %v3914_v16 = vmul.f32 %v11872_v13, %v11872_v13  ;;  %v3951_v17 = vsel %vm171_vm1, %v3912_v43, 0.0  ;;  %v11893_v20 = vsub.f32 %v11698_v31, %v11806_v22 }
 0x35d   : > { %v3942_v44 = vadd.f32 %v3941_v36, %v3940_v3  ;;  %v3915_v19 = vmul.f32 %v11879_v12, %v11879_v12  ;;  %v3953_v38 = vsel %vm171_vm1, %v3913_v10, 0.0  ;;  %v11900_v32 = vsub.f32 %v11710_v2, %v11806_v22 }
 0x35e   : > { %v3916_v28 = vmul.f32 %v11886_v21, %v11886_v21  ;;  %v3955_v46 = vsel %vm171_vm1, %v3914_v16, 0.0  ;;  %v11907_v31 = vsub.f32 %v11708_v42, %v11806_v22  ;;  %v3917_v39 = vmul.f32 %v11893_v20, %v11893_v20 }
 0x35f   : > { %v3944_v55 = vadd.f32 %v3943_v52, %v3942_v44  ;;  %v3957_v40 = vsel %vm171_vm1, %v3915_v19, 0.0  ;;  %v11914_v2 = vsub.f32 %v11720_v29, %v11806_v22  ;;  %v3918_v1 = vmul.f32 %v11900_v32, %v11900_v32 }
 0x360   : > { %v3959_v3 = vsel %vm171_vm1, %v3916_v28, 0.0  ;;  %v11921_v42 = vsub.f32 %v11718_v5, %v11806_v22  ;;  %v3919_v36 = vmul.f32 %v11907_v31, %v11907_v31  ;;  %v3961_v44 = vsel %vm171_vm1, %v3917_v39, 0.0 }
 0x361   : > { %v3946_v58 = vadd.f32 %v3945_v57, %v3944_v55  ;;  %v11928_v29 = vsub.f32 %v11730_v50, %v11806_v22  ;;  %v3920_v52 = vmul.f32 %v11914_v2, %v11914_v2  ;;  %v3963_v55 = vsel %vm171_vm1, %v3918_v1, 0.0 }
 0x362   : > { %v11935_v5 = vsub.f32 %v11728_v49, %v11806_v22  ;;  %v3921_v57 = vmul.f32 %v11921_v42, %v11921_v42  ;;  %v11942_v50 = vsub.f32 %v11740_v63, %v11806_v22  ;;  %v11949_v49 = vsub.f32 %v11738_v59, %v11806_v22 }
 0x363   : > { %v3948_v9 = vadd.f32 %v3947_v8, %v3946_v58  ;;  %v3965_v58 = vsel %vm171_vm1, %v3919_v36, 0.0  ;;  %v3922_v8 = vmul.f32 %v11928_v29, %v11928_v29  ;;  %v11956_v63 = vsub.f32 %v11750_v15, %v11806_v22 }
 0x364   : > { %v11963_v59 = vsub.f32 %v11748_v14, %v11806_v22  ;;  %v11970_v15 = vsub.f32 %v11760_v25, %v11806_v22  ;;  %v11978_v14 = vld [vmem:[%s13485_s2 + $0x8] sm:$0xf] }
 0x365   : > { %v3950_v11 = vadd.f32 %v3949_v6, %v3948_v9  ;;  %v3967_v9 = vsel %vm171_vm1, %v3920_v52, 0.0  ;;  %v3923_v6 = vmul.f32 %v11935_v5, %v11935_v5  ;;  %9803 = vmatprep.subr.msk.mxu1 %vm447_vm0, %v11978_v14 }
 0x366   : > { %v3927_v25 = vmul.f32 %v11963_v59, %v11963_v59 }
 0x367   : > { %v3952_v18 = vadd.f32 %v3951_v17, %v3950_v11  ;;  %v3969_v11 = vsel %vm171_vm1, %v3921_v57, 0.0  ;;  %v3924_v17 = vmul.f32 %v11942_v50, %v11942_v50 }
 0x368   : > { %v3981_v52 = vsel %vm171_vm1, %v3927_v25, 0.0 }
 0x369   : > { %v3954_v60 = vadd.f32 %v3953_v38, %v3952_v18  ;;  %v3971_v18 = vsel %vm171_vm1, %v3922_v8, 0.0  ;;  %v3925_v38 = vmul.f32 %v11949_v49, %v11949_v49 }
 0x36b   : > { %v3956_v61 = vadd.f32 %v3955_v46, %v3954_v60  ;;  %v3973_v60 = vsel %vm171_vm1, %v3923_v6, 0.0  ;;  %v3926_v46 = vmul.f32 %v11956_v63, %v11956_v63 }
 0x36d   : > { %v3958_v54 = vadd.f32 %v3957_v40, %v3956_v61  ;;  %v3975_v61 = vsel %vm171_vm1, %v3924_v17, 0.0  ;;  %v11984_v40 = vsub.f32 %v11758_v24, %v11806_v22  ;;  %v3979_v36 = vsel %vm171_vm1, %v3926_v46, 0.0 }
 0x36e   : > { %v11998_v24 = vsub.f32 %v11768_v62, %v11806_v22  ;;  %v12012_v62 = vsub.f32 %v11778_v4, %v11806_v22 }
 0x36f   : > { %v3960_v34 = vadd.f32 %v3959_v3, %v3958_v54  ;;  %v3977_v54 = vsel %vm171_vm1, %v3925_v38, 0.0  ;;  %v11991_v3 = vsub.f32 %v11770_v41, %v11806_v22  ;;  %v12005_v41 = vsub.f32 %v11780_v33, %v11806_v22 }
 0x370   : > { %v3902_v33 = vsub.f32 %v11788_v51, %v11806_v22  ;;  %v3933_v4 = vmul.f32 %v12012_v62, %v12012_v62 }
 0x371   : > { %v3962_v45 = vadd.f32 %v3961_v44, %v3960_v34  ;;  %v3928_v34 = vmul.f32 %v11970_v15, %v11970_v15 }
 0x373   : > { %v3964_v56 = vadd.f32 %v3963_v55, %v3962_v45  ;;  %v3929_v45 = vmul.f32 %v11984_v40, %v11984_v40  ;;  %v3983_v57 = vsel %vm171_vm1, %v3928_v34, 0.0 }
 0x375   : > { %v3966_v43 = vadd.f32 %v3965_v58, %v3964_v56  ;;  %v3930_v56 = vmul.f32 %v11991_v3, %v11991_v3  ;;  %v3985_v8 = vsel %vm171_vm1, %v3929_v45, 0.0 }
 0x377   : > { %v3968_v10 = vadd.f32 %v3967_v9, %v3966_v43  ;;  %v3931_v43 = vmul.f32 %v11998_v24, %v11998_v24  ;;  %v3987_v6 = vsel %vm171_vm1, %v3930_v56, 0.0 }
 0x379   : > { %v3970_v16 = vadd.f32 %v3969_v11, %v3968_v10  ;;  %v3932_v10 = vmul.f32 %v12005_v41, %v12005_v41  ;;  %v3989_v17 = vsel %vm171_vm1, %v3931_v43, 0.0 }
 0x37b   : > { %v3972_v19 = vadd.f32 %v3971_v18, %v3970_v16  ;;  %v3903_v16 = vsub.f32 %v11786_v48, %v11806_v22  ;;  %v3991_v38 = vsel %vm171_vm1, %v3932_v10, 0.0 }
 0x37d   : > { %v3974_v28 = vadd.f32 %v3973_v60, %v3972_v19  ;;  %v3934_v19 = vmul.f32 %v3902_v33, %v3902_v33  ;;  %v3935_v51 = vmul.f32 %v3903_v16, %v3903_v16 }
 0x37f   : > { %v3976_v39 = vadd.f32 %v3975_v61, %v3974_v28  ;;  %v3993_v28 = vsel %vm171_vm1, %v3933_v4, 0.0  ;;  %v3995_v61 = vsel %vm171_vm1, %v3934_v19, 0.0  ;;  %v3997_v25 = vsel %vm171_vm1, %v3935_v51, 0.0 }
 0x381   : > { %v3978_v1 = vadd.f32 %v3977_v54, %v3976_v39 }
 0x383   : > { %v3980_v44 = vadd.f32 %v3979_v36, %v3978_v1 }
 0x385   : > { %v3982_v55 = vadd.f32 %v3981_v52, %v3980_v44 }
 0x387   : > { %v3984_v58 = vadd.f32 %v3983_v57, %v3982_v55 }
 0x389   : > { %v3986_v9 = vadd.f32 %v3985_v8, %v3984_v58 }
 0x38b   : > { %v3988_v11 = vadd.f32 %v3987_v6, %v3986_v9 }
 0x38d   : > { %v3990_v18 = vadd.f32 %v3989_v17, %v3988_v11 }
 0x38f   : > { %v3992_v60 = vadd.f32 %v3991_v38, %v3990_v18 }
 0x391   : > { %v3994_v46 = vadd.f32 %v3993_v28, %v3992_v60 }
 0x393   : > { %v3996_v39 = vadd.f32 %v3995_v61, %v3994_v46 }
 0x395   : > { %v3998_v48 = vadd.f32 %v3997_v25, %v3996_v39 }
 0x397   : > { %v3999_v22 = vrot.slane %v3998_v48, 4 }
 0x399   : > { %v4000_v54 = vadd.f32 %v3999_v22, %v3998_v48 }
 0x39b   : > { %v4001_v1 = vrot.slane %v4000_v54, 2 }
 0x39d   : > { %v4002_v34 = vadd.f32 %v4001_v1, %v4000_v54 }
 0x39f   : > { %v4003_v36 = vrot.slane %v4002_v34, 1 }
 0x3a1   : > { %v4004_v44 = vadd.f32 %v4003_v36, %v4002_v34 }
 0x3a3   : > { %v4005_v45 = vmul.f32 0.00390625, %v4004_v44 }
 0x3a5   : > { %v4006_v52 = vadd.f32 1e-05, %v4005_v45 }
 0x3a7   : > { %10674 = vrsqrt.f32 %v4006_v52 }
 0x3b1   : > { %v10675_v55 = vpop.eup %10674 }
 0x3b2   : > { %v4038_v56 = vmul.f32 %v10675_v55, %v3902_v33  ;;  %v4008_v57 = vmul.f32 %v10675_v55, %v11810_v23  ;;  %v4009_v58 = vmul.f32 %v10675_v55, %v11814_v26  ;;  %v4010_v43 = vmul.f32 %v10675_v55, %v11818_v27 }
 0x3b3   : > { %v4011_v8 = vmul.f32 %v10675_v55, %v11822_v37  ;;  %v4012_v9 = vmul.f32 %v10675_v55, %v11830_v30  ;;  %v4013_v10 = vmul.f32 %v10675_v55, %v11836_v47  ;;  %v4014_v6 = vmul.f32 %v10675_v55, %v11844_v0 }
 0x3b4   : > { %v4070_v11 = vmax.f32 %v4038_v56, 0.0  ;;  %v4015_v4 = vmul.f32 %v10675_v55, %v11851_v53  ;;  %v4016_v17 = vmul.f32 %v10675_v55, %v11858_v35  ;;  %v4017_v33 = vmul.f32 %v10675_v55, %v11865_v7 }
 0x3b5   : > { %v4018_v23 = vmul.f32 %v10675_v55, %v11872_v13  ;;  %v4019_v26 = vmul.f32 %v10675_v55, %v11879_v12  ;;  %v4020_v27 = vmul.f32 %v10675_v55, %v11886_v21  ;;  %v4021_v37 = vmul.f32 %v10675_v55, %v11893_v20 }
 0x3b6   : > { %v4022_v30 = vmul.f32 %v10675_v55, %v11900_v32  ;;  %v4023_v47 = vmul.f32 %v10675_v55, %v11907_v31  ;;  %v4024_v0 = vmul.f32 %v10675_v55, %v11914_v2  ;;  %v4025_v53 = vmul.f32 %v10675_v55, %v11921_v42  ;;  %4102 = vst.msk [vmem:[#allocation2 + $0x181] sm:$0xff] %vm171_vm1, %v4070_v11 }
 0x3b7   : > { %v4026_v35 = vmul.f32 %v10675_v55, %v11928_v29  ;;  %v12052_v7 = vmul.f32 %v10675_v55, %v11935_v5  ;;  %v12055_v13 = vmul.f32 %v10675_v55, %v11942_v50  ;;  %v12058_v12 = vmul.f32 %v10675_v55, %v11949_v49 }
 0x3b8   : > { %v12061_v21 = vmul.f32 %v10675_v55, %v11956_v63  ;;  %v12064_v20 = vmul.f32 %v10675_v55, %v11963_v59  ;;  %v12067_v32 = vmul.f32 %v10675_v55, %v11970_v15  ;;  %v12070_v31 = vmul.f32 %v10675_v55, %v11984_v40 }
 0x3b9   : > { %v12073_v2 = vmul.f32 %v10675_v55, %v11991_v3  ;;  %v12076_v42 = vmul.f32 %v10675_v55, %v11998_v24  ;;  %v12079_v29 = vmul.f32 %v10675_v55, %v12005_v41  ;;  %v12082_v5 = vmul.f32 %v10675_v55, %v12012_v62 }
 0x3ba   : > { %v12084_v50 = vmul.f32 %v10675_v55, %v3903_v16  ;;  %v4040_v49 = vmax.f32 %v4008_v57, 0.0  ;;  %v4041_v63 = vmax.f32 %v4009_v58, 0.0  ;;  %v4042_v59 = vmax.f32 %v4010_v43, 0.0 }
 0x3bb   : > { %v4043_v15 = vmax.f32 %v4011_v8, 0.0  ;;  %v4044_v40 = vmax.f32 %v4012_v9, 0.0  ;;  %v4045_v18 = vmax.f32 %v4013_v10, 0.0  ;;  %v4046_v19 = vmax.f32 %v4014_v6, 0.0 }
 0x3bc   : > { %v4047_v3 = vmax.f32 %v4015_v4, 0.0  ;;  %v4048_v38 = vmax.f32 %v4016_v17, 0.0  ;;  %v4049_v60 = vmax.f32 %v4017_v33, 0.0  ;;  %v4050_v24 = vmax.f32 %v4018_v23, 0.0  ;;  %4072 = vst.msk [vmem:[#allocation2 + $0x19] sm:$0xff] %vm171_vm1, %v4040_v49  ;;  %4073 = vst.msk [vmem:[#allocation2 + $0x21] sm:$0xff] %vm171_vm1, %v4041_v63 }
 0x3bd   : > { %4074 = vst.msk [vmem:[#allocation2 + $0x31] sm:$0xff] %vm171_vm1, %v4042_v59  ;;  %v4051_v41 = vmax.f32 %v4019_v26, 0.0  ;;  %v4052_v62 = vmax.f32 %v4020_v27, 0.0  ;;  %v4053_v16 = vmax.f32 %v4021_v37, 0.0  ;;  %v4054_v51 = vmax.f32 %v4022_v30, 0.0  ;;  %4075 = vst.msk [vmem:[#allocation2 + $0x39] sm:$0xff] %vm171_vm1, %v4043_v15 }
 0x3be   : > { %4076 = vst.msk [vmem:[#allocation2 + $0x49] sm:$0xff] %vm171_vm1, %v4044_v40  ;;  %4077 = vst.msk [vmem:[#allocation2 + $0x51] sm:$0xff] %vm171_vm1, %v4045_v18  ;;  %v4055_v28 = vmax.f32 %v4023_v47, 0.0  ;;  %v4056_v46 = vmax.f32 %v4024_v0, 0.0  ;;  %v4057_v61 = vmax.f32 %v4025_v53, 0.0  ;;  %v4058_v39 = vmax.f32 %v4026_v35, 0.0 }
 0x3bf   : > { %4078 = vst.msk [vmem:[#allocation2 + $0x61] sm:$0xff] %vm171_vm1, %v4046_v19  ;;  %4079 = vst.msk [vmem:[#allocation2 + $0x69] sm:$0xff] %vm171_vm1, %v4047_v3  ;;  %v4059_v25 = vmax.f32 %v12052_v7, 0.0  ;;  %v4060_v48 = vmax.f32 %v12055_v13, 0.0  ;;  %v4061_v22 = vmax.f32 %v12058_v12, 0.0  ;;  %v4062_v54 = vmax.f32 %v12061_v21, 0.0 }
 0x3c0   : > { %4080 = vst.msk [vmem:[#allocation2 + $0x79] sm:$0xff] %vm171_vm1, %v4048_v38  ;;  %4081 = vst.msk [vmem:[#allocation2 + $0x81] sm:$0xff] %vm171_vm1, %v4049_v60  ;;  %v4063_v1 = vmax.f32 %v12064_v20, 0.0  ;;  %v4064_v34 = vmax.f32 %v12067_v32, 0.0  ;;  %v4065_v36 = vmax.f32 %v12070_v31, 0.0  ;;  %v4066_v44 = vmax.f32 %v12073_v2, 0.0 }
 0x3c1   : > { %4082 = vst.msk [vmem:[#allocation2 + $0x91] sm:$0xff] %vm171_vm1, %v4050_v24  ;;  %4083 = vst.msk [vmem:[#allocation2 + $0x99] sm:$0xff] %vm171_vm1, %v4051_v41  ;;  %v4067_v45 = vmax.f32 %v12076_v42, 0.0  ;;  %v4068_v52 = vmax.f32 %v12079_v29, 0.0  ;;  %v4069_v55 = vmax.f32 %v12082_v5, 0.0  ;;  %v4071_v56 = vmax.f32 %v12084_v50, 0.0 }
 0x3c2   : > { %4084 = vst.msk [vmem:[#allocation2 + $0xa9] sm:$0xff] %vm171_vm1, %v4052_v62  ;;  %4085 = vst.msk [vmem:[#allocation2 + $0xb1] sm:$0xff] %vm171_vm1, %v4053_v16  ;;  %v4104_v29 = vld [vmem:[#allocation2] sm:$0xff]  ;;  %v4105_v50 = vld [vmem:[#allocation2 + $0x8] sm:$0xff] }
 0x3c3   : > { %4086 = vst.msk [vmem:[#allocation2 + $0xc1] sm:$0xff] %vm171_vm1, %v4054_v51  ;;  %4087 = vst.msk [vmem:[#allocation2 + $0xc9] sm:$0xff] %vm171_vm1, %v4055_v28  ;;  %v12129_v57 = vld [vmem:[#allocation2 + $0x19] sm:$0xff]  ;;  %v12131_v58 = vld [vmem:[#allocation2 + $0x21] sm:$0xff] }
 0x3c4   : > { %4088 = vst.msk [vmem:[#allocation2 + $0xd9] sm:$0xff] %vm171_vm1, %v4056_v46  ;;  %4089 = vst.msk [vmem:[#allocation2 + $0xe1] sm:$0xff] %vm171_vm1, %v4057_v61  ;;  %9708 = vmatprep.mubr.msk.f32.mxu1 %vm171_vm1, %v12129_v57  ;;  %v12137_v43 = vld [vmem:[#allocation2 + $0x31] sm:$0xff]  ;;  %v12141_v8 = vld [vmem:[#allocation2 + $0x39] sm:$0xff] }
 0x3c5   : > { %4090 = vst.msk [vmem:[#allocation2 + $0xf1] sm:$0xff] %vm171_vm1, %v4058_v39  ;;  %4091 = vst.msk [vmem:[#allocation2 + $0xf9] sm:$0xff] %vm171_vm1, %v4059_v25  ;;  %9709 = vmatmul.mubr.msk.f32.gmra.mrb[2].mxu1 %vm171_vm1, %v12131_v58  ;;  %v12145_v9 = vld [vmem:[#allocation2 + $0x49] sm:$0xff]  ;;  %v12149_v10 = vld [vmem:[#allocation2 + $0x51] sm:$0xff] }
 0x3c6   : > { %4092 = vst.msk [vmem:[#allocation2 + $0x109] sm:$0xff] %vm171_vm1, %v4060_v48  ;;  %4093 = vst.msk [vmem:[#allocation2 + $0x111] sm:$0xff] %vm171_vm1, %v4061_v22  ;;  %9711 = vmatprep.mubr.msk.f32.mxu1 %vm171_vm1, %v12137_v43  ;;  %v12153_v6 = vld [vmem:[#allocation2 + $0x61] sm:$0xff]  ;;  %v12157_v11 = vld [vmem:[#allocation2 + $0x69] sm:$0xff] }
 0x3c7   : > { %4094 = vst.msk [vmem:[#allocation2 + $0x121] sm:$0xff] %vm171_vm1, %v4062_v54  ;;  %4095 = vst.msk [vmem:[#allocation2 + $0x129] sm:$0xff] %vm171_vm1, %v4063_v1  ;;  %v12161_v4 = vld [vmem:[#allocation2 + $0x79] sm:$0xff]  ;;  %v12165_v17 = vld [vmem:[#allocation2 + $0x81] sm:$0xff] }
 0x3c8   : > { %4096 = vst.msk [vmem:[#allocation2 + $0x139] sm:$0xff] %vm171_vm1, %v4064_v34  ;;  %4097 = vst.msk [vmem:[#allocation2 + $0x141] sm:$0xff] %vm171_vm1, %v4065_v36  ;;  %v12169_v33 = vld [vmem:[#allocation2 + $0x91] sm:$0xff]  ;;  %v12173_v23 = vld [vmem:[#allocation2 + $0x99] sm:$0xff] }
 0x3c9   : > { %4098 = vst.msk [vmem:[#allocation2 + $0x151] sm:$0xff] %vm171_vm1, %v4066_v44  ;;  %4099 = vst.msk [vmem:[#allocation2 + $0x159] sm:$0xff] %vm171_vm1, %v4067_v45  ;;  %9712 = vmatmul.mubr.msk.f32.gmra.mrb[4].mxu1 %vm171_vm1, %v12141_v8  ;;  %v12177_v26 = vld [vmem:[#allocation2 + $0xa9] sm:$0xff]  ;;  %v12181_v27 = vld [vmem:[#allocation2 + $0xb1] sm:$0xff] }
 0x3ca   : > { %4100 = vst.msk [vmem:[#allocation2 + $0x169] sm:$0xff] %vm171_vm1, %v4068_v52  ;;  %4101 = vst.msk [vmem:[#allocation2 + $0x171] sm:$0xff] %vm171_vm1, %v4069_v55  ;;  %9714 = vmatprep.mubr.msk.f32.mxu1 %vm171_vm1, %v12145_v9  ;;  %v12185_v37 = vld [vmem:[#allocation2 + $0xc1] sm:$0xff]  ;;  %v12189_v30 = vld [vmem:[#allocation2 + $0xc9] sm:$0xff] }
 0x3cb   : > { %4103 = vst.msk [vmem:[#allocation2 + $0x189] sm:$0xff] %vm171_vm1, %v4071_v56  ;;  %v12193_v47 = vld [vmem:[#allocation2 + $0xd9] sm:$0xff]  ;;  %v12197_v0 = vld [vmem:[#allocation2 + $0xe1] sm:$0xff]  ;;  %v12253_v49 = vld [vmem:[%s13485_s2 + $0xc] sm:$0xf] }
 0x3cc   : > { %v12201_v53 = vld [vmem:[#allocation2 + $0xf1] sm:$0xff]  ;;  %v12205_v35 = vld [vmem:[#allocation2 + $0xf9] sm:$0xff]  ;;  %v12288_v3 = vld [vmem:[#allocation2 + $0x68] sm:$0xff] }
 0x3cd   : > { %9715 = vmatmul.mubr.msk.f32.gmra.mrb[6].mxu1 %vm171_vm1, %v12149_v10  ;;  %v12209_v7 = vld [vmem:[#allocation2 + $0x109] sm:$0xff]  ;;  %v12213_v13 = vld [vmem:[#allocation2 + $0x111] sm:$0xff]  ;;  %v12264_v59 = vld [vmem:[#allocation2 + $0x20] sm:$0xff] }
 0x3ce   : > { %9717 = vmatprep.mubr.msk.f32.mxu1 %vm171_vm1, %v12153_v6  ;;  %v12217_v12 = vld [vmem:[#allocation2 + $0x121] sm:$0xff]  ;;  %v12221_v21 = vld [vmem:[#allocation2 + $0x129] sm:$0xff]  ;;  %v12256_v63 = vld [vmem:[#allocation2 + $0x18] sm:$0xff] }
 0x3cf   : > { %13668 = vst [vmem:[#allocation4_spill] sm:$0xff] %v12221_v21  ;;  %v12225_v20 = vld [vmem:[#allocation2 + $0x139] sm:$0xff]  ;;  %v12229_v32 = vld [vmem:[#allocation2 + $0x141] sm:$0xff]  ;;  %v12268_v15 = vld [vmem:[#allocation2 + $0x30] sm:$0xff] }
 0x3d0   : > { %13669 = vst [vmem:[#allocation5_spill] sm:$0xff] %v12225_v20  ;;  %13670 = vst [vmem:[#allocation6_spill] sm:$0xff] %v12229_v32  ;;  %v12233_v31 = vld [vmem:[#allocation2 + $0x151] sm:$0xff]  ;;  %v12237_v2 = vld [vmem:[#allocation2 + $0x159] sm:$0xff] }
 0x3d1   : > { %9718 = vmatmul.mubr.msk.f32.gmra.mrb[8].mxu1 %vm171_vm1, %v12157_v11  ;;  %13671 = vst [vmem:[#allocation7_spill] sm:$0xff] %v12233_v31  ;;  %13672 = vst [vmem:[#allocation8_spill] sm:$0xff] %v12237_v2  ;;  %v12241_v42 = vld [vmem:[#allocation2 + $0x169] sm:$0xff]  ;;  %v12245_v5 = vld [vmem:[#allocation2 + $0x171] sm:$0xff] }
 0x3d2   : > { %9720 = vmatprep.mubr.msk.f32.mxu1 %vm171_vm1, %v12161_v4  ;;  %13673 = vst [vmem:[#allocation9_spill] sm:$0xff] %v12241_v42  ;;  %13674 = vst [vmem:[#allocation10_spill] sm:$0xff] %v12245_v5  ;;  %v12272_v40 = vld [vmem:[#allocation2 + $0x38] sm:$0xff]  ;;  %v12280_v18 = vld [vmem:[#allocation2 + $0x50] sm:$0xff] }
 0x3d3   : > { %v12284_v19 = vld [vmem:[#allocation2 + $0x60] sm:$0xff]  ;;  %v12292_v38 = vld [vmem:[#allocation2 + $0x78] sm:$0xff]  ;;  %v12300_v24 = vld [vmem:[#allocation2 + $0x90] sm:$0xff] }
 0x3d4   : > { %v12296_v60 = vld [vmem:[#allocation2 + $0x80] sm:$0xff]  ;;  %v12304_v41 = vld [vmem:[#allocation2 + $0x98] sm:$0xff]  ;;  %v12308_v62 = vld [vmem:[#allocation2 + $0xa8] sm:$0xff] }
 0x3d5   : > { %9721 = vmatmul.mubr.msk.f32.gmra.mrb[10].mxu1 %vm171_vm1, %v12165_v17  ;;  %v12312_v16 = vld [vmem:[#allocation2 + $0xb0] sm:$0xff]  ;;  %v12316_v51 = vld [vmem:[#allocation2 + $0xc0] sm:$0xff]  ;;  %v12320_v28 = vld [vmem:[#allocation2 + $0xc8] sm:$0xff] }
 0x3d6   : > { %9723 = vmatprep.mubr.msk.f32.mxu1 %vm171_vm1, %v12169_v33  ;;  %v12324_v46 = vld [vmem:[#allocation2 + $0xd8] sm:$0xff]  ;;  %v12328_v61 = vld [vmem:[#allocation2 + $0xe0] sm:$0xff]  ;;  %v12332_v39 = vld [vmem:[#allocation2 + $0xf0] sm:$0xff] }
 0x3d7   : > { %v12336_v25 = vld [vmem:[#allocation2 + $0xf8] sm:$0xff]  ;;  %v12340_v48 = vld [vmem:[#allocation2 + $0x108] sm:$0xff]  ;;  %v12344_v22 = vld [vmem:[#allocation2 + $0x110] sm:$0xff] }
 0x3d8   : > { %v12348_v54 = vld [vmem:[#allocation2 + $0x120] sm:$0xff]  ;;  %v12352_v1 = vld [vmem:[#allocation2 + $0x128] sm:$0xff]  ;;  %v12356_v34 = vld [vmem:[#allocation2 + $0x138] sm:$0xff] }
 0x3d9   : > { %9724 = vmatmul.mubr.msk.f32.gmra.mrb[12].mxu1 %vm171_vm1, %v12173_v23  ;;  %v12360_v36 = vld [vmem:[#allocation2 + $0x140] sm:$0xff]  ;;  %v12364_v44 = vld [vmem:[#allocation2 + $0x150] sm:$0xff]  ;;  %v12368_v45 = vld [vmem:[#allocation2 + $0x158] sm:$0xff] }
 0x3da   : > { %9726 = vmatprep.mubr.msk.f32.mxu1 %vm171_vm1, %v12177_v26  ;;  %v12372_v52 = vld [vmem:[#allocation2 + $0x168] sm:$0xff]  ;;  %v12376_v56 = vld [vmem:[#allocation2 + $0x170] sm:$0xff] }
 0x3db   : > { %v4819_v55 = vld [vmem:[#allocation2 + $0x2] sm:$0xff] }
 0x3dd   : > { %9727 = vmatmul.mubr.msk.f32.gmra.mrb[14].mxu1 %vm171_vm1, %v12181_v27 }
 0x3de   : > { %9729 = vmatprep.mubr.msk.f32.mxu1 %vm171_vm1, %v12185_v37 }
 0x3e1   : > { %9730 = vmatmul.mubr.msk.f32.gmra.mrb[16].mxu1 %vm171_vm1, %v12189_v30 }
 0x3e2   : > { %9732 = vmatprep.mubr.msk.f32.mxu1 %vm171_vm1, %v12193_v47 }
 0x3e5   : > { %9733 = vmatmul.mubr.msk.f32.gmra.mrb[18].mxu1 %vm171_vm1, %v12197_v0 }
 0x3e6   : > { %9735 = vmatprep.mubr.msk.f32.mxu1 %vm171_vm1, %v12201_v53 }
 0x3e9   : > { %9736 = vmatmul.mubr.msk.f32.gmra.mrb[20].mxu1 %vm171_vm1, %v12205_v35 }
 0x3ea   : > { %9738 = vmatprep.mubr.msk.f32.mxu1 %vm171_vm1, %v12209_v7 }
 0x3ed   : > { %9739 = vmatmul.mubr.msk.f32.gmra.mrb[22].mxu1 %vm171_vm1, %v12213_v13 }
 0x3ee   : > { %9741 = vmatprep.mubr.msk.f32.mxu1 %vm171_vm1, %v12217_v12 }
 0x3f1   : > { %9742 = vmatmul.mubr.msk.f32.gmra.mrb[24].mxu1 %vm171_vm1, %v12221_v21 }
 0x3f2   : > { %9744 = vmatprep.mubr.msk.f32.mxu1 %vm171_vm1, %v12225_v20 }
 0x3f5   : > { %9745 = vmatmul.mubr.msk.f32.gmra.mrb[26].mxu1 %vm171_vm1, %v12229_v32 }
 0x3f6   : > { %9747 = vmatprep.mubr.msk.f32.mxu1 %vm171_vm1, %v12233_v31 }
 0x3f9   : > { %9748 = vmatmul.mubr.msk.f32.gmra.mrb[28].mxu1 %vm171_vm1, %v12237_v2 }
 0x3fa   : > { %9750 = vmatprep.mubr.msk.f32.mxu1 %vm171_vm1, %v12241_v42  ;;  %v12399_v42 = vld [vmem:[#allocation2 + $0x32] sm:$0xff] }
 0x3fb   : > { %13677 = vst [vmem:[#allocation13_spill] sm:$0xff] %v12399_v42 }
 0x3fd   : > { %9751 = vmatmul.mubr.msk.f32.gmra.mrb[30].mxu1 %vm171_vm1, %v12245_v5  ;;  %v12387_v5 = vld [vmem:[#allocation2 + $0x1a] sm:$0xff] }
 0x3fe   : > { %9755 = vmatprep.mubr.msk.f32.mxu1 %vm171_vm1, %v4104_v29  ;;  %v4820_v29 = vld [vmem:[#allocation2 + $0xa] sm:$0xff]  ;;  %13675 = vst [vmem:[#allocation11_spill] sm:$0xff] %v12387_v5 }
 0x401   : > { %9756 = vmatmul.mubr.msk.f32.vlgmr.msra.gmra.mrb[0].mxu1 %vm171_vm1, %v4105_v50  ;;  %v12384_v50 = vld [vmem:[%s13485_s2 + $0x10] sm:$0xf] }
 0x402   : > { %9804 = vmatpush3.msk.msra.mxu1 %vm447_vm0, %v11978_v14  ;;  %9758 = vmatprep.mubr.msk.f32.mxu1 %vm171_vm1, %v12256_v63  ;;  %v12276_v14 = vld [vmem:[#allocation2 + $0x48] sm:$0xff] }
 0x403   : > { %9853 = vmatprep.subr.msk.mxu1 %vm447_vm0, %v12253_v49 }
 0x405   : > { %9759 = vmatmul.mubr.msk.f32.gmra.mrb[2].mxu1 %vm171_vm1, %v12264_v59 }
 0x406   : > { %9761 = vmatprep.mubr.msk.f32.mxu1 %vm171_vm1, %v12268_v15 }
 0x409   : > { %9762 = vmatmul.mubr.msk.f32.gmra.mrb[4].mxu1 %vm171_vm1, %v12272_v40 }
 0x40a   : > { %9764 = vmatprep.mubr.msk.f32.mxu1 %vm171_vm1, %v12276_v14 }
 0x40d   : > { %9765 = vmatmul.mubr.msk.f32.gmra.mrb[6].mxu1 %vm171_vm1, %v12280_v18 }
 0x40e   : > { %9767 = vmatprep.mubr.msk.f32.mxu1 %vm171_vm1, %v12284_v19 }
 0x411   : > { %9768 = vmatmul.mubr.msk.f32.gmra.mrb[8].mxu1 %vm171_vm1, %v12288_v3 }
 0x412   : > { %9770 = vmatprep.mubr.msk.f32.mxu1 %vm171_vm1, %v12292_v38 }
 0x415   : > { %9771 = vmatmul.mubr.msk.f32.gmra.mrb[10].mxu1 %vm171_vm1, %v12296_v60 }
 0x416   : > { %9773 = vmatprep.mubr.msk.f32.mxu1 %vm171_vm1, %v12300_v24 }
 0x419   : > { %9774 = vmatmul.mubr.msk.f32.gmra.mrb[12].mxu1 %vm171_vm1, %v12304_v41 }
 0x41a   : > { %9776 = vmatprep.mubr.msk.f32.mxu1 %vm171_vm1, %v12308_v62 }
 0x41d   : > { %9777 = vmatmul.mubr.msk.f32.gmra.mrb[14].mxu1 %vm171_vm1, %v12312_v16 }
 0x41e   : > { %9779 = vmatprep.mubr.msk.f32.mxu1 %vm171_vm1, %v12316_v51 }
 0x421   : > { %9780 = vmatmul.mubr.msk.f32.gmra.mrb[16].mxu1 %vm171_vm1, %v12320_v28 }
 0x422   : > { %9782 = vmatprep.mubr.msk.f32.mxu1 %vm171_vm1, %v12324_v46 }
 0x425   : > { %9783 = vmatmul.mubr.msk.f32.gmra.mrb[18].mxu1 %vm171_vm1, %v12328_v61 }
 0x426   : > { %9785 = vmatprep.mubr.msk.f32.mxu1 %vm171_vm1, %v12332_v39 }
 0x429   : > { %9786 = vmatmul.mubr.msk.f32.gmra.mrb[20].mxu1 %vm171_vm1, %v12336_v25 }
 0x42a   : > { %9788 = vmatprep.mubr.msk.f32.mxu1 %vm171_vm1, %v12340_v48 }
 0x42d   : > { %9789 = vmatmul.mubr.msk.f32.gmra.mrb[22].mxu1 %vm171_vm1, %v12344_v22 }
 0x42e   : > { %9791 = vmatprep.mubr.msk.f32.mxu1 %vm171_vm1, %v12348_v54 }
 0x431   : > { %9792 = vmatmul.mubr.msk.f32.gmra.mrb[24].mxu1 %vm171_vm1, %v12352_v1 }
 0x432   : > { %9794 = vmatprep.mubr.msk.f32.mxu1 %vm171_vm1, %v12356_v34 }
 0x435   : > { %9795 = vmatmul.mubr.msk.f32.gmra.mrb[26].mxu1 %vm171_vm1, %v12360_v36 }
 0x436   : > { %9797 = vmatprep.mubr.msk.f32.mxu1 %vm171_vm1, %v12364_v44 }
 0x439   : > { %9798 = vmatmul.mubr.msk.f32.gmra.mrb[28].mxu1 %vm171_vm1, %v12368_v45 }
 0x43a   : > { %9800 = vmatprep.mubr.msk.f32.mxu1 %vm171_vm1, %v12372_v52 }
 0x43d   : > { %9801 = vmatmul.mubr.msk.f32.gmra.mrb[30].mxu1 %vm171_vm1, %v12376_v56 }
 0x43e   : > { %9805 = vmatprep.mubr.msk.f32.mxu1 %vm171_vm1, %v4819_v55  ;;  %v12395_v55 = vld [vmem:[#allocation2 + $0x22] sm:$0xff] }
 0x43f   : > { %13676 = vst [vmem:[#allocation12_spill] sm:$0xff] %v12395_v55 }
 0x441   : > { %9806 = vmatmul.mubr.msk.f32.vlgmr.msra.gmra.mrb[0].mxu1 %vm171_vm1, %v4820_v29  ;;  %v12403_v29 = vld [vmem:[#allocation2 + $0x3a] sm:$0xff] }
 0x442   : > { %9854 = vmatpush3.msk.msra.mxu1 %vm447_vm0, %v12253_v49  ;;  %9808 = vmatprep.mubr.msk.f32.mxu1 %vm171_vm1, %v12387_v5  ;;  %13678 = vst [vmem:[#allocation14_spill] sm:$0xff] %v12403_v29  ;;  %v12407_v49 = vld [vmem:[#allocation2 + $0x4a] sm:$0xff]  ;;  %v12411_v5 = vld [vmem:[#allocation2 + $0x52] sm:$0xff] }
 0x443   : > { %9903 = vmatprep.subr.msk.mxu1 %vm447_vm0, %v12384_v50  ;;  %13679 = vst [vmem:[#allocation15_spill] sm:$0xff] %v12407_v49  ;;  %13680 = vst [vmem:[#allocation16_spill] sm:$0xff] %v12411_v5 }
 0x445   : > { %9809 = vmatmul.mubr.msk.f32.gmra.mrb[2].mxu1 %vm171_vm1, %v12395_v55  ;;  %v12415_v55 = vld [vmem:[#allocation2 + $0x62] sm:$0xff] }
 0x446   : > { %9811 = vmatprep.mubr.msk.f32.mxu1 %vm171_vm1, %v12399_v42  ;;  %13681 = vst [vmem:[#allocation17_spill] sm:$0xff] %v12415_v55  ;;  %v12419_v42 = vld [vmem:[#allocation2 + $0x6a] sm:$0xff] }
 0x447   : > { %13682 = vst [vmem:[#allocation18_spill] sm:$0xff] %v12419_v42 }
 0x449   : > { %9812 = vmatmul.mubr.msk.f32.gmra.mrb[4].mxu1 %vm171_vm1, %v12403_v29  ;;  %v12423_v29 = vld [vmem:[#allocation2 + $0x7a] sm:$0xff] }
 0x44a   : > { %9814 = vmatprep.mubr.msk.f32.mxu1 %vm171_vm1, %v12407_v49  ;;  %13683 = vst [vmem:[#allocation19_spill] sm:$0xff] %v12423_v29  ;;  %v12427_v49 = vld [vmem:[#allocation2 + $0x82] sm:$0xff] }
 0x44b   : > { %13684 = vst [vmem:[#allocation20_spill] sm:$0xff] %v12427_v49 }
 0x44d   : > { %9815 = vmatmul.mubr.msk.f32.gmra.mrb[6].mxu1 %vm171_vm1, %v12411_v5  ;;  %v12431_v5 = vld [vmem:[#allocation2 + $0x92] sm:$0xff] }
 0x44e   : > { %9817 = vmatprep.mubr.msk.f32.mxu1 %vm171_vm1, %v12415_v55  ;;  %13685 = vst [vmem:[#allocation22_spill] sm:$0xff] %v12431_v5  ;;  %v12435_v55 = vld [vmem:[#allocation2 + $0x9a] sm:$0xff] }
 0x44f   : > { %13686 = vst [vmem:[#allocation24_spill] sm:$0xff] %v12435_v55 }
 0x451   : > { %9818 = vmatmul.mubr.msk.f32.gmra.mrb[8].mxu1 %vm171_vm1, %v12419_v42  ;;  %v12439_v42 = vld [vmem:[#allocation2 + $0xaa] sm:$0xff] }
 0x452   : > { %9820 = vmatprep.mubr.msk.f32.mxu1 %vm171_vm1, %v12423_v29  ;;  %13687 = vst [vmem:[#allocation26_spill] sm:$0xff] %v12439_v42  ;;  %v12443_v29 = vld [vmem:[#allocation2 + $0xb2] sm:$0xff] }
 0x453   : > { %13688 = vst [vmem:[#allocation27_spill] sm:$0xff] %v12443_v29 }
 0x455   : > { %9821 = vmatmul.mubr.msk.f32.gmra.mrb[10].mxu1 %vm171_vm1, %v12427_v49  ;;  %v12447_v49 = vld [vmem:[#allocation2 + $0xc2] sm:$0xff] }
 0x456   : > { %9823 = vmatprep.mubr.msk.f32.mxu1 %vm171_vm1, %v12431_v5  ;;  %13689 = vst [vmem:[#allocation29_spill] sm:$0xff] %v12447_v49  ;;  %v12451_v5 = vld [vmem:[#allocation2 + $0xca] sm:$0xff] }
 0x457   : > { %13690 = vst [vmem:[#allocation31_spill] sm:$0xff] %v12451_v5 }
 0x459   : > { %9824 = vmatmul.mubr.msk.f32.gmra.mrb[12].mxu1 %vm171_vm1, %v12435_v55  ;;  %v12455_v55 = vld [vmem:[#allocation2 + $0xda] sm:$0xff] }
 0x45a   : > { %9826 = vmatprep.mubr.msk.f32.mxu1 %vm171_vm1, %v12439_v42  ;;  %13691 = vst [vmem:[#allocation21_spill] sm:$0xff] %v12455_v55  ;;  %v12459_v42 = vld [vmem:[#allocation2 + $0xe2] sm:$0xff] }
 0x45b   : > { %13692 = vst [vmem:[#allocation23_spill] sm:$0xff] %v12459_v42 }
 0x45d   : > { %9827 = vmatmul.mubr.msk.f32.gmra.mrb[14].mxu1 %vm171_vm1, %v12443_v29  ;;  %v12463_v29 = vld [vmem:[#allocation2 + $0xf2] sm:$0xff] }
 0x45e   : > { %9829 = vmatprep.mubr.msk.f32.mxu1 %vm171_vm1, %v12447_v49  ;;  %13693 = vst [vmem:[#allocation25_spill] sm:$0xff] %v12463_v29  ;;  %v12467_v49 = vld [vmem:[#allocation2 + $0xfa] sm:$0xff] }
 0x45f   : > { %13694 = vst [vmem:[#allocation28_spill] sm:$0xff] %v12467_v49 }
 0x461   : > { %9830 = vmatmul.mubr.msk.f32.gmra.mrb[16].mxu1 %vm171_vm1, %v12451_v5  ;;  %v12471_v5 = vld [vmem:[#allocation2 + $0x10a] sm:$0xff] }
 0x462   : > { %9832 = vmatprep.mubr.msk.f32.mxu1 %vm171_vm1, %v12455_v55  ;;  %13695 = vst [vmem:[#allocation30_spill] sm:$0xff] %v12471_v5  ;;  %v12475_v55 = vld [vmem:[#allocation2 + $0x112] sm:$0xff] }
 0x463   : > { %13696 = vst [vmem:[#allocation32_spill] sm:$0xff] %v12475_v55 }
 0x465   : > { %9833 = vmatmul.mubr.msk.f32.gmra.mrb[18].mxu1 %vm171_vm1, %v12459_v42  ;;  %v12479_v42 = vld [vmem:[#allocation2 + $0x122] sm:$0xff] }
 0x466   : > { %9835 = vmatprep.mubr.msk.f32.mxu1 %vm171_vm1, %v12463_v29  ;;  %13697 = vst [vmem:[#allocation33_spill] sm:$0xff] %v12479_v42  ;;  %v12483_v29 = vld [vmem:[#allocation2 + $0x12a] sm:$0xff] }
 0x467   : > { %13698 = vst [vmem:[#allocation34_spill] sm:$0xff] %v12483_v29 }
 0x469   : > { %9836 = vmatmul.mubr.msk.f32.gmra.mrb[20].mxu1 %vm171_vm1, %v12467_v49  ;;  %v12487_v49 = vld [vmem:[#allocation2 + $0x13a] sm:$0xff] }
 0x46a   : > { %9838 = vmatprep.mubr.msk.f32.mxu1 %vm171_vm1, %v12471_v5  ;;  %13699 = vst [vmem:[#allocation35_spill] sm:$0xff] %v12487_v49  ;;  %v12491_v5 = vld [vmem:[#allocation2 + $0x142] sm:$0xff] }
 0x46d   : > { %9839 = vmatmul.mubr.msk.f32.gmra.mrb[22].mxu1 %vm171_vm1, %v12475_v55  ;;  %v12495_v55 = vld [vmem:[#allocation2 + $0x152] sm:$0xff] }
 0x46e   : > { %9841 = vmatprep.mubr.msk.f32.mxu1 %vm171_vm1, %v12479_v42  ;;  %13700 = vst [vmem:[#allocation36_spill] sm:$0xff] %v12495_v55  ;;  %v12499_v42 = vld [vmem:[#allocation2 + $0x15a] sm:$0xff] }
 0x471   : > { %9842 = vmatmul.mubr.msk.f32.gmra.mrb[24].mxu1 %vm171_vm1, %v12483_v29  ;;  %v12503_v29 = vld [vmem:[#allocation2 + $0x16a] sm:$0xff] }
 0x472   : > { %9844 = vmatprep.mubr.msk.f32.mxu1 %vm171_vm1, %v12487_v49  ;;  %13701 = vst [vmem:[#allocation37_spill] sm:$0xff] %v12503_v29  ;;  %v12507_v49 = vld [vmem:[#allocation2 + $0x172] sm:$0xff] }
 0x475   : > { %9845 = vmatmul.mubr.msk.f32.gmra.mrb[26].mxu1 %vm171_vm1, %v12491_v5 }
 0x476   : > { %9847 = vmatprep.mubr.msk.f32.mxu1 %vm171_vm1, %v12495_v55  ;;  %v8519_v55 = vld [vmem:[%s13485_s2 + $0x14] sm:$0xf] }
 0x479   : > { %9848 = vmatmul.mubr.msk.f32.gmra.mrb[28].mxu1 %vm171_vm1, %v12499_v42 }
 0x47a   : > { %9850 = vmatprep.mubr.msk.f32.mxu1 %vm171_vm1, %v12503_v29 }
 0x47d   : > { %9851 = vmatmul.mubr.msk.f32.gmra.mrb[30].mxu1 %vm171_vm1, %v12507_v49 }
 0x47e   : > { %9855 = vmatprep.mubr.msk.f32.mxu1 %vm171_vm1, %v12256_v63  ;;  %v12577_v63 = vld [vmem:[#allocation2 + $0x180] sm:$0xff] }
 0x481   : > { %9856 = vmatmul.mubr.msk.f32.vlgmr.msra.gmra.mrb[0].mxu1 %vm171_vm1, %v12264_v59  ;;  %v12581_v59 = vld [vmem:[#allocation2 + $0x188] sm:$0xff] }
 0x482   : > { %9904 = vmatpush3.msk.msra.mxu1 %vm447_vm0, %v12384_v50  ;;  %9858 = vmatprep.mubr.msk.f32.mxu1 %vm171_vm1, %v12268_v15  ;;  %v8553_v50 = vld [vmem:[%s13485_s2 + $0x18] sm:$0xf] }
 0x483   : > { %9953 = vmatprep.subr.msk.mxu1 %vm447_vm0, %v8519_v55 }
 0x485   : > { %9859 = vmatmul.mubr.msk.f32.gmra.mrb[2].mxu1 %vm171_vm1, %v12272_v40 }
 0x486   : > { %9861 = vmatprep.mubr.msk.f32.mxu1 %vm171_vm1, %v12276_v14 }
 0x489   : > { %9862 = vmatmul.mubr.msk.f32.gmra.mrb[4].mxu1 %vm171_vm1, %v12280_v18 }
 0x48a   : > { %9864 = vmatprep.mubr.msk.f32.mxu1 %vm171_vm1, %v12284_v19 }
 0x48d   : > { %9865 = vmatmul.mubr.msk.f32.gmra.mrb[6].mxu1 %vm171_vm1, %v12288_v3 }
 0x48e   : > { %9867 = vmatprep.mubr.msk.f32.mxu1 %vm171_vm1, %v12292_v38 }
 0x491   : > { %9868 = vmatmul.mubr.msk.f32.gmra.mrb[8].mxu1 %vm171_vm1, %v12296_v60 }
 0x492   : > { %9870 = vmatprep.mubr.msk.f32.mxu1 %vm171_vm1, %v12300_v24 }
 0x495   : > { %9871 = vmatmul.mubr.msk.f32.gmra.mrb[10].mxu1 %vm171_vm1, %v12304_v41 }
 0x496   : > { %9873 = vmatprep.mubr.msk.f32.mxu1 %vm171_vm1, %v12308_v62 }
 0x499   : > { %9874 = vmatmul.mubr.msk.f32.gmra.mrb[12].mxu1 %vm171_vm1, %v12312_v16 }
 0x49a   : > { %9876 = vmatprep.mubr.msk.f32.mxu1 %vm171_vm1, %v12316_v51 }
 0x49d   : > { %9877 = vmatmul.mubr.msk.f32.gmra.mrb[14].mxu1 %vm171_vm1, %v12320_v28 }
 0x49e   : > { %9879 = vmatprep.mubr.msk.f32.mxu1 %vm171_vm1, %v12324_v46 }
 0x4a1   : > { %9880 = vmatmul.mubr.msk.f32.gmra.mrb[16].mxu1 %vm171_vm1, %v12328_v61 }
 0x4a2   : > { %9882 = vmatprep.mubr.msk.f32.mxu1 %vm171_vm1, %v12332_v39 }
 0x4a5   : > { %9883 = vmatmul.mubr.msk.f32.gmra.mrb[18].mxu1 %vm171_vm1, %v12336_v25 }
 0x4a6   : > { %9885 = vmatprep.mubr.msk.f32.mxu1 %vm171_vm1, %v12340_v48 }
 0x4a9   : > { %9886 = vmatmul.mubr.msk.f32.gmra.mrb[20].mxu1 %vm171_vm1, %v12344_v22 }
 0x4aa   : > { %9888 = vmatprep.mubr.msk.f32.mxu1 %vm171_vm1, %v12348_v54 }
 0x4ad   : > { %9889 = vmatmul.mubr.msk.f32.gmra.mrb[22].mxu1 %vm171_vm1, %v12352_v1 }
 0x4ae   : > { %9891 = vmatprep.mubr.msk.f32.mxu1 %vm171_vm1, %v12356_v34 }
 0x4b1   : > { %9892 = vmatmul.mubr.msk.f32.gmra.mrb[24].mxu1 %vm171_vm1, %v12360_v36 }
 0x4b2   : > { %9894 = vmatprep.mubr.msk.f32.mxu1 %vm171_vm1, %v12364_v44 }
 0x4b5   : > { %9895 = vmatmul.mubr.msk.f32.gmra.mrb[26].mxu1 %vm171_vm1, %v12368_v45 }
 0x4b6   : > { %9897 = vmatprep.mubr.msk.f32.mxu1 %vm171_vm1, %v12372_v52 }
 0x4b9   : > { %9898 = vmatmul.mubr.msk.f32.gmra.mrb[28].mxu1 %vm171_vm1, %v12376_v56 }
 0x4ba   : > { %9900 = vmatprep.mubr.msk.f32.mxu1 %vm171_vm1, %v12577_v63 }
 0x4bd   : > { %9901 = vmatmul.mubr.msk.f32.gmra.mrb[30].mxu1 %vm171_vm1, %v12581_v59 }
 0x4be   : > { %9905 = vmatprep.mubr.msk.f32.mxu1 %vm171_vm1, %v12129_v57  ;;  %v13702_v57 = vld [vmem:[#allocation9_spill] sm:$0xff] }
 0x4c1   : > { %9906 = vmatmul.mubr.msk.f32.vlgmr.msra.gmra.mrb[0].mxu1 %vm171_vm1, %v12131_v58  ;;  %v13703_v58 = vld [vmem:[#allocation10_spill] sm:$0xff] }
 0x4c2   : > { %9954 = vmatpush3.msk.msra.mxu1 %vm447_vm0, %v8519_v55  ;;  %9908 = vmatprep.mubr.msk.f32.mxu1 %vm171_vm1, %v12137_v43  ;;  %v12650_v55 = vld [vmem:[#allocation2 + $0x181] sm:$0xff] }
 0x4c3   : > { %10003 = vmatprep.subr.msk.mxu1 %vm447_vm0, %v8553_v50  ;;  %13704 = vst [vmem:[#allocation38_spill] sm:$0xff] %v12650_v55 }
 0x4c5   : > { %9909 = vmatmul.mubr.msk.f32.gmra.mrb[2].mxu1 %vm171_vm1, %v12141_v8 }
 0x4c6   : > { %9911 = vmatprep.mubr.msk.f32.mxu1 %vm171_vm1, %v12145_v9 }
 0x4c9   : > { %9912 = vmatmul.mubr.msk.f32.gmra.mrb[4].mxu1 %vm171_vm1, %v12149_v10 }
 0x4ca   : > { %9914 = vmatprep.mubr.msk.f32.mxu1 %vm171_vm1, %v12153_v6 }
 0x4cd   : > { %9915 = vmatmul.mubr.msk.f32.gmra.mrb[6].mxu1 %vm171_vm1, %v12157_v11 }
 0x4ce   : > { %9917 = vmatprep.mubr.msk.f32.mxu1 %vm171_vm1, %v12161_v4 }
 0x4d1   : > { %9918 = vmatmul.mubr.msk.f32.gmra.mrb[8].mxu1 %vm171_vm1, %v12165_v17 }
 0x4d2   : > { %9920 = vmatprep.mubr.msk.f32.mxu1 %vm171_vm1, %v12169_v33 }
 0x4d5   : > { %9921 = vmatmul.mubr.msk.f32.gmra.mrb[10].mxu1 %vm171_vm1, %v12173_v23 }
 0x4d6   : > { %9923 = vmatprep.mubr.msk.f32.mxu1 %vm171_vm1, %v12177_v26 }
 0x4d9   : > { %9924 = vmatmul.mubr.msk.f32.gmra.mrb[12].mxu1 %vm171_vm1, %v12181_v27 }
 0x4da   : > { %9926 = vmatprep.mubr.msk.f32.mxu1 %vm171_vm1, %v12185_v37 }
 0x4dd   : > { %9927 = vmatmul.mubr.msk.f32.gmra.mrb[14].mxu1 %vm171_vm1, %v12189_v30 }
 0x4de   : > { %9929 = vmatprep.mubr.msk.f32.mxu1 %vm171_vm1, %v12193_v47 }
 0x4e1   : > { %9930 = vmatmul.mubr.msk.f32.gmra.mrb[16].mxu1 %vm171_vm1, %v12197_v0 }
 0x4e2   : > { %9932 = vmatprep.mubr.msk.f32.mxu1 %vm171_vm1, %v12201_v53 }
 0x4e5   : > { %9933 = vmatmul.mubr.msk.f32.gmra.mrb[18].mxu1 %vm171_vm1, %v12205_v35 }
 0x4e6   : > { %9935 = vmatprep.mubr.msk.f32.mxu1 %vm171_vm1, %v12209_v7 }
 0x4e9   : > { %9936 = vmatmul.mubr.msk.f32.gmra.mrb[20].mxu1 %vm171_vm1, %v12213_v13 }
 0x4ea   : > { %9938 = vmatprep.mubr.msk.f32.mxu1 %vm171_vm1, %v12217_v12 }
 0x4ed   : > { %9939 = vmatmul.mubr.msk.f32.gmra.mrb[22].mxu1 %vm171_vm1, %v12221_v21  ;;  %v13716_v21 = vld [vmem:[#allocation22_spill] sm:$0xff] }
 0x4ee   : > { %9941 = vmatprep.mubr.msk.f32.mxu1 %vm171_vm1, %v12225_v20  ;;  %v12654_v20 = vld [vmem:[#allocation2 + $0x189] sm:$0xff] }
 0x4ef   : > { %13705 = vst [vmem:[#allocation39_spill] sm:$0xff] %v12654_v20 }
 0x4f1   : > { %9942 = vmatmul.mubr.msk.f32.gmra.mrb[24].mxu1 %vm171_vm1, %v12229_v32  ;;  %v13712_v32 = vld [vmem:[#allocation17_spill] sm:$0xff] }
 0x4f2   : > { %9944 = vmatprep.mubr.msk.f32.mxu1 %vm171_vm1, %v12233_v31  ;;  %v13706_v31 = vld [vmem:[#allocation11_spill] sm:$0xff] }
 0x4f5   : > { %9945 = vmatmul.mubr.msk.f32.gmra.mrb[26].mxu1 %vm171_vm1, %v12237_v2  ;;  %v13707_v2 = vld [vmem:[#allocation12_spill] sm:$0xff] }
 0x4f6   : > { %9947 = vmatprep.mubr.msk.f32.mxu1 %vm171_vm1, %v13702_v57  ;;  %v8587_v57 = vld [vmem:[%s13485_s2 + $0x1c] sm:$0xf] }
 0x4f9   : > { %9948 = vmatmul.mubr.msk.f32.gmra.mrb[28].mxu1 %vm171_vm1, %v13703_v58  ;;  %v13708_v58 = vld [vmem:[#allocation13_spill] sm:$0xff] }
 0x4fa   : > { %9950 = vmatprep.mubr.msk.f32.mxu1 %vm171_vm1, %v12650_v55  ;;  %v13709_v55 = vld [vmem:[#allocation14_spill] sm:$0xff] }
 0x4fd   : > { %9951 = vmatmul.mubr.msk.f32.gmra.mrb[30].mxu1 %vm171_vm1, %v12654_v20  ;;  %v13710_v20 = vld [vmem:[#allocation15_spill] sm:$0xff] }
 0x4fe   : > { %9955 = vmatprep.mubr.msk.f32.mxu1 %vm171_vm1, %v13706_v31  ;;  %v13711_v31 = vld [vmem:[#allocation16_spill] sm:$0xff] }
 0x501   : > { %9956 = vmatmul.mubr.msk.f32.vlgmr.msra.gmra.mrb[0].mxu1 %vm171_vm1, %v13707_v2  ;;  %v13713_v2 = vld [vmem:[#allocation18_spill] sm:$0xff] }
 0x502   : > { %10004 = vmatpush3.msk.msra.mxu1 %vm447_vm0, %v8553_v50  ;;  %9958 = vmatprep.mubr.msk.f32.mxu1 %vm171_vm1, %v13708_v58  ;;  %v13714_v50 = vld [vmem:[#allocation19_spill] sm:$0xff]  ;;  %v13715_v58 = vld [vmem:[#allocation20_spill] sm:$0xff] }
 0x503   : > { %10053 = vmatprep.subr.msk.mxu1 %vm447_vm0, %v8587_v57 }
 0x505   : > { %9959 = vmatmul.mubr.msk.f32.gmra.mrb[2].mxu1 %vm171_vm1, %v13709_v55  ;;  %v13717_v55 = vld [vmem:[#allocation24_spill] sm:$0xff] }
 0x506   : > { %9961 = vmatprep.mubr.msk.f32.mxu1 %vm171_vm1, %v13710_v20  ;;  %v13718_v20 = vld [vmem:[#allocation26_spill] sm:$0xff] }
 0x509   : > { %9962 = vmatmul.mubr.msk.f32.gmra.mrb[4].mxu1 %vm171_vm1, %v13711_v31  ;;  %v13719_v31 = vld [vmem:[#allocation27_spill] sm:$0xff] }
 0x50a   : > { %9964 = vmatprep.mubr.msk.f32.mxu1 %vm171_vm1, %v13712_v32  ;;  %v13720_v32 = vld [vmem:[#allocation29_spill] sm:$0xff] }
 0x50d   : > { %9965 = vmatmul.mubr.msk.f32.gmra.mrb[6].mxu1 %vm171_vm1, %v13713_v2  ;;  %v13721_v2 = vld [vmem:[#allocation31_spill] sm:$0xff] }
 0x50e   : > { %9967 = vmatprep.mubr.msk.f32.mxu1 %vm171_vm1, %v13714_v50  ;;  %v13722_v50 = vld [vmem:[#allocation21_spill] sm:$0xff] }
 0x511   : > { %9968 = vmatmul.mubr.msk.f32.gmra.mrb[8].mxu1 %vm171_vm1, %v13715_v58  ;;  %v13723_v58 = vld [vmem:[#allocation23_spill] sm:$0xff] }
 0x512   : > { %9970 = vmatprep.mubr.msk.f32.mxu1 %vm171_vm1, %v13716_v21  ;;  %v13724_v21 = vld [vmem:[#allocation25_spill] sm:$0xff] }
 0x515   : > { %9971 = vmatmul.mubr.msk.f32.gmra.mrb[10].mxu1 %vm171_vm1, %v13717_v55  ;;  %v13725_v55 = vld [vmem:[#allocation28_spill] sm:$0xff] }
 0x516   : > { %9973 = vmatprep.mubr.msk.f32.mxu1 %vm171_vm1, %v13718_v20  ;;  %v13726_v20 = vld [vmem:[#allocation30_spill] sm:$0xff] }
 0x519   : > { %9974 = vmatmul.mubr.msk.f32.gmra.mrb[12].mxu1 %vm171_vm1, %v13719_v31  ;;  %v13727_v31 = vld [vmem:[#allocation32_spill] sm:$0xff] }
 0x51a   : > { %9976 = vmatprep.mubr.msk.f32.mxu1 %vm171_vm1, %v13720_v32  ;;  %v13728_v32 = vld [vmem:[#allocation33_spill] sm:$0xff] }
 0x51d   : > { %9977 = vmatmul.mubr.msk.f32.gmra.mrb[14].mxu1 %vm171_vm1, %v13721_v2  ;;  %v13729_v2 = vld [vmem:[#allocation34_spill] sm:$0xff] }
 0x51e   : > { %9979 = vmatprep.mubr.msk.f32.mxu1 %vm171_vm1, %v13722_v50  ;;  %v13730_v50 = vld [vmem:[#allocation35_spill] sm:$0xff] }
 0x521   : > { %9980 = vmatmul.mubr.msk.f32.gmra.mrb[16].mxu1 %vm171_vm1, %v13723_v58 }
 0x522   : > { %9982 = vmatprep.mubr.msk.f32.mxu1 %vm171_vm1, %v13724_v21  ;;  %v13731_v21 = vld [vmem:[#allocation36_spill] sm:$0xff] }
 0x525   : > { %9983 = vmatmul.mubr.msk.f32.gmra.mrb[18].mxu1 %vm171_vm1, %v13725_v55 }
 0x526   : > { %9985 = vmatprep.mubr.msk.f32.mxu1 %vm171_vm1, %v13726_v20 }
 0x529   : > { %9986 = vmatmul.mubr.msk.f32.gmra.mrb[20].mxu1 %vm171_vm1, %v13727_v31 }
 0x52a   : > { %9988 = vmatprep.mubr.msk.f32.mxu1 %vm171_vm1, %v13728_v32  ;;  %v12723_v32 = vld [vmem:[#allocation2 + $0x182] sm:$0xff] }
 0x52d   : > { %9989 = vmatmul.mubr.msk.f32.gmra.mrb[22].mxu1 %vm171_vm1, %v13729_v2 }
 0x52e   : > { %9991 = vmatprep.mubr.msk.f32.mxu1 %vm171_vm1, %v13730_v50  ;;  %v12727_v50 = vld [vmem:[#allocation2 + $0x18a] sm:$0xff] }
 0x531   : > { %9992 = vmatmul.mubr.msk.f32.gmra.mrb[24].mxu1 %vm171_vm1, %v12491_v5 }
 0x532   : > { %9994 = vmatprep.mubr.msk.f32.mxu1 %vm171_vm1, %v13731_v21 }
 0x535   : > { %9995 = vmatmul.mubr.msk.f32.gmra.mrb[26].mxu1 %vm171_vm1, %v12499_v42 }
 0x536   : > { %9997 = vmatprep.mubr.msk.f32.mxu1 %vm171_vm1, %v12503_v29  ;;  %v8621_v29 = vld [vmem:[%s13485_s2 + $0x20] sm:$0xf] }
 0x539   : > { %9998 = vmatmul.mubr.msk.f32.gmra.mrb[28].mxu1 %vm171_vm1, %v12507_v49 }
 0x53a   : > { %10000 = vmatprep.mubr.msk.f32.mxu1 %vm171_vm1, %v12723_v32 }
 0x53d   : > { %10001 = vmatmul.mubr.msk.f32.gmra.mrb[30].mxu1 %vm171_vm1, %v12727_v50 }
 0x53e   : > { %10005 = vmatprep.mubr.msk.f32.mxu1 %vm171_vm1, %v12268_v15  ;;  %v6409_v15 = vld [vmem:[#allocation2 + $0x198] sm:$0xff] }
 0x541   : > { %10006 = vmatmul.mubr.msk.f32.vlgmr.msra.gmra.mrb[0].mxu1 %vm171_vm1, %v12272_v40  ;;  %v6410_v40 = vld [vmem:[#allocation2 + $0x1a0] sm:$0xff] }
 0x542   : > { %10054 = vmatpush3.msk.msra.mxu1 %vm447_vm0, %v8587_v57  ;;  %10008 = vmatprep.mubr.msk.f32.mxu1 %vm171_vm1, %v12276_v14  ;;  %v13751_v14 = vld [vmem:[#allocation26_spill] sm:$0xff] }
 0x543   : > { %10103 = vmatprep.subr.msk.mxu1 %vm447_vm0, %v8621_v29 }
 0x545   : > { %10009 = vmatmul.mubr.msk.f32.gmra.mrb[2].mxu1 %vm171_vm1, %v12280_v18  ;;  %v13752_v18 = vld [vmem:[#allocation27_spill] sm:$0xff] }
 0x546   : > { %10011 = vmatprep.mubr.msk.f32.mxu1 %vm171_vm1, %v12284_v19  ;;  %v13753_v19 = vld [vmem:[#allocation29_spill] sm:$0xff] }
 0x549   : > { %10012 = vmatmul.mubr.msk.f32.gmra.mrb[4].mxu1 %vm171_vm1, %v12288_v3  ;;  %v13754_v3 = vld [vmem:[#allocation31_spill] sm:$0xff] }
 0x54a   : > { %10014 = vmatprep.mubr.msk.f32.mxu1 %vm171_vm1, %v12292_v38  ;;  %v13755_v38 = vld [vmem:[#allocation21_spill] sm:$0xff] }
 0x54d   : > { %10015 = vmatmul.mubr.msk.f32.gmra.mrb[6].mxu1 %vm171_vm1, %v12296_v60  ;;  %v13756_v60 = vld [vmem:[#allocation25_spill] sm:$0xff] }
 0x54e   : > { %10017 = vmatprep.mubr.msk.f32.mxu1 %vm171_vm1, %v12300_v24  ;;  %v13757_v24 = vld [vmem:[#allocation33_spill] sm:$0xff] }
 0x551   : > { %10018 = vmatmul.mubr.msk.f32.gmra.mrb[8].mxu1 %vm171_vm1, %v12304_v41  ;;  %v13758_v41 = vld [vmem:[#allocation35_spill] sm:$0xff] }
 0x552   : > { %10020 = vmatprep.mubr.msk.f32.mxu1 %vm171_vm1, %v12308_v62  ;;  %v7189_v62 = vld [vmem:[#allocation2 + $0x19a] sm:$0xff] }
 0x555   : > { %10021 = vmatmul.mubr.msk.f32.gmra.mrb[10].mxu1 %vm171_vm1, %v12312_v16 }
 0x556   : > { %10023 = vmatprep.mubr.msk.f32.mxu1 %vm171_vm1, %v12316_v51 }
 0x559   : > { %10024 = vmatmul.mubr.msk.f32.gmra.mrb[12].mxu1 %vm171_vm1, %v12320_v28 }
 0x55a   : > { %10026 = vmatprep.mubr.msk.f32.mxu1 %vm171_vm1, %v12324_v46 }
 0x55d   : > { %10027 = vmatmul.mubr.msk.f32.gmra.mrb[14].mxu1 %vm171_vm1, %v12328_v61 }
 0x55e   : > { %10029 = vmatprep.mubr.msk.f32.mxu1 %vm171_vm1, %v12332_v39 }
 0x561   : > { %10030 = vmatmul.mubr.msk.f32.gmra.mrb[16].mxu1 %vm171_vm1, %v12336_v25 }
 0x562   : > { %10032 = vmatprep.mubr.msk.f32.mxu1 %vm171_vm1, %v12340_v48 }
 0x565   : > { %10033 = vmatmul.mubr.msk.f32.gmra.mrb[18].mxu1 %vm171_vm1, %v12344_v22 }
 0x566   : > { %10035 = vmatprep.mubr.msk.f32.mxu1 %vm171_vm1, %v12348_v54 }
 0x569   : > { %10036 = vmatmul.mubr.msk.f32.gmra.mrb[20].mxu1 %vm171_vm1, %v12352_v1 }
 0x56a   : > { %10038 = vmatprep.mubr.msk.f32.mxu1 %vm171_vm1, %v12356_v34 }
 0x56d   : > { %10039 = vmatmul.mubr.msk.f32.gmra.mrb[22].mxu1 %vm171_vm1, %v12360_v36 }
 0x56e   : > { %10041 = vmatprep.mubr.msk.f32.mxu1 %vm171_vm1, %v12364_v44 }
 0x571   : > { %10042 = vmatmul.mubr.msk.f32.gmra.mrb[24].mxu1 %vm171_vm1, %v12368_v45 }
 0x572   : > { %10044 = vmatprep.mubr.msk.f32.mxu1 %vm171_vm1, %v12372_v52 }
 0x575   : > { %10045 = vmatmul.mubr.msk.f32.gmra.mrb[26].mxu1 %vm171_vm1, %v12376_v56 }
 0x576   : > { %10047 = vmatprep.mubr.msk.f32.mxu1 %vm171_vm1, %v12577_v63 }
 0x579   : > { %10048 = vmatmul.mubr.msk.f32.gmra.mrb[28].mxu1 %vm171_vm1, %v12581_v59 }
 0x57a   : > { %10050 = vmatprep.mubr.msk.f32.mxu1 %vm171_vm1, %v6409_v15 }
 0x57d   : > { %10051 = vmatmul.mubr.msk.f32.gmra.mrb[30].mxu1 %vm171_vm1, %v6410_v40 }
 0x57e   : > { %10055 = vmatprep.mubr.msk.f32.mxu1 %vm171_vm1, %v12137_v43  ;;  %v13732_v43 = vld [vmem:[#allocation4_spill] sm:$0xff] }
 0x581   : > { %10056 = vmatmul.mubr.msk.f32.vlgmr.msra.gmra.mrb[0].mxu1 %vm171_vm1, %v12141_v8  ;;  %v13733_v8 = vld [vmem:[#allocation5_spill] sm:$0xff] }
 0x582   : > { %10104 = vmatpush3.msk.msra.mxu1 %vm447_vm0, %v8621_v29  ;;  %10058 = vmatprep.mubr.msk.f32.mxu1 %vm171_vm1, %v12145_v9  ;;  %v13734_v9 = vld [vmem:[#allocation6_spill] sm:$0xff] }
 0x585   : > { %10059 = vmatmul.mubr.msk.f32.gmra.mrb[2].mxu1 %vm171_vm1, %v12149_v10  ;;  %v13735_v10 = vld [vmem:[#allocation7_spill] sm:$0xff] }
 0x586   : > { %10061 = vmatprep.mubr.msk.f32.mxu1 %vm171_vm1, %v12153_v6  ;;  %v13736_v6 = vld [vmem:[#allocation8_spill] sm:$0xff] }
 0x589   : > { %10062 = vmatmul.mubr.msk.f32.gmra.mrb[4].mxu1 %vm171_vm1, %v12157_v11  ;;  %v13737_v11 = vld [vmem:[#allocation9_spill] sm:$0xff] }
 0x58a   : > { %10064 = vmatprep.mubr.msk.f32.mxu1 %vm171_vm1, %v12161_v4  ;;  %v13738_v4 = vld [vmem:[#allocation10_spill] sm:$0xff] }
 0x58d   : > { %10065 = vmatmul.mubr.msk.f32.gmra.mrb[6].mxu1 %vm171_vm1, %v12165_v17  ;;  %v13739_v17 = vld [vmem:[#allocation38_spill] sm:$0xff] }
 0x58e   : > { %10067 = vmatprep.mubr.msk.f32.mxu1 %vm171_vm1, %v12169_v33  ;;  %v6799_v33 = vld [vmem:[#allocation2 + $0x199] sm:$0xff] }
 0x591   : > { %10068 = vmatmul.mubr.msk.f32.gmra.mrb[8].mxu1 %vm171_vm1, %v12173_v23  ;;  %v13740_v23 = vld [vmem:[#allocation39_spill] sm:$0xff] }
 0x592   : > { %10070 = vmatprep.mubr.msk.f32.mxu1 %vm171_vm1, %v12177_v26  ;;  %v6800_v26 = vld [vmem:[#allocation2 + $0x1a1] sm:$0xff] }
 0x595   : > { %10071 = vmatmul.mubr.msk.f32.gmra.mrb[10].mxu1 %vm171_vm1, %v12181_v27  ;;  %v13741_v27 = vld [vmem:[#allocation13_spill] sm:$0xff] }
 0x596   : > { %10073 = vmatprep.mubr.msk.f32.mxu1 %vm171_vm1, %v12185_v37  ;;  %v13742_v37 = vld [vmem:[#allocation14_spill] sm:$0xff] }
 0x599   : > { %10074 = vmatmul.mubr.msk.f32.gmra.mrb[12].mxu1 %vm171_vm1, %v12189_v30  ;;  %v13743_v30 = vld [vmem:[#allocation15_spill] sm:$0xff] }
 0x59a   : > { %10076 = vmatprep.mubr.msk.f32.mxu1 %vm171_vm1, %v12193_v47  ;;  %v13744_v47 = vld [vmem:[#allocation16_spill] sm:$0xff] }
 0x59d   : > { %10077 = vmatmul.mubr.msk.f32.gmra.mrb[14].mxu1 %vm171_vm1, %v12197_v0  ;;  %v13745_v0 = vld [vmem:[#allocation17_spill] sm:$0xff] }
 0x59e   : > { %10079 = vmatprep.mubr.msk.f32.mxu1 %vm171_vm1, %v12201_v53  ;;  %v13746_v53 = vld [vmem:[#allocation18_spill] sm:$0xff] }
 0x5a1   : > { %10080 = vmatmul.mubr.msk.f32.gmra.mrb[16].mxu1 %vm171_vm1, %v12205_v35  ;;  %v13747_v35 = vld [vmem:[#allocation19_spill] sm:$0xff] }
 0x5a2   : > { %10082 = vmatprep.mubr.msk.f32.mxu1 %vm171_vm1, %v12209_v7  ;;  %v13748_v7 = vld [vmem:[#allocation20_spill] sm:$0xff] }
 0x5a5   : > { %10083 = vmatmul.mubr.msk.f32.gmra.mrb[18].mxu1 %vm171_vm1, %v12213_v13  ;;  %v13749_v13 = vld [vmem:[#allocation22_spill] sm:$0xff] }
 0x5a6   : > { %10085 = vmatprep.mubr.msk.f32.mxu1 %vm171_vm1, %v12217_v12  ;;  %v13750_v12 = vld [vmem:[#allocation24_spill] sm:$0xff] }
 0x5a9   : > { %10086 = vmatmul.mubr.msk.f32.gmra.mrb[20].mxu1 %vm171_vm1, %v13732_v43 }
 0x5aa   : > { %10088 = vmatprep.mubr.msk.f32.mxu1 %vm171_vm1, %v13733_v8 }
 0x5ad   : > { %10089 = vmatmul.mubr.msk.f32.gmra.mrb[22].mxu1 %vm171_vm1, %v13734_v9 }
 0x5ae   : > { %10091 = vmatprep.mubr.msk.f32.mxu1 %vm171_vm1, %v13735_v10 }
 0x5b1   : > { %10092 = vmatmul.mubr.msk.f32.gmra.mrb[24].mxu1 %vm171_vm1, %v13736_v6 }
 0x5b2   : > { %10094 = vmatprep.mubr.msk.f32.mxu1 %vm171_vm1, %v13737_v11 }
 0x5b5   : > { %10095 = vmatmul.mubr.msk.f32.gmra.mrb[26].mxu1 %vm171_vm1, %v13738_v4 }
 0x5b6   : > { %10097 = vmatprep.mubr.msk.f32.mxu1 %vm171_vm1, %v13739_v17 }
 0x5b9   : > { %10098 = vmatmul.mubr.msk.f32.gmra.mrb[28].mxu1 %vm171_vm1, %v13740_v23 }
 0x5ba   : > { %10100 = vmatprep.mubr.msk.f32.mxu1 %vm171_vm1, %v6799_v33 }
 0x5bd   : > { %10101 = vmatmul.mubr.msk.f32.gmra.mrb[30].mxu1 %vm171_vm1, %v6800_v26 }
 0x5be   : > { %10105 = vmatprep.mubr.msk.f32.mxu1 %vm171_vm1, %v13741_v27 }
 0x5c1   : > { %10106 = vmatmul.mubr.msk.f32.vlgmr.msra.gmra.mrb[0].mxu1 %vm171_vm1, %v13742_v37 }
 0x5c2   : > { %10108 = vmatprep.mubr.msk.f32.mxu1 %vm171_vm1, %v13743_v30 }
 0x5c5   : > { %10109 = vmatmul.mubr.msk.f32.gmra.mrb[2].mxu1 %vm171_vm1, %v13744_v47 }
 0x5c6   : > { %10111 = vmatprep.mubr.msk.f32.mxu1 %vm171_vm1, %v13745_v0 }
 0x5c9   : > { %10112 = vmatmul.mubr.msk.f32.gmra.mrb[4].mxu1 %vm171_vm1, %v13746_v53 }
 0x5ca   : > { %10114 = vmatprep.mubr.msk.f32.mxu1 %vm171_vm1, %v13747_v35 }
 0x5cd   : > { %10115 = vmatmul.mubr.msk.f32.gmra.mrb[6].mxu1 %vm171_vm1, %v13748_v7 }
 0x5ce   : > { %10117 = vmatprep.mubr.msk.f32.mxu1 %vm171_vm1, %v13749_v13 }
 0x5d1   : > { %10118 = vmatmul.mubr.msk.f32.gmra.mrb[8].mxu1 %vm171_vm1, %v13750_v12 }
 0x5d2   : > { %10120 = vmatprep.mubr.msk.f32.mxu1 %vm171_vm1, %v13751_v14 }
 0x5d5   : > { %10121 = vmatmul.mubr.msk.f32.gmra.mrb[10].mxu1 %vm171_vm1, %v13752_v18 }
 0x5d6   : > { %10123 = vmatprep.mubr.msk.f32.mxu1 %vm171_vm1, %v13753_v19 }
 0x5d9   : > { %10124 = vmatmul.mubr.msk.f32.gmra.mrb[12].mxu1 %vm171_vm1, %v13754_v3 }
 0x5da   : > { %10126 = vmatprep.mubr.msk.f32.mxu1 %vm171_vm1, %v13755_v38 }
 0x5dd   : > { %10127 = vmatmul.mubr.msk.f32.gmra.mrb[14].mxu1 %vm171_vm1, %v13723_v58 }
 0x5de   : > { %10129 = vmatprep.mubr.msk.f32.mxu1 %vm171_vm1, %v13756_v60 }
 0x5e1   : > { %10130 = vmatmul.mubr.msk.f32.gmra.mrb[16].mxu1 %vm171_vm1, %v13725_v55 }
 0x5e2   : > { %10132 = vmatprep.mubr.msk.f32.mxu1 %vm171_vm1, %v13726_v20  ;;  %v13759_v20 = vld [vmem:[#allocation37_spill] sm:$0xff] }
 0x5e5   : > { %10133 = vmatmul.mubr.msk.f32.gmra.mrb[18].mxu1 %vm171_vm1, %v13727_v31 }
 0x5e6   : > { %10135 = vmatprep.mubr.msk.f32.mxu1 %vm171_vm1, %v13757_v24 }
 0x5e9   : > { %10136 = vmatmul.mubr.msk.f32.gmra.mrb[20].mxu1 %vm171_vm1, %v13729_v2 }
 0x5ea   : > { %10138 = vmatprep.mubr.msk.f32.mxu1 %vm171_vm1, %v13758_v41 }
 0x5ed   : > { %10139 = vmatmul.mubr.msk.f32.gmra.mrb[22].mxu1 %vm171_vm1, %v12491_v5  ;;  %v7190_v5 = vld [vmem:[#allocation2 + $0x1a2] sm:$0xff] }
 0x5ee   : > { %10141 = vmatprep.mubr.msk.f32.mxu1 %vm171_vm1, %v13731_v21 }
 0x5f1   : > { %10142 = vmatmul.mubr.msk.f32.gmra.mrb[24].mxu1 %vm171_vm1, %v12499_v42 }
 0x5f2   : > { %10144 = vmatprep.mubr.msk.f32.mxu1 %vm171_vm1, %v13759_v20 }
 0x5f5   : > { %10145 = vmatmul.mubr.msk.f32.gmra.mrb[26].mxu1 %vm171_vm1, %v12507_v49 }
 0x5f6   : > { %10147 = vmatprep.mubr.msk.f32.mxu1 %vm171_vm1, %v12723_v32 }
 0x5f9   : > { %10148 = vmatmul.mubr.msk.f32.gmra.mrb[28].mxu1 %vm171_vm1, %v12727_v50 }
 0x5fa   : > { %10150 = vmatprep.mubr.msk.f32.mxu1 %vm171_vm1, %v7189_v62 }
 0x5fd   : > { %10151 = vmatmul.mubr.msk.f32.gmra.mrb[30].mxu1 %vm171_vm1, %v7190_v5 }
 0x694   : > { %v10107_v21 = vpop.f32.mrb[0].mxu1 }
 0x695   : > { %7550 = vst.msk [vmem:[#allocation3 + $0x8] sm:$0xff] %vm171_vm1, %v10107_v21  ;;  %v7358_v42 = vpop.f32.mrb[1].mxu1 }
 0x696   : > { %7549 = vst.msk [vmem:[#allocation3] sm:$0xff] %vm171_vm1, %v7358_v42 }
 0x698   : > { %v10110_v16 = vpop.f32.mrb[2].mxu1 }
 0x699   : > { %7552 = vst.msk [vmem:[#allocation3 + $0x18] sm:$0xff] %vm171_vm1, %v10110_v16  ;;  %v7368_v51 = vpop.f32.mrb[3].mxu1 }
 0x69a   : > { %7551 = vst.msk [vmem:[#allocation3 + $0x10] sm:$0xff] %vm171_vm1, %v7368_v51 }
 0x69c   : > { %v12927_v32 = vld [vmem:[#allocation3 + $0x8] sm:$0xff]  ;;  %v10113_v28 = vpop.f32.mrb[4].mxu1 }
 0x69d   : > { %v12929_v46 = vld [vmem:[#allocation3] sm:$0xff]  ;;  %7554 = vst.msk [vmem:[#allocation3 + $0x28] sm:$0xff] %vm171_vm1, %v10113_v28  ;;  %v7378_v61 = vpop.f32.mrb[5].mxu1  ;;  %v7614_v39 = vsel %vm171_vm1, %v12927_v32, 0.0 }
 0x69e   : > { %v7613_v25 = vsel %vm171_vm1, %v12929_v46, 0.0  ;;  %7553 = vst.msk [vmem:[#allocation3 + $0x20] sm:$0xff] %vm171_vm1, %v7378_v61 }
 0x69f   : > { %v7615_v22 = vadd.f32 %v7614_v39, %v7613_v25 }
 0x6a0   : > { %v10116_v48 = vpop.f32.mrb[6].mxu1  ;;  %v12937_v54 = vld [vmem:[#allocation3 + $0x18] sm:$0xff] }
 0x6a1   : > { %v12939_v1 = vld [vmem:[#allocation3 + $0x10] sm:$0xff]  ;;  %7556 = vst.msk [vmem:[#allocation3 + $0x38] sm:$0xff] %vm171_vm1, %v10116_v48  ;;  %v7388_v34 = vpop.f32.mrb[7].mxu1  ;;  %v7618_v45 = vsel %vm171_vm1, %v12937_v54, 0.0 }
 0x6a2   : > { %v7616_v36 = vsel %vm171_vm1, %v12939_v1, 0.0  ;;  %7555 = vst.msk [vmem:[#allocation3 + $0x30] sm:$0xff] %vm171_vm1, %v7388_v34 }
 0x6a3   : > { %v7617_v44 = vadd.f32 %v7616_v36, %v7615_v22 }
 0x6a4   : > { %v10119_v52 = vpop.f32.mrb[8].mxu1  ;;  %v12947_v56 = vld [vmem:[#allocation3 + $0x28] sm:$0xff] }
 0x6a5   : > { %v12949_v29 = vld [vmem:[#allocation3 + $0x20] sm:$0xff]  ;;  %v7619_v49 = vadd.f32 %v7618_v45, %v7617_v44  ;;  %7558 = vst.msk [vmem:[#allocation3 + $0x48] sm:$0xff] %vm171_vm1, %v10119_v52  ;;  %v7398_v63 = vpop.f32.mrb[9].mxu1  ;;  %v7622_v58 = vsel %vm171_vm1, %v12947_v56, 0.0 }
 0x6a6   : > { %v7620_v59 = vsel %vm171_vm1, %v12949_v29, 0.0  ;;  %7557 = vst.msk [vmem:[#allocation3 + $0x40] sm:$0xff] %vm171_vm1, %v7398_v63 }
 0x6a7   : > { %v7621_v57 = vadd.f32 %v7620_v59, %v7619_v49 }
 0x6a8   : > { %v10122_v55 = vpop.f32.mrb[10].mxu1  ;;  %v12957_v31 = vld [vmem:[#allocation3 + $0x38] sm:$0xff] }
 0x6a9   : > { %v12959_v2 = vld [vmem:[#allocation3 + $0x30] sm:$0xff]  ;;  %v7623_v50 = vadd.f32 %v7622_v58, %v7621_v57  ;;  %7560 = vst.msk [vmem:[#allocation3 + $0x58] sm:$0xff] %vm171_vm1, %v10122_v55  ;;  %v7408_v15 = vpop.f32.mrb[11].mxu1  ;;  %v7626_v8 = vsel %vm171_vm1, %v12957_v31, 0.0 }
 0x6aa   : > { %v7624_v40 = vsel %vm171_vm1, %v12959_v2, 0.0  ;;  %7559 = vst.msk [vmem:[#allocation3 + $0x50] sm:$0xff] %vm171_vm1, %v7408_v15 }
 0x6ab   : > { %v7625_v43 = vadd.f32 %v7624_v40, %v7623_v50 }
 0x6ac   : > { %v10125_v9 = vpop.f32.mrb[12].mxu1  ;;  %v12967_v10 = vld [vmem:[#allocation3 + $0x48] sm:$0xff] }
 0x6ad   : > { %v12969_v6 = vld [vmem:[#allocation3 + $0x40] sm:$0xff]  ;;  %v7627_v11 = vadd.f32 %v7626_v8, %v7625_v43  ;;  %7562 = vst.msk [vmem:[#allocation3 + $0x68] sm:$0xff] %vm171_vm1, %v10125_v9  ;;  %v7418_v4 = vpop.f32.mrb[13].mxu1  ;;  %v7630_v23 = vsel %vm171_vm1, %v12967_v10, 0.0 }
 0x6ae   : > { %v7628_v17 = vsel %vm171_vm1, %v12969_v6, 0.0  ;;  %7561 = vst.msk [vmem:[#allocation3 + $0x60] sm:$0xff] %vm171_vm1, %v7418_v4 }
 0x6af   : > { %v7629_v33 = vadd.f32 %v7628_v17, %v7627_v11 }
 0x6b0   : > { %v10128_v26 = vpop.f32.mrb[14].mxu1  ;;  %v12977_v27 = vld [vmem:[#allocation3 + $0x58] sm:$0xff] }
 0x6b1   : > { %v12979_v37 = vld [vmem:[#allocation3 + $0x50] sm:$0xff]  ;;  %v7631_v30 = vadd.f32 %v7630_v23, %v7629_v33  ;;  %7564 = vst.msk [vmem:[#allocation3 + $0x78] sm:$0xff] %vm171_vm1, %v10128_v26  ;;  %v7428_v47 = vpop.f32.mrb[15].mxu1  ;;  %v7634_v35 = vsel %vm171_vm1, %v12977_v27, 0.0 }
 0x6b2   : > { %v7632_v0 = vsel %vm171_vm1, %v12979_v37, 0.0  ;;  %7563 = vst.msk [vmem:[#allocation3 + $0x70] sm:$0xff] %vm171_vm1, %v7428_v47 }
 0x6b3   : > { %v7633_v53 = vadd.f32 %v7632_v0, %v7631_v30 }
 0x6b4   : > { %v10131_v7 = vpop.f32.mrb[16].mxu1  ;;  %v12987_v13 = vld [vmem:[#allocation3 + $0x68] sm:$0xff] }
 0x6b5   : > { %v12989_v12 = vld [vmem:[#allocation3 + $0x60] sm:$0xff]  ;;  %v7635_v14 = vadd.f32 %v7634_v35, %v7633_v53  ;;  %7566 = vst.msk [vmem:[#allocation3 + $0x88] sm:$0xff] %vm171_vm1, %v10131_v7  ;;  %v7438_v18 = vpop.f32.mrb[17].mxu1  ;;  %v7638_v38 = vsel %vm171_vm1, %v12987_v13, 0.0 }
 0x6b6   : > { %v7636_v19 = vsel %vm171_vm1, %v12989_v12, 0.0  ;;  %7565 = vst.msk [vmem:[#allocation3 + $0x80] sm:$0xff] %vm171_vm1, %v7438_v18 }
 0x6b7   : > { %v7637_v3 = vadd.f32 %v7636_v19, %v7635_v14 }
 0x6b8   : > { %v10134_v60 = vpop.f32.mrb[18].mxu1  ;;  %v12997_v24 = vld [vmem:[#allocation3 + $0x78] sm:$0xff] }
 0x6b9   : > { %v12999_v41 = vld [vmem:[#allocation3 + $0x70] sm:$0xff]  ;;  %v7639_v20 = vadd.f32 %v7638_v38, %v7637_v3  ;;  %7568 = vst.msk [vmem:[#allocation3 + $0x98] sm:$0xff] %vm171_vm1, %v10134_v60  ;;  %v7448_v62 = vpop.f32.mrb[19].mxu1  ;;  %v7642_v42 = vsel %vm171_vm1, %v12997_v24, 0.0 }
 0x6ba   : > { %v7640_v5 = vsel %vm171_vm1, %v12999_v41, 0.0  ;;  %7567 = vst.msk [vmem:[#allocation3 + $0x90] sm:$0xff] %vm171_vm1, %v7448_v62 }
 0x6bb   : > { %v7641_v21 = vadd.f32 %v7640_v5, %v7639_v20 }
 0x6bc   : > { %v10137_v16 = vpop.f32.mrb[20].mxu1  ;;  %v13007_v51 = vld [vmem:[#allocation3 + $0x88] sm:$0xff] }
 0x6bd   : > { %v13009_v28 = vld [vmem:[#allocation3 + $0x80] sm:$0xff]  ;;  %v7643_v61 = vadd.f32 %v7642_v42, %v7641_v21  ;;  %7570 = vst.msk [vmem:[#allocation3 + $0xa8] sm:$0xff] %vm171_vm1, %v10137_v16  ;;  %v7458_v39 = vpop.f32.mrb[21].mxu1  ;;  %v7646_v22 = vsel %vm171_vm1, %v13007_v51, 0.0 }
 0x6be   : > { %v7644_v25 = vsel %vm171_vm1, %v13009_v28, 0.0  ;;  %7569 = vst.msk [vmem:[#allocation3 + $0xa0] sm:$0xff] %vm171_vm1, %v7458_v39 }
 0x6bf   : > { %v7645_v48 = vadd.f32 %v7644_v25, %v7643_v61 }
 0x6c0   : > { %v10140_v34 = vpop.f32.mrb[22].mxu1  ;;  %v13017_v36 = vld [vmem:[#allocation3 + $0x98] sm:$0xff] }
 0x6c1   : > { %v13019_v44 = vld [vmem:[#allocation3 + $0x90] sm:$0xff]  ;;  %v7647_v45 = vadd.f32 %v7646_v22, %v7645_v48  ;;  %7572 = vst.msk [vmem:[#allocation3 + $0xb8] sm:$0xff] %vm171_vm1, %v10140_v34  ;;  %v7468_v52 = vpop.f32.mrb[23].mxu1  ;;  %v7650_v59 = vsel %vm171_vm1, %v13017_v36, 0.0 }
 0x6c2   : > { %v7648_v49 = vsel %vm171_vm1, %v13019_v44, 0.0  ;;  %7571 = vst.msk [vmem:[#allocation3 + $0xb0] sm:$0xff] %vm171_vm1, %v7468_v52 }
 0x6c3   : > { %v7649_v63 = vadd.f32 %v7648_v49, %v7647_v45 }
 0x6c4   : > { %v10143_v57 = vpop.f32.mrb[24].mxu1  ;;  %v13027_v58 = vld [vmem:[#allocation3 + $0xa8] sm:$0xff] }
 0x6c5   : > { %v13029_v55 = vld [vmem:[#allocation3 + $0xa0] sm:$0xff]  ;;  %v7651_v50 = vadd.f32 %v7650_v59, %v7649_v63  ;;  %7574 = vst.msk [vmem:[#allocation3 + $0xc8] sm:$0xff] %vm171_vm1, %v10143_v57  ;;  %v7478_v15 = vpop.f32.mrb[25].mxu1  ;;  %v7654_v8 = vsel %vm171_vm1, %v13027_v58, 0.0 }
 0x6c6   : > { %v7652_v40 = vsel %vm171_vm1, %v13029_v55, 0.0  ;;  %7573 = vst.msk [vmem:[#allocation3 + $0xc0] sm:$0xff] %vm171_vm1, %v7478_v15 }
 0x6c7   : > { %v7653_v43 = vadd.f32 %v7652_v40, %v7651_v50 }
 0x6c8   : > { %v10146_v9 = vpop.f32.mrb[26].mxu1  ;;  %v13037_v11 = vld [vmem:[#allocation3 + $0xb8] sm:$0xff] }
 0x6c9   : > { %v13039_v4 = vld [vmem:[#allocation3 + $0xb0] sm:$0xff]  ;;  %v7655_v17 = vadd.f32 %v7654_v8, %v7653_v43  ;;  %7576 = vst.msk [vmem:[#allocation3 + $0xd8] sm:$0xff] %vm171_vm1, %v10146_v9  ;;  %v7488_v33 = vpop.f32.mrb[27].mxu1  ;;  %v7658_v30 = vsel %vm171_vm1, %v13037_v11, 0.0 }
 0x6ca   : > { %v7656_v23 = vsel %vm171_vm1, %v13039_v4, 0.0  ;;  %7575 = vst.msk [vmem:[#allocation3 + $0xd0] sm:$0xff] %vm171_vm1, %v7488_v33 }
 0x6cb   : > { %v7657_v26 = vadd.f32 %v7656_v23, %v7655_v17 }
 0x6cc   : > { %v10149_v47 = vpop.f32.mrb[28].mxu1  ;;  %v13047_v0 = vld [vmem:[#allocation3 + $0xc8] sm:$0xff] }
 0x6cd   : > { %v13049_v53 = vld [vmem:[#allocation3 + $0xc0] sm:$0xff]  ;;  %v7659_v35 = vadd.f32 %v7658_v30, %v7657_v26  ;;  %7578 = vst.msk [vmem:[#allocation3 + $0xe8] sm:$0xff] %vm171_vm1, %v10149_v47  ;;  %v7498_v7 = vpop.f32.mrb[29].mxu1  ;;  %v7662_v19 = vsel %vm171_vm1, %v13047_v0, 0.0 }
 0x6ce   : > { %v7660_v14 = vsel %vm171_vm1, %v13049_v53, 0.0  ;;  %7577 = vst.msk [vmem:[#allocation3 + $0xe0] sm:$0xff] %vm171_vm1, %v7498_v7 }
 0x6cf   : > { %v7661_v18 = vadd.f32 %v7660_v14, %v7659_v35 }
 0x6d0   : > { %v10152_v3 = vpop.f32.mrb[30].mxu1  ;;  %v13057_v38 = vld [vmem:[#allocation3 + $0xd8] sm:$0xff] }
 0x6d1   : > { %v13059_v60 = vld [vmem:[#allocation3 + $0xd0] sm:$0xff]  ;;  %v7663_v20 = vadd.f32 %v7662_v19, %v7661_v18  ;;  %7580 = vst.msk [vmem:[#allocation3 + $0xf8] sm:$0xff] %vm171_vm1, %v10152_v3  ;;  %v7508_v62 = vpop.f32.mrb[31].mxu1  ;;  %v7666_v42 = vsel %vm171_vm1, %v13057_v38, 0.0 }
 0x6d2   : > { %v7664_v5 = vsel %vm171_vm1, %v13059_v60, 0.0  ;;  %7579 = vst.msk [vmem:[#allocation3 + $0xf0] sm:$0xff] %vm171_vm1, %v7508_v62 }
 0x6d3   : > { %v7665_v21 = vadd.f32 %v7664_v5, %v7663_v20 }
 0x6d4   : > { %v13067_v16 = vld [vmem:[#allocation3 + $0xe8] sm:$0xff] }
 0x6d5   : > { %v13069_v61 = vld [vmem:[#allocation3 + $0xe0] sm:$0xff]  ;;  %v7667_v39 = vadd.f32 %v7666_v42, %v7665_v21  ;;  %v7670_v22 = vsel %vm171_vm1, %v13067_v16, 0.0 }
 0x6d6   : > { %v7668_v25 = vsel %vm171_vm1, %v13069_v61, 0.0 }
 0x6d7   : > { %v7669_v48 = vadd.f32 %v7668_v25, %v7667_v39 }
 0x6d8   : > { %v13075_v34 = vld [vmem:[#allocation3 + $0xf8] sm:$0xff] }
 0x6d9   : > { %v13077_v45 = vld [vmem:[#allocation3 + $0xf0] sm:$0xff]  ;;  %v7671_v52 = vadd.f32 %v7670_v22, %v7669_v48  ;;  %v7674_v59 = vsel %vm171_vm1, %v13075_v34, 0.0 }
 0x6da   : > { %v7672_v49 = vsel %vm171_vm1, %v13077_v45, 0.0 }
 0x6db   : > { %v7673_v63 = vadd.f32 %v7672_v49, %v7671_v52 }
 0x6dd   : > { %v7675_v57 = vadd.f32 %v7674_v59, %v7673_v63 }
 0x6df   : > { %v7676_v50 = vrot.slane %v7675_v57, 4 }
 0x6e1   : > { %v7677_v15 = vadd.f32 %v7676_v50, %v7675_v57 }
 0x6e3   : > { %v7678_v40 = vrot.slane %v7677_v15, 2 }
 0x6e5   : > { %v7679_v43 = vadd.f32 %v7678_v40, %v7677_v15 }
 0x6e7   : > { %v7680_v8 = vrot.slane %v7679_v43, 1 }
 0x6e9   : > { %v7681_v9 = vadd.f32 %v7680_v8, %v7679_v43 }
 0x6eb   : > { %v13083_v17 = vmul.f32 0.00390625, %v7681_v9 }
 0x6ed   : > { %v13087_v33 = vsub.f32 %v12929_v46, %v13083_v17  ;;  %v13091_v23 = vsub.f32 %v12927_v32, %v13083_v17  ;;  %v13095_v26 = vsub.f32 %v12939_v1, %v13083_v17  ;;  %v13099_v30 = vsub.f32 %v12937_v54, %v13083_v17 }
 0x6ee   : > { %v13107_v46 = vsub.f32 %v12949_v29, %v13083_v17  ;;  %v13113_v1 = vsub.f32 %v12947_v56, %v13083_v17  ;;  %v13121_v19 = vsub.f32 %v12959_v2, %v13083_v17  ;;  %v13128_v56 = vsub.f32 %v12957_v31, %v13083_v17 }
 0x6ef   : > { %v7715_v47 = vmul.f32 %v13087_v33, %v13087_v33  ;;  %v7716_v35 = vmul.f32 %v13091_v23, %v13091_v23  ;;  %v7717_v32 = vmul.f32 %v13095_v26, %v13095_v26  ;;  %v7718_v54 = vmul.f32 %v13099_v30, %v13099_v30 }
 0x6f0   : > { %v7719_v29 = vmul.f32 %v13107_v46, %v13107_v46  ;;  %v7720_v62 = vmul.f32 %v13113_v1, %v13113_v1  ;;  %v13135_v2 = vsub.f32 %v12969_v6, %v13083_v17  ;;  %v7721_v42 = vmul.f32 %v13121_v19, %v13121_v19 }
 0x6f1   : > { %v7747_v7 = vsel %vm171_vm1, %v7715_v47, 0.0  ;;  %v7748_v14 = vsel %vm171_vm1, %v7716_v35, 0.0  ;;  %v7750_v3 = vsel %vm171_vm1, %v7717_v32, 0.0  ;;  %v7752_v5 = vsel %vm171_vm1, %v7718_v54, 0.0 }
 0x6f2   : > { %v7749_v18 = vadd.f32 %v7748_v14, %v7747_v7  ;;  %v7754_v39 = vsel %vm171_vm1, %v7719_v29, 0.0  ;;  %v13142_v31 = vsub.f32 %v12967_v10, %v13083_v17  ;;  %v7722_v48 = vmul.f32 %v13128_v56, %v13128_v56 }
 0x6f3   : > { %v7756_v22 = vsel %vm171_vm1, %v7720_v62, 0.0  ;;  %v13149_v6 = vsub.f32 %v12979_v37, %v13083_v17  ;;  %v7723_v49 = vmul.f32 %v13135_v2, %v13135_v2  ;;  %v7758_v63 = vsel %vm171_vm1, %v7721_v42, 0.0 }
 0x6f4   : > { %v7751_v20 = vadd.f32 %v7750_v3, %v7749_v18  ;;  %v13156_v10 = vsub.f32 %v12977_v27, %v13083_v17  ;;  %v7724_v57 = vmul.f32 %v13142_v31, %v13142_v31  ;;  %v7760_v50 = vsel %vm171_vm1, %v7722_v48, 0.0 }
 0x6f5   : > { %v13163_v37 = vsub.f32 %v12989_v12, %v13083_v17  ;;  %v7725_v40 = vmul.f32 %v13149_v6, %v13149_v6  ;;  %v7762_v43 = vsel %vm171_vm1, %v7723_v49, 0.0  ;;  %v13170_v27 = vsub.f32 %v12987_v13, %v13083_v17 }
 0x6f6   : > { %v7753_v21 = vadd.f32 %v7752_v5, %v7751_v20  ;;  %v7726_v9 = vmul.f32 %v13156_v10, %v13156_v10  ;;  %v7764_v47 = vsel %vm171_vm1, %v7724_v57, 0.0  ;;  %v13177_v12 = vsub.f32 %v12999_v41, %v13083_v17 }
 0x6f7   : > { %v7727_v32 = vmul.f32 %v13163_v37, %v13163_v37  ;;  %v7766_v54 = vsel %vm171_vm1, %v7725_v40, 0.0  ;;  %v13184_v13 = vsub.f32 %v12997_v24, %v13083_v17  ;;  %v7728_v14 = vmul.f32 %v13170_v27, %v13170_v27 }
 0x6f8   : > { %v7755_v25 = vadd.f32 %v7754_v39, %v7753_v21  ;;  %v7768_v18 = vsel %vm171_vm1, %v7726_v9, 0.0  ;;  %v13191_v41 = vsub.f32 %v13009_v28, %v13083_v17  ;;  %v7729_v3 = vmul.f32 %v13177_v12, %v13177_v12 }
 0x6f9   : > { %v7770_v20 = vsel %vm171_vm1, %v7727_v32, 0.0  ;;  %v13198_v24 = vsub.f32 %v13007_v51, %v13083_v17  ;;  %v7730_v5 = vmul.f32 %v13184_v13, %v13184_v13  ;;  %v7772_v21 = vsel %vm171_vm1, %v7728_v14, 0.0 }
 0x6fa   : > { %v7757_v52 = vadd.f32 %v7756_v22, %v7755_v25  ;;  %v13205_v28 = vsub.f32 %v13019_v44, %v13083_v17  ;;  %v7731_v39 = vmul.f32 %v13191_v41, %v13191_v41  ;;  %v7774_v25 = vsel %vm171_vm1, %v7729_v3, 0.0 }
 0x6fb   : > { %v13212_v51 = vsub.f32 %v13017_v36, %v13083_v17  ;;  %v7732_v22 = vmul.f32 %v13198_v24, %v13198_v24  ;;  %v13219_v44 = vsub.f32 %v13029_v55, %v13083_v17  ;;  %v13226_v36 = vsub.f32 %v13027_v58, %v13083_v17 }
 0x6fc   : > { %v7759_v59 = vadd.f32 %v7758_v63, %v7757_v52  ;;  %v7776_v52 = vsel %vm171_vm1, %v7730_v5, 0.0  ;;  %v7733_v63 = vmul.f32 %v13205_v28, %v13205_v28  ;;  %v13233_v55 = vsub.f32 %v13039_v4, %v13083_v17 }
 0x6fd   : > { %v13240_v58 = vsub.f32 %v13037_v11, %v13083_v17  ;;  %v13247_v4 = vsub.f32 %v13049_v53, %v13083_v17  ;;  %v13254_v11 = vsub.f32 %v13047_v0, %v13083_v17  ;;  %v13261_v53 = vsub.f32 %v13059_v60, %v13083_v17 }
 0x6fe   : > { %v7761_v15 = vadd.f32 %v7760_v50, %v7759_v59  ;;  %v7778_v59 = vsel %vm171_vm1, %v7731_v39, 0.0  ;;  %v7734_v50 = vmul.f32 %v13212_v51, %v13212_v51  ;;  %v13268_v0 = vsub.f32 %v13057_v38, %v13083_v17 }
 0x6ff   : > { %v13275_v60 = vsub.f32 %v13069_v61, %v13083_v17  ;;  %v13282_v38 = vsub.f32 %v13067_v16, %v13083_v17  ;;  %v13289_v61 = vsub.f32 %v13077_v45, %v13083_v17  ;;  %v13296_v16 = vsub.f32 %v13075_v34, %v13083_v17 }
 0x700   : > { %v7763_v8 = vadd.f32 %v7762_v43, %v7761_v15  ;;  %v7780_v15 = vsel %vm171_vm1, %v7732_v22, 0.0  ;;  %v7735_v43 = vmul.f32 %v13219_v44, %v13219_v44 }
 0x701   : > { %v7745_v45 = vmul.f32 %v13289_v61, %v13289_v61 }
 0x702   : > { %v7765_v35 = vadd.f32 %v7764_v47, %v7763_v8  ;;  %v7782_v8 = vsel %vm171_vm1, %v7733_v63, 0.0  ;;  %v7736_v47 = vmul.f32 %v13226_v36, %v13226_v36 }
 0x703   : > { %v7806_v34 = vsel %vm171_vm1, %v7745_v45, 0.0 }
 0x704   : > { %v7767_v7 = vadd.f32 %v7766_v54, %v7765_v35  ;;  %v7784_v35 = vsel %vm171_vm1, %v7734_v50, 0.0  ;;  %v7737_v54 = vmul.f32 %v13233_v55, %v13233_v55 }
 0x706   : > { %v7769_v29 = vadd.f32 %v7768_v18, %v7767_v7  ;;  %v7786_v7 = vsel %vm171_vm1, %v7735_v43, 0.0  ;;  %v7738_v18 = vmul.f32 %v13240_v58, %v13240_v58 }
 0x708   : > { %v7771_v62 = vadd.f32 %v7770_v20, %v7769_v29  ;;  %v7788_v29 = vsel %vm171_vm1, %v7736_v47, 0.0  ;;  %v7739_v20 = vmul.f32 %v13247_v4, %v13247_v4  ;;  %v7746_v47 = vmul.f32 %v13296_v16, %v13296_v16 }
 0x70a   : > { %v7773_v42 = vadd.f32 %v7772_v21, %v7771_v62  ;;  %v7790_v62 = vsel %vm171_vm1, %v7737_v54, 0.0  ;;  %v7740_v21 = vmul.f32 %v13254_v11, %v13254_v11  ;;  %v7808_v54 = vsel %vm171_vm1, %v7746_v47, 0.0 }
 0x70c   : > { %v7775_v48 = vadd.f32 %v7774_v25, %v7773_v42  ;;  %v7792_v42 = vsel %vm171_vm1, %v7738_v18, 0.0  ;;  %v7741_v25 = vmul.f32 %v13261_v53, %v13261_v53 }
 0x70e   : > { %v7777_v49 = vadd.f32 %v7776_v52, %v7775_v48  ;;  %v7794_v48 = vsel %vm171_vm1, %v7739_v20, 0.0  ;;  %v7742_v52 = vmul.f32 %v13268_v0, %v13268_v0 }
 0x710   : > { %v7779_v57 = vadd.f32 %v7778_v59, %v7777_v49  ;;  %v7796_v49 = vsel %vm171_vm1, %v7740_v21, 0.0  ;;  %v7743_v59 = vmul.f32 %v13275_v60, %v13275_v60 }
 0x712   : > { %v7781_v40 = vadd.f32 %v7780_v15, %v7779_v57  ;;  %v7798_v57 = vsel %vm171_vm1, %v7741_v25, 0.0  ;;  %v7744_v15 = vmul.f32 %v13282_v38, %v13282_v38 }
 0x714   : > { %v7783_v9 = vadd.f32 %v7782_v8, %v7781_v40  ;;  %v7800_v40 = vsel %vm171_vm1, %v7742_v52, 0.0  ;;  %v7802_v8 = vsel %vm171_vm1, %v7743_v59, 0.0 }
 0x716   : > { %v7785_v32 = vadd.f32 %v7784_v35, %v7783_v9  ;;  %v7804_v35 = vsel %vm171_vm1, %v7744_v15, 0.0 }
 0x718   : > { %v7787_v14 = vadd.f32 %v7786_v7, %v7785_v32 }
 0x71a   : > { %v7789_v3 = vadd.f32 %v7788_v29, %v7787_v14 }
 0x71c   : > { %v7791_v5 = vadd.f32 %v7790_v62, %v7789_v3 }
 0x71e   : > { %v7793_v39 = vadd.f32 %v7792_v42, %v7791_v5 }
 0x720   : > { %v7795_v22 = vadd.f32 %v7794_v48, %v7793_v39 }
 0x722   : > { %v7797_v63 = vadd.f32 %v7796_v49, %v7795_v22 }
 0x724   : > { %v7799_v50 = vadd.f32 %v7798_v57, %v7797_v63  ;;  %v7851_v57 = vld [vmem:[%s10785_s22] sm:$0xff] }
 0x726   : > { %v7801_v43 = vadd.f32 %v7800_v40, %v7799_v50  ;;  %v7854_v50 = vld [vmem:[%s10785_s22 + $0x18] sm:$0xff] }
 0x727   : > { %v7858_v40 = vld [vmem:[%s10785_s22 + $0x38] sm:$0xff] }
 0x728   : > { %v7803_v9 = vadd.f32 %v7802_v8, %v7801_v43 }
 0x72a   : > { %v7805_v32 = vadd.f32 %v7804_v35, %v7803_v9  ;;  %v7863_v35 = vld [vmem:[%s10785_s22 + $0x60] sm:$0xff] }
 0x72c   : > { %v7807_v17 = vadd.f32 %v7806_v34, %v7805_v32 }
 0x72e   : > { %v7809_v7 = vadd.f32 %v7808_v54, %v7807_v17  ;;  %v7865_v54 = vld [vmem:[%s10785_s22 + $0x70] sm:$0xff] }
 0x730   : > { %v7810_v14 = vrot.slane %v7809_v7, 4 }
 0x732   : > { %v7811_v18 = vadd.f32 %v7810_v14, %v7809_v7  ;;  %v7869_v7 = vld [vmem:[%s10785_s22 + $0x90] sm:$0xff]  ;;  %v7870_v14 = vld [vmem:[%s10785_s22 + $0x98] sm:$0xff] }
 0x734   : > { %v7812_v29 = vrot.slane %v7811_v18, 2 }
 0x736   : > { %v7813_v3 = vadd.f32 %v7812_v29, %v7811_v18 }
 0x738   : > { %v7814_v20 = vrot.slane %v7813_v3, 1 }
 0x73a   : > { %v7815_v62 = vadd.f32 %v7814_v20, %v7813_v3  ;;  %v7873_v20 = vld [vmem:[%s10785_s22 + $0xb0] sm:$0xff] }
 0x73c   : > { %v7816_v5 = vmul.f32 0.00390625, %v7815_v62 }
 0x73e   : > { %v7817_v21 = vadd.f32 1e-05, %v7816_v5 }
 0x740   : > { %10676 = vrsqrt.f32 %v7817_v21 }
 0x74a   : > { %v10677_v42 = vpop.eup %10676 }
 0x74b   : > { %v7819_v39 = vmul.f32 %v10677_v42, %v13087_v33  ;;  %v7820_v25 = vmul.f32 %v10677_v42, %v13091_v23  ;;  %v7821_v48 = vmul.f32 %v10677_v42, %v13095_v26  ;;  %v7822_v22 = vmul.f32 %v10677_v42, %v13099_v30 }
 0x74c   : > { %v7823_v52 = vmul.f32 %v10677_v42, %v13107_v46  ;;  %v7824_v49 = vmul.f32 %v10677_v42, %v13113_v1  ;;  %v7825_v63 = vmul.f32 %v10677_v42, %v13121_v19  ;;  %v7826_v59 = vmul.f32 %v10677_v42, %v13128_v56 }
 0x74d   : > { %v7827_v33 = vmul.f32 %v10677_v42, %v13135_v2  ;;  %v7828_v23 = vmul.f32 %v10677_v42, %v13142_v31  ;;  %v7829_v26 = vmul.f32 %v10677_v42, %v13149_v6  ;;  %v7830_v30 = vmul.f32 %v10677_v42, %v13156_v10  ;;  %v7852_v2 = vld [vmem:[%s10785_s22 + $0x8] sm:$0xff]  ;;  %v7853_v31 = vld [vmem:[%s10785_s22 + $0x10] sm:$0xff] }
 0x74e   : > { %v7831_v46 = vmul.f32 %v10677_v42, %v13163_v37  ;;  %v7832_v1 = vmul.f32 %v10677_v42, %v13170_v27  ;;  %v7833_v19 = vmul.f32 %v10677_v42, %v13177_v12  ;;  %v7834_v56 = vmul.f32 %v10677_v42, %v13184_v13  ;;  %v7855_v27 = vld [vmem:[%s10785_s22 + $0x20] sm:$0xff]  ;;  %v7856_v12 = vld [vmem:[%s10785_s22 + $0x28] sm:$0xff]  ;;  %v7857_v13 = vld [vmem:[%s10785_s22 + $0x30] sm:$0xff] }
 0x74f   : > { %v7835_v6 = vmul.f32 %v10677_v42, %v13191_v41  ;;  %v7836_v10 = vmul.f32 %v10677_v42, %v13198_v24  ;;  %v7837_v15 = vmul.f32 %v10677_v42, %v13205_v28  ;;  %v7838_v37 = vmul.f32 %v10677_v42, %v13212_v51  ;;  %v7859_v24 = vld [vmem:[%s10785_s22 + $0x40] sm:$0xff]  ;;  %v7860_v28 = vld [vmem:[%s10785_s22 + $0x48] sm:$0xff]  ;;  %v7861_v51 = vld [vmem:[%s10785_s22 + $0x50] sm:$0xff] }
 0x750   : > { %v7839_v43 = vmul.f32 %v10677_v42, %v13219_v44  ;;  %v7840_v45 = vmul.f32 %v10677_v42, %v13226_v36  ;;  %v7841_v8 = vmul.f32 %v10677_v42, %v13233_v55  ;;  %v7842_v41 = vmul.f32 %v10677_v42, %v13240_v58  ;;  %v7862_v55 = vld [vmem:[%s10785_s22 + $0x58] sm:$0xff]  ;;  %v7864_v58 = vld [vmem:[%s10785_s22 + $0x68] sm:$0xff] }
 0x751   : > { %v7843_v9 = vmul.f32 %v10677_v42, %v13247_v4  ;;  %v7844_v47 = vmul.f32 %v10677_v42, %v13254_v11  ;;  %v7845_v44 = vmul.f32 %v10677_v42, %v13261_v53  ;;  %v7846_v36 = vmul.f32 %v10677_v42, %v13268_v0  ;;  %v7866_v11 = vld [vmem:[%s10785_s22 + $0x78] sm:$0xff]  ;;  %v7867_v53 = vld [vmem:[%s10785_s22 + $0x80] sm:$0xff]  ;;  %v7868_v0 = vld [vmem:[%s10785_s22 + $0x88] sm:$0xff] }
 0x752   : > { %v7847_v32 = vmul.f32 %v10677_v42, %v13275_v60  ;;  %v7848_v34 = vmul.f32 %v10677_v42, %v13282_v38  ;;  %v7849_v17 = vmul.f32 %v10677_v42, %v13289_v61  ;;  %v7850_v4 = vmul.f32 %v10677_v42, %v13296_v16  ;;  %v7871_v38 = vld [vmem:[%s10785_s22 + $0xa0] sm:$0xff]  ;;  %v7872_v61 = vld [vmem:[%s10785_s22 + $0xa8] sm:$0xff]  ;;  %v7874_v42 = vld [vmem:[%s10785_s22 + $0xb8] sm:$0xff] }
 0x753   : > { %v7883_v18 = vadd.f32 %v7851_v57, %v7819_v39  ;;  %v7884_v29 = vadd.f32 %v7852_v2, %v7820_v25  ;;  %v7885_v3 = vadd.f32 %v7853_v31, %v7821_v48  ;;  %v7886_v60 = vadd.f32 %v7854_v50, %v7822_v22  ;;  %v7875_v39 = vld [vmem:[%s10785_s22 + $0xc0] sm:$0xff]  ;;  %v7876_v57 = vld [vmem:[%s10785_s22 + $0xc8] sm:$0xff]  ;;  %v7877_v22 = vld [vmem:[%s10785_s22 + $0xd0] sm:$0xff] }
 0x754   : > { %v7887_v16 = vadd.f32 %v7855_v27, %v7823_v52  ;;  %v7888_v62 = vadd.f32 %v7856_v12, %v7824_v49  ;;  %v7889_v5 = vadd.f32 %v7857_v13, %v7825_v63  ;;  %v7890_v21 = vadd.f32 %v7858_v40, %v7826_v59  ;;  %v7878_v50 = vld [vmem:[%s10785_s22 + $0xd8] sm:$0xff]  ;;  %v7879_v27 = vld [vmem:[%s10785_s22 + $0xe0] sm:$0xff]  ;;  %v7880_v63 = vld [vmem:[%s10785_s22 + $0xe8] sm:$0xff] }
 0x755   : > { %v7891_v2 = vadd.f32 %v7859_v24, %v7827_v33  ;;  %v7892_v25 = vadd.f32 %v7860_v28, %v7828_v23  ;;  %v7893_v48 = vadd.f32 %v7861_v51, %v7829_v26  ;;  %v7894_v31 = vadd.f32 %v7862_v55, %v7830_v30  ;;  %v7881_v40 = vld [vmem:[%s10785_s22 + $0xf0] sm:$0xff]  ;;  %v7882_v59 = vld [vmem:[%s10785_s22 + $0xf8] sm:$0xff] }
 0x756   : > { %v7895_v52 = vadd.f32 %v7863_v35, %v7831_v46  ;;  %v7896_v12 = vadd.f32 %v7864_v58, %v7832_v1  ;;  %v7897_v49 = vadd.f32 %v7865_v54, %v7833_v19  ;;  %v7898_v13 = vadd.f32 %v7866_v11, %v7834_v56 }
 0x757   : > { %v7899_v24 = vadd.f32 %v7867_v53, %v7835_v6  ;;  %v7900_v33 = vadd.f32 %v7868_v0, %v7836_v10  ;;  %v7901_v23 = vadd.f32 %v7869_v7, %v7837_v15  ;;  %v7902_v28 = vadd.f32 %v7870_v14, %v7838_v37 }
 0x758   : > { %v13373_v26 = vadd.f32 %v7871_v38, %v7839_v43  ;;  %v13375_v51 = vadd.f32 %v7872_v61, %v7840_v45  ;;  %v13377_v30 = vadd.f32 %v7873_v20, %v7841_v8  ;;  %v13379_v55 = vadd.f32 %v7874_v42, %v7842_v41 }
 0x759   : > { %v13381_v46 = vadd.f32 %v7875_v39, %v7843_v9  ;;  %v13383_v1 = vadd.f32 %v7876_v57, %v7844_v47  ;;  %v13385_v19 = vadd.f32 %v7877_v22, %v7845_v44  ;;  %v13387_v56 = vadd.f32 %v7878_v50, %v7846_v36 }
 0x75a   : > { %v13396_v6 = vadd.f32 %v7879_v27, %v7847_v32  ;;  %v13398_v10 = vadd.f32 %v7880_v63, %v7848_v34  ;;  %v13400_v15 = vadd.f32 %v7881_v40, %v7849_v17  ;;  %v13402_v37 = vadd.f32 %v7882_v59, %v7850_v4 }
 0x75b   : > { %v7915_v43 = vmax.f32 %v7883_v18, 0.0  ;;  %v7916_v45 = vmax.f32 %v7884_v29, 0.0  ;;  %v7917_v8 = vmax.f32 %v7885_v3, 0.0  ;;  %v7918_v41 = vmax.f32 %v7886_v60, 0.0 }
 0x75c   : > { %v7919_v9 = vmax.f32 %v7887_v16, 0.0  ;;  %v7920_v47 = vmax.f32 %v7888_v62, 0.0  ;;  %v7921_v44 = vmax.f32 %v7889_v5, 0.0  ;;  %v7922_v36 = vmax.f32 %v7890_v21, 0.0 }
 0x75d   : > { %v7923_v35 = vmax.f32 %v7891_v2, 0.0  ;;  %v7924_v58 = vmax.f32 %v7892_v25, 0.0  ;;  %v7925_v32 = vmax.f32 %v7893_v48, 0.0  ;;  %v7926_v34 = vmax.f32 %v7894_v31, 0.0  ;;  %7947 = vst.msk [vmem:[%s13394_s6] sm:$0xff] %vm171_vm1, %v7915_v43  ;;  %7948 = vst.msk [vmem:[%s13394_s6 + $0x8] sm:$0xff] %vm171_vm1, %v7916_v45 }
 0x75e   : > { %7949 = vst.msk [vmem:[%s13394_s6 + $0x10] sm:$0xff] %vm171_vm1, %v7917_v8  ;;  %7950 = vst.msk [vmem:[%s13394_s6 + $0x18] sm:$0xff] %vm171_vm1, %v7918_v41  ;;  %v7927_v17 = vmax.f32 %v7895_v52, 0.0  ;;  %v7928_v4 = vmax.f32 %v7896_v12, 0.0  ;;  %v7929_v54 = vmax.f32 %v7897_v49, 0.0  ;;  %v7930_v11 = vmax.f32 %v7898_v13, 0.0 }
 0x75f   : > { %7951 = vst.msk [vmem:[%s13394_s6 + $0x20] sm:$0xff] %vm171_vm1, %v7919_v9  ;;  %7952 = vst.msk [vmem:[%s13394_s6 + $0x28] sm:$0xff] %vm171_vm1, %v7920_v47  ;;  %v7931_v53 = vmax.f32 %v7899_v24, 0.0  ;;  %v7932_v0 = vmax.f32 %v7900_v33, 0.0  ;;  %v7933_v7 = vmax.f32 %v7901_v23, 0.0  ;;  %v7934_v14 = vmax.f32 %v7902_v28, 0.0 }
 0x760   : > { %7953 = vst.msk [vmem:[%s13394_s6 + $0x30] sm:$0xff] %vm171_vm1, %v7921_v44  ;;  %7954 = vst.msk [vmem:[%s13394_s6 + $0x38] sm:$0xff] %vm171_vm1, %v7922_v36  ;;  %v7935_v18 = vmax.f32 %v13373_v26, 0.0  ;;  %v7936_v29 = vmax.f32 %v13375_v51, 0.0  ;;  %v7937_v3 = vmax.f32 %v13377_v30, 0.0  ;;  %v7938_v60 = vmax.f32 %v13379_v55, 0.0 }
 0x761   : > { %7955 = vst.msk [vmem:[%s13394_s6 + $0x40] sm:$0xff] %vm171_vm1, %v7923_v35  ;;  %7956 = vst.msk [vmem:[%s13394_s6 + $0x48] sm:$0xff] %vm171_vm1, %v7924_v58  ;;  %v7939_v38 = vmax.f32 %v13381_v46, 0.0  ;;  %v7940_v61 = vmax.f32 %v13383_v1, 0.0  ;;  %v7941_v20 = vmax.f32 %v13385_v19, 0.0  ;;  %v7942_v16 = vmax.f32 %v13387_v56, 0.0 }
 0x762   : > { %7957 = vst.msk [vmem:[%s13394_s6 + $0x50] sm:$0xff] %vm171_vm1, %v7925_v32  ;;  %7958 = vst.msk [vmem:[%s13394_s6 + $0x58] sm:$0xff] %vm171_vm1, %v7926_v34  ;;  %v7943_v62 = vmax.f32 %v13396_v6, 0.0  ;;  %v7944_v5 = vmax.f32 %v13398_v10, 0.0  ;;  %v7945_v21 = vmax.f32 %v13400_v15, 0.0  ;;  %v7946_v42 = vmax.f32 %v13402_v37, 0.0 }
 0x763   : > { %7959 = vst.msk [vmem:[%s13394_s6 + $0x60] sm:$0xff] %vm171_vm1, %v7927_v17  ;;  %7960 = vst.msk [vmem:[%s13394_s6 + $0x68] sm:$0xff] %vm171_vm1, %v7928_v4 }
 0x764   : > { %7961 = vst.msk [vmem:[%s13394_s6 + $0x70] sm:$0xff] %vm171_vm1, %v7929_v54  ;;  %7962 = vst.msk [vmem:[%s13394_s6 + $0x78] sm:$0xff] %vm171_vm1, %v7930_v11 }
 0x765   : > { %7963 = vst.msk [vmem:[%s13394_s6 + $0x80] sm:$0xff] %vm171_vm1, %v7931_v53  ;;  %7964 = vst.msk [vmem:[%s13394_s6 + $0x88] sm:$0xff] %vm171_vm1, %v7932_v0 }
 0x766   : > { %7965 = vst.msk [vmem:[%s13394_s6 + $0x90] sm:$0xff] %vm171_vm1, %v7933_v7  ;;  %7966 = vst.msk [vmem:[%s13394_s6 + $0x98] sm:$0xff] %vm171_vm1, %v7934_v14 }
 0x767   : > { %7967 = vst.msk [vmem:[%s13394_s6 + $0xa0] sm:$0xff] %vm171_vm1, %v7935_v18  ;;  %7968 = vst.msk [vmem:[%s13394_s6 + $0xa8] sm:$0xff] %vm171_vm1, %v7936_v29 }
 0x768   : > { %7969 = vst.msk [vmem:[%s13394_s6 + $0xb0] sm:$0xff] %vm171_vm1, %v7937_v3  ;;  %7970 = vst.msk [vmem:[%s13394_s6 + $0xb8] sm:$0xff] %vm171_vm1, %v7938_v60 }
 0x769   : > { %7971 = vst.msk [vmem:[%s13394_s6 + $0xc0] sm:$0xff] %vm171_vm1, %v7939_v38  ;;  %7972 = vst.msk [vmem:[%s13394_s6 + $0xc8] sm:$0xff] %vm171_vm1, %v7940_v61 }
 0x76a   : > { %7973 = vst.msk [vmem:[%s13394_s6 + $0xd0] sm:$0xff] %vm171_vm1, %v7941_v20  ;;  %7974 = vst.msk [vmem:[%s13394_s6 + $0xd8] sm:$0xff] %vm171_vm1, %v7942_v16 }
 0x76b   : > { %7975 = vst.msk [vmem:[%s13394_s6 + $0xe0] sm:$0xff] %vm171_vm1, %v7943_v62  ;;  %7976 = vst.msk [vmem:[%s13394_s6 + $0xe8] sm:$0xff] %vm171_vm1, %v7944_v5 }
 0x76c   : > { %7977 = vst.msk [vmem:[%s13394_s6 + $0xf0] sm:$0xff] %vm171_vm1, %v7945_v21  ;;  %7978 = vst.msk [vmem:[%s13394_s6 + $0xf8] sm:$0xff] %vm171_vm1, %v7946_v42 }
 0x76d PF: > { %s13_s12 = sadd.s32 1, %s10684_s12  }
 0x76e   : > { %p10_p4 = scmp.ge.s32.totalorder %s13_s12, 4  }
 0x770   :  { %12 = sbr.rel (!%p10_p4) target bundleno = 1 (0x1), region = 84 }

// kernel: tpu_custom_call.1
= control target key start
LH: loop header
LB: loop body
LE: loop exit
PB: predicated region body
PF: predicated region fallthrough
CT: control target
= control target key end

     0   :  { %s10707_s12 = smov 0   ;;  %s13483_s0 = inlined_call_operand.vmem [shape: f32[2,16,16,4], index: 0, kind: input, shape index: {}]   ;;  %s13484_s1 = inlined_call_operand.vmem [shape: f32[9,4,4], index: 1, kind: input, shape index: {}]   ;;  %s13485_s2 = inlined_call_operand.vmem [shape: f32[9,4,4], index: 2, kind: input, shape index: {}]   ;;  %s13486_s3 = inlined_call_operand.vmem [shape: f32[2,16,16,4], index: 3, kind: output, shape index: {}]  }
   0x1 LB: > { %s8036_s13 = sadd.s32 4294967295, %s10684_s12   ;;  %p8040_p0 = scmp.ge.s32.totalorder %s10684_s12, 1  ;;  %s10684_s12 = sphi %s10707_s12, %s13_s12  }
   0x2   : > { %p137_p1 = scmp.lt.s32.totalorder %s10684_s12, 3 }
   0x4   : > { %p138_p2 = pnand %p8040_p0, %p137_p1 }
   0x6   : > { %141 = sbr.rel (%p138_p2) target bundleno = 1901 (0x76d), region = 32 }
   0xd   : > { %v8045_v0 = vld [vmem:[%s13484_s1 + $0x4] sm:$0xf]  ;;  %vm447_vm0 = vcmask 1043456   ;;  %vm171_vm1 = vcmask 31744   ;;  %vm174_vm2 = vcmask 25600   ;;  %v10686_v1 = vmov 0.0  }
   0xe   : > { %9253 = vmatprep.subr.msk.mxu0 %vm447_vm0, %v8045_v0  ;;  %172 = vst.msk [vmem:[#allocation2] sm:$0xff] %vm171_vm1, %v10686_v1  ;;  %173 = vst.msk [vmem:[#allocation2 + $0x8] sm:$0xff] %vm171_vm1, %v10686_v1  ;;  %v10726_v2 = vld [vmem:[%s13484_s1] sm:$0xf]  ;;  %p10730_p3 = scmp.lt.s32.totalorder %s8036_s13, 1  ;;  %vm180_vm3 = vcmask 24576  }
   0xf   : > { %177 = vst.msk [vmem:[#allocation2 + $0x198] sm:$0xff] %vm171_vm1, %v10686_v1  ;;  %178 = vst.msk [vmem:[#allocation2 + $0x1a0] sm:$0xff] %vm171_vm1, %v10686_v1  ;;  %9254 = vmatpush3.msk.msra.mxu0 %vm447_vm0, %v8045_v0  ;;  %v10793_v6 = vld [vmem:[%s13484_s1 + $0x8] sm:$0xf] }
  0x10   : > { %175 = vst.msk [vmem:[#allocation2 + $0x10] sm:$0x3] %vm174_vm2, %v10686_v1  ;;  %179 = vst.msk [vmem:[#allocation2 + $0x1a8] sm:$0x3] %vm174_vm2, %v10686_v1  ;;  %9303 = vmatprep.subr.msk.mxu0 %vm447_vm0, %v10726_v2  ;;  %s13761_s13 = smov (!%p10730_p3, %s8036_s13), 1 }
  0x11   : > { %181 = vst.msk [vmem:[#allocation2] sm:$0x1] %vm180_vm3, %v10686_v1  ;;  %182 = vst.msk [vmem:[#allocation2 + $0x18] sm:$0x1] %vm180_vm3, %v10686_v1  ;;  %s8657_s19 = sshll.u32 %s13761_s13, 8 }
  0x12   : > { %183 = vst.msk [vmem:[#allocation2 + $0x30] sm:$0x1] %vm180_vm3, %v10686_v1  ;;  %184 = vst.msk [vmem:[#allocation2 + $0x48] sm:$0x1] %vm180_vm3, %v10686_v1  ;;  %s10785_s22 = scalar_lea.vmem %s13483_s0, %s8657_s19  ;;  %s13394_s6 = scalar_lea.vmem %s13486_s3, %s8657_s19 }
  0x13   : > { %185 = vst.msk [vmem:[#allocation2 + $0x60] sm:$0x1] %vm180_vm3, %v10686_v1  ;;  %186 = vst.msk [vmem:[#allocation2 + $0x78] sm:$0x1] %vm180_vm3, %v10686_v1  ;;  %v217_v3 = vld [vmem:[%s10785_s22] sm:$0xff]  ;;  %v218_v4 = vld [vmem:[%s10785_s22 + $0x8] sm:$0xff] }
  0x14   : > { %187 = vst.msk [vmem:[#allocation2 + $0x90] sm:$0x1] %vm180_vm3, %v10686_v1  ;;  %188 = vst.msk [vmem:[#allocation2 + $0xa8] sm:$0x1] %vm180_vm3, %v10686_v1  ;;  %v219_v5 = vld [vmem:[%s10785_s22 + $0x10] sm:$0xff]  ;;  %v220_v9 = vld [vmem:[%s10785_s22 + $0x18] sm:$0xff] }
  0x15   : > { %189 = vst.msk [vmem:[#allocation2 + $0xc0] sm:$0x1] %vm180_vm3, %v10686_v1  ;;  %190 = vst.msk [vmem:[#allocation2 + $0xd8] sm:$0x1] %vm180_vm3, %v10686_v1  ;;  %v317_v7 = vld [vmem:[#allocation2 + $0x1] sm:$0xff]  ;;  %v223_v12 = vld [vmem:[%s10785_s22 + $0x30] sm:$0xff] }
  0x16   : > { %191 = vst.msk [vmem:[#allocation2 + $0xf0] sm:$0x1] %vm180_vm3, %v10686_v1  ;;  %192 = vst.msk [vmem:[#allocation2 + $0x108] sm:$0x1] %vm180_vm3, %v10686_v1  ;;  %9255 = vmatprep.mubr.msk.f32.mxu0 %vm171_vm1, %v317_v7  ;;  %v221_v10 = vld [vmem:[%s10785_s22 + $0x20] sm:$0xff]  ;;  %v222_v11 = vld [vmem:[%s10785_s22 + $0x28] sm:$0xff] }
  0x17   : > { %193 = vst.msk [vmem:[#allocation2 + $0x120] sm:$0x1] %vm180_vm3, %v10686_v1  ;;  %194 = vst.msk [vmem:[#allocation2 + $0x138] sm:$0x1] %vm180_vm3, %v10686_v1  ;;  %v318_v8 = vld [vmem:[#allocation2 + $0x9] sm:$0xff]  ;;  %v224_v13 = vld [vmem:[%s10785_s22 + $0x38] sm:$0xff] }
  0x18   : > { %195 = vst.msk [vmem:[#allocation2 + $0x150] sm:$0x1] %vm180_vm3, %v10686_v1  ;;  %196 = vst.msk [vmem:[#allocation2 + $0x168] sm:$0x1] %vm180_vm3, %v10686_v1  ;;  %9256 = vmatmul.mubr.msk.f32.vlgmr.msra.gmra.mrb[0].mxu0 %vm171_vm1, %v318_v8  ;;  %v225_v14 = vld [vmem:[%s10785_s22 + $0x40] sm:$0xff]  ;;  %v226_v15 = vld [vmem:[%s10785_s22 + $0x48] sm:$0xff] }
  0x19   : > { %197 = vst.msk [vmem:[#allocation2 + $0x180] sm:$0x1] %vm180_vm3, %v10686_v1  ;;  %198 = vst.msk [vmem:[#allocation2 + $0x198] sm:$0x1] %vm180_vm3, %v10686_v1  ;;  %9304 = vmatpush3.msk.msra.mxu0 %vm447_vm0, %v10726_v2  ;;  %v227_v16 = vld [vmem:[%s10785_s22 + $0x50] sm:$0xff]  ;;  %v228_v17 = vld [vmem:[%s10785_s22 + $0x58] sm:$0xff] }
  0x1a   : > { %199 = vst.msk [vmem:[#allocation2 + $0x11] sm:$0x1] %vm180_vm3, %v10686_v1  ;;  %200 = vst.msk [vmem:[#allocation2 + $0x29] sm:$0x1] %vm180_vm3, %v10686_v1  ;;  %v229_v18 = vld [vmem:[%s10785_s22 + $0x60] sm:$0xff]  ;;  %v230_v19 = vld [vmem:[%s10785_s22 + $0x68] sm:$0xff]  ;;  %9353 = vmatprep.subr.msk.mxu0 %vm447_vm0, %v10793_v6 }
  0x1b   : > { %201 = vst.msk [vmem:[#allocation2 + $0x41] sm:$0x1] %vm180_vm3, %v10686_v1  ;;  %202 = vst.msk [vmem:[#allocation2 + $0x59] sm:$0x1] %vm180_vm3, %v10686_v1  ;;  %v231_v20 = vld [vmem:[%s10785_s22 + $0x70] sm:$0xff]  ;;  %v232_v21 = vld [vmem:[%s10785_s22 + $0x78] sm:$0xff] }
  0x1c   : > { %203 = vst.msk [vmem:[#allocation2 + $0x71] sm:$0x1] %vm180_vm3, %v10686_v1  ;;  %204 = vst.msk [vmem:[#allocation2 + $0x89] sm:$0x1] %vm180_vm3, %v10686_v1  ;;  %v233_v22 = vld [vmem:[%s10785_s22 + $0x80] sm:$0xff]  ;;  %v234_v23 = vld [vmem:[%s10785_s22 + $0x88] sm:$0xff] }
  0x1d   : > { %205 = vst.msk [vmem:[#allocation2 + $0xa1] sm:$0x1] %vm180_vm3, %v10686_v1  ;;  %206 = vst.msk [vmem:[#allocation2 + $0xb9] sm:$0x1] %vm180_vm3, %v10686_v1  ;;  %v235_v24 = vld [vmem:[%s10785_s22 + $0x90] sm:$0xff]  ;;  %v236_v25 = vld [vmem:[%s10785_s22 + $0x98] sm:$0xff] }
  0x1e   : > { %207 = vst.msk [vmem:[#allocation2 + $0xd1] sm:$0x1] %vm180_vm3, %v10686_v1  ;;  %208 = vst.msk [vmem:[#allocation2 + $0xe9] sm:$0x1] %vm180_vm3, %v10686_v1  ;;  %v237_v26 = vld [vmem:[%s10785_s22 + $0xa0] sm:$0xff]  ;;  %v238_v27 = vld [vmem:[%s10785_s22 + $0xa8] sm:$0xff] }
  0x1f   : > { %209 = vst.msk [vmem:[#allocation2 + $0x101] sm:$0x1] %vm180_vm3, %v10686_v1  ;;  %210 = vst.msk [vmem:[#allocation2 + $0x119] sm:$0x1] %vm180_vm3, %v10686_v1  ;;  %v239_v31 = vld [vmem:[%s10785_s22 + $0xb0] sm:$0xff]  ;;  %v240_v32 = vld [vmem:[%s10785_s22 + $0xb8] sm:$0xff] }
  0x20   : > { %211 = vst.msk [vmem:[#allocation2 + $0x131] sm:$0x1] %vm180_vm3, %v10686_v1  ;;  %212 = vst.msk [vmem:[#allocation2 + $0x149] sm:$0x1] %vm180_vm3, %v10686_v1  ;;  %v241_v37 = vld [vmem:[%s10785_s22 + $0xc0] sm:$0xff]  ;;  %v242_v38 = vld [vmem:[%s10785_s22 + $0xc8] sm:$0xff] }
  0x21   : > { %213 = vst.msk [vmem:[#allocation2 + $0x161] sm:$0x1] %vm180_vm3, %v10686_v1  ;;  %214 = vst.msk [vmem:[#allocation2 + $0x179] sm:$0x1] %vm180_vm3, %v10686_v1  ;;  %v243_v39 = vld [vmem:[%s10785_s22 + $0xd0] sm:$0xff]  ;;  %v244_v40 = vld [vmem:[%s10785_s22 + $0xd8] sm:$0xff] }
  0x22   : > { %215 = vst.msk [vmem:[#allocation2 + $0x191] sm:$0x1] %vm180_vm3, %v10686_v1  ;;  %216 = vst.msk [vmem:[#allocation2 + $0x1a9] sm:$0x1] %vm180_vm3, %v10686_v1  ;;  %v245_v41 = vld [vmem:[%s10785_s22 + $0xe0] sm:$0xff]  ;;  %v246_v42 = vld [vmem:[%s10785_s22 + $0xe8] sm:$0xff] }
  0x23   : > { %250 = vst.msk [vmem:[#allocation2 + $0x19] sm:$0xff] %vm171_vm1, %v217_v3  ;;  %251 = vst.msk [vmem:[#allocation2 + $0x21] sm:$0xff] %vm171_vm1, %v218_v4  ;;  %v284_v2 = vld [vmem:[#allocation2] sm:$0xff]  ;;  %v285_v3 = vld [vmem:[#allocation2 + $0x8] sm:$0xff] }
  0x24   : > { %252 = vst.msk [vmem:[#allocation2 + $0x31] sm:$0xff] %vm171_vm1, %v219_v5  ;;  %253 = vst.msk [vmem:[#allocation2 + $0x39] sm:$0xff] %vm171_vm1, %v220_v9  ;;  %v10984_v5 = vld [vmem:[%s13484_s1 + $0xc] sm:$0xf] }
  0x25   : > { %254 = vst.msk [vmem:[#allocation2 + $0x49] sm:$0xff] %vm171_vm1, %v221_v10  ;;  %255 = vst.msk [vmem:[#allocation2 + $0x51] sm:$0xff] %vm171_vm1, %v222_v11 }
  0x26   : > { %256 = vst.msk [vmem:[#allocation2 + $0x61] sm:$0xff] %vm171_vm1, %v223_v12  ;;  %257 = vst.msk [vmem:[#allocation2 + $0x69] sm:$0xff] %vm171_vm1, %v224_v13 }
  0x27   : > { %258 = vst.msk [vmem:[#allocation2 + $0x79] sm:$0xff] %vm171_vm1, %v225_v14  ;;  %259 = vst.msk [vmem:[#allocation2 + $0x81] sm:$0xff] %vm171_vm1, %v226_v15 }
  0x28   : > { %260 = vst.msk [vmem:[#allocation2 + $0x91] sm:$0xff] %vm171_vm1, %v227_v16  ;;  %261 = vst.msk [vmem:[#allocation2 + $0x99] sm:$0xff] %vm171_vm1, %v228_v17 }
  0x29   : > { %262 = vst.msk [vmem:[#allocation2 + $0xa9] sm:$0xff] %vm171_vm1, %v229_v18  ;;  %263 = vst.msk [vmem:[#allocation2 + $0xb1] sm:$0xff] %vm171_vm1, %v230_v19 }
  0x2a   : > { %264 = vst.msk [vmem:[#allocation2 + $0xc1] sm:$0xff] %vm171_vm1, %v231_v20  ;;  %265 = vst.msk [vmem:[#allocation2 + $0xc9] sm:$0xff] %vm171_vm1, %v232_v21  ;;  %v10839_v28 = vld [vmem:[#allocation2 + $0x19] sm:$0xff]  ;;  %v10841_v29 = vld [vmem:[#allocation2 + $0x21] sm:$0xff] }
  0x2b   : > { %266 = vst.msk [vmem:[#allocation2 + $0xd9] sm:$0xff] %vm171_vm1, %v233_v22  ;;  %267 = vst.msk [vmem:[#allocation2 + $0xe1] sm:$0xff] %vm171_vm1, %v234_v23  ;;  %v10843_v30 = vld [vmem:[#allocation2 + $0x31] sm:$0xff]  ;;  %9258 = vmatprep.mubr.msk.f32.mxu0 %vm171_vm1, %v10839_v28  ;;  %v10858_v33 = vld [vmem:[#allocation2 + $0x39] sm:$0xff] }
  0x2c   : > { %268 = vst.msk [vmem:[#allocation2 + $0xf1] sm:$0xff] %vm171_vm1, %v235_v24  ;;  %269 = vst.msk [vmem:[#allocation2 + $0xf9] sm:$0xff] %vm171_vm1, %v236_v25  ;;  %9259 = vmatmul.mubr.msk.f32.gmra.mrb[2].mxu0 %vm171_vm1, %v10841_v29  ;;  %v10860_v34 = vld [vmem:[#allocation2 + $0x49] sm:$0xff]  ;;  %v10866_v35 = vld [vmem:[#allocation2 + $0x51] sm:$0xff] }
  0x2d   : > { %270 = vst.msk [vmem:[#allocation2 + $0x109] sm:$0xff] %vm171_vm1, %v237_v26  ;;  %271 = vst.msk [vmem:[#allocation2 + $0x111] sm:$0xff] %vm171_vm1, %v238_v27  ;;  %9261 = vmatprep.mubr.msk.f32.mxu0 %vm171_vm1, %v10843_v30  ;;  %v10868_v36 = vld [vmem:[#allocation2 + $0x61] sm:$0xff]  ;;  %v10884_v43 = vld [vmem:[#allocation2 + $0x69] sm:$0xff] }
  0x2e   : > { %272 = vst.msk [vmem:[#allocation2 + $0x121] sm:$0xff] %vm171_vm1, %v239_v31  ;;  %273 = vst.msk [vmem:[#allocation2 + $0x129] sm:$0xff] %vm171_vm1, %v240_v32  ;;  %v10888_v44 = vld [vmem:[#allocation2 + $0x79] sm:$0xff]  ;;  %v10894_v45 = vld [vmem:[#allocation2 + $0x81] sm:$0xff] }
  0x2f   : > { %274 = vst.msk [vmem:[#allocation2 + $0x139] sm:$0xff] %vm171_vm1, %v241_v37  ;;  %275 = vst.msk [vmem:[#allocation2 + $0x141] sm:$0xff] %vm171_vm1, %v242_v38  ;;  %v10896_v46 = vld [vmem:[#allocation2 + $0x91] sm:$0xff]  ;;  %v10902_v47 = vld [vmem:[#allocation2 + $0x99] sm:$0xff] }
  0x30   : > { %9262 = vmatmul.mubr.msk.f32.gmra.mrb[4].mxu0 %vm171_vm1, %v10858_v33  ;;  %276 = vst.msk [vmem:[#allocation2 + $0x151] sm:$0xff] %vm171_vm1, %v243_v39  ;;  %277 = vst.msk [vmem:[#allocation2 + $0x159] sm:$0xff] %vm171_vm1, %v244_v40  ;;  %v10904_v48 = vld [vmem:[#allocation2 + $0xa9] sm:$0xff]  ;;  %v10910_v49 = vld [vmem:[#allocation2 + $0xb1] sm:$0xff] }
  0x31   : > { %9264 = vmatprep.mubr.msk.f32.mxu0 %vm171_vm1, %v10860_v34  ;;  %278 = vst.msk [vmem:[#allocation2 + $0x169] sm:$0xff] %vm171_vm1, %v245_v41  ;;  %279 = vst.msk [vmem:[#allocation2 + $0x171] sm:$0xff] %vm171_vm1, %v246_v42  ;;  %v10912_v50 = vld [vmem:[#allocation2 + $0xc1] sm:$0xff]  ;;  %v10918_v51 = vld [vmem:[#allocation2 + $0xc9] sm:$0xff] }
  0x32   : > { %v10920_v52 = vld [vmem:[#allocation2 + $0xd9] sm:$0xff]  ;;  %v10926_v53 = vld [vmem:[#allocation2 + $0xe1] sm:$0xff]  ;;  %v10993_v8 = vld [vmem:[#allocation2 + $0x30] sm:$0xff] }
  0x33   : > { %v10928_v54 = vld [vmem:[#allocation2 + $0xf1] sm:$0xff]  ;;  %v10934_v55 = vld [vmem:[#allocation2 + $0xf9] sm:$0xff]  ;;  %v11003_v10 = vld [vmem:[#allocation2 + $0x48] sm:$0xff] }
  0x34   : > { %9265 = vmatmul.mubr.msk.f32.gmra.mrb[6].mxu0 %vm171_vm1, %v10866_v35  ;;  %v10936_v56 = vld [vmem:[#allocation2 + $0x109] sm:$0xff]  ;;  %v10942_v57 = vld [vmem:[#allocation2 + $0x111] sm:$0xff]  ;;  %v10991_v7 = vld [vmem:[#allocation2 + $0x20] sm:$0xff] }
  0x35   : > { %9267 = vmatprep.mubr.msk.f32.mxu0 %vm171_vm1, %v10868_v36  ;;  %v10944_v58 = vld [vmem:[#allocation2 + $0x121] sm:$0xff]  ;;  %v10950_v59 = vld [vmem:[#allocation2 + $0x129] sm:$0xff]  ;;  %v10979_v4 = vld [vmem:[#allocation2 + $0x18] sm:$0xff] }
  0x36   : > { %v10952_v60 = vld [vmem:[#allocation2 + $0x139] sm:$0xff]  ;;  %v10958_v61 = vld [vmem:[#allocation2 + $0x141] sm:$0xff]  ;;  %v11027_v15 = vld [vmem:[#allocation2 + $0x90] sm:$0xff] }
  0x37   : > { %v10960_v62 = vld [vmem:[#allocation2 + $0x151] sm:$0xff]  ;;  %v10966_v63 = vld [vmem:[#allocation2 + $0x159] sm:$0xff]  ;;  %v11017_v12 = vld [vmem:[#allocation2 + $0x68] sm:$0xff] }
  0x38   : > { %9268 = vmatmul.mubr.msk.f32.gmra.mrb[8].mxu0 %vm171_vm1, %v10884_v43  ;;  %13605 = vst [vmem:[#allocation4_spill] sm:$0xff] %v10966_v63  ;;  %v10968_v0 = vld [vmem:[#allocation2 + $0x169] sm:$0xff]  ;;  %v10974_v1 = vld [vmem:[#allocation2 + $0x171] sm:$0xff]  ;;  %v11011_v11 = vld [vmem:[#allocation2 + $0x60] sm:$0xff] }
  0x39   : > { %9270 = vmatprep.mubr.msk.f32.mxu0 %vm171_vm1, %v10888_v44  ;;  %13606 = vst [vmem:[#allocation5_spill] sm:$0xff] %v10968_v0  ;;  %13607 = vst [vmem:[#allocation6_spill] sm:$0xff] %v10974_v1  ;;  %v11001_v9 = vld [vmem:[#allocation2 + $0x38] sm:$0xff]  ;;  %v11025_v14 = vld [vmem:[#allocation2 + $0x80] sm:$0xff] }
  0x3a   : > { %v11019_v13 = vld [vmem:[#allocation2 + $0x78] sm:$0xff]  ;;  %v11035_v17 = vld [vmem:[#allocation2 + $0xa8] sm:$0xff]  ;;  %v11041_v18 = vld [vmem:[#allocation2 + $0xb0] sm:$0xff] }
  0x3b   : > { %v11033_v16 = vld [vmem:[#allocation2 + $0x98] sm:$0xff]  ;;  %v11043_v19 = vld [vmem:[#allocation2 + $0xc0] sm:$0xff]  ;;  %v11049_v20 = vld [vmem:[#allocation2 + $0xc8] sm:$0xff] }
  0x3c   : > { %9271 = vmatmul.mubr.msk.f32.gmra.mrb[10].mxu0 %vm171_vm1, %v10894_v45  ;;  %v11051_v21 = vld [vmem:[#allocation2 + $0xd8] sm:$0xff]  ;;  %v11057_v22 = vld [vmem:[#allocation2 + $0xe0] sm:$0xff]  ;;  %v11059_v23 = vld [vmem:[#allocation2 + $0xf0] sm:$0xff] }
  0x3d   : > { %9273 = vmatprep.mubr.msk.f32.mxu0 %vm171_vm1, %v10896_v46  ;;  %v11065_v24 = vld [vmem:[#allocation2 + $0xf8] sm:$0xff]  ;;  %v11067_v25 = vld [vmem:[#allocation2 + $0x108] sm:$0xff]  ;;  %v11073_v26 = vld [vmem:[#allocation2 + $0x110] sm:$0xff] }
  0x3e   : > { %v11075_v27 = vld [vmem:[#allocation2 + $0x120] sm:$0xff]  ;;  %v11081_v31 = vld [vmem:[#allocation2 + $0x128] sm:$0xff]  ;;  %v11083_v32 = vld [vmem:[#allocation2 + $0x138] sm:$0xff] }
  0x3f   : > { %v11089_v37 = vld [vmem:[#allocation2 + $0x140] sm:$0xff]  ;;  %v11091_v38 = vld [vmem:[#allocation2 + $0x150] sm:$0xff]  ;;  %v248_v40 = vld [vmem:[%s10785_s22 + $0xf8] sm:$0xff] }
  0x40   : > { %9274 = vmatmul.mubr.msk.f32.gmra.mrb[12].mxu0 %vm171_vm1, %v10902_v47  ;;  %v247_v39 = vld [vmem:[%s10785_s22 + $0xf0] sm:$0xff]  ;;  %281 = vst.msk [vmem:[#allocation2 + $0x189] sm:$0xff] %vm171_vm1, %v248_v40  ;;  %v11101_v41 = vld [vmem:[#allocation2 + $0x158] sm:$0xff]  ;;  %v11103_v42 = vld [vmem:[#allocation2 + $0x168] sm:$0xff] }
  0x41   : > { %9276 = vmatprep.mubr.msk.f32.mxu0 %vm171_vm1, %v10904_v48  ;;  %280 = vst.msk [vmem:[#allocation2 + $0x181] sm:$0xff] %vm171_vm1, %v247_v39  ;;  %v1001_v39 = vld [vmem:[#allocation2 + $0xa] sm:$0xff]  ;;  %v11114_v40 = vld [vmem:[#allocation2 + $0x1a] sm:$0xff] }
  0x42   : > { %13608 = vst [vmem:[#allocation7_spill] sm:$0xff] %v11114_v40 }
  0x44   : > { %9277 = vmatmul.mubr.msk.f32.gmra.mrb[14].mxu0 %vm171_vm1, %v10910_v49 }
  0x45   : > { %9279 = vmatprep.mubr.msk.f32.mxu0 %vm171_vm1, %v10912_v50 }
  0x48   : > { %9280 = vmatmul.mubr.msk.f32.gmra.mrb[16].mxu0 %vm171_vm1, %v10918_v51 }
  0x49   : > { %9282 = vmatprep.mubr.msk.f32.mxu0 %vm171_vm1, %v10920_v52 }
  0x4c   : > { %9283 = vmatmul.mubr.msk.f32.gmra.mrb[18].mxu0 %vm171_vm1, %v10926_v53 }
  0x4d   : > { %9285 = vmatprep.mubr.msk.f32.mxu0 %vm171_vm1, %v10928_v54 }
  0x50   : > { %9286 = vmatmul.mubr.msk.f32.gmra.mrb[20].mxu0 %vm171_vm1, %v10934_v55 }
  0x51   : > { %9288 = vmatprep.mubr.msk.f32.mxu0 %vm171_vm1, %v10936_v56 }
  0x54   : > { %9289 = vmatmul.mubr.msk.f32.gmra.mrb[22].mxu0 %vm171_vm1, %v10942_v57 }
  0x55   : > { %9291 = vmatprep.mubr.msk.f32.mxu0 %vm171_vm1, %v10944_v58 }
  0x58   : > { %9292 = vmatmul.mubr.msk.f32.gmra.mrb[24].mxu0 %vm171_vm1, %v10950_v59 }
  0x59   : > { %9294 = vmatprep.mubr.msk.f32.mxu0 %vm171_vm1, %v10952_v60 }
  0x5c   : > { %9295 = vmatmul.mubr.msk.f32.gmra.mrb[26].mxu0 %vm171_vm1, %v10958_v61 }
  0x5d   : > { %9297 = vmatprep.mubr.msk.f32.mxu0 %vm171_vm1, %v10960_v62 }
  0x60   : > { %9298 = vmatmul.mubr.msk.f32.gmra.mrb[28].mxu0 %vm171_vm1, %v10966_v63  ;;  %v11128_v63 = vld [vmem:[#allocation2 + $0x32] sm:$0xff] }
  0x61   : > { %9300 = vmatprep.mubr.msk.f32.mxu0 %vm171_vm1, %v10968_v0  ;;  %v11126_v0 = vld [vmem:[#allocation2 + $0x22] sm:$0xff]  ;;  %13610 = vst [vmem:[#allocation9_spill] sm:$0xff] %v11128_v63 }
  0x62   : > { %13609 = vst [vmem:[#allocation8_spill] sm:$0xff] %v11126_v0 }
  0x64   : > { %9301 = vmatmul.mubr.msk.f32.gmra.mrb[30].mxu0 %vm171_vm1, %v10974_v1  ;;  %v11119_v1 = vld [vmem:[%s13484_s1 + $0x10] sm:$0xf] }
  0x65   : > { %9305 = vmatprep.mubr.msk.f32.mxu0 %vm171_vm1, %v284_v2  ;;  %v11109_v2 = vld [vmem:[#allocation2 + $0x170] sm:$0xff] }
  0x68   : > { %9306 = vmatmul.mubr.msk.f32.vlgmr.msra.gmra.mrb[0].mxu0 %vm171_vm1, %v285_v3  ;;  %v1000_v3 = vld [vmem:[#allocation2 + $0x2] sm:$0xff] }
  0x69   : > { %9354 = vmatpush3.msk.msra.mxu0 %vm447_vm0, %v10793_v6  ;;  %9308 = vmatprep.mubr.msk.f32.mxu0 %vm171_vm1, %v10979_v4  ;;  %v11009_v6 = vld [vmem:[#allocation2 + $0x50] sm:$0xff] }
  0x6a   : > { %9403 = vmatprep.subr.msk.mxu0 %vm447_vm0, %v10984_v5 }
  0x6c   : > { %9309 = vmatmul.mubr.msk.f32.gmra.mrb[2].mxu0 %vm171_vm1, %v10991_v7 }
  0x6d   : > { %9311 = vmatprep.mubr.msk.f32.mxu0 %vm171_vm1, %v10993_v8 }
  0x70   : > { %9312 = vmatmul.mubr.msk.f32.gmra.mrb[4].mxu0 %vm171_vm1, %v11001_v9 }
  0x71   : > { %9314 = vmatprep.mubr.msk.f32.mxu0 %vm171_vm1, %v11003_v10 }
  0x74   : > { %9315 = vmatmul.mubr.msk.f32.gmra.mrb[6].mxu0 %vm171_vm1, %v11009_v6 }
  0x75   : > { %9317 = vmatprep.mubr.msk.f32.mxu0 %vm171_vm1, %v11011_v11 }
  0x78   : > { %9318 = vmatmul.mubr.msk.f32.gmra.mrb[8].mxu0 %vm171_vm1, %v11017_v12 }
  0x79   : > { %9320 = vmatprep.mubr.msk.f32.mxu0 %vm171_vm1, %v11019_v13 }
  0x7c   : > { %9321 = vmatmul.mubr.msk.f32.gmra.mrb[10].mxu0 %vm171_vm1, %v11025_v14 }
  0x7d   : > { %9323 = vmatprep.mubr.msk.f32.mxu0 %vm171_vm1, %v11027_v15 }
  0x80   : > { %9324 = vmatmul.mubr.msk.f32.gmra.mrb[12].mxu0 %vm171_vm1, %v11033_v16 }
  0x81   : > { %9326 = vmatprep.mubr.msk.f32.mxu0 %vm171_vm1, %v11035_v17 }
  0x84   : > { %9327 = vmatmul.mubr.msk.f32.gmra.mrb[14].mxu0 %vm171_vm1, %v11041_v18 }
  0x85   : > { %9329 = vmatprep.mubr.msk.f32.mxu0 %vm171_vm1, %v11043_v19 }
  0x88   : > { %9330 = vmatmul.mubr.msk.f32.gmra.mrb[16].mxu0 %vm171_vm1, %v11049_v20 }
  0x89   : > { %9332 = vmatprep.mubr.msk.f32.mxu0 %vm171_vm1, %v11051_v21 }
  0x8c   : > { %9333 = vmatmul.mubr.msk.f32.gmra.mrb[18].mxu0 %vm171_vm1, %v11057_v22 }
  0x8d   : > { %9335 = vmatprep.mubr.msk.f32.mxu0 %vm171_vm1, %v11059_v23 }
  0x90   : > { %9336 = vmatmul.mubr.msk.f32.gmra.mrb[20].mxu0 %vm171_vm1, %v11065_v24 }
  0x91   : > { %9338 = vmatprep.mubr.msk.f32.mxu0 %vm171_vm1, %v11067_v25 }
  0x94   : > { %9339 = vmatmul.mubr.msk.f32.gmra.mrb[22].mxu0 %vm171_vm1, %v11073_v26 }
  0x95   : > { %9341 = vmatprep.mubr.msk.f32.mxu0 %vm171_vm1, %v11075_v27 }
  0x98   : > { %9342 = vmatmul.mubr.msk.f32.gmra.mrb[24].mxu0 %vm171_vm1, %v11081_v31 }
  0x99   : > { %9344 = vmatprep.mubr.msk.f32.mxu0 %vm171_vm1, %v11083_v32 }
  0x9c   : > { %9345 = vmatmul.mubr.msk.f32.gmra.mrb[26].mxu0 %vm171_vm1, %v11089_v37 }
  0x9d   : > { %9347 = vmatprep.mubr.msk.f32.mxu0 %vm171_vm1, %v11091_v38 }
  0xa0   : > { %9348 = vmatmul.mubr.msk.f32.gmra.mrb[28].mxu0 %vm171_vm1, %v11101_v41 }
  0xa1   : > { %9350 = vmatprep.mubr.msk.f32.mxu0 %vm171_vm1, %v11103_v42 }
  0xa4   : > { %9351 = vmatmul.mubr.msk.f32.gmra.mrb[30].mxu0 %vm171_vm1, %v11109_v2 }
  0xa5   : > { %9355 = vmatprep.mubr.msk.f32.mxu0 %vm171_vm1, %v1000_v3  ;;  %v11136_v3 = vld [vmem:[#allocation2 + $0x3a] sm:$0xff] }
  0xa6   : > { %13611 = vst [vmem:[#allocation10_spill] sm:$0xff] %v11136_v3 }
  0xa8   : > { %9356 = vmatmul.mubr.msk.f32.vlgmr.msra.gmra.mrb[0].mxu0 %vm171_vm1, %v1001_v39  ;;  %v11138_v39 = vld [vmem:[#allocation2 + $0x4a] sm:$0xff] }
  0xa9   : > { %9404 = vmatpush3.msk.msra.mxu0 %vm447_vm0, %v10984_v5  ;;  %9358 = vmatprep.mubr.msk.f32.mxu0 %vm171_vm1, %v11114_v40  ;;  %13612 = vst [vmem:[#allocation11_spill] sm:$0xff] %v11138_v39  ;;  %v11144_v5 = vld [vmem:[#allocation2 + $0x52] sm:$0xff]  ;;  %v11146_v40 = vld [vmem:[#allocation2 + $0x62] sm:$0xff] }
  0xaa   : > { %9453 = vmatprep.subr.msk.mxu0 %vm447_vm0, %v11119_v1  ;;  %13613 = vst [vmem:[#allocation12_spill] sm:$0xff] %v11144_v5  ;;  %13614 = vst [vmem:[#allocation13_spill] sm:$0xff] %v11146_v40 }
  0xac   : > { %9359 = vmatmul.mubr.msk.f32.gmra.mrb[2].mxu0 %vm171_vm1, %v11126_v0  ;;  %v11154_v0 = vld [vmem:[#allocation2 + $0x7a] sm:$0xff] }
  0xad   : > { %9361 = vmatprep.mubr.msk.f32.mxu0 %vm171_vm1, %v11128_v63  ;;  %v11152_v63 = vld [vmem:[#allocation2 + $0x6a] sm:$0xff]  ;;  %13616 = vst [vmem:[#allocation15_spill] sm:$0xff] %v11154_v0 }
  0xae   : > { %13615 = vst [vmem:[#allocation14_spill] sm:$0xff] %v11152_v63 }
  0xb0   : > { %9362 = vmatmul.mubr.msk.f32.gmra.mrb[4].mxu0 %vm171_vm1, %v11136_v3  ;;  %v11162_v3 = vld [vmem:[#allocation2 + $0x92] sm:$0xff] }
  0xb1   : > { %9364 = vmatprep.mubr.msk.f32.mxu0 %vm171_vm1, %v11138_v39  ;;  %v11160_v39 = vld [vmem:[#allocation2 + $0x82] sm:$0xff]  ;;  %13618 = vst [vmem:[#allocation17_spill] sm:$0xff] %v11162_v3 }
  0xb2   : > { %13617 = vst [vmem:[#allocation16_spill] sm:$0xff] %v11160_v39 }
  0xb4   : > { %9365 = vmatmul.mubr.msk.f32.gmra.mrb[6].mxu0 %vm171_vm1, %v11144_v5  ;;  %v11170_v5 = vld [vmem:[#allocation2 + $0xaa] sm:$0xff] }
  0xb5   : > { %9367 = vmatprep.mubr.msk.f32.mxu0 %vm171_vm1, %v11146_v40  ;;  %v11168_v40 = vld [vmem:[#allocation2 + $0x9a] sm:$0xff]  ;;  %13620 = vst [vmem:[#allocation19_spill] sm:$0xff] %v11170_v5 }
  0xb6   : > { %13619 = vst [vmem:[#allocation18_spill] sm:$0xff] %v11168_v40 }
  0xb8   : > { %9368 = vmatmul.mubr.msk.f32.gmra.mrb[8].mxu0 %vm171_vm1, %v11152_v63  ;;  %v11178_v63 = vld [vmem:[#allocation2 + $0xc2] sm:$0xff] }
  0xb9   : > { %9370 = vmatprep.mubr.msk.f32.mxu0 %vm171_vm1, %v11154_v0  ;;  %v11176_v0 = vld [vmem:[#allocation2 + $0xb2] sm:$0xff]  ;;  %13622 = vst [vmem:[#allocation21_spill] sm:$0xff] %v11178_v63 }
  0xba   : > { %13621 = vst [vmem:[#allocation20_spill] sm:$0xff] %v11176_v0 }
  0xbc   : > { %9371 = vmatmul.mubr.msk.f32.gmra.mrb[10].mxu0 %vm171_vm1, %v11160_v39  ;;  %v11186_v39 = vld [vmem:[#allocation2 + $0xda] sm:$0xff] }
  0xbd   : > { %9373 = vmatprep.mubr.msk.f32.mxu0 %vm171_vm1, %v11162_v3  ;;  %v11184_v3 = vld [vmem:[#allocation2 + $0xca] sm:$0xff]  ;;  %13624 = vst [vmem:[#allocation23_spill] sm:$0xff] %v11186_v39 }
  0xbe   : > { %13623 = vst [vmem:[#allocation22_spill] sm:$0xff] %v11184_v3 }
  0xc0   : > { %9374 = vmatmul.mubr.msk.f32.gmra.mrb[12].mxu0 %vm171_vm1, %v11168_v40  ;;  %v11194_v40 = vld [vmem:[#allocation2 + $0xf2] sm:$0xff] }
  0xc1   : > { %9376 = vmatprep.mubr.msk.f32.mxu0 %vm171_vm1, %v11170_v5  ;;  %v11192_v5 = vld [vmem:[#allocation2 + $0xe2] sm:$0xff]  ;;  %13626 = vst [vmem:[#allocation25_spill] sm:$0xff] %v11194_v40 }
  0xc2   : > { %13625 = vst [vmem:[#allocation24_spill] sm:$0xff] %v11192_v5 }
  0xc4   : > { %9377 = vmatmul.mubr.msk.f32.gmra.mrb[14].mxu0 %vm171_vm1, %v11176_v0  ;;  %v11202_v0 = vld [vmem:[#allocation2 + $0x10a] sm:$0xff] }
  0xc5   : > { %9379 = vmatprep.mubr.msk.f32.mxu0 %vm171_vm1, %v11178_v63  ;;  %v11200_v63 = vld [vmem:[#allocation2 + $0xfa] sm:$0xff]  ;;  %13628 = vst [vmem:[#allocation27_spill] sm:$0xff] %v11202_v0 }
  0xc6   : > { %13627 = vst [vmem:[#allocation26_spill] sm:$0xff] %v11200_v63 }
  0xc8   : > { %9380 = vmatmul.mubr.msk.f32.gmra.mrb[16].mxu0 %vm171_vm1, %v11184_v3  ;;  %v11210_v3 = vld [vmem:[#allocation2 + $0x122] sm:$0xff] }
  0xc9   : > { %9382 = vmatprep.mubr.msk.f32.mxu0 %vm171_vm1, %v11186_v39  ;;  %v11208_v39 = vld [vmem:[#allocation2 + $0x112] sm:$0xff]  ;;  %13630 = vst [vmem:[#allocation29_spill] sm:$0xff] %v11210_v3 }
  0xca   : > { %13629 = vst [vmem:[#allocation28_spill] sm:$0xff] %v11208_v39 }
  0xcc   : > { %9383 = vmatmul.mubr.msk.f32.gmra.mrb[18].mxu0 %vm171_vm1, %v11192_v5  ;;  %v11218_v5 = vld [vmem:[#allocation2 + $0x13a] sm:$0xff] }
  0xcd   : > { %9385 = vmatprep.mubr.msk.f32.mxu0 %vm171_vm1, %v11194_v40  ;;  %v11216_v40 = vld [vmem:[#allocation2 + $0x12a] sm:$0xff]  ;;  %13631 = vst [vmem:[#allocation30_spill] sm:$0xff] %v11218_v5 }
  0xd0   : > { %9386 = vmatmul.mubr.msk.f32.gmra.mrb[20].mxu0 %vm171_vm1, %v11200_v63  ;;  %v11226_v63 = vld [vmem:[#allocation2 + $0x152] sm:$0xff] }
  0xd1   : > { %9388 = vmatprep.mubr.msk.f32.mxu0 %vm171_vm1, %v11202_v0  ;;  %v11224_v0 = vld [vmem:[#allocation2 + $0x142] sm:$0xff]  ;;  %13632 = vst [vmem:[#allocation31_spill] sm:$0xff] %v11226_v63 }
  0xd4   : > { %9389 = vmatmul.mubr.msk.f32.gmra.mrb[22].mxu0 %vm171_vm1, %v11208_v39  ;;  %v11234_v39 = vld [vmem:[#allocation2 + $0x16a] sm:$0xff] }
  0xd5   : > { %9391 = vmatprep.mubr.msk.f32.mxu0 %vm171_vm1, %v11210_v3  ;;  %v11232_v3 = vld [vmem:[#allocation2 + $0x15a] sm:$0xff]  ;;  %13633 = vst [vmem:[#allocation32_spill] sm:$0xff] %v11234_v39 }
  0xd8   : > { %9392 = vmatmul.mubr.msk.f32.gmra.mrb[24].mxu0 %vm171_vm1, %v11216_v40 }
  0xd9   : > { %9394 = vmatprep.mubr.msk.f32.mxu0 %vm171_vm1, %v11218_v5  ;;  %v11240_v5 = vld [vmem:[#allocation2 + $0x172] sm:$0xff] }
  0xdc   : > { %9395 = vmatmul.mubr.msk.f32.gmra.mrb[26].mxu0 %vm171_vm1, %v11224_v0 }
  0xdd   : > { %9397 = vmatprep.mubr.msk.f32.mxu0 %vm171_vm1, %v11226_v63  ;;  %v8214_v63 = vld [vmem:[%s13484_s1 + $0x14] sm:$0xf] }
  0xe0   : > { %9398 = vmatmul.mubr.msk.f32.gmra.mrb[28].mxu0 %vm171_vm1, %v11232_v3 }
  0xe1   : > { %9400 = vmatprep.mubr.msk.f32.mxu0 %vm171_vm1, %v11234_v39 }
  0xe4   : > { %9401 = vmatmul.mubr.msk.f32.gmra.mrb[30].mxu0 %vm171_vm1, %v11240_v5 }
  0xe5   : > { %9405 = vmatprep.mubr.msk.f32.mxu0 %vm171_vm1, %v10979_v4  ;;  %v11314_v4 = vld [vmem:[#allocation2 + $0x188] sm:$0xff] }
  0xe8   : > { %9406 = vmatmul.mubr.msk.f32.vlgmr.msra.gmra.mrb[0].mxu0 %vm171_vm1, %v10991_v7  ;;  %v8248_v7 = vld [vmem:[%s13484_s1 + $0x18] sm:$0xf] }
  0xe9   : > { %9454 = vmatpush3.msk.msra.mxu0 %vm447_vm0, %v11119_v1  ;;  %9408 = vmatprep.mubr.msk.f32.mxu0 %vm171_vm1, %v10993_v8  ;;  %v11308_v1 = vld [vmem:[#allocation2 + $0x180] sm:$0xff] }
  0xea   : > { %9503 = vmatprep.subr.msk.mxu0 %vm447_vm0, %v8214_v63 }
  0xec   : > { %9409 = vmatmul.mubr.msk.f32.gmra.mrb[2].mxu0 %vm171_vm1, %v11001_v9 }
  0xed   : > { %9411 = vmatprep.mubr.msk.f32.mxu0 %vm171_vm1, %v11003_v10 }
  0xf0   : > { %9412 = vmatmul.mubr.msk.f32.gmra.mrb[4].mxu0 %vm171_vm1, %v11009_v6 }
  0xf1   : > { %9414 = vmatprep.mubr.msk.f32.mxu0 %vm171_vm1, %v11011_v11 }
  0xf4   : > { %9415 = vmatmul.mubr.msk.f32.gmra.mrb[6].mxu0 %vm171_vm1, %v11017_v12 }
  0xf5   : > { %9417 = vmatprep.mubr.msk.f32.mxu0 %vm171_vm1, %v11019_v13 }
  0xf8   : > { %9418 = vmatmul.mubr.msk.f32.gmra.mrb[8].mxu0 %vm171_vm1, %v11025_v14 }
  0xf9   : > { %9420 = vmatprep.mubr.msk.f32.mxu0 %vm171_vm1, %v11027_v15 }
  0xfc   : > { %9421 = vmatmul.mubr.msk.f32.gmra.mrb[10].mxu0 %vm171_vm1, %v11033_v16 }
  0xfd   : > { %9423 = vmatprep.mubr.msk.f32.mxu0 %vm171_vm1, %v11035_v17 }
 0x100   : > { %9424 = vmatmul.mubr.msk.f32.gmra.mrb[12].mxu0 %vm171_vm1, %v11041_v18 }
 0x101   : > { %9426 = vmatprep.mubr.msk.f32.mxu0 %vm171_vm1, %v11043_v19 }
 0x104   : > { %9427 = vmatmul.mubr.msk.f32.gmra.mrb[14].mxu0 %vm171_vm1, %v11049_v20 }
 0x105   : > { %9429 = vmatprep.mubr.msk.f32.mxu0 %vm171_vm1, %v11051_v21 }
 0x108   : > { %9430 = vmatmul.mubr.msk.f32.gmra.mrb[16].mxu0 %vm171_vm1, %v11057_v22 }
 0x109   : > { %9432 = vmatprep.mubr.msk.f32.mxu0 %vm171_vm1, %v11059_v23 }
 0x10c   : > { %9433 = vmatmul.mubr.msk.f32.gmra.mrb[18].mxu0 %vm171_vm1, %v11065_v24 }
 0x10d   : > { %9435 = vmatprep.mubr.msk.f32.mxu0 %vm171_vm1, %v11067_v25 }
 0x110   : > { %9436 = vmatmul.mubr.msk.f32.gmra.mrb[20].mxu0 %vm171_vm1, %v11073_v26 }
 0x111   : > { %9438 = vmatprep.mubr.msk.f32.mxu0 %vm171_vm1, %v11075_v27 }
 0x114   : > { %9439 = vmatmul.mubr.msk.f32.gmra.mrb[22].mxu0 %vm171_vm1, %v11081_v31 }
 0x115   : > { %9441 = vmatprep.mubr.msk.f32.mxu0 %vm171_vm1, %v11083_v32 }
 0x118   : > { %9442 = vmatmul.mubr.msk.f32.gmra.mrb[24].mxu0 %vm171_vm1, %v11089_v37 }
 0x119   : > { %9444 = vmatprep.mubr.msk.f32.mxu0 %vm171_vm1, %v11091_v38 }
 0x11c   : > { %9445 = vmatmul.mubr.msk.f32.gmra.mrb[26].mxu0 %vm171_vm1, %v11101_v41 }
 0x11d   : > { %9447 = vmatprep.mubr.msk.f32.mxu0 %vm171_vm1, %v11103_v42 }
 0x120   : > { %9448 = vmatmul.mubr.msk.f32.gmra.mrb[28].mxu0 %vm171_vm1, %v11109_v2 }
 0x121   : > { %9450 = vmatprep.mubr.msk.f32.mxu0 %vm171_vm1, %v11308_v1 }
 0x124   : > { %9451 = vmatmul.mubr.msk.f32.gmra.mrb[30].mxu0 %vm171_vm1, %v11314_v4 }
 0x125   : > { %9455 = vmatprep.mubr.msk.f32.mxu0 %vm171_vm1, %v10839_v28  ;;  %v13634_v28 = vld [vmem:[#allocation4_spill] sm:$0xff] }
 0x128   : > { %9456 = vmatmul.mubr.msk.f32.vlgmr.msra.gmra.mrb[0].mxu0 %vm171_vm1, %v10841_v29  ;;  %v13635_v29 = vld [vmem:[#allocation5_spill] sm:$0xff] }
 0x129   : > { %9504 = vmatpush3.msk.msra.mxu0 %vm447_vm0, %v8214_v63  ;;  %9458 = vmatprep.mubr.msk.f32.mxu0 %vm171_vm1, %v10843_v30  ;;  %v11381_v30 = vld [vmem:[#allocation2 + $0x181] sm:$0xff]  ;;  %v13655_v63 = vld [vmem:[#allocation25_spill] sm:$0xff] }
 0x12a   : > { %9553 = vmatprep.subr.msk.mxu0 %vm447_vm0, %v8248_v7 }
 0x12c   : > { %9459 = vmatmul.mubr.msk.f32.gmra.mrb[2].mxu0 %vm171_vm1, %v10858_v33  ;;  %v13636_v33 = vld [vmem:[#allocation6_spill] sm:$0xff] }
 0x12d   : > { %9461 = vmatprep.mubr.msk.f32.mxu0 %vm171_vm1, %v10860_v34  ;;  %v11387_v34 = vld [vmem:[#allocation2 + $0x189] sm:$0xff] }
 0x130   : > { %9462 = vmatmul.mubr.msk.f32.gmra.mrb[4].mxu0 %vm171_vm1, %v10866_v35  ;;  %v13637_v35 = vld [vmem:[#allocation7_spill] sm:$0xff] }
 0x131   : > { %9464 = vmatprep.mubr.msk.f32.mxu0 %vm171_vm1, %v10868_v36  ;;  %v8282_v36 = vld [vmem:[%s13484_s1 + $0x1c] sm:$0xf] }
 0x134   : > { %9465 = vmatmul.mubr.msk.f32.gmra.mrb[6].mxu0 %vm171_vm1, %v10884_v43  ;;  %v13638_v43 = vld [vmem:[#allocation8_spill] sm:$0xff] }
 0x135   : > { %9467 = vmatprep.mubr.msk.f32.mxu0 %vm171_vm1, %v10888_v44  ;;  %v13639_v44 = vld [vmem:[#allocation9_spill] sm:$0xff] }
 0x138   : > { %9468 = vmatmul.mubr.msk.f32.gmra.mrb[8].mxu0 %vm171_vm1, %v10894_v45  ;;  %v13640_v45 = vld [vmem:[#allocation10_spill] sm:$0xff] }
 0x139   : > { %9470 = vmatprep.mubr.msk.f32.mxu0 %vm171_vm1, %v10896_v46  ;;  %v13641_v46 = vld [vmem:[#allocation11_spill] sm:$0xff] }
 0x13c   : > { %9471 = vmatmul.mubr.msk.f32.gmra.mrb[10].mxu0 %vm171_vm1, %v10902_v47  ;;  %v13642_v47 = vld [vmem:[#allocation12_spill] sm:$0xff] }
 0x13d   : > { %9473 = vmatprep.mubr.msk.f32.mxu0 %vm171_vm1, %v10904_v48  ;;  %v13643_v48 = vld [vmem:[#allocation13_spill] sm:$0xff] }
 0x140   : > { %9474 = vmatmul.mubr.msk.f32.gmra.mrb[12].mxu0 %vm171_vm1, %v10910_v49  ;;  %v13644_v49 = vld [vmem:[#allocation14_spill] sm:$0xff] }
 0x141   : > { %9476 = vmatprep.mubr.msk.f32.mxu0 %vm171_vm1, %v10912_v50  ;;  %v13645_v50 = vld [vmem:[#allocation15_spill] sm:$0xff] }
 0x144   : > { %9477 = vmatmul.mubr.msk.f32.gmra.mrb[14].mxu0 %vm171_vm1, %v10918_v51  ;;  %v13646_v51 = vld [vmem:[#allocation16_spill] sm:$0xff] }
 0x145   : > { %9479 = vmatprep.mubr.msk.f32.mxu0 %vm171_vm1, %v10920_v52  ;;  %v13647_v52 = vld [vmem:[#allocation17_spill] sm:$0xff] }
 0x148   : > { %9480 = vmatmul.mubr.msk.f32.gmra.mrb[16].mxu0 %vm171_vm1, %v10926_v53  ;;  %v13648_v53 = vld [vmem:[#allocation18_spill] sm:$0xff] }
 0x149   : > { %9482 = vmatprep.mubr.msk.f32.mxu0 %vm171_vm1, %v10928_v54  ;;  %v13649_v54 = vld [vmem:[#allocation19_spill] sm:$0xff] }
 0x14c   : > { %9483 = vmatmul.mubr.msk.f32.gmra.mrb[18].mxu0 %vm171_vm1, %v10934_v55  ;;  %v13650_v55 = vld [vmem:[#allocation20_spill] sm:$0xff] }
 0x14d   : > { %9485 = vmatprep.mubr.msk.f32.mxu0 %vm171_vm1, %v10936_v56  ;;  %v13651_v56 = vld [vmem:[#allocation21_spill] sm:$0xff] }
 0x150   : > { %9486 = vmatmul.mubr.msk.f32.gmra.mrb[20].mxu0 %vm171_vm1, %v10942_v57  ;;  %v13652_v57 = vld [vmem:[#allocation22_spill] sm:$0xff] }
 0x151   : > { %9488 = vmatprep.mubr.msk.f32.mxu0 %vm171_vm1, %v10944_v58  ;;  %v13653_v58 = vld [vmem:[#allocation23_spill] sm:$0xff] }
 0x154   : > { %9489 = vmatmul.mubr.msk.f32.gmra.mrb[22].mxu0 %vm171_vm1, %v10950_v59  ;;  %v13654_v59 = vld [vmem:[#allocation24_spill] sm:$0xff] }
 0x155   : > { %9491 = vmatprep.mubr.msk.f32.mxu0 %vm171_vm1, %v10952_v60 }
 0x158   : > { %9492 = vmatmul.mubr.msk.f32.gmra.mrb[24].mxu0 %vm171_vm1, %v10958_v61 }
 0x159   : > { %9494 = vmatprep.mubr.msk.f32.mxu0 %vm171_vm1, %v10960_v62 }
 0x15c   : > { %9495 = vmatmul.mubr.msk.f32.gmra.mrb[26].mxu0 %vm171_vm1, %v13634_v28 }
 0x15d   : > { %9497 = vmatprep.mubr.msk.f32.mxu0 %vm171_vm1, %v13635_v29 }
 0x160   : > { %9498 = vmatmul.mubr.msk.f32.gmra.mrb[28].mxu0 %vm171_vm1, %v13636_v33 }
 0x161   : > { %9500 = vmatprep.mubr.msk.f32.mxu0 %vm171_vm1, %v11381_v30 }
 0x164   : > { %9501 = vmatmul.mubr.msk.f32.gmra.mrb[30].mxu0 %vm171_vm1, %v11387_v34 }
 0x165   : > { %9505 = vmatprep.mubr.msk.f32.mxu0 %vm171_vm1, %v13637_v35  ;;  %v13657_v35 = vld [vmem:[#allocation27_spill] sm:$0xff] }
 0x168   : > { %9506 = vmatmul.mubr.msk.f32.vlgmr.msra.gmra.mrb[0].mxu0 %vm171_vm1, %v13638_v43  ;;  %v13658_v43 = vld [vmem:[#allocation28_spill] sm:$0xff] }
 0x169   : > { %9554 = vmatpush3.msk.msra.mxu0 %vm447_vm0, %v8248_v7  ;;  %9508 = vmatprep.mubr.msk.f32.mxu0 %vm171_vm1, %v13639_v44  ;;  %v13656_v7 = vld [vmem:[#allocation26_spill] sm:$0xff] }
 0x16a   : > { %9603 = vmatprep.subr.msk.mxu0 %vm447_vm0, %v8282_v36 }
 0x16c   : > { %9509 = vmatmul.mubr.msk.f32.gmra.mrb[2].mxu0 %vm171_vm1, %v13640_v45 }
 0x16d   : > { %9511 = vmatprep.mubr.msk.f32.mxu0 %vm171_vm1, %v13641_v46 }
 0x170   : > { %9512 = vmatmul.mubr.msk.f32.gmra.mrb[4].mxu0 %vm171_vm1, %v13642_v47 }
 0x171   : > { %9514 = vmatprep.mubr.msk.f32.mxu0 %vm171_vm1, %v13643_v48 }
 0x174   : > { %9515 = vmatmul.mubr.msk.f32.gmra.mrb[6].mxu0 %vm171_vm1, %v13644_v49 }
 0x175   : > { %9517 = vmatprep.mubr.msk.f32.mxu0 %vm171_vm1, %v13645_v50 }
 0x178   : > { %9518 = vmatmul.mubr.msk.f32.gmra.mrb[8].mxu0 %vm171_vm1, %v13646_v51 }
 0x179   : > { %9520 = vmatprep.mubr.msk.f32.mxu0 %vm171_vm1, %v13647_v52 }
 0x17c   : > { %9521 = vmatmul.mubr.msk.f32.gmra.mrb[10].mxu0 %vm171_vm1, %v13648_v53 }
 0x17d   : > { %9523 = vmatprep.mubr.msk.f32.mxu0 %vm171_vm1, %v13649_v54 }
 0x180   : > { %9524 = vmatmul.mubr.msk.f32.gmra.mrb[12].mxu0 %vm171_vm1, %v13650_v55 }
 0x181   : > { %9526 = vmatprep.mubr.msk.f32.mxu0 %vm171_vm1, %v13651_v56  ;;  %v13659_v56 = vld [vmem:[#allocation29_spill] sm:$0xff] }
 0x184   : > { %9527 = vmatmul.mubr.msk.f32.gmra.mrb[14].mxu0 %vm171_vm1, %v13652_v57 }
 0x185   : > { %9529 = vmatprep.mubr.msk.f32.mxu0 %vm171_vm1, %v13653_v58  ;;  %v13660_v58 = vld [vmem:[#allocation30_spill] sm:$0xff] }
 0x188   : > { %9530 = vmatmul.mubr.msk.f32.gmra.mrb[16].mxu0 %vm171_vm1, %v13654_v59 }
 0x189   : > { %9532 = vmatprep.mubr.msk.f32.mxu0 %vm171_vm1, %v13655_v63  ;;  %v13661_v63 = vld [vmem:[#allocation31_spill] sm:$0xff] }
 0x18c   : > { %9533 = vmatmul.mubr.msk.f32.gmra.mrb[18].mxu0 %vm171_vm1, %v13656_v7 }
 0x18d   : > { %9535 = vmatprep.mubr.msk.f32.mxu0 %vm171_vm1, %v13657_v35 }
 0x190   : > { %9536 = vmatmul.mubr.msk.f32.gmra.mrb[20].mxu0 %vm171_vm1, %v13658_v43  ;;  %v11454_v43 = vld [vmem:[#allocation2 + $0x182] sm:$0xff] }
 0x191   : > { %9538 = vmatprep.mubr.msk.f32.mxu0 %vm171_vm1, %v13659_v56 }
 0x194   : > { %9539 = vmatmul.mubr.msk.f32.gmra.mrb[22].mxu0 %vm171_vm1, %v11216_v40 }
 0x195   : > { %9541 = vmatprep.mubr.msk.f32.mxu0 %vm171_vm1, %v13660_v58  ;;  %v11460_v58 = vld [vmem:[#allocation2 + $0x18a] sm:$0xff] }
 0x198   : > { %9542 = vmatmul.mubr.msk.f32.gmra.mrb[24].mxu0 %vm171_vm1, %v11224_v0 }
 0x199   : > { %9544 = vmatprep.mubr.msk.f32.mxu0 %vm171_vm1, %v13661_v63 }
 0x19c   : > { %9545 = vmatmul.mubr.msk.f32.gmra.mrb[26].mxu0 %vm171_vm1, %v11232_v3 }
 0x19d   : > { %9547 = vmatprep.mubr.msk.f32.mxu0 %vm171_vm1, %v11234_v39  ;;  %v8316_v39 = vld [vmem:[%s13484_s1 + $0x20] sm:$0xf] }
 0x1a0   : > { %9548 = vmatmul.mubr.msk.f32.gmra.mrb[28].mxu0 %vm171_vm1, %v11240_v5 }
 0x1a1   : > { %9550 = vmatprep.mubr.msk.f32.mxu0 %vm171_vm1, %v11454_v43 }
 0x1a4   : > { %9551 = vmatmul.mubr.msk.f32.gmra.mrb[30].mxu0 %vm171_vm1, %v11460_v58 }
 0x1a5   : > { %9555 = vmatprep.mubr.msk.f32.mxu0 %vm171_vm1, %v10993_v8  ;;  %v2596_v8 = vld [vmem:[#allocation2 + $0x198] sm:$0xff] }
 0x1a8   : > { %9556 = vmatmul.mubr.msk.f32.vlgmr.msra.gmra.mrb[0].mxu0 %vm171_vm1, %v11001_v9  ;;  %v2597_v9 = vld [vmem:[#allocation2 + $0x1a0] sm:$0xff] }
 0x1a9   : > { %9604 = vmatpush3.msk.msra.mxu0 %vm447_vm0, %v8282_v36  ;;  %9558 = vmatprep.mubr.msk.f32.mxu0 %vm171_vm1, %v11003_v10  ;;  %v2956_v10 = vld [vmem:[#allocation2 + $0x31] sm:$0xff] }
 0x1aa   : > { %9653 = vmatprep.subr.msk.mxu0 %vm447_vm0, %v8316_v39 }
 0x1ac   : > { %9559 = vmatmul.mubr.msk.f32.gmra.mrb[2].mxu0 %vm171_vm1, %v11009_v6  ;;  %v2957_v6 = vld [vmem:[#allocation2 + $0x39] sm:$0xff] }
 0x1ad   : > { %9561 = vmatprep.mubr.msk.f32.mxu0 %vm171_vm1, %v11011_v11  ;;  %v2958_v11 = vld [vmem:[#allocation2 + $0x49] sm:$0xff] }
 0x1b0   : > { %9562 = vmatmul.mubr.msk.f32.gmra.mrb[4].mxu0 %vm171_vm1, %v11017_v12  ;;  %v2959_v12 = vld [vmem:[#allocation2 + $0x51] sm:$0xff] }
 0x1b1   : > { %9564 = vmatprep.mubr.msk.f32.mxu0 %vm171_vm1, %v11019_v13  ;;  %v2960_v13 = vld [vmem:[#allocation2 + $0x61] sm:$0xff] }
 0x1b4   : > { %9565 = vmatmul.mubr.msk.f32.gmra.mrb[6].mxu0 %vm171_vm1, %v11025_v14  ;;  %v2961_v14 = vld [vmem:[#allocation2 + $0x69] sm:$0xff] }
 0x1b5   : > { %9567 = vmatprep.mubr.msk.f32.mxu0 %vm171_vm1, %v11027_v15  ;;  %v2962_v15 = vld [vmem:[#allocation2 + $0x79] sm:$0xff] }
 0x1b8   : > { %9568 = vmatmul.mubr.msk.f32.gmra.mrb[8].mxu0 %vm171_vm1, %v11033_v16  ;;  %v2963_v16 = vld [vmem:[#allocation2 + $0x81] sm:$0xff] }
 0x1b9   : > { %9570 = vmatprep.mubr.msk.f32.mxu0 %vm171_vm1, %v11035_v17  ;;  %v2964_v17 = vld [vmem:[#allocation2 + $0x91] sm:$0xff] }
 0x1bc   : > { %9571 = vmatmul.mubr.msk.f32.gmra.mrb[10].mxu0 %vm171_vm1, %v11041_v18  ;;  %v2965_v18 = vld [vmem:[#allocation2 + $0x99] sm:$0xff] }
 0x1bd   : > { %9573 = vmatprep.mubr.msk.f32.mxu0 %vm171_vm1, %v11043_v19  ;;  %v2966_v19 = vld [vmem:[#allocation2 + $0xa9] sm:$0xff] }
 0x1c0   : > { %9574 = vmatmul.mubr.msk.f32.gmra.mrb[12].mxu0 %vm171_vm1, %v11049_v20  ;;  %v2967_v20 = vld [vmem:[#allocation2 + $0xb1] sm:$0xff] }
 0x1c1   : > { %9576 = vmatprep.mubr.msk.f32.mxu0 %vm171_vm1, %v11051_v21  ;;  %v2968_v21 = vld [vmem:[#allocation2 + $0xc1] sm:$0xff] }
 0x1c4   : > { %9577 = vmatmul.mubr.msk.f32.gmra.mrb[14].mxu0 %vm171_vm1, %v11057_v22  ;;  %v2969_v22 = vld [vmem:[#allocation2 + $0xc9] sm:$0xff] }
 0x1c5   : > { %9579 = vmatprep.mubr.msk.f32.mxu0 %vm171_vm1, %v11059_v23  ;;  %v2970_v23 = vld [vmem:[#allocation2 + $0xd9] sm:$0xff] }
 0x1c8   : > { %9580 = vmatmul.mubr.msk.f32.gmra.mrb[16].mxu0 %vm171_vm1, %v11065_v24  ;;  %v2971_v24 = vld [vmem:[#allocation2 + $0xe1] sm:$0xff] }
 0x1c9   : > { %9582 = vmatprep.mubr.msk.f32.mxu0 %vm171_vm1, %v11067_v25  ;;  %v2972_v25 = vld [vmem:[#allocation2 + $0xf1] sm:$0xff] }
 0x1cc   : > { %9583 = vmatmul.mubr.msk.f32.gmra.mrb[18].mxu0 %vm171_vm1, %v11073_v26  ;;  %v2973_v26 = vld [vmem:[#allocation2 + $0xf9] sm:$0xff] }
 0x1cd   : > { %9585 = vmatprep.mubr.msk.f32.mxu0 %vm171_vm1, %v11075_v27  ;;  %v2974_v27 = vld [vmem:[#allocation2 + $0x109] sm:$0xff] }
 0x1d0   : > { %9586 = vmatmul.mubr.msk.f32.gmra.mrb[20].mxu0 %vm171_vm1, %v11081_v31  ;;  %v2975_v31 = vld [vmem:[#allocation2 + $0x111] sm:$0xff] }
 0x1d1   : > { %9588 = vmatprep.mubr.msk.f32.mxu0 %vm171_vm1, %v11083_v32  ;;  %v2976_v32 = vld [vmem:[#allocation2 + $0x121] sm:$0xff] }
 0x1d4   : > { %9589 = vmatmul.mubr.msk.f32.gmra.mrb[22].mxu0 %vm171_vm1, %v11089_v37  ;;  %v2977_v37 = vld [vmem:[#allocation2 + $0x129] sm:$0xff] }
 0x1d5   : > { %9591 = vmatprep.mubr.msk.f32.mxu0 %vm171_vm1, %v11091_v38  ;;  %v2986_v38 = vld [vmem:[#allocation2 + $0x199] sm:$0xff] }
 0x1d8   : > { %9592 = vmatmul.mubr.msk.f32.gmra.mrb[24].mxu0 %vm171_vm1, %v11101_v41  ;;  %v13664_v41 = vld [vmem:[#allocation25_spill] sm:$0xff] }
 0x1d9   : > { %9594 = vmatprep.mubr.msk.f32.mxu0 %vm171_vm1, %v11103_v42  ;;  %v13665_v42 = vld [vmem:[#allocation28_spill] sm:$0xff] }
 0x1dc   : > { %9595 = vmatmul.mubr.msk.f32.gmra.mrb[26].mxu0 %vm171_vm1, %v11109_v2  ;;  %v13666_v2 = vld [vmem:[#allocation30_spill] sm:$0xff] }
 0x1dd   : > { %9597 = vmatprep.mubr.msk.f32.mxu0 %vm171_vm1, %v11308_v1 }
 0x1e0   : > { %9598 = vmatmul.mubr.msk.f32.gmra.mrb[28].mxu0 %vm171_vm1, %v11314_v4 }
 0x1e1   : > { %9600 = vmatprep.mubr.msk.f32.mxu0 %vm171_vm1, %v2596_v8 }
 0x1e4   : > { %9601 = vmatmul.mubr.msk.f32.gmra.mrb[30].mxu0 %vm171_vm1, %v2597_v9 }
 0x1e5   : > { %9605 = vmatprep.mubr.msk.f32.mxu0 %vm171_vm1, %v2956_v10 }
 0x1e8   : > { %9606 = vmatmul.mubr.msk.f32.vlgmr.msra.gmra.mrb[0].mxu0 %vm171_vm1, %v2957_v6 }
 0x1e9   : > { %9654 = vmatpush3.msk.msra.mxu0 %vm447_vm0, %v8316_v39  ;;  %9608 = vmatprep.mubr.msk.f32.mxu0 %vm171_vm1, %v2958_v11  ;;  %v13667_v39 = vld [vmem:[#allocation32_spill] sm:$0xff] }
 0x1ec   : > { %9609 = vmatmul.mubr.msk.f32.gmra.mrb[2].mxu0 %vm171_vm1, %v2959_v12 }
 0x1ed   : > { %9611 = vmatprep.mubr.msk.f32.mxu0 %vm171_vm1, %v2960_v13 }
 0x1f0   : > { %9612 = vmatmul.mubr.msk.f32.gmra.mrb[4].mxu0 %vm171_vm1, %v2961_v14 }
 0x1f1   : > { %9614 = vmatprep.mubr.msk.f32.mxu0 %vm171_vm1, %v2962_v15 }
 0x1f4   : > { %9615 = vmatmul.mubr.msk.f32.gmra.mrb[6].mxu0 %vm171_vm1, %v2963_v16 }
 0x1f5   : > { %9617 = vmatprep.mubr.msk.f32.mxu0 %vm171_vm1, %v2964_v17 }
 0x1f8   : > { %9618 = vmatmul.mubr.msk.f32.gmra.mrb[8].mxu0 %vm171_vm1, %v2965_v18 }
 0x1f9   : > { %9620 = vmatprep.mubr.msk.f32.mxu0 %vm171_vm1, %v2966_v19 }
 0x1fc   : > { %9621 = vmatmul.mubr.msk.f32.gmra.mrb[10].mxu0 %vm171_vm1, %v2967_v20 }
 0x1fd   : > { %9623 = vmatprep.mubr.msk.f32.mxu0 %vm171_vm1, %v2968_v21 }
 0x200   : > { %9624 = vmatmul.mubr.msk.f32.gmra.mrb[12].mxu0 %vm171_vm1, %v2969_v22 }
 0x201   : > { %9626 = vmatprep.mubr.msk.f32.mxu0 %vm171_vm1, %v2970_v23 }
 0x204   : > { %9627 = vmatmul.mubr.msk.f32.gmra.mrb[14].mxu0 %vm171_vm1, %v2971_v24 }
 0x205   : > { %9629 = vmatprep.mubr.msk.f32.mxu0 %vm171_vm1, %v2972_v25 }
 0x208   : > { %9630 = vmatmul.mubr.msk.f32.gmra.mrb[16].mxu0 %vm171_vm1, %v2973_v26 }
 0x209   : > { %9632 = vmatprep.mubr.msk.f32.mxu0 %vm171_vm1, %v2974_v27 }
 0x20c   : > { %9633 = vmatmul.mubr.msk.f32.gmra.mrb[18].mxu0 %vm171_vm1, %v2975_v31 }
 0x20d   : > { %9635 = vmatprep.mubr.msk.f32.mxu0 %vm171_vm1, %v2976_v32 }
 0x210   : > { %9636 = vmatmul.mubr.msk.f32.gmra.mrb[20].mxu0 %vm171_vm1, %v2977_v37 }
 0x211   : > { %9638 = vmatprep.mubr.msk.f32.mxu0 %vm171_vm1, %v10952_v60  ;;  %v2987_v60 = vld [vmem:[#allocation2 + $0x1a1] sm:$0xff] }
 0x214   : > { %9639 = vmatmul.mubr.msk.f32.gmra.mrb[22].mxu0 %vm171_vm1, %v10958_v61  ;;  %v13662_v61 = vld [vmem:[#allocation21_spill] sm:$0xff] }
 0x215   : > { %9641 = vmatprep.mubr.msk.f32.mxu0 %vm171_vm1, %v10960_v62  ;;  %v13663_v62 = vld [vmem:[#allocation23_spill] sm:$0xff] }
 0x218   : > { %9642 = vmatmul.mubr.msk.f32.gmra.mrb[24].mxu0 %vm171_vm1, %v13634_v28 }
 0x219   : > { %9644 = vmatprep.mubr.msk.f32.mxu0 %vm171_vm1, %v13635_v29 }
 0x21c   : > { %9645 = vmatmul.mubr.msk.f32.gmra.mrb[26].mxu0 %vm171_vm1, %v13636_v33 }
 0x21d   : > { %9647 = vmatprep.mubr.msk.f32.mxu0 %vm171_vm1, %v11381_v30 }
 0x220   : > { %9648 = vmatmul.mubr.msk.f32.gmra.mrb[28].mxu0 %vm171_vm1, %v11387_v34 }
 0x221   : > { %9650 = vmatprep.mubr.msk.f32.mxu0 %vm171_vm1, %v2986_v38 }
 0x224   : > { %9651 = vmatmul.mubr.msk.f32.gmra.mrb[30].mxu0 %vm171_vm1, %v2987_v60 }
 0x225   : > { %9655 = vmatprep.mubr.msk.f32.mxu0 %vm171_vm1, %v13639_v44 }
 0x228   : > { %9656 = vmatmul.mubr.msk.f32.vlgmr.msra.gmra.mrb[0].mxu0 %vm171_vm1, %v13640_v45 }
 0x229   : > { %9658 = vmatprep.mubr.msk.f32.mxu0 %vm171_vm1, %v13641_v46 }
 0x22c   : > { %9659 = vmatmul.mubr.msk.f32.gmra.mrb[2].mxu0 %vm171_vm1, %v13642_v47 }
 0x22d   : > { %9661 = vmatprep.mubr.msk.f32.mxu0 %vm171_vm1, %v13643_v48 }
 0x230   : > { %9662 = vmatmul.mubr.msk.f32.gmra.mrb[4].mxu0 %vm171_vm1, %v13644_v49 }
 0x231   : > { %9664 = vmatprep.mubr.msk.f32.mxu0 %vm171_vm1, %v13645_v50 }
 0x234   : > { %9665 = vmatmul.mubr.msk.f32.gmra.mrb[6].mxu0 %vm171_vm1, %v13646_v51 }
 0x235   : > { %9667 = vmatprep.mubr.msk.f32.mxu0 %vm171_vm1, %v13647_v52 }
 0x238   : > { %9668 = vmatmul.mubr.msk.f32.gmra.mrb[8].mxu0 %vm171_vm1, %v13648_v53 }
 0x239   : > { %9670 = vmatprep.mubr.msk.f32.mxu0 %vm171_vm1, %v13649_v54 }
 0x23c   : > { %9671 = vmatmul.mubr.msk.f32.gmra.mrb[10].mxu0 %vm171_vm1, %v13650_v55 }
 0x23d   : > { %9673 = vmatprep.mubr.msk.f32.mxu0 %vm171_vm1, %v13662_v61 }
 0x240   : > { %9674 = vmatmul.mubr.msk.f32.gmra.mrb[12].mxu0 %vm171_vm1, %v13652_v57 }
 0x241   : > { %9676 = vmatprep.mubr.msk.f32.mxu0 %vm171_vm1, %v13663_v62 }
 0x244   : > { %9677 = vmatmul.mubr.msk.f32.gmra.mrb[14].mxu0 %vm171_vm1, %v13654_v59 }
 0x245   : > { %9679 = vmatprep.mubr.msk.f32.mxu0 %vm171_vm1, %v13664_v41 }
 0x248   : > { %9680 = vmatmul.mubr.msk.f32.gmra.mrb[16].mxu0 %vm171_vm1, %v13656_v7 }
 0x249   : > { %9682 = vmatprep.mubr.msk.f32.mxu0 %vm171_vm1, %v13657_v35 }
 0x24c   : > { %9683 = vmatmul.mubr.msk.f32.gmra.mrb[18].mxu0 %vm171_vm1, %v13665_v42 }
 0x24d   : > { %9685 = vmatprep.mubr.msk.f32.mxu0 %vm171_vm1, %v13659_v56 }
 0x250   : > { %9686 = vmatmul.mubr.msk.f32.gmra.mrb[20].mxu0 %vm171_vm1, %v11216_v40  ;;  %v3376_v40 = vld [vmem:[#allocation2 + $0x19a] sm:$0xff] }
 0x251   : > { %9688 = vmatprep.mubr.msk.f32.mxu0 %vm171_vm1, %v13666_v2 }
 0x254   : > { %9689 = vmatmul.mubr.msk.f32.gmra.mrb[22].mxu0 %vm171_vm1, %v11224_v0  ;;  %v3377_v0 = vld [vmem:[#allocation2 + $0x1a2] sm:$0xff] }
 0x255   : > { %9691 = vmatprep.mubr.msk.f32.mxu0 %vm171_vm1, %v13661_v63 }
 0x258   : > { %9692 = vmatmul.mubr.msk.f32.gmra.mrb[24].mxu0 %vm171_vm1, %v11232_v3 }
 0x259   : > { %9694 = vmatprep.mubr.msk.f32.mxu0 %vm171_vm1, %v13667_v39 }
 0x25c   : > { %9695 = vmatmul.mubr.msk.f32.gmra.mrb[26].mxu0 %vm171_vm1, %v11240_v5 }
 0x25d   : > { %9697 = vmatprep.mubr.msk.f32.mxu0 %vm171_vm1, %v11454_v43 }
 0x260   : > { %9698 = vmatmul.mubr.msk.f32.gmra.mrb[28].mxu0 %vm171_vm1, %v11460_v58 }
 0x261   : > { %9700 = vmatprep.mubr.msk.f32.mxu0 %vm171_vm1, %v3376_v40 }
 0x264   : > { %9701 = vmatmul.mubr.msk.f32.gmra.mrb[30].mxu0 %vm171_vm1, %v3377_v0 }
 0x2fb   : > { %v9657_v1 = vpop.f32.mrb[0].mxu0 }
 0x2fc   : > { %3739 = vst.msk [vmem:[#allocation3 + $0x8] sm:$0xff] %vm171_vm1, %v9657_v1  ;;  %v3545_v3 = vpop.f32.mrb[1].mxu0 }
 0x2fd   : > { %3738 = vst.msk [vmem:[#allocation3] sm:$0xff] %vm171_vm1, %v3545_v3 }
 0x2ff   : > { %v9660_v4 = vpop.f32.mrb[2].mxu0 }
 0x300   : > { %3741 = vst.msk [vmem:[#allocation3 + $0x18] sm:$0xff] %vm171_vm1, %v9660_v4  ;;  %v3555_v5 = vpop.f32.mrb[3].mxu0 }
 0x301   : > { %3740 = vst.msk [vmem:[#allocation3 + $0x10] sm:$0xff] %vm171_vm1, %v3555_v5 }
 0x303   : > { %v11638_v28 = vld [vmem:[#allocation3 + $0x8] sm:$0xff]  ;;  %v9663_v29 = vpop.f32.mrb[4].mxu0 }
 0x304   : > { %v11640_v30 = vld [vmem:[#allocation3] sm:$0xff]  ;;  %3743 = vst.msk [vmem:[#allocation3 + $0x28] sm:$0xff] %vm171_vm1, %v9663_v29  ;;  %v3565_v33 = vpop.f32.mrb[5].mxu0  ;;  %v3803_v34 = vsel %vm171_vm1, %v11638_v28, 0.0 }
 0x305   : > { %v3802_v36 = vsel %vm171_vm1, %v11640_v30, 0.0  ;;  %3742 = vst.msk [vmem:[#allocation3 + $0x20] sm:$0xff] %vm171_vm1, %v3565_v33 }
 0x306   : > { %v3804_v45 = vadd.f32 %v3803_v34, %v3802_v36 }
 0x307   : > { %v9666_v44 = vpop.f32.mrb[6].mxu0  ;;  %v11648_v46 = vld [vmem:[#allocation3 + $0x18] sm:$0xff] }
 0x308   : > { %v11650_v47 = vld [vmem:[#allocation3 + $0x10] sm:$0xff]  ;;  %3745 = vst.msk [vmem:[#allocation3 + $0x38] sm:$0xff] %vm171_vm1, %v9666_v44  ;;  %v3575_v48 = vpop.f32.mrb[7].mxu0  ;;  %v3807_v51 = vsel %vm171_vm1, %v11648_v46, 0.0 }
 0x309   : > { %v3805_v49 = vsel %vm171_vm1, %v11650_v47, 0.0  ;;  %3744 = vst.msk [vmem:[#allocation3 + $0x30] sm:$0xff] %vm171_vm1, %v3575_v48 }
 0x30a   : > { %v3806_v50 = vadd.f32 %v3805_v49, %v3804_v45 }
 0x30b   : > { %v9669_v52 = vpop.f32.mrb[8].mxu0  ;;  %v11658_v53 = vld [vmem:[#allocation3 + $0x28] sm:$0xff] }
 0x30c   : > { %v11660_v54 = vld [vmem:[#allocation3 + $0x20] sm:$0xff]  ;;  %v3808_v55 = vadd.f32 %v3807_v51, %v3806_v50  ;;  %3747 = vst.msk [vmem:[#allocation3 + $0x48] sm:$0xff] %vm171_vm1, %v9669_v52  ;;  %v3585_v56 = vpop.f32.mrb[9].mxu0  ;;  %v3811_v59 = vsel %vm171_vm1, %v11658_v53, 0.0 }
 0x30d   : > { %v3809_v57 = vsel %vm171_vm1, %v11660_v54, 0.0  ;;  %3746 = vst.msk [vmem:[#allocation3 + $0x40] sm:$0xff] %vm171_vm1, %v3585_v56 }
 0x30e   : > { %v3810_v58 = vadd.f32 %v3809_v57, %v3808_v55 }
 0x30f   : > { %v9672_v63 = vpop.f32.mrb[10].mxu0  ;;  %v11668_v7 = vld [vmem:[#allocation3 + $0x38] sm:$0xff] }
 0x310   : > { %v11670_v35 = vld [vmem:[#allocation3 + $0x30] sm:$0xff]  ;;  %v3812_v43 = vadd.f32 %v3811_v59, %v3810_v58  ;;  %3749 = vst.msk [vmem:[#allocation3 + $0x58] sm:$0xff] %vm171_vm1, %v9672_v63  ;;  %v3595_v8 = vpop.f32.mrb[11].mxu0  ;;  %v3815_v6 = vsel %vm171_vm1, %v11668_v7, 0.0 }
 0x311   : > { %v3813_v9 = vsel %vm171_vm1, %v11670_v35, 0.0  ;;  %3748 = vst.msk [vmem:[#allocation3 + $0x50] sm:$0xff] %vm171_vm1, %v3595_v8 }
 0x312   : > { %v3814_v10 = vadd.f32 %v3813_v9, %v3812_v43 }
 0x313   : > { %v9675_v11 = vpop.f32.mrb[12].mxu0  ;;  %v11678_v12 = vld [vmem:[#allocation3 + $0x48] sm:$0xff] }
 0x314   : > { %v11680_v13 = vld [vmem:[#allocation3 + $0x40] sm:$0xff]  ;;  %v3816_v14 = vadd.f32 %v3815_v6, %v3814_v10  ;;  %3751 = vst.msk [vmem:[#allocation3 + $0x68] sm:$0xff] %vm171_vm1, %v9675_v11  ;;  %v3605_v15 = vpop.f32.mrb[13].mxu0  ;;  %v3819_v18 = vsel %vm171_vm1, %v11678_v12, 0.0 }
 0x315   : > { %v3817_v16 = vsel %vm171_vm1, %v11680_v13, 0.0  ;;  %3750 = vst.msk [vmem:[#allocation3 + $0x60] sm:$0xff] %vm171_vm1, %v3605_v15 }
 0x316   : > { %v3818_v17 = vadd.f32 %v3817_v16, %v3816_v14 }
 0x317   : > { %v9678_v19 = vpop.f32.mrb[14].mxu0  ;;  %v11688_v20 = vld [vmem:[#allocation3 + $0x58] sm:$0xff] }
 0x318   : > { %v11690_v21 = vld [vmem:[#allocation3 + $0x50] sm:$0xff]  ;;  %v3820_v22 = vadd.f32 %v3819_v18, %v3818_v17  ;;  %3753 = vst.msk [vmem:[#allocation3 + $0x78] sm:$0xff] %vm171_vm1, %v9678_v19  ;;  %v3615_v23 = vpop.f32.mrb[15].mxu0  ;;  %v3823_v26 = vsel %vm171_vm1, %v11688_v20, 0.0 }
 0x319   : > { %v3821_v24 = vsel %vm171_vm1, %v11690_v21, 0.0  ;;  %3752 = vst.msk [vmem:[#allocation3 + $0x70] sm:$0xff] %vm171_vm1, %v3615_v23 }
 0x31a   : > { %v3822_v25 = vadd.f32 %v3821_v24, %v3820_v22 }
 0x31b   : > { %v9681_v27 = vpop.f32.mrb[16].mxu0  ;;  %v11698_v31 = vld [vmem:[#allocation3 + $0x68] sm:$0xff] }
 0x31c   : > { %v11700_v32 = vld [vmem:[#allocation3 + $0x60] sm:$0xff]  ;;  %v3824_v37 = vadd.f32 %v3823_v26, %v3822_v25  ;;  %3755 = vst.msk [vmem:[#allocation3 + $0x88] sm:$0xff] %vm171_vm1, %v9681_v27  ;;  %v3625_v38 = vpop.f32.mrb[17].mxu0  ;;  %v3827_v62 = vsel %vm171_vm1, %v11698_v31, 0.0 }
 0x31d   : > { %v3825_v60 = vsel %vm171_vm1, %v11700_v32, 0.0  ;;  %3754 = vst.msk [vmem:[#allocation3 + $0x80] sm:$0xff] %vm171_vm1, %v3625_v38 }
 0x31e   : > { %v3826_v61 = vadd.f32 %v3825_v60, %v3824_v37 }
 0x31f   : > { %v9684_v41 = vpop.f32.mrb[18].mxu0  ;;  %v11708_v42 = vld [vmem:[#allocation3 + $0x78] sm:$0xff] }
 0x320   : > { %v11710_v2 = vld [vmem:[#allocation3 + $0x70] sm:$0xff]  ;;  %v3828_v39 = vadd.f32 %v3827_v62, %v3826_v61  ;;  %3757 = vst.msk [vmem:[#allocation3 + $0x98] sm:$0xff] %vm171_vm1, %v9684_v41  ;;  %v3635_v40 = vpop.f32.mrb[19].mxu0  ;;  %v3831_v3 = vsel %vm171_vm1, %v11708_v42, 0.0 }
 0x321   : > { %v3829_v0 = vsel %vm171_vm1, %v11710_v2, 0.0  ;;  %3756 = vst.msk [vmem:[#allocation3 + $0x90] sm:$0xff] %vm171_vm1, %v3635_v40 }
 0x322   : > { %v3830_v1 = vadd.f32 %v3829_v0, %v3828_v39 }
 0x323   : > { %v9687_v4 = vpop.f32.mrb[20].mxu0  ;;  %v11718_v5 = vld [vmem:[#allocation3 + $0x88] sm:$0xff] }
 0x324   : > { %v11720_v29 = vld [vmem:[#allocation3 + $0x80] sm:$0xff]  ;;  %v3832_v33 = vadd.f32 %v3831_v3, %v3830_v1  ;;  %3759 = vst.msk [vmem:[#allocation3 + $0xa8] sm:$0xff] %vm171_vm1, %v9687_v4  ;;  %v3645_v34 = vpop.f32.mrb[21].mxu0  ;;  %v3835_v45 = vsel %vm171_vm1, %v11718_v5, 0.0 }
 0x325   : > { %v3833_v36 = vsel %vm171_vm1, %v11720_v29, 0.0  ;;  %3758 = vst.msk [vmem:[#allocation3 + $0xa0] sm:$0xff] %vm171_vm1, %v3645_v34 }
 0x326   : > { %v3834_v44 = vadd.f32 %v3833_v36, %v3832_v33 }
 0x327   : > { %v9690_v48 = vpop.f32.mrb[22].mxu0  ;;  %v11728_v49 = vld [vmem:[#allocation3 + $0x98] sm:$0xff] }
 0x328   : > { %v11730_v50 = vld [vmem:[#allocation3 + $0x90] sm:$0xff]  ;;  %v3836_v51 = vadd.f32 %v3835_v45, %v3834_v44  ;;  %3761 = vst.msk [vmem:[#allocation3 + $0xb8] sm:$0xff] %vm171_vm1, %v9690_v48  ;;  %v3655_v52 = vpop.f32.mrb[23].mxu0  ;;  %v3839_v57 = vsel %vm171_vm1, %v11728_v49, 0.0 }
 0x329   : > { %v3837_v55 = vsel %vm171_vm1, %v11730_v50, 0.0  ;;  %3760 = vst.msk [vmem:[#allocation3 + $0xb0] sm:$0xff] %vm171_vm1, %v3655_v52 }
 0x32a   : > { %v3838_v56 = vadd.f32 %v3837_v55, %v3836_v51 }
 0x32b   : > { %v9693_v58 = vpop.f32.mrb[24].mxu0  ;;  %v11738_v59 = vld [vmem:[#allocation3 + $0xa8] sm:$0xff] }
 0x32c   : > { %v11740_v63 = vld [vmem:[#allocation3 + $0xa0] sm:$0xff]  ;;  %v3840_v43 = vadd.f32 %v3839_v57, %v3838_v56  ;;  %3763 = vst.msk [vmem:[#allocation3 + $0xc8] sm:$0xff] %vm171_vm1, %v9693_v58  ;;  %v3665_v8 = vpop.f32.mrb[25].mxu0  ;;  %v3843_v6 = vsel %vm171_vm1, %v11738_v59, 0.0 }
 0x32d   : > { %v3841_v9 = vsel %vm171_vm1, %v11740_v63, 0.0  ;;  %3762 = vst.msk [vmem:[#allocation3 + $0xc0] sm:$0xff] %vm171_vm1, %v3665_v8 }
 0x32e   : > { %v3842_v10 = vadd.f32 %v3841_v9, %v3840_v43 }
 0x32f   : > { %v9696_v11 = vpop.f32.mrb[26].mxu0  ;;  %v11748_v14 = vld [vmem:[#allocation3 + $0xb8] sm:$0xff] }
 0x330   : > { %v11750_v15 = vld [vmem:[#allocation3 + $0xb0] sm:$0xff]  ;;  %v3844_v16 = vadd.f32 %v3843_v6, %v3842_v10  ;;  %3765 = vst.msk [vmem:[#allocation3 + $0xd8] sm:$0xff] %vm171_vm1, %v9696_v11  ;;  %v3675_v17 = vpop.f32.mrb[27].mxu0  ;;  %v3847_v22 = vsel %vm171_vm1, %v11748_v14, 0.0 }
 0x331   : > { %v3845_v18 = vsel %vm171_vm1, %v11750_v15, 0.0  ;;  %3764 = vst.msk [vmem:[#allocation3 + $0xd0] sm:$0xff] %vm171_vm1, %v3675_v17  ;;  %v8350_v6 = vld [vmem:[%s13485_s2 + $0x4] sm:$0xf]  ;;  %v4138_v17 = vld [vmem:[#allocation2 + $0x9] sm:$0xff] }
 0x332   : > { %v3846_v19 = vadd.f32 %v3845_v18, %v3844_v16  ;;  %9703 = vmatprep.subr.msk.mxu1 %vm447_vm0, %v8350_v6  ;;  %v4137_v11 = vld [vmem:[#allocation2 + $0x1] sm:$0xff] }
 0x333   : > { %v9699_v23 = vpop.f32.mrb[28].mxu0  ;;  %v11758_v24 = vld [vmem:[#allocation3 + $0xc8] sm:$0xff]  ;;  %9704 = vmatpush3.msk.msra.mxu1 %vm447_vm0, %v8350_v6  ;;  %v4136_v16 = vld [vmem:[%s13485_s2] sm:$0xf]  ;;  %9705 = vmatprep.mubr.msk.f32.mxu1 %vm171_vm1, %v4137_v11 }
 0x334   : > { %v11760_v25 = vld [vmem:[#allocation3 + $0xc0] sm:$0xff]  ;;  %v3848_v26 = vadd.f32 %v3847_v22, %v3846_v19  ;;  %3767 = vst.msk [vmem:[#allocation3 + $0xe8] sm:$0xff] %vm171_vm1, %v9699_v23  ;;  %v3685_v27 = vpop.f32.mrb[29].mxu0  ;;  %v3851_v60 = vsel %vm171_vm1, %v11758_v24, 0.0  ;;  %9753 = vmatprep.subr.msk.mxu1 %vm447_vm0, %v4136_v16  ;;  %9706 = vmatmul.mubr.msk.f32.vlgmr.msra.gmra.mrb[0].mxu1 %vm171_vm1, %v4138_v17 }
 0x335   : > { %v3849_v37 = vsel %vm171_vm1, %v11760_v25, 0.0  ;;  %3766 = vst.msk [vmem:[#allocation3 + $0xe0] sm:$0xff] %vm171_vm1, %v3685_v27  ;;  %9754 = vmatpush3.msk.msra.mxu1 %vm447_vm0, %v4136_v16 }
 0x336   : > { %v3850_v38 = vadd.f32 %v3849_v37, %v3848_v26 }
 0x337   : > { %v9702_v61 = vpop.f32.mrb[30].mxu0  ;;  %v11768_v62 = vld [vmem:[#allocation3 + $0xd8] sm:$0xff] }
 0x338   : > { %v11770_v41 = vld [vmem:[#allocation3 + $0xd0] sm:$0xff]  ;;  %v3852_v39 = vadd.f32 %v3851_v60, %v3850_v38  ;;  %3769 = vst.msk [vmem:[#allocation3 + $0xf8] sm:$0xff] %vm171_vm1, %v9702_v61  ;;  %v3695_v40 = vpop.f32.mrb[31].mxu0  ;;  %v3855_v3 = vsel %vm171_vm1, %v11768_v62, 0.0 }
 0x339   : > { %v3853_v0 = vsel %vm171_vm1, %v11770_v41, 0.0  ;;  %3768 = vst.msk [vmem:[#allocation3 + $0xf0] sm:$0xff] %vm171_vm1, %v3695_v40 }
 0x33a   : > { %v3854_v1 = vadd.f32 %v3853_v0, %v3852_v39 }
 0x33b   : > { %v11778_v4 = vld [vmem:[#allocation3 + $0xe8] sm:$0xff] }
 0x33c   : > { %v11780_v33 = vld [vmem:[#allocation3 + $0xe0] sm:$0xff]  ;;  %v3856_v34 = vadd.f32 %v3855_v3, %v3854_v1  ;;  %v3859_v45 = vsel %vm171_vm1, %v11778_v4, 0.0 }
 0x33d   : > { %v3857_v36 = vsel %vm171_vm1, %v11780_v33, 0.0 }
 0x33e   : > { %v3858_v44 = vadd.f32 %v3857_v36, %v3856_v34 }
 0x33f   : > { %v11786_v48 = vld [vmem:[#allocation3 + $0xf8] sm:$0xff] }
 0x340   : > { %v11788_v51 = vld [vmem:[#allocation3 + $0xf0] sm:$0xff]  ;;  %v3860_v52 = vadd.f32 %v3859_v45, %v3858_v44  ;;  %v3863_v57 = vsel %vm171_vm1, %v11786_v48, 0.0 }
 0x341   : > { %v3861_v55 = vsel %vm171_vm1, %v11788_v51, 0.0 }
 0x342   : > { %v3862_v56 = vadd.f32 %v3861_v55, %v3860_v52 }
 0x344   : > { %v3864_v58 = vadd.f32 %v3863_v57, %v3862_v56 }
 0x346   : > { %v3865_v43 = vrot.slane %v3864_v58, 4 }
 0x348   : > { %v3866_v8 = vadd.f32 %v3865_v43, %v3864_v58 }
 0x34a   : > { %v3867_v9 = vrot.slane %v3866_v8, 2 }
 0x34c   : > { %v3868_v10 = vadd.f32 %v3867_v9, %v3866_v8 }
 0x34e   : > { %v3869_v18 = vrot.slane %v3868_v10, 1 }
 0x350   : > { %v3870_v19 = vadd.f32 %v3869_v18, %v3868_v10 }
 0x352   : > { %v11806_v22 = vmul.f32 0.00390625, %v3870_v19 }
 0x354   : > { %v11810_v23 = vsub.f32 %v11640_v30, %v11806_v22  ;;  %v11814_v26 = vsub.f32 %v11638_v28, %v11806_v22  ;;  %v11818_v27 = vsub.f32 %v11650_v47, %v11806_v22  ;;  %v11822_v37 = vsub.f32 %v11648_v46, %v11806_v22 }
 0x355   : > { %v11830_v30 = vsub.f32 %v11660_v54, %v11806_v22  ;;  %v11836_v47 = vsub.f32 %v11658_v53, %v11806_v22  ;;  %v11844_v0 = vsub.f32 %v11670_v35, %v11806_v22  ;;  %v11851_v53 = vsub.f32 %v11668_v7, %v11806_v22 }
 0x356   : > { %v3904_v38 = vmul.f32 %v11810_v23, %v11810_v23  ;;  %v3905_v60 = vmul.f32 %v11814_v26, %v11814_v26  ;;  %v3906_v28 = vmul.f32 %v11818_v27, %v11818_v27  ;;  %v3907_v46 = vmul.f32 %v11822_v37, %v11822_v37 }
 0x357   : > { %v3908_v54 = vmul.f32 %v11830_v30, %v11830_v30  ;;  %v3909_v34 = vmul.f32 %v11836_v47, %v11836_v47  ;;  %v11858_v35 = vsub.f32 %v11680_v13, %v11806_v22  ;;  %v3910_v45 = vmul.f32 %v11844_v0, %v11844_v0 }
 0x358   : > { %v3936_v61 = vsel %vm171_vm1, %v3904_v38, 0.0  ;;  %v3937_v39 = vsel %vm171_vm1, %v3905_v60, 0.0  ;;  %v3939_v1 = vsel %vm171_vm1, %v3906_v28, 0.0  ;;  %v3941_v36 = vsel %vm171_vm1, %v3907_v46, 0.0 }
 0x359   : > { %v3938_v40 = vadd.f32 %v3937_v39, %v3936_v61  ;;  %v3943_v52 = vsel %vm171_vm1, %v3908_v54, 0.0  ;;  %v11865_v7 = vsub.f32 %v11678_v12, %v11806_v22  ;;  %v3911_v56 = vmul.f32 %v11851_v53, %v11851_v53 }
 0x35a   : > { %v3945_v57 = vsel %vm171_vm1, %v3909_v34, 0.0  ;;  %v11872_v13 = vsub.f32 %v11690_v21, %v11806_v22  ;;  %v3912_v43 = vmul.f32 %v11858_v35, %v11858_v35  ;;  %v3947_v8 = vsel %vm171_vm1, %v3910_v45, 0.0 }
 0x35b   : > { %v3940_v3 = vadd.f32 %v3939_v1, %v3938_v40  ;;  %v11879_v12 = vsub.f32 %v11688_v20, %v11806_v22  ;;  %v3913_v10 = vmul.f32 %v11865_v7, %v11865_v7  ;;  %v3949_v6 = vsel %vm171_vm1, %v3911_v56, 0.0 }
 0x35c   : > { %v11886_v21 = vsub.f32 %v11700_v32, %v11806_v22  ;;  %v3914_v16 = vmul.f32 %v11872_v13, %v11872_v13  ;;  %v3951_v17 = vsel %vm171_vm1, %v3912_v43, 0.0  ;;  %v11893_v20 = vsub.f32 %v11698_v31, %v11806_v22 }
 0x35d   : > { %v3942_v44 = vadd.f32 %v3941_v36, %v3940_v3  ;;  %v3915_v19 = vmul.f32 %v11879_v12, %v11879_v12  ;;  %v3953_v38 = vsel %vm171_vm1, %v3913_v10, 0.0  ;;  %v11900_v32 = vsub.f32 %v11710_v2, %v11806_v22 }
 0x35e   : > { %v3916_v28 = vmul.f32 %v11886_v21, %v11886_v21  ;;  %v3955_v46 = vsel %vm171_vm1, %v3914_v16, 0.0  ;;  %v11907_v31 = vsub.f32 %v11708_v42, %v11806_v22  ;;  %v3917_v39 = vmul.f32 %v11893_v20, %v11893_v20 }
 0x35f   : > { %v3944_v55 = vadd.f32 %v3943_v52, %v3942_v44  ;;  %v3957_v40 = vsel %vm171_vm1, %v3915_v19, 0.0  ;;  %v11914_v2 = vsub.f32 %v11720_v29, %v11806_v22  ;;  %v3918_v1 = vmul.f32 %v11900_v32, %v11900_v32 }
 0x360   : > { %v3959_v3 = vsel %vm171_vm1, %v3916_v28, 0.0  ;;  %v11921_v42 = vsub.f32 %v11718_v5, %v11806_v22  ;;  %v3919_v36 = vmul.f32 %v11907_v31, %v11907_v31  ;;  %v3961_v44 = vsel %vm171_vm1, %v3917_v39, 0.0 }
 0x361   : > { %v3946_v58 = vadd.f32 %v3945_v57, %v3944_v55  ;;  %v11928_v29 = vsub.f32 %v11730_v50, %v11806_v22  ;;  %v3920_v52 = vmul.f32 %v11914_v2, %v11914_v2  ;;  %v3963_v55 = vsel %vm171_vm1, %v3918_v1, 0.0 }
 0x362   : > { %v11935_v5 = vsub.f32 %v11728_v49, %v11806_v22  ;;  %v3921_v57 = vmul.f32 %v11921_v42, %v11921_v42  ;;  %v11942_v50 = vsub.f32 %v11740_v63, %v11806_v22  ;;  %v11949_v49 = vsub.f32 %v11738_v59, %v11806_v22 }
 0x363   : > { %v3948_v9 = vadd.f32 %v3947_v8, %v3946_v58  ;;  %v3965_v58 = vsel %vm171_vm1, %v3919_v36, 0.0  ;;  %v3922_v8 = vmul.f32 %v11928_v29, %v11928_v29  ;;  %v11956_v63 = vsub.f32 %v11750_v15, %v11806_v22 }
 0x364   : > { %v11963_v59 = vsub.f32 %v11748_v14, %v11806_v22  ;;  %v11970_v15 = vsub.f32 %v11760_v25, %v11806_v22  ;;  %v11978_v14 = vld [vmem:[%s13485_s2 + $0x8] sm:$0xf] }
 0x365   : > { %v3950_v11 = vadd.f32 %v3949_v6, %v3948_v9  ;;  %v3967_v9 = vsel %vm171_vm1, %v3920_v52, 0.0  ;;  %v3923_v6 = vmul.f32 %v11935_v5, %v11935_v5  ;;  %9803 = vmatprep.subr.msk.mxu1 %vm447_vm0, %v11978_v14 }
 0x366   : > { %v3927_v25 = vmul.f32 %v11963_v59, %v11963_v59 }
 0x367   : > { %v3952_v18 = vadd.f32 %v3951_v17, %v3950_v11  ;;  %v3969_v11 = vsel %vm171_vm1, %v3921_v57, 0.0  ;;  %v3924_v17 = vmul.f32 %v11942_v50, %v11942_v50 }
 0x368   : > { %v3981_v52 = vsel %vm171_vm1, %v3927_v25, 0.0 }
 0x369   : > { %v3954_v60 = vadd.f32 %v3953_v38, %v3952_v18  ;;  %v3971_v18 = vsel %vm171_vm1, %v3922_v8, 0.0  ;;  %v3925_v38 = vmul.f32 %v11949_v49, %v11949_v49 }
 0x36b   : > { %v3956_v61 = vadd.f32 %v3955_v46, %v3954_v60  ;;  %v3973_v60 = vsel %vm171_vm1, %v3923_v6, 0.0  ;;  %v3926_v46 = vmul.f32 %v11956_v63, %v11956_v63 }
 0x36d   : > { %v3958_v54 = vadd.f32 %v3957_v40, %v3956_v61  ;;  %v3975_v61 = vsel %vm171_vm1, %v3924_v17, 0.0  ;;  %v11984_v40 = vsub.f32 %v11758_v24, %v11806_v22  ;;  %v3979_v36 = vsel %vm171_vm1, %v3926_v46, 0.0 }
 0x36e   : > { %v11998_v24 = vsub.f32 %v11768_v62, %v11806_v22  ;;  %v12012_v62 = vsub.f32 %v11778_v4, %v11806_v22 }
 0x36f   : > { %v3960_v34 = vadd.f32 %v3959_v3, %v3958_v54  ;;  %v3977_v54 = vsel %vm171_vm1, %v3925_v38, 0.0  ;;  %v11991_v3 = vsub.f32 %v11770_v41, %v11806_v22  ;;  %v12005_v41 = vsub.f32 %v11780_v33, %v11806_v22 }
 0x370   : > { %v3902_v33 = vsub.f32 %v11788_v51, %v11806_v22  ;;  %v3933_v4 = vmul.f32 %v12012_v62, %v12012_v62 }
 0x371   : > { %v3962_v45 = vadd.f32 %v3961_v44, %v3960_v34  ;;  %v3928_v34 = vmul.f32 %v11970_v15, %v11970_v15 }
 0x373   : > { %v3964_v56 = vadd.f32 %v3963_v55, %v3962_v45  ;;  %v3929_v45 = vmul.f32 %v11984_v40, %v11984_v40  ;;  %v3983_v57 = vsel %vm171_vm1, %v3928_v34, 0.0 }
 0x375   : > { %v3966_v43 = vadd.f32 %v3965_v58, %v3964_v56  ;;  %v3930_v56 = vmul.f32 %v11991_v3, %v11991_v3  ;;  %v3985_v8 = vsel %vm171_vm1, %v3929_v45, 0.0 }
 0x377   : > { %v3968_v10 = vadd.f32 %v3967_v9, %v3966_v43  ;;  %v3931_v43 = vmul.f32 %v11998_v24, %v11998_v24  ;;  %v3987_v6 = vsel %vm171_vm1, %v3930_v56, 0.0 }
 0x379   : > { %v3970_v16 = vadd.f32 %v3969_v11, %v3968_v10  ;;  %v3932_v10 = vmul.f32 %v12005_v41, %v12005_v41  ;;  %v3989_v17 = vsel %vm171_vm1, %v3931_v43, 0.0 }
 0x37b   : > { %v3972_v19 = vadd.f32 %v3971_v18, %v3970_v16  ;;  %v3903_v16 = vsub.f32 %v11786_v48, %v11806_v22  ;;  %v3991_v38 = vsel %vm171_vm1, %v3932_v10, 0.0 }
 0x37d   : > { %v3974_v28 = vadd.f32 %v3973_v60, %v3972_v19  ;;  %v3934_v19 = vmul.f32 %v3902_v33, %v3902_v33  ;;  %v3935_v51 = vmul.f32 %v3903_v16, %v3903_v16 }
 0x37f   : > { %v3976_v39 = vadd.f32 %v3975_v61, %v3974_v28  ;;  %v3993_v28 = vsel %vm171_vm1, %v3933_v4, 0.0  ;;  %v3995_v61 = vsel %vm171_vm1, %v3934_v19, 0.0  ;;  %v3997_v25 = vsel %vm171_vm1, %v3935_v51, 0.0 }
 0x381   : > { %v3978_v1 = vadd.f32 %v3977_v54, %v3976_v39 }
 0x383   : > { %v3980_v44 = vadd.f32 %v3979_v36, %v3978_v1 }
 0x385   : > { %v3982_v55 = vadd.f32 %v3981_v52, %v3980_v44 }
 0x387   : > { %v3984_v58 = vadd.f32 %v3983_v57, %v3982_v55 }
 0x389   : > { %v3986_v9 = vadd.f32 %v3985_v8, %v3984_v58 }
 0x38b   : > { %v3988_v11 = vadd.f32 %v3987_v6, %v3986_v9 }
 0x38d   : > { %v3990_v18 = vadd.f32 %v3989_v17, %v3988_v11 }
 0x38f   : > { %v3992_v60 = vadd.f32 %v3991_v38, %v3990_v18 }
 0x391   : > { %v3994_v46 = vadd.f32 %v3993_v28, %v3992_v60 }
 0x393   : > { %v3996_v39 = vadd.f32 %v3995_v61, %v3994_v46 }
 0x395   : > { %v3998_v48 = vadd.f32 %v3997_v25, %v3996_v39 }
 0x397   : > { %v3999_v22 = vrot.slane %v3998_v48, 4 }
 0x399   : > { %v4000_v54 = vadd.f32 %v3999_v22, %v3998_v48 }
 0x39b   : > { %v4001_v1 = vrot.slane %v4000_v54, 2 }
 0x39d   : > { %v4002_v34 = vadd.f32 %v4001_v1, %v4000_v54 }
 0x39f   : > { %v4003_v36 = vrot.slane %v4002_v34, 1 }
 0x3a1   : > { %v4004_v44 = vadd.f32 %v4003_v36, %v4002_v34 }
 0x3a3   : > { %v4005_v45 = vmul.f32 0.00390625, %v4004_v44 }
 0x3a5   : > { %v4006_v52 = vadd.f32 1e-05, %v4005_v45 }
 0x3a7   : > { %10674 = vrsqrt.f32 %v4006_v52 }
 0x3b1   : > { %v10675_v55 = vpop.eup %10674 }
 0x3b2   : > { %v4038_v56 = vmul.f32 %v10675_v55, %v3902_v33  ;;  %v4008_v57 = vmul.f32 %v10675_v55, %v11810_v23  ;;  %v4009_v58 = vmul.f32 %v10675_v55, %v11814_v26  ;;  %v4010_v43 = vmul.f32 %v10675_v55, %v11818_v27 }
 0x3b3   : > { %v4011_v8 = vmul.f32 %v10675_v55, %v11822_v37  ;;  %v4012_v9 = vmul.f32 %v10675_v55, %v11830_v30  ;;  %v4013_v10 = vmul.f32 %v10675_v55, %v11836_v47  ;;  %v4014_v6 = vmul.f32 %v10675_v55, %v11844_v0 }
 0x3b4   : > { %v4070_v11 = vmax.f32 %v4038_v56, 0.0  ;;  %v4015_v4 = vmul.f32 %v10675_v55, %v11851_v53  ;;  %v4016_v17 = vmul.f32 %v10675_v55, %v11858_v35  ;;  %v4017_v33 = vmul.f32 %v10675_v55, %v11865_v7 }
 0x3b5   : > { %v4018_v23 = vmul.f32 %v10675_v55, %v11872_v13  ;;  %v4019_v26 = vmul.f32 %v10675_v55, %v11879_v12  ;;  %v4020_v27 = vmul.f32 %v10675_v55, %v11886_v21  ;;  %v4021_v37 = vmul.f32 %v10675_v55, %v11893_v20 }
 0x3b6   : > { %v4022_v30 = vmul.f32 %v10675_v55, %v11900_v32  ;;  %v4023_v47 = vmul.f32 %v10675_v55, %v11907_v31  ;;  %v4024_v0 = vmul.f32 %v10675_v55, %v11914_v2  ;;  %v4025_v53 = vmul.f32 %v10675_v55, %v11921_v42  ;;  %4102 = vst.msk [vmem:[#allocation2 + $0x181] sm:$0xff] %vm171_vm1, %v4070_v11 }
 0x3b7   : > { %v4026_v35 = vmul.f32 %v10675_v55, %v11928_v29  ;;  %v12052_v7 = vmul.f32 %v10675_v55, %v11935_v5  ;;  %v12055_v13 = vmul.f32 %v10675_v55, %v11942_v50  ;;  %v12058_v12 = vmul.f32 %v10675_v55, %v11949_v49 }
 0x3b8   : > { %v12061_v21 = vmul.f32 %v10675_v55, %v11956_v63  ;;  %v12064_v20 = vmul.f32 %v10675_v55, %v11963_v59  ;;  %v12067_v32 = vmul.f32 %v10675_v55, %v11970_v15  ;;  %v12070_v31 = vmul.f32 %v10675_v55, %v11984_v40 }
 0x3b9   : > { %v12073_v2 = vmul.f32 %v10675_v55, %v11991_v3  ;;  %v12076_v42 = vmul.f32 %v10675_v55, %v11998_v24  ;;  %v12079_v29 = vmul.f32 %v10675_v55, %v12005_v41  ;;  %v12082_v5 = vmul.f32 %v10675_v55, %v12012_v62 }
 0x3ba   : > { %v12084_v50 = vmul.f32 %v10675_v55, %v3903_v16  ;;  %v4040_v49 = vmax.f32 %v4008_v57, 0.0  ;;  %v4041_v63 = vmax.f32 %v4009_v58, 0.0  ;;  %v4042_v59 = vmax.f32 %v4010_v43, 0.0 }
 0x3bb   : > { %v4043_v15 = vmax.f32 %v4011_v8, 0.0  ;;  %v4044_v40 = vmax.f32 %v4012_v9, 0.0  ;;  %v4045_v18 = vmax.f32 %v4013_v10, 0.0  ;;  %v4046_v19 = vmax.f32 %v4014_v6, 0.0 }
 0x3bc   : > { %v4047_v3 = vmax.f32 %v4015_v4, 0.0  ;;  %v4048_v38 = vmax.f32 %v4016_v17, 0.0  ;;  %v4049_v60 = vmax.f32 %v4017_v33, 0.0  ;;  %v4050_v24 = vmax.f32 %v4018_v23, 0.0  ;;  %4072 = vst.msk [vmem:[#allocation2 + $0x19] sm:$0xff] %vm171_vm1, %v4040_v49  ;;  %4073 = vst.msk [vmem:[#allocation2 + $0x21] sm:$0xff] %vm171_vm1, %v4041_v63 }
 0x3bd   : > { %4074 = vst.msk [vmem:[#allocation2 + $0x31] sm:$0xff] %vm171_vm1, %v4042_v59  ;;  %v4051_v41 = vmax.f32 %v4019_v26, 0.0  ;;  %v4052_v62 = vmax.f32 %v4020_v27, 0.0  ;;  %v4053_v16 = vmax.f32 %v4021_v37, 0.0  ;;  %v4054_v51 = vmax.f32 %v4022_v30, 0.0  ;;  %4075 = vst.msk [vmem:[#allocation2 + $0x39] sm:$0xff] %vm171_vm1, %v4043_v15 }
 0x3be   : > { %4076 = vst.msk [vmem:[#allocation2 + $0x49] sm:$0xff] %vm171_vm1, %v4044_v40  ;;  %4077 = vst.msk [vmem:[#allocation2 + $0x51] sm:$0xff] %vm171_vm1, %v4045_v18  ;;  %v4055_v28 = vmax.f32 %v4023_v47, 0.0  ;;  %v4056_v46 = vmax.f32 %v4024_v0, 0.0  ;;  %v4057_v61 = vmax.f32 %v4025_v53, 0.0  ;;  %v4058_v39 = vmax.f32 %v4026_v35, 0.0 }
 0x3bf   : > { %4078 = vst.msk [vmem:[#allocation2 + $0x61] sm:$0xff] %vm171_vm1, %v4046_v19  ;;  %4079 = vst.msk [vmem:[#allocation2 + $0x69] sm:$0xff] %vm171_vm1, %v4047_v3  ;;  %v4059_v25 = vmax.f32 %v12052_v7, 0.0  ;;  %v4060_v48 = vmax.f32 %v12055_v13, 0.0  ;;  %v4061_v22 = vmax.f32 %v12058_v12, 0.0  ;;  %v4062_v54 = vmax.f32 %v12061_v21, 0.0 }
 0x3c0   : > { %4080 = vst.msk [vmem:[#allocation2 + $0x79] sm:$0xff] %vm171_vm1, %v4048_v38  ;;  %4081 = vst.msk [vmem:[#allocation2 + $0x81] sm:$0xff] %vm171_vm1, %v4049_v60  ;;  %v4063_v1 = vmax.f32 %v12064_v20, 0.0  ;;  %v4064_v34 = vmax.f32 %v12067_v32, 0.0  ;;  %v4065_v36 = vmax.f32 %v12070_v31, 0.0  ;;  %v4066_v44 = vmax.f32 %v12073_v2, 0.0 }
 0x3c1   : > { %4082 = vst.msk [vmem:[#allocation2 + $0x91] sm:$0xff] %vm171_vm1, %v4050_v24  ;;  %4083 = vst.msk [vmem:[#allocation2 + $0x99] sm:$0xff] %vm171_vm1, %v4051_v41  ;;  %v4067_v45 = vmax.f32 %v12076_v42, 0.0  ;;  %v4068_v52 = vmax.f32 %v12079_v29, 0.0  ;;  %v4069_v55 = vmax.f32 %v12082_v5, 0.0  ;;  %v4071_v56 = vmax.f32 %v12084_v50, 0.0 }
 0x3c2   : > { %4084 = vst.msk [vmem:[#allocation2 + $0xa9] sm:$0xff] %vm171_vm1, %v4052_v62  ;;  %4085 = vst.msk [vmem:[#allocation2 + $0xb1] sm:$0xff] %vm171_vm1, %v4053_v16  ;;  %v4104_v29 = vld [vmem:[#allocation2] sm:$0xff]  ;;  %v4105_v50 = vld [vmem:[#allocation2 + $0x8] sm:$0xff] }
 0x3c3   : > { %4086 = vst.msk [vmem:[#allocation2 + $0xc1] sm:$0xff] %vm171_vm1, %v4054_v51  ;;  %4087 = vst.msk [vmem:[#allocation2 + $0xc9] sm:$0xff] %vm171_vm1, %v4055_v28  ;;  %v12129_v57 = vld [vmem:[#allocation2 + $0x19] sm:$0xff]  ;;  %v12131_v58 = vld [vmem:[#allocation2 + $0x21] sm:$0xff] }
 0x3c4   : > { %4088 = vst.msk [vmem:[#allocation2 + $0xd9] sm:$0xff] %vm171_vm1, %v4056_v46  ;;  %4089 = vst.msk [vmem:[#allocation2 + $0xe1] sm:$0xff] %vm171_vm1, %v4057_v61  ;;  %9708 = vmatprep.mubr.msk.f32.mxu1 %vm171_vm1, %v12129_v57  ;;  %v12137_v43 = vld [vmem:[#allocation2 + $0x31] sm:$0xff]  ;;  %v12141_v8 = vld [vmem:[#allocation2 + $0x39] sm:$0xff] }
 0x3c5   : > { %4090 = vst.msk [vmem:[#allocation2 + $0xf1] sm:$0xff] %vm171_vm1, %v4058_v39  ;;  %4091 = vst.msk [vmem:[#allocation2 + $0xf9] sm:$0xff] %vm171_vm1, %v4059_v25  ;;  %9709 = vmatmul.mubr.msk.f32.gmra.mrb[2].mxu1 %vm171_vm1, %v12131_v58  ;;  %v12145_v9 = vld [vmem:[#allocation2 + $0x49] sm:$0xff]  ;;  %v12149_v10 = vld [vmem:[#allocation2 + $0x51] sm:$0xff] }
 0x3c6   : > { %4092 = vst.msk [vmem:[#allocation2 + $0x109] sm:$0xff] %vm171_vm1, %v4060_v48  ;;  %4093 = vst.msk [vmem:[#allocation2 + $0x111] sm:$0xff] %vm171_vm1, %v4061_v22  ;;  %9711 = vmatprep.mubr.msk.f32.mxu1 %vm171_vm1, %v12137_v43  ;;  %v12153_v6 = vld [vmem:[#allocation2 + $0x61] sm:$0xff]  ;;  %v12157_v11 = vld [vmem:[#allocation2 + $0x69] sm:$0xff] }
 0x3c7   : > { %4094 = vst.msk [vmem:[#allocation2 + $0x121] sm:$0xff] %vm171_vm1, %v4062_v54  ;;  %4095 = vst.msk [vmem:[#allocation2 + $0x129] sm:$0xff] %vm171_vm1, %v4063_v1  ;;  %v12161_v4 = vld [vmem:[#allocation2 + $0x79] sm:$0xff]  ;;  %v12165_v17 = vld [vmem:[#allocation2 + $0x81] sm:$0xff] }
 0x3c8   : > { %4096 = vst.msk [vmem:[#allocation2 + $0x139] sm:$0xff] %vm171_vm1, %v4064_v34  ;;  %4097 = vst.msk [vmem:[#allocation2 + $0x141] sm:$0xff] %vm171_vm1, %v4065_v36  ;;  %v12169_v33 = vld [vmem:[#allocation2 + $0x91] sm:$0xff]  ;;  %v12173_v23 = vld [vmem:[#allocation2 + $0x99] sm:$0xff] }
 0x3c9   : > { %4098 = vst.msk [vmem:[#allocation2 + $0x151] sm:$0xff] %vm171_vm1, %v4066_v44  ;;  %4099 = vst.msk [vmem:[#allocation2 + $0x159] sm:$0xff] %vm171_vm1, %v4067_v45  ;;  %9712 = vmatmul.mubr.msk.f32.gmra.mrb[4].mxu1 %vm171_vm1, %v12141_v8  ;;  %v12177_v26 = vld [vmem:[#allocation2 + $0xa9] sm:$0xff]  ;;  %v12181_v27 = vld [vmem:[#allocation2 + $0xb1] sm:$0xff] }
 0x3ca   : > { %4100 = vst.msk [vmem:[#allocation2 + $0x169] sm:$0xff] %vm171_vm1, %v4068_v52  ;;  %4101 = vst.msk [vmem:[#allocation2 + $0x171] sm:$0xff] %vm171_vm1, %v4069_v55  ;;  %9714 = vmatprep.mubr.msk.f32.mxu1 %vm171_vm1, %v12145_v9  ;;  %v12185_v37 = vld [vmem:[#allocation2 + $0xc1] sm:$0xff]  ;;  %v12189_v30 = vld [vmem:[#allocation2 + $0xc9] sm:$0xff] }
 0x3cb   : > { %4103 = vst.msk [vmem:[#allocation2 + $0x189] sm:$0xff] %vm171_vm1, %v4071_v56  ;;  %v12193_v47 = vld [vmem:[#allocation2 + $0xd9] sm:$0xff]  ;;  %v12197_v0 = vld [vmem:[#allocation2 + $0xe1] sm:$0xff]  ;;  %v12253_v49 = vld [vmem:[%s13485_s2 + $0xc] sm:$0xf] }
 0x3cc   : > { %v12201_v53 = vld [vmem:[#allocation2 + $0xf1] sm:$0xff]  ;;  %v12205_v35 = vld [vmem:[#allocation2 + $0xf9] sm:$0xff]  ;;  %v12288_v3 = vld [vmem:[#allocation2 + $0x68] sm:$0xff] }
 0x3cd   : > { %9715 = vmatmul.mubr.msk.f32.gmra.mrb[6].mxu1 %vm171_vm1, %v12149_v10  ;;  %v12209_v7 = vld [vmem:[#allocation2 + $0x109] sm:$0xff]  ;;  %v12213_v13 = vld [vmem:[#allocation2 + $0x111] sm:$0xff]  ;;  %v12264_v59 = vld [vmem:[#allocation2 + $0x20] sm:$0xff] }
 0x3ce   : > { %9717 = vmatprep.mubr.msk.f32.mxu1 %vm171_vm1, %v12153_v6  ;;  %v12217_v12 = vld [vmem:[#allocation2 + $0x121] sm:$0xff]  ;;  %v12221_v21 = vld [vmem:[#allocation2 + $0x129] sm:$0xff]  ;;  %v12256_v63 = vld [vmem:[#allocation2 + $0x18] sm:$0xff] }
 0x3cf   : > { %13668 = vst [vmem:[#allocation4_spill] sm:$0xff] %v12221_v21  ;;  %v12225_v20 = vld [vmem:[#allocation2 + $0x139] sm:$0xff]  ;;  %v12229_v32 = vld [vmem:[#allocation2 + $0x141] sm:$0xff]  ;;  %v12268_v15 = vld [vmem:[#allocation2 + $0x30] sm:$0xff] }
 0x3d0   : > { %13669 = vst [vmem:[#allocation5_spill] sm:$0xff] %v12225_v20  ;;  %13670 = vst [vmem:[#allocation6_spill] sm:$0xff] %v12229_v32  ;;  %v12233_v31 = vld [vmem:[#allocation2 + $0x151] sm:$0xff]  ;;  %v12237_v2 = vld [vmem:[#allocation2 + $0x159] sm:$0xff] }
 0x3d1   : > { %9718 = vmatmul.mubr.msk.f32.gmra.mrb[8].mxu1 %vm171_vm1, %v12157_v11  ;;  %13671 = vst [vmem:[#allocation7_spill] sm:$0xff] %v12233_v31  ;;  %13672 = vst [vmem:[#allocation8_spill] sm:$0xff] %v12237_v2  ;;  %v12241_v42 = vld [vmem:[#allocation2 + $0x169] sm:$0xff]  ;;  %v12245_v5 = vld [vmem:[#allocation2 + $0x171] sm:$0xff] }
 0x3d2   : > { %9720 = vmatprep.mubr.msk.f32.mxu1 %vm171_vm1, %v12161_v4  ;;  %13673 = vst [vmem:[#allocation9_spill] sm:$0xff] %v12241_v42  ;;  %13674 = vst [vmem:[#allocation10_spill] sm:$0xff] %v12245_v5  ;;  %v12272_v40 = vld [vmem:[#allocation2 + $0x38] sm:$0xff]  ;;  %v12280_v18 = vld [vmem:[#allocation2 + $0x50] sm:$0xff] }
 0x3d3   : > { %v12284_v19 = vld [vmem:[#allocation2 + $0x60] sm:$0xff]  ;;  %v12292_v38 = vld [vmem:[#allocation2 + $0x78] sm:$0xff]  ;;  %v12300_v24 = vld [vmem:[#allocation2 + $0x90] sm:$0xff] }
 0x3d4   : > { %v12296_v60 = vld [vmem:[#allocation2 + $0x80] sm:$0xff]  ;;  %v12304_v41 = vld [vmem:[#allocation2 + $0x98] sm:$0xff]  ;;  %v12308_v62 = vld [vmem:[#allocation2 + $0xa8] sm:$0xff] }
 0x3d5   : > { %9721 = vmatmul.mubr.msk.f32.gmra.mrb[10].mxu1 %vm171_vm1, %v12165_v17  ;;  %v12312_v16 = vld [vmem:[#allocation2 + $0xb0] sm:$0xff]  ;;  %v12316_v51 = vld [vmem:[#allocation2 + $0xc0] sm:$0xff]  ;;  %v12320_v28 = vld [vmem:[#allocation2 + $0xc8] sm:$0xff] }
 0x3d6   : > { %9723 = vmatprep.mubr.msk.f32.mxu1 %vm171_vm1, %v12169_v33  ;;  %v12324_v46 = vld [vmem:[#allocation2 + $0xd8] sm:$0xff]  ;;  %v12328_v61 = vld [vmem:[#allocation2 + $0xe0] sm:$0xff]  ;;  %v12332_v39 = vld [vmem:[#allocation2 + $0xf0] sm:$0xff] }
 0x3d7   : > { %v12336_v25 = vld [vmem:[#allocation2 + $0xf8] sm:$0xff]  ;;  %v12340_v48 = vld [vmem:[#allocation2 + $0x108] sm:$0xff]  ;;  %v12344_v22 = vld [vmem:[#allocation2 + $0x110] sm:$0xff] }
 0x3d8   : > { %v12348_v54 = vld [vmem:[#allocation2 + $0x120] sm:$0xff]  ;;  %v12352_v1 = vld [vmem:[#allocation2 + $0x128] sm:$0xff]  ;;  %v12356_v34 = vld [vmem:[#allocation2 + $0x138] sm:$0xff] }
 0x3d9   : > { %9724 = vmatmul.mubr.msk.f32.gmra.mrb[12].mxu1 %vm171_vm1, %v12173_v23  ;;  %v12360_v36 = vld [vmem:[#allocation2 + $0x140] sm:$0xff]  ;;  %v12364_v44 = vld [vmem:[#allocation2 + $0x150] sm:$0xff]  ;;  %v12368_v45 = vld [vmem:[#allocation2 + $0x158] sm:$0xff] }
 0x3da   : > { %9726 = vmatprep.mubr.msk.f32.mxu1 %vm171_vm1, %v12177_v26  ;;  %v12372_v52 = vld [vmem:[#allocation2 + $0x168] sm:$0xff]  ;;  %v12376_v56 = vld [vmem:[#allocation2 + $0x170] sm:$0xff] }
 0x3db   : > { %v4819_v55 = vld [vmem:[#allocation2 + $0x2] sm:$0xff] }
 0x3dd   : > { %9727 = vmatmul.mubr.msk.f32.gmra.mrb[14].mxu1 %vm171_vm1, %v12181_v27 }
 0x3de   : > { %9729 = vmatprep.mubr.msk.f32.mxu1 %vm171_vm1, %v12185_v37 }
 0x3e1   : > { %9730 = vmatmul.mubr.msk.f32.gmra.mrb[16].mxu1 %vm171_vm1, %v12189_v30 }
 0x3e2   : > { %9732 = vmatprep.mubr.msk.f32.mxu1 %vm171_vm1, %v12193_v47 }
 0x3e5   : > { %9733 = vmatmul.mubr.msk.f32.gmra.mrb[18].mxu1 %vm171_vm1, %v12197_v0 }
 0x3e6   : > { %9735 = vmatprep.mubr.msk.f32.mxu1 %vm171_vm1, %v12201_v53 }
 0x3e9   : > { %9736 = vmatmul.mubr.msk.f32.gmra.mrb[20].mxu1 %vm171_vm1, %v12205_v35 }
 0x3ea   : > { %9738 = vmatprep.mubr.msk.f32.mxu1 %vm171_vm1, %v12209_v7 }
 0x3ed   : > { %9739 = vmatmul.mubr.msk.f32.gmra.mrb[22].mxu1 %vm171_vm1, %v12213_v13 }
 0x3ee   : > { %9741 = vmatprep.mubr.msk.f32.mxu1 %vm171_vm1, %v12217_v12 }
 0x3f1   : > { %9742 = vmatmul.mubr.msk.f32.gmra.mrb[24].mxu1 %vm171_vm1, %v12221_v21 }
 0x3f2   : > { %9744 = vmatprep.mubr.msk.f32.mxu1 %vm171_vm1, %v12225_v20 }
 0x3f5   : > { %9745 = vmatmul.mubr.msk.f32.gmra.mrb[26].mxu1 %vm171_vm1, %v12229_v32 }
 0x3f6   : > { %9747 = vmatprep.mubr.msk.f32.mxu1 %vm171_vm1, %v12233_v31 }
 0x3f9   : > { %9748 = vmatmul.mubr.msk.f32.gmra.mrb[28].mxu1 %vm171_vm1, %v12237_v2 }
 0x3fa   : > { %9750 = vmatprep.mubr.msk.f32.mxu1 %vm171_vm1, %v12241_v42  ;;  %v12399_v42 = vld [vmem:[#allocation2 + $0x32] sm:$0xff] }
 0x3fb   : > { %13677 = vst [vmem:[#allocation13_spill] sm:$0xff] %v12399_v42 }
 0x3fd   : > { %9751 = vmatmul.mubr.msk.f32.gmra.mrb[30].mxu1 %vm171_vm1, %v12245_v5  ;;  %v12387_v5 = vld [vmem:[#allocation2 + $0x1a] sm:$0xff] }
 0x3fe   : > { %9755 = vmatprep.mubr.msk.f32.mxu1 %vm171_vm1, %v4104_v29  ;;  %v4820_v29 = vld [vmem:[#allocation2 + $0xa] sm:$0xff]  ;;  %13675 = vst [vmem:[#allocation11_spill] sm:$0xff] %v12387_v5 }
 0x401   : > { %9756 = vmatmul.mubr.msk.f32.vlgmr.msra.gmra.mrb[0].mxu1 %vm171_vm1, %v4105_v50  ;;  %v12384_v50 = vld [vmem:[%s13485_s2 + $0x10] sm:$0xf] }
 0x402   : > { %9804 = vmatpush3.msk.msra.mxu1 %vm447_vm0, %v11978_v14  ;;  %9758 = vmatprep.mubr.msk.f32.mxu1 %vm171_vm1, %v12256_v63  ;;  %v12276_v14 = vld [vmem:[#allocation2 + $0x48] sm:$0xff] }
 0x403   : > { %9853 = vmatprep.subr.msk.mxu1 %vm447_vm0, %v12253_v49 }
 0x405   : > { %9759 = vmatmul.mubr.msk.f32.gmra.mrb[2].mxu1 %vm171_vm1, %v12264_v59 }
 0x406   : > { %9761 = vmatprep.mubr.msk.f32.mxu1 %vm171_vm1, %v12268_v15 }
 0x409   : > { %9762 = vmatmul.mubr.msk.f32.gmra.mrb[4].mxu1 %vm171_vm1, %v12272_v40 }
 0x40a   : > { %9764 = vmatprep.mubr.msk.f32.mxu1 %vm171_vm1, %v12276_v14 }
 0x40d   : > { %9765 = vmatmul.mubr.msk.f32.gmra.mrb[6].mxu1 %vm171_vm1, %v12280_v18 }
 0x40e   : > { %9767 = vmatprep.mubr.msk.f32.mxu1 %vm171_vm1, %v12284_v19 }
 0x411   : > { %9768 = vmatmul.mubr.msk.f32.gmra.mrb[8].mxu1 %vm171_vm1, %v12288_v3 }
 0x412   : > { %9770 = vmatprep.mubr.msk.f32.mxu1 %vm171_vm1, %v12292_v38 }
 0x415   : > { %9771 = vmatmul.mubr.msk.f32.gmra.mrb[10].mxu1 %vm171_vm1, %v12296_v60 }
 0x416   : > { %9773 = vmatprep.mubr.msk.f32.mxu1 %vm171_vm1, %v12300_v24 }
 0x419   : > { %9774 = vmatmul.mubr.msk.f32.gmra.mrb[12].mxu1 %vm171_vm1, %v12304_v41 }
 0x41a   : > { %9776 = vmatprep.mubr.msk.f32.mxu1 %vm171_vm1, %v12308_v62 }
 0x41d   : > { %9777 = vmatmul.mubr.msk.f32.gmra.mrb[14].mxu1 %vm171_vm1, %v12312_v16 }
 0x41e   : > { %9779 = vmatprep.mubr.msk.f32.mxu1 %vm171_vm1, %v12316_v51 }
 0x421   : > { %9780 = vmatmul.mubr.msk.f32.gmra.mrb[16].mxu1 %vm171_vm1, %v12320_v28 }
 0x422   : > { %9782 = vmatprep.mubr.msk.f32.mxu1 %vm171_vm1, %v12324_v46 }
 0x425   : > { %9783 = vmatmul.mubr.msk.f32.gmra.mrb[18].mxu1 %vm171_vm1, %v12328_v61 }
 0x426   : > { %9785 = vmatprep.mubr.msk.f32.mxu1 %vm171_vm1, %v12332_v39 }
 0x429   : > { %9786 = vmatmul.mubr.msk.f32.gmra.mrb[20].mxu1 %vm171_vm1, %v12336_v25 }
 0x42a   : > { %9788 = vmatprep.mubr.msk.f32.mxu1 %vm171_vm1, %v12340_v48 }
 0x42d   : > { %9789 = vmatmul.mubr.msk.f32.gmra.mrb[22].mxu1 %vm171_vm1, %v12344_v22 }
 0x42e   : > { %9791 = vmatprep.mubr.msk.f32.mxu1 %vm171_vm1, %v12348_v54 }
 0x431   : > { %9792 = vmatmul.mubr.msk.f32.gmra.mrb[24].mxu1 %vm171_vm1, %v12352_v1 }
 0x432   : > { %9794 = vmatprep.mubr.msk.f32.mxu1 %vm171_vm1, %v12356_v34 }
 0x435   : > { %9795 = vmatmul.mubr.msk.f32.gmra.mrb[26].mxu1 %vm171_vm1, %v12360_v36 }
 0x436   : > { %9797 = vmatprep.mubr.msk.f32.mxu1 %vm171_vm1, %v12364_v44 }
 0x439   : > { %9798 = vmatmul.mubr.msk.f32.gmra.mrb[28].mxu1 %vm171_vm1, %v12368_v45 }
 0x43a   : > { %9800 = vmatprep.mubr.msk.f32.mxu1 %vm171_vm1, %v12372_v52 }
 0x43d   : > { %9801 = vmatmul.mubr.msk.f32.gmra.mrb[30].mxu1 %vm171_vm1, %v12376_v56 }
 0x43e   : > { %9805 = vmatprep.mubr.msk.f32.mxu1 %vm171_vm1, %v4819_v55  ;;  %v12395_v55 = vld [vmem:[#allocation2 + $0x22] sm:$0xff] }
 0x43f   : > { %13676 = vst [vmem:[#allocation12_spill] sm:$0xff] %v12395_v55 }
 0x441   : > { %9806 = vmatmul.mubr.msk.f32.vlgmr.msra.gmra.mrb[0].mxu1 %vm171_vm1, %v4820_v29  ;;  %v12403_v29 = vld [vmem:[#allocation2 + $0x3a] sm:$0xff] }
 0x442   : > { %9854 = vmatpush3.msk.msra.mxu1 %vm447_vm0, %v12253_v49  ;;  %9808 = vmatprep.mubr.msk.f32.mxu1 %vm171_vm1, %v12387_v5  ;;  %13678 = vst [vmem:[#allocation14_spill] sm:$0xff] %v12403_v29  ;;  %v12407_v49 = vld [vmem:[#allocation2 + $0x4a] sm:$0xff]  ;;  %v12411_v5 = vld [vmem:[#allocation2 + $0x52] sm:$0xff] }
 0x443   : > { %9903 = vmatprep.subr.msk.mxu1 %vm447_vm0, %v12384_v50  ;;  %13679 = vst [vmem:[#allocation15_spill] sm:$0xff] %v12407_v49  ;;  %13680 = vst [vmem:[#allocation16_spill] sm:$0xff] %v12411_v5 }
 0x445   : > { %9809 = vmatmul.mubr.msk.f32.gmra.mrb[2].mxu1 %vm171_vm1, %v12395_v55  ;;  %v12415_v55 = vld [vmem:[#allocation2 + $0x62] sm:$0xff] }
 0x446   : > { %9811 = vmatprep.mubr.msk.f32.mxu1 %vm171_vm1, %v12399_v42  ;;  %13681 = vst [vmem:[#allocation17_spill] sm:$0xff] %v12415_v55  ;;  %v12419_v42 = vld [vmem:[#allocation2 + $0x6a] sm:$0xff] }
 0x447   : > { %13682 = vst [vmem:[#allocation18_spill] sm:$0xff] %v12419_v42 }
 0x449   : > { %9812 = vmatmul.mubr.msk.f32.gmra.mrb[4].mxu1 %vm171_vm1, %v12403_v29  ;;  %v12423_v29 = vld [vmem:[#allocation2 + $0x7a] sm:$0xff] }
 0x44a   : > { %9814 = vmatprep.mubr.msk.f32.mxu1 %vm171_vm1, %v12407_v49  ;;  %13683 = vst [vmem:[#allocation19_spill] sm:$0xff] %v12423_v29  ;;  %v12427_v49 = vld [vmem:[#allocation2 + $0x82] sm:$0xff] }
 0x44b   : > { %13684 = vst [vmem:[#allocation20_spill] sm:$0xff] %v12427_v49 }
 0x44d   : > { %9815 = vmatmul.mubr.msk.f32.gmra.mrb[6].mxu1 %vm171_vm1, %v12411_v5  ;;  %v12431_v5 = vld [vmem:[#allocation2 + $0x92] sm:$0xff] }
 0x44e   : > { %9817 = vmatprep.mubr.msk.f32.mxu1 %vm171_vm1, %v12415_v55  ;;  %13685 = vst [vmem:[#allocation22_spill] sm:$0xff] %v12431_v5  ;;  %v12435_v55 = vld [vmem:[#allocation2 + $0x9a] sm:$0xff] }
 0x44f   : > { %13686 = vst [vmem:[#allocation24_spill] sm:$0xff] %v12435_v55 }
 0x451   : > { %9818 = vmatmul.mubr.msk.f32.gmra.mrb[8].mxu1 %vm171_vm1, %v12419_v42  ;;  %v12439_v42 = vld [vmem:[#allocation2 + $0xaa] sm:$0xff] }
 0x452   : > { %9820 = vmatprep.mubr.msk.f32.mxu1 %vm171_vm1, %v12423_v29  ;;  %13687 = vst [vmem:[#allocation26_spill] sm:$0xff] %v12439_v42  ;;  %v12443_v29 = vld [vmem:[#allocation2 + $0xb2] sm:$0xff] }
 0x453   : > { %13688 = vst [vmem:[#allocation27_spill] sm:$0xff] %v12443_v29 }
 0x455   : > { %9821 = vmatmul.mubr.msk.f32.gmra.mrb[10].mxu1 %vm171_vm1, %v12427_v49  ;;  %v12447_v49 = vld [vmem:[#allocation2 + $0xc2] sm:$0xff] }
 0x456   : > { %9823 = vmatprep.mubr.msk.f32.mxu1 %vm171_vm1, %v12431_v5  ;;  %13689 = vst [vmem:[#allocation29_spill] sm:$0xff] %v12447_v49  ;;  %v12451_v5 = vld [vmem:[#allocation2 + $0xca] sm:$0xff] }
 0x457   : > { %13690 = vst [vmem:[#allocation31_spill] sm:$0xff] %v12451_v5 }
 0x459   : > { %9824 = vmatmul.mubr.msk.f32.gmra.mrb[12].mxu1 %vm171_vm1, %v12435_v55  ;;  %v12455_v55 = vld [vmem:[#allocation2 + $0xda] sm:$0xff] }
 0x45a   : > { %9826 = vmatprep.mubr.msk.f32.mxu1 %vm171_vm1, %v12439_v42  ;;  %13691 = vst [vmem:[#allocation21_spill] sm:$0xff] %v12455_v55  ;;  %v12459_v42 = vld [vmem:[#allocation2 + $0xe2] sm:$0xff] }
 0x45b   : > { %13692 = vst [vmem:[#allocation23_spill] sm:$0xff] %v12459_v42 }
 0x45d   : > { %9827 = vmatmul.mubr.msk.f32.gmra.mrb[14].mxu1 %vm171_vm1, %v12443_v29  ;;  %v12463_v29 = vld [vmem:[#allocation2 + $0xf2] sm:$0xff] }
 0x45e   : > { %9829 = vmatprep.mubr.msk.f32.mxu1 %vm171_vm1, %v12447_v49  ;;  %13693 = vst [vmem:[#allocation25_spill] sm:$0xff] %v12463_v29  ;;  %v12467_v49 = vld [vmem:[#allocation2 + $0xfa] sm:$0xff] }
 0x45f   : > { %13694 = vst [vmem:[#allocation28_spill] sm:$0xff] %v12467_v49 }
 0x461   : > { %9830 = vmatmul.mubr.msk.f32.gmra.mrb[16].mxu1 %vm171_vm1, %v12451_v5  ;;  %v12471_v5 = vld [vmem:[#allocation2 + $0x10a] sm:$0xff] }
 0x462   : > { %9832 = vmatprep.mubr.msk.f32.mxu1 %vm171_vm1, %v12455_v55  ;;  %13695 = vst [vmem:[#allocation30_spill] sm:$0xff] %v12471_v5  ;;  %v12475_v55 = vld [vmem:[#allocation2 + $0x112] sm:$0xff] }
 0x463   : > { %13696 = vst [vmem:[#allocation32_spill] sm:$0xff] %v12475_v55 }
 0x465   : > { %9833 = vmatmul.mubr.msk.f32.gmra.mrb[18].mxu1 %vm171_vm1, %v12459_v42  ;;  %v12479_v42 = vld [vmem:[#allocation2 + $0x122] sm:$0xff] }
 0x466   : > { %9835 = vmatprep.mubr.msk.f32.mxu1 %vm171_vm1, %v12463_v29  ;;  %13697 = vst [vmem:[#allocation33_spill] sm:$0xff] %v12479_v42  ;;  %v12483_v29 = vld [vmem:[#allocation2 + $0x12a] sm:$0xff] }
 0x467   : > { %13698 = vst [vmem:[#allocation34_spill] sm:$0xff] %v12483_v29 }
 0x469   : > { %9836 = vmatmul.mubr.msk.f32.gmra.mrb[20].mxu1 %vm171_vm1, %v12467_v49  ;;  %v12487_v49 = vld [vmem:[#allocation2 + $0x13a] sm:$0xff] }
 0x46a   : > { %9838 = vmatprep.mubr.msk.f32.mxu1 %vm171_vm1, %v12471_v5  ;;  %13699 = vst [vmem:[#allocation35_spill] sm:$0xff] %v12487_v49  ;;  %v12491_v5 = vld [vmem:[#allocation2 + $0x142] sm:$0xff] }
 0x46d   : > { %9839 = vmatmul.mubr.msk.f32.gmra.mrb[22].mxu1 %vm171_vm1, %v12475_v55  ;;  %v12495_v55 = vld [vmem:[#allocation2 + $0x152] sm:$0xff] }
 0x46e   : > { %9841 = vmatprep.mubr.msk.f32.mxu1 %vm171_vm1, %v12479_v42  ;;  %13700 = vst [vmem:[#allocation36_spill] sm:$0xff] %v12495_v55  ;;  %v12499_v42 = vld [vmem:[#allocation2 + $0x15a] sm:$0xff] }
 0x471   : > { %9842 = vmatmul.mubr.msk.f32.gmra.mrb[24].mxu1 %vm171_vm1, %v12483_v29  ;;  %v12503_v29 = vld [vmem:[#allocation2 + $0x16a] sm:$0xff] }
 0x472   : > { %9844 = vmatprep.mubr.msk.f32.mxu1 %vm171_vm1, %v12487_v49  ;;  %13701 = vst [vmem:[#allocation37_spill] sm:$0xff] %v12503_v29  ;;  %v12507_v49 = vld [vmem:[#allocation2 + $0x172] sm:$0xff] }
 0x475   : > { %9845 = vmatmul.mubr.msk.f32.gmra.mrb[26].mxu1 %vm171_vm1, %v12491_v5 }
 0x476   : > { %9847 = vmatprep.mubr.msk.f32.mxu1 %vm171_vm1, %v12495_v55  ;;  %v8519_v55 = vld [vmem:[%s13485_s2 + $0x14] sm:$0xf] }
 0x479   : > { %9848 = vmatmul.mubr.msk.f32.gmra.mrb[28].mxu1 %vm171_vm1, %v12499_v42 }
 0x47a   : > { %9850 = vmatprep.mubr.msk.f32.mxu1 %vm171_vm1, %v12503_v29 }
 0x47d   : > { %9851 = vmatmul.mubr.msk.f32.gmra.mrb[30].mxu1 %vm171_vm1, %v12507_v49 }
 0x47e   : > { %9855 = vmatprep.mubr.msk.f32.mxu1 %vm171_vm1, %v12256_v63  ;;  %v12577_v63 = vld [vmem:[#allocation2 + $0x180] sm:$0xff] }
 0x481   : > { %9856 = vmatmul.mubr.msk.f32.vlgmr.msra.gmra.mrb[0].mxu1 %vm171_vm1, %v12264_v59  ;;  %v12581_v59 = vld [vmem:[#allocation2 + $0x188] sm:$0xff] }
 0x482   : > { %9904 = vmatpush3.msk.msra.mxu1 %vm447_vm0, %v12384_v50  ;;  %9858 = vmatprep.mubr.msk.f32.mxu1 %vm171_vm1, %v12268_v15  ;;  %v8553_v50 = vld [vmem:[%s13485_s2 + $0x18] sm:$0xf] }
 0x483   : > { %9953 = vmatprep.subr.msk.mxu1 %vm447_vm0, %v8519_v55 }
 0x485   : > { %9859 = vmatmul.mubr.msk.f32.gmra.mrb[2].mxu1 %vm171_vm1, %v12272_v40 }
 0x486   : > { %9861 = vmatprep.mubr.msk.f32.mxu1 %vm171_vm1, %v12276_v14 }
 0x489   : > { %9862 = vmatmul.mubr.msk.f32.gmra.mrb[4].mxu1 %vm171_vm1, %v12280_v18 }
 0x48a   : > { %9864 = vmatprep.mubr.msk.f32.mxu1 %vm171_vm1, %v12284_v19 }
 0x48d   : > { %9865 = vmatmul.mubr.msk.f32.gmra.mrb[6].mxu1 %vm171_vm1, %v12288_v3 }
 0x48e   : > { %9867 = vmatprep.mubr.msk.f32.mxu1 %vm171_vm1, %v12292_v38 }
 0x491   : > { %9868 = vmatmul.mubr.msk.f32.gmra.mrb[8].mxu1 %vm171_vm1, %v12296_v60 }
 0x492   : > { %9870 = vmatprep.mubr.msk.f32.mxu1 %vm171_vm1, %v12300_v24 }
 0x495   : > { %9871 = vmatmul.mubr.msk.f32.gmra.mrb[10].mxu1 %vm171_vm1, %v12304_v41 }
 0x496   : > { %9873 = vmatprep.mubr.msk.f32.mxu1 %vm171_vm1, %v12308_v62 }
 0x499   : > { %9874 = vmatmul.mubr.msk.f32.gmra.mrb[12].mxu1 %vm171_vm1, %v12312_v16 }
 0x49a   : > { %9876 = vmatprep.mubr.msk.f32.mxu1 %vm171_vm1, %v12316_v51 }
 0x49d   : > { %9877 = vmatmul.mubr.msk.f32.gmra.mrb[14].mxu1 %vm171_vm1, %v12320_v28 }
 0x49e   : > { %9879 = vmatprep.mubr.msk.f32.mxu1 %vm171_vm1, %v12324_v46 }
 0x4a1   : > { %9880 = vmatmul.mubr.msk.f32.gmra.mrb[16].mxu1 %vm171_vm1, %v12328_v61 }
 0x4a2   : > { %9882 = vmatprep.mubr.msk.f32.mxu1 %vm171_vm1, %v12332_v39 }
 0x4a5   : > { %9883 = vmatmul.mubr.msk.f32.gmra.mrb[18].mxu1 %vm171_vm1, %v12336_v25 }
 0x4a6   : > { %9885 = vmatprep.mubr.msk.f32.mxu1 %vm171_vm1, %v12340_v48 }
 0x4a9   : > { %9886 = vmatmul.mubr.msk.f32.gmra.mrb[20].mxu1 %vm171_vm1, %v12344_v22 }
 0x4aa   : > { %9888 = vmatprep.mubr.msk.f32.mxu1 %vm171_vm1, %v12348_v54 }
 0x4ad   : > { %9889 = vmatmul.mubr.msk.f32.gmra.mrb[22].mxu1 %vm171_vm1, %v12352_v1 }
 0x4ae   : > { %9891 = vmatprep.mubr.msk.f32.mxu1 %vm171_vm1, %v12356_v34 }
 0x4b1   : > { %9892 = vmatmul.mubr.msk.f32.gmra.mrb[24].mxu1 %vm171_vm1, %v12360_v36 }
 0x4b2   : > { %9894 = vmatprep.mubr.msk.f32.mxu1 %vm171_vm1, %v12364_v44 }
 0x4b5   : > { %9895 = vmatmul.mubr.msk.f32.gmra.mrb[26].mxu1 %vm171_vm1, %v12368_v45 }
 0x4b6   : > { %9897 = vmatprep.mubr.msk.f32.mxu1 %vm171_vm1, %v12372_v52 }
 0x4b9   : > { %9898 = vmatmul.mubr.msk.f32.gmra.mrb[28].mxu1 %vm171_vm1, %v12376_v56 }
 0x4ba   : > { %9900 = vmatprep.mubr.msk.f32.mxu1 %vm171_vm1, %v12577_v63 }
 0x4bd   : > { %9901 = vmatmul.mubr.msk.f32.gmra.mrb[30].mxu1 %vm171_vm1, %v12581_v59 }
 0x4be   : > { %9905 = vmatprep.mubr.msk.f32.mxu1 %vm171_vm1, %v12129_v57  ;;  %v13702_v57 = vld [vmem:[#allocation9_spill] sm:$0xff] }
 0x4c1   : > { %9906 = vmatmul.mubr.msk.f32.vlgmr.msra.gmra.mrb[0].mxu1 %vm171_vm1, %v12131_v58  ;;  %v13703_v58 = vld [vmem:[#allocation10_spill] sm:$0xff] }
 0x4c2   : > { %9954 = vmatpush3.msk.msra.mxu1 %vm447_vm0, %v8519_v55  ;;  %9908 = vmatprep.mubr.msk.f32.mxu1 %vm171_vm1, %v12137_v43  ;;  %v12650_v55 = vld [vmem:[#allocation2 + $0x181] sm:$0xff] }
 0x4c3   : > { %10003 = vmatprep.subr.msk.mxu1 %vm447_vm0, %v8553_v50  ;;  %13704 = vst [vmem:[#allocation38_spill] sm:$0xff] %v12650_v55 }
 0x4c5   : > { %9909 = vmatmul.mubr.msk.f32.gmra.mrb[2].mxu1 %vm171_vm1, %v12141_v8 }
 0x4c6   : > { %9911 = vmatprep.mubr.msk.f32.mxu1 %vm171_vm1, %v12145_v9 }
 0x4c9   : > { %9912 = vmatmul.mubr.msk.f32.gmra.mrb[4].mxu1 %vm171_vm1, %v12149_v10 }
 0x4ca   : > { %9914 = vmatprep.mubr.msk.f32.mxu1 %vm171_vm1, %v12153_v6 }
 0x4cd   : > { %9915 = vmatmul.mubr.msk.f32.gmra.mrb[6].mxu1 %vm171_vm1, %v12157_v11 }
 0x4ce   : > { %9917 = vmatprep.mubr.msk.f32.mxu1 %vm171_vm1, %v12161_v4 }
 0x4d1   : > { %9918 = vmatmul.mubr.msk.f32.gmra.mrb[8].mxu1 %vm171_vm1, %v12165_v17 }
 0x4d2   : > { %9920 = vmatprep.mubr.msk.f32.mxu1 %vm171_vm1, %v12169_v33 }
 0x4d5   : > { %9921 = vmatmul.mubr.msk.f32.gmra.mrb[10].mxu1 %vm171_vm1, %v12173_v23 }
 0x4d6   : > { %9923 = vmatprep.mubr.msk.f32.mxu1 %vm171_vm1, %v12177_v26 }
 0x4d9   : > { %9924 = vmatmul.mubr.msk.f32.gmra.mrb[12].mxu1 %vm171_vm1, %v12181_v27 }
 0x4da   : > { %9926 = vmatprep.mubr.msk.f32.mxu1 %vm171_vm1, %v12185_v37 }
 0x4dd   : > { %9927 = vmatmul.mubr.msk.f32.gmra.mrb[14].mxu1 %vm171_vm1, %v12189_v30 }
 0x4de   : > { %9929 = vmatprep.mubr.msk.f32.mxu1 %vm171_vm1, %v12193_v47 }
 0x4e1   : > { %9930 = vmatmul.mubr.msk.f32.gmra.mrb[16].mxu1 %vm171_vm1, %v12197_v0 }
 0x4e2   : > { %9932 = vmatprep.mubr.msk.f32.mxu1 %vm171_vm1, %v12201_v53 }
 0x4e5   : > { %9933 = vmatmul.mubr.msk.f32.gmra.mrb[18].mxu1 %vm171_vm1, %v12205_v35 }
 0x4e6   : > { %9935 = vmatprep.mubr.msk.f32.mxu1 %vm171_vm1, %v12209_v7 }
 0x4e9   : > { %9936 = vmatmul.mubr.msk.f32.gmra.mrb[20].mxu1 %vm171_vm1, %v12213_v13 }
 0x4ea   : > { %9938 = vmatprep.mubr.msk.f32.mxu1 %vm171_vm1, %v12217_v12 }
 0x4ed   : > { %9939 = vmatmul.mubr.msk.f32.gmra.mrb[22].mxu1 %vm171_vm1, %v12221_v21  ;;  %v13716_v21 = vld [vmem:[#allocation22_spill] sm:$0xff] }
 0x4ee   : > { %9941 = vmatprep.mubr.msk.f32.mxu1 %vm171_vm1, %v12225_v20  ;;  %v12654_v20 = vld [vmem:[#allocation2 + $0x189] sm:$0xff] }
 0x4ef   : > { %13705 = vst [vmem:[#allocation39_spill] sm:$0xff] %v12654_v20 }
 0x4f1   : > { %9942 = vmatmul.mubr.msk.f32.gmra.mrb[24].mxu1 %vm171_vm1, %v12229_v32  ;;  %v13712_v32 = vld [vmem:[#allocation17_spill] sm:$0xff] }
 0x4f2   : > { %9944 = vmatprep.mubr.msk.f32.mxu1 %vm171_vm1, %v12233_v31  ;;  %v13706_v31 = vld [vmem:[#allocation11_spill] sm:$0xff] }
 0x4f5   : > { %9945 = vmatmul.mubr.msk.f32.gmra.mrb[26].mxu1 %vm171_vm1, %v12237_v2  ;;  %v13707_v2 = vld [vmem:[#allocation12_spill] sm:$0xff] }
 0x4f6   : > { %9947 = vmatprep.mubr.msk.f32.mxu1 %vm171_vm1, %v13702_v57  ;;  %v8587_v57 = vld [vmem:[%s13485_s2 + $0x1c] sm:$0xf] }
 0x4f9   : > { %9948 = vmatmul.mubr.msk.f32.gmra.mrb[28].mxu1 %vm171_vm1, %v13703_v58  ;;  %v13708_v58 = vld [vmem:[#allocation13_spill] sm:$0xff] }
 0x4fa   : > { %9950 = vmatprep.mubr.msk.f32.mxu1 %vm171_vm1, %v12650_v55  ;;  %v13709_v55 = vld [vmem:[#allocation14_spill] sm:$0xff] }
 0x4fd   : > { %9951 = vmatmul.mubr.msk.f32.gmra.mrb[30].mxu1 %vm171_vm1, %v12654_v20  ;;  %v13710_v20 = vld [vmem:[#allocation15_spill] sm:$0xff] }
 0x4fe   : > { %9955 = vmatprep.mubr.msk.f32.mxu1 %vm171_vm1, %v13706_v31  ;;  %v13711_v31 = vld [vmem:[#allocation16_spill] sm:$0xff] }
 0x501   : > { %9956 = vmatmul.mubr.msk.f32.vlgmr.msra.gmra.mrb[0].mxu1 %vm171_vm1, %v13707_v2  ;;  %v13713_v2 = vld [vmem:[#allocation18_spill] sm:$0xff] }
 0x502   : > { %10004 = vmatpush3.msk.msra.mxu1 %vm447_vm0, %v8553_v50  ;;  %9958 = vmatprep.mubr.msk.f32.mxu1 %vm171_vm1, %v13708_v58  ;;  %v13714_v50 = vld [vmem:[#allocation19_spill] sm:$0xff]  ;;  %v13715_v58 = vld [vmem:[#allocation20_spill] sm:$0xff] }
 0x503   : > { %10053 = vmatprep.subr.msk.mxu1 %vm447_vm0, %v8587_v57 }
 0x505   : > { %9959 = vmatmul.mubr.msk.f32.gmra.mrb[2].mxu1 %vm171_vm1, %v13709_v55  ;;  %v13717_v55 = vld [vmem:[#allocation24_spill] sm:$0xff] }
 0x506   : > { %9961 = vmatprep.mubr.msk.f32.mxu1 %vm171_vm1, %v13710_v20  ;;  %v13718_v20 = vld [vmem:[#allocation26_spill] sm:$0xff] }
 0x509   : > { %9962 = vmatmul.mubr.msk.f32.gmra.mrb[4].mxu1 %vm171_vm1, %v13711_v31  ;;  %v13719_v31 = vld [vmem:[#allocation27_spill] sm:$0xff] }
 0x50a   : > { %9964 = vmatprep.mubr.msk.f32.mxu1 %vm171_vm1, %v13712_v32  ;;  %v13720_v32 = vld [vmem:[#allocation29_spill] sm:$0xff] }
 0x50d   : > { %9965 = vmatmul.mubr.msk.f32.gmra.mrb[6].mxu1 %vm171_vm1, %v13713_v2  ;;  %v13721_v2 = vld [vmem:[#allocation31_spill] sm:$0xff] }
 0x50e   : > { %9967 = vmatprep.mubr.msk.f32.mxu1 %vm171_vm1, %v13714_v50  ;;  %v13722_v50 = vld [vmem:[#allocation21_spill] sm:$0xff] }
 0x511   : > { %9968 = vmatmul.mubr.msk.f32.gmra.mrb[8].mxu1 %vm171_vm1, %v13715_v58  ;;  %v13723_v58 = vld [vmem:[#allocation23_spill] sm:$0xff] }
 0x512   : > { %9970 = vmatprep.mubr.msk.f32.mxu1 %vm171_vm1, %v13716_v21  ;;  %v13724_v21 = vld [vmem:[#allocation25_spill] sm:$0xff] }
 0x515   : > { %9971 = vmatmul.mubr.msk.f32.gmra.mrb[10].mxu1 %vm171_vm1, %v13717_v55  ;;  %v13725_v55 = vld [vmem:[#allocation28_spill] sm:$0xff] }
 0x516   : > { %9973 = vmatprep.mubr.msk.f32.mxu1 %vm171_vm1, %v13718_v20  ;;  %v13726_v20 = vld [vmem:[#allocation30_spill] sm:$0xff] }
 0x519   : > { %9974 = vmatmul.mubr.msk.f32.gmra.mrb[12].mxu1 %vm171_vm1, %v13719_v31  ;;  %v13727_v31 = vld [vmem:[#allocation32_spill] sm:$0xff] }
 0x51a   : > { %9976 = vmatprep.mubr.msk.f32.mxu1 %vm171_vm1, %v13720_v32  ;;  %v13728_v32 = vld [vmem:[#allocation33_spill] sm:$0xff] }
 0x51d   : > { %9977 = vmatmul.mubr.msk.f32.gmra.mrb[14].mxu1 %vm171_vm1, %v13721_v2  ;;  %v13729_v2 = vld [vmem:[#allocation34_spill] sm:$0xff] }
 0x51e   : > { %9979 = vmatprep.mubr.msk.f32.mxu1 %vm171_vm1, %v13722_v50  ;;  %v13730_v50 = vld [vmem:[#allocation35_spill] sm:$0xff] }
 0x521   : > { %9980 = vmatmul.mubr.msk.f32.gmra.mrb[16].mxu1 %vm171_vm1, %v13723_v58 }
 0x522   : > { %9982 = vmatprep.mubr.msk.f32.mxu1 %vm171_vm1, %v13724_v21  ;;  %v13731_v21 = vld [vmem:[#allocation36_spill] sm:$0xff] }
 0x525   : > { %9983 = vmatmul.mubr.msk.f32.gmra.mrb[18].mxu1 %vm171_vm1, %v13725_v55 }
 0x526   : > { %9985 = vmatprep.mubr.msk.f32.mxu1 %vm171_vm1, %v13726_v20 }
 0x529   : > { %9986 = vmatmul.mubr.msk.f32.gmra.mrb[20].mxu1 %vm171_vm1, %v13727_v31 }
 0x52a   : > { %9988 = vmatprep.mubr.msk.f32.mxu1 %vm171_vm1, %v13728_v32  ;;  %v12723_v32 = vld [vmem:[#allocation2 + $0x182] sm:$0xff] }
 0x52d   : > { %9989 = vmatmul.mubr.msk.f32.gmra.mrb[22].mxu1 %vm171_vm1, %v13729_v2 }
 0x52e   : > { %9991 = vmatprep.mubr.msk.f32.mxu1 %vm171_vm1, %v13730_v50  ;;  %v12727_v50 = vld [vmem:[#allocation2 + $0x18a] sm:$0xff] }
 0x531   : > { %9992 = vmatmul.mubr.msk.f32.gmra.mrb[24].mxu1 %vm171_vm1, %v12491_v5 }
 0x532   : > { %9994 = vmatprep.mubr.msk.f32.mxu1 %vm171_vm1, %v13731_v21 }
 0x535   : > { %9995 = vmatmul.mubr.msk.f32.gmra.mrb[26].mxu1 %vm171_vm1, %v12499_v42 }
 0x536   : > { %9997 = vmatprep.mubr.msk.f32.mxu1 %vm171_vm1, %v12503_v29  ;;  %v8621_v29 = vld [vmem:[%s13485_s2 + $0x20] sm:$0xf] }
 0x539   : > { %9998 = vmatmul.mubr.msk.f32.gmra.mrb[28].mxu1 %vm171_vm1, %v12507_v49 }
 0x53a   : > { %10000 = vmatprep.mubr.msk.f32.mxu1 %vm171_vm1, %v12723_v32 }
 0x53d   : > { %10001 = vmatmul.mubr.msk.f32.gmra.mrb[30].mxu1 %vm171_vm1, %v12727_v50 }
 0x53e   : > { %10005 = vmatprep.mubr.msk.f32.mxu1 %vm171_vm1, %v12268_v15  ;;  %v6409_v15 = vld [vmem:[#allocation2 + $0x198] sm:$0xff] }
 0x541   : > { %10006 = vmatmul.mubr.msk.f32.vlgmr.msra.gmra.mrb[0].mxu1 %vm171_vm1, %v12272_v40  ;;  %v6410_v40 = vld [vmem:[#allocation2 + $0x1a0] sm:$0xff] }
 0x542   : > { %10054 = vmatpush3.msk.msra.mxu1 %vm447_vm0, %v8587_v57  ;;  %10008 = vmatprep.mubr.msk.f32.mxu1 %vm171_vm1, %v12276_v14  ;;  %v13751_v14 = vld [vmem:[#allocation26_spill] sm:$0xff] }
 0x543   : > { %10103 = vmatprep.subr.msk.mxu1 %vm447_vm0, %v8621_v29 }
 0x545   : > { %10009 = vmatmul.mubr.msk.f32.gmra.mrb[2].mxu1 %vm171_vm1, %v12280_v18  ;;  %v13752_v18 = vld [vmem:[#allocation27_spill] sm:$0xff] }
 0x546   : > { %10011 = vmatprep.mubr.msk.f32.mxu1 %vm171_vm1, %v12284_v19  ;;  %v13753_v19 = vld [vmem:[#allocation29_spill] sm:$0xff] }
 0x549   : > { %10012 = vmatmul.mubr.msk.f32.gmra.mrb[4].mxu1 %vm171_vm1, %v12288_v3  ;;  %v13754_v3 = vld [vmem:[#allocation31_spill] sm:$0xff] }
 0x54a   : > { %10014 = vmatprep.mubr.msk.f32.mxu1 %vm171_vm1, %v12292_v38  ;;  %v13755_v38 = vld [vmem:[#allocation21_spill] sm:$0xff] }
 0x54d   : > { %10015 = vmatmul.mubr.msk.f32.gmra.mrb[6].mxu1 %vm171_vm1, %v12296_v60  ;;  %v13756_v60 = vld [vmem:[#allocation25_spill] sm:$0xff] }
 0x54e   : > { %10017 = vmatprep.mubr.msk.f32.mxu1 %vm171_vm1, %v12300_v24  ;;  %v13757_v24 = vld [vmem:[#allocation33_spill] sm:$0xff] }
 0x551   : > { %10018 = vmatmul.mubr.msk.f32.gmra.mrb[8].mxu1 %vm171_vm1, %v12304_v41  ;;  %v13758_v41 = vld [vmem:[#allocation35_spill] sm:$0xff] }
 0x552   : > { %10020 = vmatprep.mubr.msk.f32.mxu1 %vm171_vm1, %v12308_v62  ;;  %v7189_v62 = vld [vmem:[#allocation2 + $0x19a] sm:$0xff] }
 0x555   : > { %10021 = vmatmul.mubr.msk.f32.gmra.mrb[10].mxu1 %vm171_vm1, %v12312_v16 }
 0x556   : > { %10023 = vmatprep.mubr.msk.f32.mxu1 %vm171_vm1, %v12316_v51 }
 0x559   : > { %10024 = vmatmul.mubr.msk.f32.gmra.mrb[12].mxu1 %vm171_vm1, %v12320_v28 }
 0x55a   : > { %10026 = vmatprep.mubr.msk.f32.mxu1 %vm171_vm1, %v12324_v46 }
 0x55d   : > { %10027 = vmatmul.mubr.msk.f32.gmra.mrb[14].mxu1 %vm171_vm1, %v12328_v61 }
 0x55e   : > { %10029 = vmatprep.mubr.msk.f32.mxu1 %vm171_vm1, %v12332_v39 }
 0x561   : > { %10030 = vmatmul.mubr.msk.f32.gmra.mrb[16].mxu1 %vm171_vm1, %v12336_v25 }
 0x562   : > { %10032 = vmatprep.mubr.msk.f32.mxu1 %vm171_vm1, %v12340_v48 }
 0x565   : > { %10033 = vmatmul.mubr.msk.f32.gmra.mrb[18].mxu1 %vm171_vm1, %v12344_v22 }
 0x566   : > { %10035 = vmatprep.mubr.msk.f32.mxu1 %vm171_vm1, %v12348_v54 }
 0x569   : > { %10036 = vmatmul.mubr.msk.f32.gmra.mrb[20].mxu1 %vm171_vm1, %v12352_v1 }
 0x56a   : > { %10038 = vmatprep.mubr.msk.f32.mxu1 %vm171_vm1, %v12356_v34 }
 0x56d   : > { %10039 = vmatmul.mubr.msk.f32.gmra.mrb[22].mxu1 %vm171_vm1, %v12360_v36 }
 0x56e   : > { %10041 = vmatprep.mubr.msk.f32.mxu1 %vm171_vm1, %v12364_v44 }
 0x571   : > { %10042 = vmatmul.mubr.msk.f32.gmra.mrb[24].mxu1 %vm171_vm1, %v12368_v45 }
 0x572   : > { %10044 = vmatprep.mubr.msk.f32.mxu1 %vm171_vm1, %v12372_v52 }
 0x575   : > { %10045 = vmatmul.mubr.msk.f32.gmra.mrb[26].mxu1 %vm171_vm1, %v12376_v56 }
 0x576   : > { %10047 = vmatprep.mubr.msk.f32.mxu1 %vm171_vm1, %v12577_v63 }
 0x579   : > { %10048 = vmatmul.mubr.msk.f32.gmra.mrb[28].mxu1 %vm171_vm1, %v12581_v59 }
 0x57a   : > { %10050 = vmatprep.mubr.msk.f32.mxu1 %vm171_vm1, %v6409_v15 }
 0x57d   : > { %10051 = vmatmul.mubr.msk.f32.gmra.mrb[30].mxu1 %vm171_vm1, %v6410_v40 }
 0x57e   : > { %10055 = vmatprep.mubr.msk.f32.mxu1 %vm171_vm1, %v12137_v43  ;;  %v13732_v43 = vld [vmem:[#allocation4_spill] sm:$0xff] }
 0x581   : > { %10056 = vmatmul.mubr.msk.f32.vlgmr.msra.gmra.mrb[0].mxu1 %vm171_vm1, %v12141_v8  ;;  %v13733_v8 = vld [vmem:[#allocation5_spill] sm:$0xff] }
 0x582   : > { %10104 = vmatpush3.msk.msra.mxu1 %vm447_vm0, %v8621_v29  ;;  %10058 = vmatprep.mubr.msk.f32.mxu1 %vm171_vm1, %v12145_v9  ;;  %v13734_v9 = vld [vmem:[#allocation6_spill] sm:$0xff] }
 0x585   : > { %10059 = vmatmul.mubr.msk.f32.gmra.mrb[2].mxu1 %vm171_vm1, %v12149_v10  ;;  %v13735_v10 = vld [vmem:[#allocation7_spill] sm:$0xff] }
 0x586   : > { %10061 = vmatprep.mubr.msk.f32.mxu1 %vm171_vm1, %v12153_v6  ;;  %v13736_v6 = vld [vmem:[#allocation8_spill] sm:$0xff] }
 0x589   : > { %10062 = vmatmul.mubr.msk.f32.gmra.mrb[4].mxu1 %vm171_vm1, %v12157_v11  ;;  %v13737_v11 = vld [vmem:[#allocation9_spill] sm:$0xff] }
 0x58a   : > { %10064 = vmatprep.mubr.msk.f32.mxu1 %vm171_vm1, %v12161_v4  ;;  %v13738_v4 = vld [vmem:[#allocation10_spill] sm:$0xff] }
 0x58d   : > { %10065 = vmatmul.mubr.msk.f32.gmra.mrb[6].mxu1 %vm171_vm1, %v12165_v17  ;;  %v13739_v17 = vld [vmem:[#allocation38_spill] sm:$0xff] }
 0x58e   : > { %10067 = vmatprep.mubr.msk.f32.mxu1 %vm171_vm1, %v12169_v33  ;;  %v6799_v33 = vld [vmem:[#allocation2 + $0x199] sm:$0xff] }
 0x591   : > { %10068 = vmatmul.mubr.msk.f32.gmra.mrb[8].mxu1 %vm171_vm1, %v12173_v23  ;;  %v13740_v23 = vld [vmem:[#allocation39_spill] sm:$0xff] }
 0x592   : > { %10070 = vmatprep.mubr.msk.f32.mxu1 %vm171_vm1, %v12177_v26  ;;  %v6800_v26 = vld [vmem:[#allocation2 + $0x1a1] sm:$0xff] }
 0x595   : > { %10071 = vmatmul.mubr.msk.f32.gmra.mrb[10].mxu1 %vm171_vm1, %v12181_v27  ;;  %v13741_v27 = vld [vmem:[#allocation13_spill] sm:$0xff] }
 0x596   : > { %10073 = vmatprep.mubr.msk.f32.mxu1 %vm171_vm1, %v12185_v37  ;;  %v13742_v37 = vld [vmem:[#allocation14_spill] sm:$0xff] }
 0x599   : > { %10074 = vmatmul.mubr.msk.f32.gmra.mrb[12].mxu1 %vm171_vm1, %v12189_v30  ;;  %v13743_v30 = vld [vmem:[#allocation15_spill] sm:$0xff] }
 0x59a   : > { %10076 = vmatprep.mubr.msk.f32.mxu1 %vm171_vm1, %v12193_v47  ;;  %v13744_v47 = vld [vmem:[#allocation16_spill] sm:$0xff] }
 0x59d   : > { %10077 = vmatmul.mubr.msk.f32.gmra.mrb[14].mxu1 %vm171_vm1, %v12197_v0  ;;  %v13745_v0 = vld [vmem:[#allocation17_spill] sm:$0xff] }
 0x59e   : > { %10079 = vmatprep.mubr.msk.f32.mxu1 %vm171_vm1, %v12201_v53  ;;  %v13746_v53 = vld [vmem:[#allocation18_spill] sm:$0xff] }
 0x5a1   : > { %10080 = vmatmul.mubr.msk.f32.gmra.mrb[16].mxu1 %vm171_vm1, %v12205_v35  ;;  %v13747_v35 = vld [vmem:[#allocation19_spill] sm:$0xff] }
 0x5a2   : > { %10082 = vmatprep.mubr.msk.f32.mxu1 %vm171_vm1, %v12209_v7  ;;  %v13748_v7 = vld [vmem:[#allocation20_spill] sm:$0xff] }
 0x5a5   : > { %10083 = vmatmul.mubr.msk.f32.gmra.mrb[18].mxu1 %vm171_vm1, %v12213_v13  ;;  %v13749_v13 = vld [vmem:[#allocation22_spill] sm:$0xff] }
 0x5a6   : > { %10085 = vmatprep.mubr.msk.f32.mxu1 %vm171_vm1, %v12217_v12  ;;  %v13750_v12 = vld [vmem:[#allocation24_spill] sm:$0xff] }
 0x5a9   : > { %10086 = vmatmul.mubr.msk.f32.gmra.mrb[20].mxu1 %vm171_vm1, %v13732_v43 }
 0x5aa   : > { %10088 = vmatprep.mubr.msk.f32.mxu1 %vm171_vm1, %v13733_v8 }
 0x5ad   : > { %10089 = vmatmul.mubr.msk.f32.gmra.mrb[22].mxu1 %vm171_vm1, %v13734_v9 }
 0x5ae   : > { %10091 = vmatprep.mubr.msk.f32.mxu1 %vm171_vm1, %v13735_v10 }
 0x5b1   : > { %10092 = vmatmul.mubr.msk.f32.gmra.mrb[24].mxu1 %vm171_vm1, %v13736_v6 }
 0x5b2   : > { %10094 = vmatprep.mubr.msk.f32.mxu1 %vm171_vm1, %v13737_v11 }
 0x5b5   : > { %10095 = vmatmul.mubr.msk.f32.gmra.mrb[26].mxu1 %vm171_vm1, %v13738_v4 }
 0x5b6   : > { %10097 = vmatprep.mubr.msk.f32.mxu1 %vm171_vm1, %v13739_v17 }
 0x5b9   : > { %10098 = vmatmul.mubr.msk.f32.gmra.mrb[28].mxu1 %vm171_vm1, %v13740_v23 }
 0x5ba   : > { %10100 = vmatprep.mubr.msk.f32.mxu1 %vm171_vm1, %v6799_v33 }
 0x5bd   : > { %10101 = vmatmul.mubr.msk.f32.gmra.mrb[30].mxu1 %vm171_vm1, %v6800_v26 }
 0x5be   : > { %10105 = vmatprep.mubr.msk.f32.mxu1 %vm171_vm1, %v13741_v27 }
 0x5c1   : > { %10106 = vmatmul.mubr.msk.f32.vlgmr.msra.gmra.mrb[0].mxu1 %vm171_vm1, %v13742_v37 }
 0x5c2   : > { %10108 = vmatprep.mubr.msk.f32.mxu1 %vm171_vm1, %v13743_v30 }
 0x5c5   : > { %10109 = vmatmul.mubr.msk.f32.gmra.mrb[2].mxu1 %vm171_vm1, %v13744_v47 }
 0x5c6   : > { %10111 = vmatprep.mubr.msk.f32.mxu1 %vm171_vm1, %v13745_v0 }
 0x5c9   : > { %10112 = vmatmul.mubr.msk.f32.gmra.mrb[4].mxu1 %vm171_vm1, %v13746_v53 }
 0x5ca   : > { %10114 = vmatprep.mubr.msk.f32.mxu1 %vm171_vm1, %v13747_v35 }
 0x5cd   : > { %10115 = vmatmul.mubr.msk.f32.gmra.mrb[6].mxu1 %vm171_vm1, %v13748_v7 }
 0x5ce   : > { %10117 = vmatprep.mubr.msk.f32.mxu1 %vm171_vm1, %v13749_v13 }
 0x5d1   : > { %10118 = vmatmul.mubr.msk.f32.gmra.mrb[8].mxu1 %vm171_vm1, %v13750_v12 }
 0x5d2   : > { %10120 = vmatprep.mubr.msk.f32.mxu1 %vm171_vm1, %v13751_v14 }
 0x5d5   : > { %10121 = vmatmul.mubr.msk.f32.gmra.mrb[10].mxu1 %vm171_vm1, %v13752_v18 }
 0x5d6   : > { %10123 = vmatprep.mubr.msk.f32.mxu1 %vm171_vm1, %v13753_v19 }
 0x5d9   : > { %10124 = vmatmul.mubr.msk.f32.gmra.mrb[12].mxu1 %vm171_vm1, %v13754_v3 }
 0x5da   : > { %10126 = vmatprep.mubr.msk.f32.mxu1 %vm171_vm1, %v13755_v38 }
 0x5dd   : > { %10127 = vmatmul.mubr.msk.f32.gmra.mrb[14].mxu1 %vm171_vm1, %v13723_v58 }
 0x5de   : > { %10129 = vmatprep.mubr.msk.f32.mxu1 %vm171_vm1, %v13756_v60 }
 0x5e1   : > { %10130 = vmatmul.mubr.msk.f32.gmra.mrb[16].mxu1 %vm171_vm1, %v13725_v55 }
 0x5e2   : > { %10132 = vmatprep.mubr.msk.f32.mxu1 %vm171_vm1, %v13726_v20  ;;  %v13759_v20 = vld [vmem:[#allocation37_spill] sm:$0xff] }
 0x5e5   : > { %10133 = vmatmul.mubr.msk.f32.gmra.mrb[18].mxu1 %vm171_vm1, %v13727_v31 }
 0x5e6   : > { %10135 = vmatprep.mubr.msk.f32.mxu1 %vm171_vm1, %v13757_v24 }
 0x5e9   : > { %10136 = vmatmul.mubr.msk.f32.gmra.mrb[20].mxu1 %vm171_vm1, %v13729_v2 }
 0x5ea   : > { %10138 = vmatprep.mubr.msk.f32.mxu1 %vm171_vm1, %v13758_v41 }
 0x5ed   : > { %10139 = vmatmul.mubr.msk.f32.gmra.mrb[22].mxu1 %vm171_vm1, %v12491_v5  ;;  %v7190_v5 = vld [vmem:[#allocation2 + $0x1a2] sm:$0xff] }
 0x5ee   : > { %10141 = vmatprep.mubr.msk.f32.mxu1 %vm171_vm1, %v13731_v21 }
 0x5f1   : > { %10142 = vmatmul.mubr.msk.f32.gmra.mrb[24].mxu1 %vm171_vm1, %v12499_v42 }
 0x5f2   : > { %10144 = vmatprep.mubr.msk.f32.mxu1 %vm171_vm1, %v13759_v20 }
 0x5f5   : > { %10145 = vmatmul.mubr.msk.f32.gmra.mrb[26].mxu1 %vm171_vm1, %v12507_v49 }
 0x5f6   : > { %10147 = vmatprep.mubr.msk.f32.mxu1 %vm171_vm1, %v12723_v32 }
 0x5f9   : > { %10148 = vmatmul.mubr.msk.f32.gmra.mrb[28].mxu1 %vm171_vm1, %v12727_v50 }
 0x5fa   : > { %10150 = vmatprep.mubr.msk.f32.mxu1 %vm171_vm1, %v7189_v62 }
 0x5fd   : > { %10151 = vmatmul.mubr.msk.f32.gmra.mrb[30].mxu1 %vm171_vm1, %v7190_v5 }
 0x694   : > { %v10107_v21 = vpop.f32.mrb[0].mxu1 }
 0x695   : > { %7550 = vst.msk [vmem:[#allocation3 + $0x8] sm:$0xff] %vm171_vm1, %v10107_v21  ;;  %v7358_v42 = vpop.f32.mrb[1].mxu1 }
 0x696   : > { %7549 = vst.msk [vmem:[#allocation3] sm:$0xff] %vm171_vm1, %v7358_v42 }
 0x698   : > { %v10110_v16 = vpop.f32.mrb[2].mxu1 }
 0x699   : > { %7552 = vst.msk [vmem:[#allocation3 + $0x18] sm:$0xff] %vm171_vm1, %v10110_v16  ;;  %v7368_v51 = vpop.f32.mrb[3].mxu1 }
 0x69a   : > { %7551 = vst.msk [vmem:[#allocation3 + $0x10] sm:$0xff] %vm171_vm1, %v7368_v51 }
 0x69c   : > { %v12927_v32 = vld [vmem:[#allocation3 + $0x8] sm:$0xff]  ;;  %v10113_v28 = vpop.f32.mrb[4].mxu1 }
 0x69d   : > { %v12929_v46 = vld [vmem:[#allocation3] sm:$0xff]  ;;  %7554 = vst.msk [vmem:[#allocation3 + $0x28] sm:$0xff] %vm171_vm1, %v10113_v28  ;;  %v7378_v61 = vpop.f32.mrb[5].mxu1  ;;  %v7614_v39 = vsel %vm171_vm1, %v12927_v32, 0.0 }
 0x69e   : > { %v7613_v25 = vsel %vm171_vm1, %v12929_v46, 0.0  ;;  %7553 = vst.msk [vmem:[#allocation3 + $0x20] sm:$0xff] %vm171_vm1, %v7378_v61 }
 0x69f   : > { %v7615_v22 = vadd.f32 %v7614_v39, %v7613_v25 }
 0x6a0   : > { %v10116_v48 = vpop.f32.mrb[6].mxu1  ;;  %v12937_v54 = vld [vmem:[#allocation3 + $0x18] sm:$0xff] }
 0x6a1   : > { %v12939_v1 = vld [vmem:[#allocation3 + $0x10] sm:$0xff]  ;;  %7556 = vst.msk [vmem:[#allocation3 + $0x38] sm:$0xff] %vm171_vm1, %v10116_v48  ;;  %v7388_v34 = vpop.f32.mrb[7].mxu1  ;;  %v7618_v45 = vsel %vm171_vm1, %v12937_v54, 0.0 }
 0x6a2   : > { %v7616_v36 = vsel %vm171_vm1, %v12939_v1, 0.0  ;;  %7555 = vst.msk [vmem:[#allocation3 + $0x30] sm:$0xff] %vm171_vm1, %v7388_v34 }
 0x6a3   : > { %v7617_v44 = vadd.f32 %v7616_v36, %v7615_v22 }
 0x6a4   : > { %v10119_v52 = vpop.f32.mrb[8].mxu1  ;;  %v12947_v56 = vld [vmem:[#allocation3 + $0x28] sm:$0xff] }
 0x6a5   : > { %v12949_v29 = vld [vmem:[#allocation3 + $0x20] sm:$0xff]  ;;  %v7619_v49 = vadd.f32 %v7618_v45, %v7617_v44  ;;  %7558 = vst.msk [vmem:[#allocation3 + $0x48] sm:$0xff] %vm171_vm1, %v10119_v52  ;;  %v7398_v63 = vpop.f32.mrb[9].mxu1  ;;  %v7622_v58 = vsel %vm171_vm1, %v12947_v56, 0.0 }
 0x6a6   : > { %v7620_v59 = vsel %vm171_vm1, %v12949_v29, 0.0  ;;  %7557 = vst.msk [vmem:[#allocation3 + $0x40] sm:$0xff] %vm171_vm1, %v7398_v63 }
 0x6a7   : > { %v7621_v57 = vadd.f32 %v7620_v59, %v7619_v49 }
 0x6a8   : > { %v10122_v55 = vpop.f32.mrb[10].mxu1  ;;  %v12957_v31 = vld [vmem:[#allocation3 + $0x38] sm:$0xff] }
 0x6a9   : > { %v12959_v2 = vld [vmem:[#allocation3 + $0x30] sm:$0xff]  ;;  %v7623_v50 = vadd.f32 %v7622_v58, %v7621_v57  ;;  %7560 = vst.msk [vmem:[#allocation3 + $0x58] sm:$0xff] %vm171_vm1, %v10122_v55  ;;  %v7408_v15 = vpop.f32.mrb[11].mxu1  ;;  %v7626_v8 = vsel %vm171_vm1, %v12957_v31, 0.0 }
 0x6aa   : > { %v7624_v40 = vsel %vm171_vm1, %v12959_v2, 0.0  ;;  %7559 = vst.msk [vmem:[#allocation3 + $0x50] sm:$0xff] %vm171_vm1, %v7408_v15 }
 0x6ab   : > { %v7625_v43 = vadd.f32 %v7624_v40, %v7623_v50 }
 0x6ac   : > { %v10125_v9 = vpop.f32.mrb[12].mxu1  ;;  %v12967_v10 = vld [vmem:[#allocation3 + $0x48] sm:$0xff] }
 0x6ad   : > { %v12969_v6 = vld [vmem:[#allocation3 + $0x40] sm:$0xff]  ;;  %v7627_v11 = vadd.f32 %v7626_v8, %v7625_v43  ;;  %7562 = vst.msk [vmem:[#allocation3 + $0x68] sm:$0xff] %vm171_vm1, %v10125_v9  ;;  %v7418_v4 = vpop.f32.mrb[13].mxu1  ;;  %v7630_v23 = vsel %vm171_vm1, %v12967_v10, 0.0 }
 0x6ae   : > { %v7628_v17 = vsel %vm171_vm1, %v12969_v6, 0.0  ;;  %7561 = vst.msk [vmem:[#allocation3 + $0x60] sm:$0xff] %vm171_vm1, %v7418_v4 }
 0x6af   : > { %v7629_v33 = vadd.f32 %v7628_v17, %v7627_v11 }
 0x6b0   : > { %v10128_v26 = vpop.f32.mrb[14].mxu1  ;;  %v12977_v27 = vld [vmem:[#allocation3 + $0x58] sm:$0xff] }
 0x6b1   : > { %v12979_v37 = vld [vmem:[#allocation3 + $0x50] sm:$0xff]  ;;  %v7631_v30 = vadd.f32 %v7630_v23, %v7629_v33  ;;  %7564 = vst.msk [vmem:[#allocation3 + $0x78] sm:$0xff] %vm171_vm1, %v10128_v26  ;;  %v7428_v47 = vpop.f32.mrb[15].mxu1  ;;  %v7634_v35 = vsel %vm171_vm1, %v12977_v27, 0.0 }
 0x6b2   : > { %v7632_v0 = vsel %vm171_vm1, %v12979_v37, 0.0  ;;  %7563 = vst.msk [vmem:[#allocation3 + $0x70] sm:$0xff] %vm171_vm1, %v7428_v47 }
 0x6b3   : > { %v7633_v53 = vadd.f32 %v7632_v0, %v7631_v30 }
 0x6b4   : > { %v10131_v7 = vpop.f32.mrb[16].mxu1  ;;  %v12987_v13 = vld [vmem:[#allocation3 + $0x68] sm:$0xff] }
 0x6b5   : > { %v12989_v12 = vld [vmem:[#allocation3 + $0x60] sm:$0xff]  ;;  %v7635_v14 = vadd.f32 %v7634_v35, %v7633_v53  ;;  %7566 = vst.msk [vmem:[#allocation3 + $0x88] sm:$0xff] %vm171_vm1, %v10131_v7  ;;  %v7438_v18 = vpop.f32.mrb[17].mxu1  ;;  %v7638_v38 = vsel %vm171_vm1, %v12987_v13, 0.0 }
 0x6b6   : > { %v7636_v19 = vsel %vm171_vm1, %v12989_v12, 0.0  ;;  %7565 = vst.msk [vmem:[#allocation3 + $0x80] sm:$0xff] %vm171_vm1, %v7438_v18 }
 0x6b7   : > { %v7637_v3 = vadd.f32 %v7636_v19, %v7635_v14 }
 0x6b8   : > { %v10134_v60 = vpop.f32.mrb[18].mxu1  ;;  %v12997_v24 = vld [vmem:[#allocation3 + $0x78] sm:$0xff] }
 0x6b9   : > { %v12999_v41 = vld [vmem:[#allocation3 + $0x70] sm:$0xff]  ;;  %v7639_v20 = vadd.f32 %v7638_v38, %v7637_v3  ;;  %7568 = vst.msk [vmem:[#allocation3 + $0x98] sm:$0xff] %vm171_vm1, %v10134_v60  ;;  %v7448_v62 = vpop.f32.mrb[19].mxu1  ;;  %v7642_v42 = vsel %vm171_vm1, %v12997_v24, 0.0 }
 0x6ba   : > { %v7640_v5 = vsel %vm171_vm1, %v12999_v41, 0.0  ;;  %7567 = vst.msk [vmem:[#allocation3 + $0x90] sm:$0xff] %vm171_vm1, %v7448_v62 }
 0x6bb   : > { %v7641_v21 = vadd.f32 %v7640_v5, %v7639_v20 }
 0x6bc   : > { %v10137_v16 = vpop.f32.mrb[20].mxu1  ;;  %v13007_v51 = vld [vmem:[#allocation3 + $0x88] sm:$0xff] }
 0x6bd   : > { %v13009_v28 = vld [vmem:[#allocation3 + $0x80] sm:$0xff]  ;;  %v7643_v61 = vadd.f32 %v7642_v42, %v7641_v21  ;;  %7570 = vst.msk [vmem:[#allocation3 + $0xa8] sm:$0xff] %vm171_vm1, %v10137_v16  ;;  %v7458_v39 = vpop.f32.mrb[21].mxu1  ;;  %v7646_v22 = vsel %vm171_vm1, %v13007_v51, 0.0 }
 0x6be   : > { %v7644_v25 = vsel %vm171_vm1, %v13009_v28, 0.0  ;;  %7569 = vst.msk [vmem:[#allocation3 + $0xa0] sm:$0xff] %vm171_vm1, %v7458_v39 }
 0x6bf   : > { %v7645_v48 = vadd.f32 %v7644_v25, %v7643_v61 }
 0x6c0   : > { %v10140_v34 = vpop.f32.mrb[22].mxu1  ;;  %v13017_v36 = vld [vmem:[#allocation3 + $0x98] sm:$0xff] }
 0x6c1   : > { %v13019_v44 = vld [vmem:[#allocation3 + $0x90] sm:$0xff]  ;;  %v7647_v45 = vadd.f32 %v7646_v22, %v7645_v48  ;;  %7572 = vst.msk [vmem:[#allocation3 + $0xb8] sm:$0xff] %vm171_vm1, %v10140_v34  ;;  %v7468_v52 = vpop.f32.mrb[23].mxu1  ;;  %v7650_v59 = vsel %vm171_vm1, %v13017_v36, 0.0 }
 0x6c2   : > { %v7648_v49 = vsel %vm171_vm1, %v13019_v44, 0.0  ;;  %7571 = vst.msk [vmem:[#allocation3 + $0xb0] sm:$0xff] %vm171_vm1, %v7468_v52 }
 0x6c3   : > { %v7649_v63 = vadd.f32 %v7648_v49, %v7647_v45 }
 0x6c4   : > { %v10143_v57 = vpop.f32.mrb[24].mxu1  ;;  %v13027_v58 = vld [vmem:[#allocation3 + $0xa8] sm:$0xff] }
 0x6c5   : > { %v13029_v55 = vld [vmem:[#allocation3 + $0xa0] sm:$0xff]  ;;  %v7651_v50 = vadd.f32 %v7650_v59, %v7649_v63  ;;  %7574 = vst.msk [vmem:[#allocation3 + $0xc8] sm:$0xff] %vm171_vm1, %v10143_v57  ;;  %v7478_v15 = vpop.f32.mrb[25].mxu1  ;;  %v7654_v8 = vsel %vm171_vm1, %v13027_v58, 0.0 }
 0x6c6   : > { %v7652_v40 = vsel %vm171_vm1, %v13029_v55, 0.0  ;;  %7573 = vst.msk [vmem:[#allocation3 + $0xc0] sm:$0xff] %vm171_vm1, %v7478_v15 }
 0x6c7   : > { %v7653_v43 = vadd.f32 %v7652_v40, %v7651_v50 }
 0x6c8   : > { %v10146_v9 = vpop.f32.mrb[26].mxu1  ;;  %v13037_v11 = vld [vmem:[#allocation3 + $0xb8] sm:$0xff] }
 0x6c9   : > { %v13039_v4 = vld [vmem:[#allocation3 + $0xb0] sm:$0xff]  ;;  %v7655_v17 = vadd.f32 %v7654_v8, %v7653_v43  ;;  %7576 = vst.msk [vmem:[#allocation3 + $0xd8] sm:$0xff] %vm171_vm1, %v10146_v9  ;;  %v7488_v33 = vpop.f32.mrb[27].mxu1  ;;  %v7658_v30 = vsel %vm171_vm1, %v13037_v11, 0.0 }
 0x6ca   : > { %v7656_v23 = vsel %vm171_vm1, %v13039_v4, 0.0  ;;  %7575 = vst.msk [vmem:[#allocation3 + $0xd0] sm:$0xff] %vm171_vm1, %v7488_v33 }
 0x6cb   : > { %v7657_v26 = vadd.f32 %v7656_v23, %v7655_v17 }
 0x6cc   : > { %v10149_v47 = vpop.f32.mrb[28].mxu1  ;;  %v13047_v0 = vld [vmem:[#allocation3 + $0xc8] sm:$0xff] }
 0x6cd   : > { %v13049_v53 = vld [vmem:[#allocation3 + $0xc0] sm:$0xff]  ;;  %v7659_v35 = vadd.f32 %v7658_v30, %v7657_v26  ;;  %7578 = vst.msk [vmem:[#allocation3 + $0xe8] sm:$0xff] %vm171_vm1, %v10149_v47  ;;  %v7498_v7 = vpop.f32.mrb[29].mxu1  ;;  %v7662_v19 = vsel %vm171_vm1, %v13047_v0, 0.0 }
 0x6ce   : > { %v7660_v14 = vsel %vm171_vm1, %v13049_v53, 0.0  ;;  %7577 = vst.msk [vmem:[#allocation3 + $0xe0] sm:$0xff] %vm171_vm1, %v7498_v7 }
 0x6cf   : > { %v7661_v18 = vadd.f32 %v7660_v14, %v7659_v35 }
 0x6d0   : > { %v10152_v3 = vpop.f32.mrb[30].mxu1  ;;  %v13057_v38 = vld [vmem:[#allocation3 + $0xd8] sm:$0xff] }
 0x6d1   : > { %v13059_v60 = vld [vmem:[#allocation3 + $0xd0] sm:$0xff]  ;;  %v7663_v20 = vadd.f32 %v7662_v19, %v7661_v18  ;;  %7580 = vst.msk [vmem:[#allocation3 + $0xf8] sm:$0xff] %vm171_vm1, %v10152_v3  ;;  %v7508_v62 = vpop.f32.mrb[31].mxu1  ;;  %v7666_v42 = vsel %vm171_vm1, %v13057_v38, 0.0 }
 0x6d2   : > { %v7664_v5 = vsel %vm171_vm1, %v13059_v60, 0.0  ;;  %7579 = vst.msk [vmem:[#allocation3 + $0xf0] sm:$0xff] %vm171_vm1, %v7508_v62 }
 0x6d3   : > { %v7665_v21 = vadd.f32 %v7664_v5, %v7663_v20 }
 0x6d4   : > { %v13067_v16 = vld [vmem:[#allocation3 + $0xe8] sm:$0xff] }
 0x6d5   : > { %v13069_v61 = vld [vmem:[#allocation3 + $0xe0] sm:$0xff]  ;;  %v7667_v39 = vadd.f32 %v7666_v42, %v7665_v21  ;;  %v7670_v22 = vsel %vm171_vm1, %v13067_v16, 0.0 }
 0x6d6   : > { %v7668_v25 = vsel %vm171_vm1, %v13069_v61, 0.0 }
 0x6d7   : > { %v7669_v48 = vadd.f32 %v7668_v25, %v7667_v39 }
 0x6d8   : > { %v13075_v34 = vld [vmem:[#allocation3 + $0xf8] sm:$0xff] }
 0x6d9   : > { %v13077_v45 = vld [vmem:[#allocation3 + $0xf0] sm:$0xff]  ;;  %v7671_v52 = vadd.f32 %v7670_v22, %v7669_v48  ;;  %v7674_v59 = vsel %vm171_vm1, %v13075_v34, 0.0 }
 0x6da   : > { %v7672_v49 = vsel %vm171_vm1, %v13077_v45, 0.0 }
 0x6db   : > { %v7673_v63 = vadd.f32 %v7672_v49, %v7671_v52 }
 0x6dd   : > { %v7675_v57 = vadd.f32 %v7674_v59, %v7673_v63 }
 0x6df   : > { %v7676_v50 = vrot.slane %v7675_v57, 4 }
 0x6e1   : > { %v7677_v15 = vadd.f32 %v7676_v50, %v7675_v57 }
 0x6e3   : > { %v7678_v40 = vrot.slane %v7677_v15, 2 }
 0x6e5   : > { %v7679_v43 = vadd.f32 %v7678_v40, %v7677_v15 }
 0x6e7   : > { %v7680_v8 = vrot.slane %v7679_v43, 1 }
 0x6e9   : > { %v7681_v9 = vadd.f32 %v7680_v8, %v7679_v43 }
 0x6eb   : > { %v13083_v17 = vmul.f32 0.00390625, %v7681_v9 }
 0x6ed   : > { %v13087_v33 = vsub.f32 %v12929_v46, %v13083_v17  ;;  %v13091_v23 = vsub.f32 %v12927_v32, %v13083_v17  ;;  %v13095_v26 = vsub.f32 %v12939_v1, %v13083_v17  ;;  %v13099_v30 = vsub.f32 %v12937_v54, %v13083_v17 }
 0x6ee   : > { %v13107_v46 = vsub.f32 %v12949_v29, %v13083_v17  ;;  %v13113_v1 = vsub.f32 %v12947_v56, %v13083_v17  ;;  %v13121_v19 = vsub.f32 %v12959_v2, %v13083_v17  ;;  %v13128_v56 = vsub.f32 %v12957_v31, %v13083_v17 }
 0x6ef   : > { %v7715_v47 = vmul.f32 %v13087_v33, %v13087_v33  ;;  %v7716_v35 = vmul.f32 %v13091_v23, %v13091_v23  ;;  %v7717_v32 = vmul.f32 %v13095_v26, %v13095_v26  ;;  %v7718_v54 = vmul.f32 %v13099_v30, %v13099_v30 }
 0x6f0   : > { %v7719_v29 = vmul.f32 %v13107_v46, %v13107_v46  ;;  %v7720_v62 = vmul.f32 %v13113_v1, %v13113_v1  ;;  %v13135_v2 = vsub.f32 %v12969_v6, %v13083_v17  ;;  %v7721_v42 = vmul.f32 %v13121_v19, %v13121_v19 }
 0x6f1   : > { %v7747_v7 = vsel %vm171_vm1, %v7715_v47, 0.0  ;;  %v7748_v14 = vsel %vm171_vm1, %v7716_v35, 0.0  ;;  %v7750_v3 = vsel %vm171_vm1, %v7717_v32, 0.0  ;;  %v7752_v5 = vsel %vm171_vm1, %v7718_v54, 0.0 }
 0x6f2   : > { %v7749_v18 = vadd.f32 %v7748_v14, %v7747_v7  ;;  %v7754_v39 = vsel %vm171_vm1, %v7719_v29, 0.0  ;;  %v13142_v31 = vsub.f32 %v12967_v10, %v13083_v17  ;;  %v7722_v48 = vmul.f32 %v13128_v56, %v13128_v56 }
 0x6f3   : > { %v7756_v22 = vsel %vm171_vm1, %v7720_v62, 0.0  ;;  %v13149_v6 = vsub.f32 %v12979_v37, %v13083_v17  ;;  %v7723_v49 = vmul.f32 %v13135_v2, %v13135_v2  ;;  %v7758_v63 = vsel %vm171_vm1, %v7721_v42, 0.0 }
 0x6f4   : > { %v7751_v20 = vadd.f32 %v7750_v3, %v7749_v18  ;;  %v13156_v10 = vsub.f32 %v12977_v27, %v13083_v17  ;;  %v7724_v57 = vmul.f32 %v13142_v31, %v13142_v31  ;;  %v7760_v50 = vsel %vm171_vm1, %v7722_v48, 0.0 }
 0x6f5   : > { %v13163_v37 = vsub.f32 %v12989_v12, %v13083_v17  ;;  %v7725_v40 = vmul.f32 %v13149_v6, %v13149_v6  ;;  %v7762_v43 = vsel %vm171_vm1, %v7723_v49, 0.0  ;;  %v13170_v27 = vsub.f32 %v12987_v13, %v13083_v17 }
 0x6f6   : > { %v7753_v21 = vadd.f32 %v7752_v5, %v7751_v20  ;;  %v7726_v9 = vmul.f32 %v13156_v10, %v13156_v10  ;;  %v7764_v47 = vsel %vm171_vm1, %v7724_v57, 0.0  ;;  %v13177_v12 = vsub.f32 %v12999_v41, %v13083_v17 }
 0x6f7   : > { %v7727_v32 = vmul.f32 %v13163_v37, %v13163_v37  ;;  %v7766_v54 = vsel %vm171_vm1, %v7725_v40, 0.0  ;;  %v13184_v13 = vsub.f32 %v12997_v24, %v13083_v17  ;;  %v7728_v14 = vmul.f32 %v13170_v27, %v13170_v27 }
 0x6f8   : > { %v7755_v25 = vadd.f32 %v7754_v39, %v7753_v21  ;;  %v7768_v18 = vsel %vm171_vm1, %v7726_v9, 0.0  ;;  %v13191_v41 = vsub.f32 %v13009_v28, %v13083_v17  ;;  %v7729_v3 = vmul.f32 %v13177_v12, %v13177_v12 }
 0x6f9   : > { %v7770_v20 = vsel %vm171_vm1, %v7727_v32, 0.0  ;;  %v13198_v24 = vsub.f32 %v13007_v51, %v13083_v17  ;;  %v7730_v5 = vmul.f32 %v13184_v13, %v13184_v13  ;;  %v7772_v21 = vsel %vm171_vm1, %v7728_v14, 0.0 }
 0x6fa   : > { %v7757_v52 = vadd.f32 %v7756_v22, %v7755_v25  ;;  %v13205_v28 = vsub.f32 %v13019_v44, %v13083_v17  ;;  %v7731_v39 = vmul.f32 %v13191_v41, %v13191_v41  ;;  %v7774_v25 = vsel %vm171_vm1, %v7729_v3, 0.0 }
 0x6fb   : > { %v13212_v51 = vsub.f32 %v13017_v36, %v13083_v17  ;;  %v7732_v22 = vmul.f32 %v13198_v24, %v13198_v24  ;;  %v13219_v44 = vsub.f32 %v13029_v55, %v13083_v17  ;;  %v13226_v36 = vsub.f32 %v13027_v58, %v13083_v17 }
 0x6fc   : > { %v7759_v59 = vadd.f32 %v7758_v63, %v7757_v52  ;;  %v7776_v52 = vsel %vm171_vm1, %v7730_v5, 0.0  ;;  %v7733_v63 = vmul.f32 %v13205_v28, %v13205_v28  ;;  %v13233_v55 = vsub.f32 %v13039_v4, %v13083_v17 }
 0x6fd   : > { %v13240_v58 = vsub.f32 %v13037_v11, %v13083_v17  ;;  %v13247_v4 = vsub.f32 %v13049_v53, %v13083_v17  ;;  %v13254_v11 = vsub.f32 %v13047_v0, %v13083_v17  ;;  %v13261_v53 = vsub.f32 %v13059_v60, %v13083_v17 }
 0x6fe   : > { %v7761_v15 = vadd.f32 %v7760_v50, %v7759_v59  ;;  %v7778_v59 = vsel %vm171_vm1, %v7731_v39, 0.0  ;;  %v7734_v50 = vmul.f32 %v13212_v51, %v13212_v51  ;;  %v13268_v0 = vsub.f32 %v13057_v38, %v13083_v17 }
 0x6ff   : > { %v13275_v60 = vsub.f32 %v13069_v61, %v13083_v17  ;;  %v13282_v38 = vsub.f32 %v13067_v16, %v13083_v17  ;;  %v13289_v61 = vsub.f32 %v13077_v45, %v13083_v17  ;;  %v13296_v16 = vsub.f32 %v13075_v34, %v13083_v17 }
 0x700   : > { %v7763_v8 = vadd.f32 %v7762_v43, %v7761_v15  ;;  %v7780_v15 = vsel %vm171_vm1, %v7732_v22, 0.0  ;;  %v7735_v43 = vmul.f32 %v13219_v44, %v13219_v44 }
 0x701   : > { %v7745_v45 = vmul.f32 %v13289_v61, %v13289_v61 }
 0x702   : > { %v7765_v35 = vadd.f32 %v7764_v47, %v7763_v8  ;;  %v7782_v8 = vsel %vm171_vm1, %v7733_v63, 0.0  ;;  %v7736_v47 = vmul.f32 %v13226_v36, %v13226_v36 }
 0x703   : > { %v7806_v34 = vsel %vm171_vm1, %v7745_v45, 0.0 }
 0x704   : > { %v7767_v7 = vadd.f32 %v7766_v54, %v7765_v35  ;;  %v7784_v35 = vsel %vm171_vm1, %v7734_v50, 0.0  ;;  %v7737_v54 = vmul.f32 %v13233_v55, %v13233_v55 }
 0x706   : > { %v7769_v29 = vadd.f32 %v7768_v18, %v7767_v7  ;;  %v7786_v7 = vsel %vm171_vm1, %v7735_v43, 0.0  ;;  %v7738_v18 = vmul.f32 %v13240_v58, %v13240_v58 }
 0x708   : > { %v7771_v62 = vadd.f32 %v7770_v20, %v7769_v29  ;;  %v7788_v29 = vsel %vm171_vm1, %v7736_v47, 0.0  ;;  %v7739_v20 = vmul.f32 %v13247_v4, %v13247_v4  ;;  %v7746_v47 = vmul.f32 %v13296_v16, %v13296_v16 }
 0x70a   : > { %v7773_v42 = vadd.f32 %v7772_v21, %v7771_v62  ;;  %v7790_v62 = vsel %vm171_vm1, %v7737_v54, 0.0  ;;  %v7740_v21 = vmul.f32 %v13254_v11, %v13254_v11  ;;  %v7808_v54 = vsel %vm171_vm1, %v7746_v47, 0.0 }
 0x70c   : > { %v7775_v48 = vadd.f32 %v7774_v25, %v7773_v42  ;;  %v7792_v42 = vsel %vm171_vm1, %v7738_v18, 0.0  ;;  %v7741_v25 = vmul.f32 %v13261_v53, %v13261_v53 }
 0x70e   : > { %v7777_v49 = vadd.f32 %v7776_v52, %v7775_v48  ;;  %v7794_v48 = vsel %vm171_vm1, %v7739_v20, 0.0  ;;  %v7742_v52 = vmul.f32 %v13268_v0, %v13268_v0 }
 0x710   : > { %v7779_v57 = vadd.f32 %v7778_v59, %v7777_v49  ;;  %v7796_v49 = vsel %vm171_vm1, %v7740_v21, 0.0  ;;  %v7743_v59 = vmul.f32 %v13275_v60, %v13275_v60 }
 0x712   : > { %v7781_v40 = vadd.f32 %v7780_v15, %v7779_v57  ;;  %v7798_v57 = vsel %vm171_vm1, %v7741_v25, 0.0  ;;  %v7744_v15 = vmul.f32 %v13282_v38, %v13282_v38 }
 0x714   : > { %v7783_v9 = vadd.f32 %v7782_v8, %v7781_v40  ;;  %v7800_v40 = vsel %vm171_vm1, %v7742_v52, 0.0  ;;  %v7802_v8 = vsel %vm171_vm1, %v7743_v59, 0.0 }
 0x716   : > { %v7785_v32 = vadd.f32 %v7784_v35, %v7783_v9  ;;  %v7804_v35 = vsel %vm171_vm1, %v7744_v15, 0.0 }
 0x718   : > { %v7787_v14 = vadd.f32 %v7786_v7, %v7785_v32 }
 0x71a   : > { %v7789_v3 = vadd.f32 %v7788_v29, %v7787_v14 }
 0x71c   : > { %v7791_v5 = vadd.f32 %v7790_v62, %v7789_v3 }
 0x71e   : > { %v7793_v39 = vadd.f32 %v7792_v42, %v7791_v5 }
 0x720   : > { %v7795_v22 = vadd.f32 %v7794_v48, %v7793_v39 }
 0x722   : > { %v7797_v63 = vadd.f32 %v7796_v49, %v7795_v22 }
 0x724   : > { %v7799_v50 = vadd.f32 %v7798_v57, %v7797_v63  ;;  %v7851_v57 = vld [vmem:[%s10785_s22] sm:$0xff] }
 0x726   : > { %v7801_v43 = vadd.f32 %v7800_v40, %v7799_v50  ;;  %v7854_v50 = vld [vmem:[%s10785_s22 + $0x18] sm:$0xff] }
 0x727   : > { %v7858_v40 = vld [vmem:[%s10785_s22 + $0x38] sm:$0xff] }
 0x728   : > { %v7803_v9 = vadd.f32 %v7802_v8, %v7801_v43 }
 0x72a   : > { %v7805_v32 = vadd.f32 %v7804_v35, %v7803_v9  ;;  %v7863_v35 = vld [vmem:[%s10785_s22 + $0x60] sm:$0xff] }
 0x72c   : > { %v7807_v17 = vadd.f32 %v7806_v34, %v7805_v32 }
 0x72e   : > { %v7809_v7 = vadd.f32 %v7808_v54, %v7807_v17  ;;  %v7865_v54 = vld [vmem:[%s10785_s22 + $0x70] sm:$0xff] }
 0x730   : > { %v7810_v14 = vrot.slane %v7809_v7, 4 }
 0x732   : > { %v7811_v18 = vadd.f32 %v7810_v14, %v7809_v7  ;;  %v7869_v7 = vld [vmem:[%s10785_s22 + $0x90] sm:$0xff]  ;;  %v7870_v14 = vld [vmem:[%s10785_s22 + $0x98] sm:$0xff] }
 0x734   : > { %v7812_v29 = vrot.slane %v7811_v18, 2 }
 0x736   : > { %v7813_v3 = vadd.f32 %v7812_v29, %v7811_v18 }
 0x738   : > { %v7814_v20 = vrot.slane %v7813_v3, 1 }
 0x73a   : > { %v7815_v62 = vadd.f32 %v7814_v20, %v7813_v3  ;;  %v7873_v20 = vld [vmem:[%s10785_s22 + $0xb0] sm:$0xff] }
 0x73c   : > { %v7816_v5 = vmul.f32 0.00390625, %v7815_v62 }
 0x73e   : > { %v7817_v21 = vadd.f32 1e-05, %v7816_v5 }
 0x740   : > { %10676 = vrsqrt.f32 %v7817_v21 }
 0x74a   : > { %v10677_v42 = vpop.eup %10676 }
 0x74b   : > { %v7819_v39 = vmul.f32 %v10677_v42, %v13087_v33  ;;  %v7820_v25 = vmul.f32 %v10677_v42, %v13091_v23  ;;  %v7821_v48 = vmul.f32 %v10677_v42, %v13095_v26  ;;  %v7822_v22 = vmul.f32 %v10677_v42, %v13099_v30 }
 0x74c   : > { %v7823_v52 = vmul.f32 %v10677_v42, %v13107_v46  ;;  %v7824_v49 = vmul.f32 %v10677_v42, %v13113_v1  ;;  %v7825_v63 = vmul.f32 %v10677_v42, %v13121_v19  ;;  %v7826_v59 = vmul.f32 %v10677_v42, %v13128_v56 }
 0x74d   : > { %v7827_v33 = vmul.f32 %v10677_v42, %v13135_v2  ;;  %v7828_v23 = vmul.f32 %v10677_v42, %v13142_v31  ;;  %v7829_v26 = vmul.f32 %v10677_v42, %v13149_v6  ;;  %v7830_v30 = vmul.f32 %v10677_v42, %v13156_v10  ;;  %v7852_v2 = vld [vmem:[%s10785_s22 + $0x8] sm:$0xff]  ;;  %v7853_v31 = vld [vmem:[%s10785_s22 + $0x10] sm:$0xff] }
 0x74e   : > { %v7831_v46 = vmul.f32 %v10677_v42, %v13163_v37  ;;  %v7832_v1 = vmul.f32 %v10677_v42, %v13170_v27  ;;  %v7833_v19 = vmul.f32 %v10677_v42, %v13177_v12  ;;  %v7834_v56 = vmul.f32 %v10677_v42, %v13184_v13  ;;  %v7855_v27 = vld [vmem:[%s10785_s22 + $0x20] sm:$0xff]  ;;  %v7856_v12 = vld [vmem:[%s10785_s22 + $0x28] sm:$0xff]  ;;  %v7857_v13 = vld [vmem:[%s10785_s22 + $0x30] sm:$0xff] }
 0x74f   : > { %v7835_v6 = vmul.f32 %v10677_v42, %v13191_v41  ;;  %v7836_v10 = vmul.f32 %v10677_v42, %v13198_v24  ;;  %v7837_v15 = vmul.f32 %v10677_v42, %v13205_v28  ;;  %v7838_v37 = vmul.f32 %v10677_v42, %v13212_v51  ;;  %v7859_v24 = vld [vmem:[%s10785_s22 + $0x40] sm:$0xff]  ;;  %v7860_v28 = vld [vmem:[%s10785_s22 + $0x48] sm:$0xff]  ;;  %v7861_v51 = vld [vmem:[%s10785_s22 + $0x50] sm:$0xff] }
 0x750   : > { %v7839_v43 = vmul.f32 %v10677_v42, %v13219_v44  ;;  %v7840_v45 = vmul.f32 %v10677_v42, %v13226_v36  ;;  %v7841_v8 = vmul.f32 %v10677_v42, %v13233_v55  ;;  %v7842_v41 = vmul.f32 %v10677_v42, %v13240_v58  ;;  %v7862_v55 = vld [vmem:[%s10785_s22 + $0x58] sm:$0xff]  ;;  %v7864_v58 = vld [vmem:[%s10785_s22 + $0x68] sm:$0xff] }
 0x751   : > { %v7843_v9 = vmul.f32 %v10677_v42, %v13247_v4  ;;  %v7844_v47 = vmul.f32 %v10677_v42, %v13254_v11  ;;  %v7845_v44 = vmul.f32 %v10677_v42, %v13261_v53  ;;  %v7846_v36 = vmul.f32 %v10677_v42, %v13268_v0  ;;  %v7866_v11 = vld [vmem:[%s10785_s22 + $0x78] sm:$0xff]  ;;  %v7867_v53 = vld [vmem:[%s10785_s22 + $0x80] sm:$0xff]  ;;  %v7868_v0 = vld [vmem:[%s10785_s22 + $0x88] sm:$0xff] }
 0x752   : > { %v7847_v32 = vmul.f32 %v10677_v42, %v13275_v60  ;;  %v7848_v34 = vmul.f32 %v10677_v42, %v13282_v38  ;;  %v7849_v17 = vmul.f32 %v10677_v42, %v13289_v61  ;;  %v7850_v4 = vmul.f32 %v10677_v42, %v13296_v16  ;;  %v7871_v38 = vld [vmem:[%s10785_s22 + $0xa0] sm:$0xff]  ;;  %v7872_v61 = vld [vmem:[%s10785_s22 + $0xa8] sm:$0xff]  ;;  %v7874_v42 = vld [vmem:[%s10785_s22 + $0xb8] sm:$0xff] }
 0x753   : > { %v7883_v18 = vadd.f32 %v7851_v57, %v7819_v39  ;;  %v7884_v29 = vadd.f32 %v7852_v2, %v7820_v25  ;;  %v7885_v3 = vadd.f32 %v7853_v31, %v7821_v48  ;;  %v7886_v60 = vadd.f32 %v7854_v50, %v7822_v22  ;;  %v7875_v39 = vld [vmem:[%s10785_s22 + $0xc0] sm:$0xff]  ;;  %v7876_v57 = vld [vmem:[%s10785_s22 + $0xc8] sm:$0xff]  ;;  %v7877_v22 = vld [vmem:[%s10785_s22 + $0xd0] sm:$0xff] }
 0x754   : > { %v7887_v16 = vadd.f32 %v7855_v27, %v7823_v52  ;;  %v7888_v62 = vadd.f32 %v7856_v12, %v7824_v49  ;;  %v7889_v5 = vadd.f32 %v7857_v13, %v7825_v63  ;;  %v7890_v21 = vadd.f32 %v7858_v40, %v7826_v59  ;;  %v7878_v50 = vld [vmem:[%s10785_s22 + $0xd8] sm:$0xff]  ;;  %v7879_v27 = vld [vmem:[%s10785_s22 + $0xe0] sm:$0xff]  ;;  %v7880_v63 = vld [vmem:[%s10785_s22 + $0xe8] sm:$0xff] }
 0x755   : > { %v7891_v2 = vadd.f32 %v7859_v24, %v7827_v33  ;;  %v7892_v25 = vadd.f32 %v7860_v28, %v7828_v23  ;;  %v7893_v48 = vadd.f32 %v7861_v51, %v7829_v26  ;;  %v7894_v31 = vadd.f32 %v7862_v55, %v7830_v30  ;;  %v7881_v40 = vld [vmem:[%s10785_s22 + $0xf0] sm:$0xff]  ;;  %v7882_v59 = vld [vmem:[%s10785_s22 + $0xf8] sm:$0xff] }
 0x756   : > { %v7895_v52 = vadd.f32 %v7863_v35, %v7831_v46  ;;  %v7896_v12 = vadd.f32 %v7864_v58, %v7832_v1  ;;  %v7897_v49 = vadd.f32 %v7865_v54, %v7833_v19  ;;  %v7898_v13 = vadd.f32 %v7866_v11, %v7834_v56 }
 0x757   : > { %v7899_v24 = vadd.f32 %v7867_v53, %v7835_v6  ;;  %v7900_v33 = vadd.f32 %v7868_v0, %v7836_v10  ;;  %v7901_v23 = vadd.f32 %v7869_v7, %v7837_v15  ;;  %v7902_v28 = vadd.f32 %v7870_v14, %v7838_v37 }
 0x758   : > { %v13373_v26 = vadd.f32 %v7871_v38, %v7839_v43  ;;  %v13375_v51 = vadd.f32 %v7872_v61, %v7840_v45  ;;  %v13377_v30 = vadd.f32 %v7873_v20, %v7841_v8  ;;  %v13379_v55 = vadd.f32 %v7874_v42, %v7842_v41 }
 0x759   : > { %v13381_v46 = vadd.f32 %v7875_v39, %v7843_v9  ;;  %v13383_v1 = vadd.f32 %v7876_v57, %v7844_v47  ;;  %v13385_v19 = vadd.f32 %v7877_v22, %v7845_v44  ;;  %v13387_v56 = vadd.f32 %v7878_v50, %v7846_v36 }
 0x75a   : > { %v13396_v6 = vadd.f32 %v7879_v27, %v7847_v32  ;;  %v13398_v10 = vadd.f32 %v7880_v63, %v7848_v34  ;;  %v13400_v15 = vadd.f32 %v7881_v40, %v7849_v17  ;;  %v13402_v37 = vadd.f32 %v7882_v59, %v7850_v4 }
 0x75b   : > { %v7915_v43 = vmax.f32 %v7883_v18, 0.0  ;;  %v7916_v45 = vmax.f32 %v7884_v29, 0.0  ;;  %v7917_v8 = vmax.f32 %v7885_v3, 0.0  ;;  %v7918_v41 = vmax.f32 %v7886_v60, 0.0 }
 0x75c   : > { %v7919_v9 = vmax.f32 %v7887_v16, 0.0  ;;  %v7920_v47 = vmax.f32 %v7888_v62, 0.0  ;;  %v7921_v44 = vmax.f32 %v7889_v5, 0.0  ;;  %v7922_v36 = vmax.f32 %v7890_v21, 0.0 }
 0x75d   : > { %v7923_v35 = vmax.f32 %v7891_v2, 0.0  ;;  %v7924_v58 = vmax.f32 %v7892_v25, 0.0  ;;  %v7925_v32 = vmax.f32 %v7893_v48, 0.0  ;;  %v7926_v34 = vmax.f32 %v7894_v31, 0.0  ;;  %7947 = vst.msk [vmem:[%s13394_s6] sm:$0xff] %vm171_vm1, %v7915_v43  ;;  %7948 = vst.msk [vmem:[%s13394_s6 + $0x8] sm:$0xff] %vm171_vm1, %v7916_v45 }
 0x75e   : > { %7949 = vst.msk [vmem:[%s13394_s6 + $0x10] sm:$0xff] %vm171_vm1, %v7917_v8  ;;  %7950 = vst.msk [vmem:[%s13394_s6 + $0x18] sm:$0xff] %vm171_vm1, %v7918_v41  ;;  %v7927_v17 = vmax.f32 %v7895_v52, 0.0  ;;  %v7928_v4 = vmax.f32 %v7896_v12, 0.0  ;;  %v7929_v54 = vmax.f32 %v7897_v49, 0.0  ;;  %v7930_v11 = vmax.f32 %v7898_v13, 0.0 }
 0x75f   : > { %7951 = vst.msk [vmem:[%s13394_s6 + $0x20] sm:$0xff] %vm171_vm1, %v7919_v9  ;;  %7952 = vst.msk [vmem:[%s13394_s6 + $0x28] sm:$0xff] %vm171_vm1, %v7920_v47  ;;  %v7931_v53 = vmax.f32 %v7899_v24, 0.0  ;;  %v7932_v0 = vmax.f32 %v7900_v33, 0.0  ;;  %v7933_v7 = vmax.f32 %v7901_v23, 0.0  ;;  %v7934_v14 = vmax.f32 %v7902_v28, 0.0 }
 0x760   : > { %7953 = vst.msk [vmem:[%s13394_s6 + $0x30] sm:$0xff] %vm171_vm1, %v7921_v44  ;;  %7954 = vst.msk [vmem:[%s13394_s6 + $0x38] sm:$0xff] %vm171_vm1, %v7922_v36  ;;  %v7935_v18 = vmax.f32 %v13373_v26, 0.0  ;;  %v7936_v29 = vmax.f32 %v13375_v51, 0.0  ;;  %v7937_v3 = vmax.f32 %v13377_v30, 0.0  ;;  %v7938_v60 = vmax.f32 %v13379_v55, 0.0 }
 0x761   : > { %7955 = vst.msk [vmem:[%s13394_s6 + $0x40] sm:$0xff] %vm171_vm1, %v7923_v35  ;;  %7956 = vst.msk [vmem:[%s13394_s6 + $0x48] sm:$0xff] %vm171_vm1, %v7924_v58  ;;  %v7939_v38 = vmax.f32 %v13381_v46, 0.0  ;;  %v7940_v61 = vmax.f32 %v13383_v1, 0.0  ;;  %v7941_v20 = vmax.f32 %v13385_v19, 0.0  ;;  %v7942_v16 = vmax.f32 %v13387_v56, 0.0 }
 0x762   : > { %7957 = vst.msk [vmem:[%s13394_s6 + $0x50] sm:$0xff] %vm171_vm1, %v7925_v32  ;;  %7958 = vst.msk [vmem:[%s13394_s6 + $0x58] sm:$0xff] %vm171_vm1, %v7926_v34  ;;  %v7943_v62 = vmax.f32 %v13396_v6, 0.0  ;;  %v7944_v5 = vmax.f32 %v13398_v10, 0.0  ;;  %v7945_v21 = vmax.f32 %v13400_v15, 0.0  ;;  %v7946_v42 = vmax.f32 %v13402_v37, 0.0 }
 0x763   : > { %7959 = vst.msk [vmem:[%s13394_s6 + $0x60] sm:$0xff] %vm171_vm1, %v7927_v17  ;;  %7960 = vst.msk [vmem:[%s13394_s6 + $0x68] sm:$0xff] %vm171_vm1, %v7928_v4 }
 0x764   : > { %7961 = vst.msk [vmem:[%s13394_s6 + $0x70] sm:$0xff] %vm171_vm1, %v7929_v54  ;;  %7962 = vst.msk [vmem:[%s13394_s6 + $0x78] sm:$0xff] %vm171_vm1, %v7930_v11 }
 0x765   : > { %7963 = vst.msk [vmem:[%s13394_s6 + $0x80] sm:$0xff] %vm171_vm1, %v7931_v53  ;;  %7964 = vst.msk [vmem:[%s13394_s6 + $0x88] sm:$0xff] %vm171_vm1, %v7932_v0 }
 0x766   : > { %7965 = vst.msk [vmem:[%s13394_s6 + $0x90] sm:$0xff] %vm171_vm1, %v7933_v7  ;;  %7966 = vst.msk [vmem:[%s13394_s6 + $0x98] sm:$0xff] %vm171_vm1, %v7934_v14 }
 0x767   : > { %7967 = vst.msk [vmem:[%s13394_s6 + $0xa0] sm:$0xff] %vm171_vm1, %v7935_v18  ;;  %7968 = vst.msk [vmem:[%s13394_s6 + $0xa8] sm:$0xff] %vm171_vm1, %v7936_v29 }
 0x768   : > { %7969 = vst.msk [vmem:[%s13394_s6 + $0xb0] sm:$0xff] %vm171_vm1, %v7937_v3  ;;  %7970 = vst.msk [vmem:[%s13394_s6 + $0xb8] sm:$0xff] %vm171_vm1, %v7938_v60 }
 0x769   : > { %7971 = vst.msk [vmem:[%s13394_s6 + $0xc0] sm:$0xff] %vm171_vm1, %v7939_v38  ;;  %7972 = vst.msk [vmem:[%s13394_s6 + $0xc8] sm:$0xff] %vm171_vm1, %v7940_v61 }
 0x76a   : > { %7973 = vst.msk [vmem:[%s13394_s6 + $0xd0] sm:$0xff] %vm171_vm1, %v7941_v20  ;;  %7974 = vst.msk [vmem:[%s13394_s6 + $0xd8] sm:$0xff] %vm171_vm1, %v7942_v16 }
 0x76b   : > { %7975 = vst.msk [vmem:[%s13394_s6 + $0xe0] sm:$0xff] %vm171_vm1, %v7943_v62  ;;  %7976 = vst.msk [vmem:[%s13394_s6 + $0xe8] sm:$0xff] %vm171_vm1, %v7944_v5 }
 0x76c   : > { %7977 = vst.msk [vmem:[%s13394_s6 + $0xf0] sm:$0xff] %vm171_vm1, %v7945_v21  ;;  %7978 = vst.msk [vmem:[%s13394_s6 + $0xf8] sm:$0xff] %vm171_vm1, %v7946_v42 }
 0x76d PF: > { %s13_s12 = sadd.s32 1, %s10684_s12  }
 0x76e   : > { %p10_p4 = scmp.ge.s32.totalorder %s13_s12, 4  }
 0x770   :  { %12 = sbr.rel (!%p10_p4) target bundleno = 1 (0x1), region = 84 }

</bundles_post_ra>
